<compile_context>
chip_gen: v7x
topology: tpu7x:2x2x1
jax: 0.10.0
libtpu: 0.0.40
codegen_flags: <defaults>
</compile_context>

<pallas_src>
import jax
import jax.numpy as jnp
from jax.experimental import pallas as pl
from jax.experimental.pallas import tpu as pltpu

# ----------------------- synthetic "flags" (small sizes) -----------------------
DIM_TEXT = 16            # flags.DIM_text
NUM_FEATURES = 8         # num_features (alphabet size in the original)
NUM_LAYERS_TEXT = 7      # flags.num_layers_text (final channels = 7 * DIM_text)
SEQ_LEN = 256            # minimal length so the conv stack ends at spatial size 1
BATCH = 2
NUM_CLASSES = 40
A_VAL, B_VAL = 2.0, 0.3  # residual mixing constants of the feature-extractor block
BN_EPS = 1e-5
PACK_LANES = 128         # lane width of the packed parameter slabs
PADS = (1, 1, 1, 1, 1, 0)  # paddings of resblocks 1..6


# ------------------------------ parameter init ---------------------------------

def _bn_params(key, c):
    k1, k2, k3, k4 = jax.random.split(key, 4)
    return dict(gamma=1.0 + 0.1 * jax.random.normal(k1, (c,), jnp.float32),
                beta=0.1 * jax.random.normal(k2, (c,), jnp.float32),
                mean=0.1 * jax.random.normal(k3, (c,), jnp.float32),
                var=1.0 + 0.2 * jax.random.uniform(k4, (c,), jnp.float32))


def _conv_params(key, cout, cin, k):
    k1, k2 = jax.random.split(key)
    w = 0.05 * jax.random.normal(k1, (cout, cin, k), jnp.float32)   # PyTorch (Cout, Cin, K)
    b = 0.05 * jax.random.normal(k2, (cout,), jnp.float32)
    return w, b


def init_params(key):
    D = DIM_TEXT
    keys = iter(jax.random.split(key, 64))
    params = {}
    params["conv1_w"], params["conv1_b"] = _conv_params(next(keys), D, NUM_FEATURES, 3)
    blocks = []
    dims = [(D, 2 * D), (2 * D, 3 * D), (3 * D, 4 * D),
            (4 * D, 5 * D), (5 * D, 6 * D), (6 * D, 7 * D)]
    for cin, cout in dims:
        w1, b1 = _conv_params(next(keys), cin, cin, 1)
        w2, b2 = _conv_params(next(keys), cout, cin, 4)
        wd, bd = _conv_params(next(keys), cout, cin, 4)
        blocks.append(dict(bn1=_bn_params(next(keys), cin), conv1_w=w1, conv1_b=b1,
                           bn2=_bn_params(next(keys), cin), conv2_w=w2, conv2_b=b2,
                           ds_w=wd, ds_b=bd, ds_bn=_bn_params(next(keys), cout)))
    params["blocks"] = blocks
    kl1, kl2 = jax.random.split(next(keys))
    params["lin_w"] = 0.05 * jax.random.normal(kl1, (NUM_LAYERS_TEXT * D, NUM_CLASSES),
                                               jnp.float32)
    params["lin_b"] = 0.05 * jax.random.normal(kl2, (NUM_CLASSES,), jnp.float32)
    return params


# ---------------------------- parameter packing ---------------------------------

def _bn_scale_shift(bn):
    s = bn["gamma"] / jnp.sqrt(bn["var"] + BN_EPS)
    return s, bn["beta"] - bn["mean"] * s


def prepare_packed_params(params):
    """Pack every matmul weight into one bf16 slab and every per-channel vector into
    one f32 slab.  Returns (wpack, vpack, plan); `plan` holds only static Python
    ints (row offsets / dims) that the kernel closes over."""
    mats, vecs = [], []
    cursor = [0]

    def add_mat(m):
        off = cursor[0]
        mats.append((off, jnp.asarray(m, jnp.float32)))
        cursor[0] += ((m.shape[0] + 7) // 8) * 8          # keep sublane-aligned rows
        return off

    def add_vec(v):
        vecs.append(jnp.asarray(v, jnp.float32).reshape(-1))
        return len(vecs) - 1

    def conv_plan(w_oik, bias, stride, pad):
        cout, cin, K = w_oik.shape
        return dict(K=K, stride=stride, pad=pad, cin=cin, cout=cout,
                    w_offs=[add_mat(w_oik[:, :, k].T) for k in range(K)],
                    b_row=add_vec(bias))

    plan = {"conv1": conv_plan(params["conv1_w"], params["conv1_b"], 2, 1)}

    blocks = []
    for p, pad in zip(params["blocks"], PADS):
        cin = p["conv1_w"].shape[0]
        cout = p["conv2_w"].shape[0]
        s1, t1 = _bn_scale_shift(p["bn1"])
        s2, t2 = _bn_scale_shift(p["bn2"])
        # Fold the downsample BatchNorm (inference) into the downsample conv.
        sd, td = _bn_scale_shift(p["ds_bn"])
        ds_w = p["ds_w"] * sd[:, None, None]
        ds_b = p["ds_b"] * sd + td
        blocks.append(dict(
            cin=cin, cout=cout,
            bn1_s=add_vec(s1), bn1_t=add_vec(t1),
            bn2_s=add_vec(s2), bn2_t=add_vec(t2),
            c1=conv_plan(p["conv1_w"], p["conv1_b"], 1, 0),
            c2=conv_plan(p["conv2_w"], p["conv2_b"], 2, pad),
            ds=conv_plan(ds_w, ds_b, 2, pad),
        ))
    plan["blocks"] = blocks
    plan["lin_off"] = add_mat(params["lin_w"])            # (7*D, 40)
    plan["lin_in"] = params["lin_w"].shape[0]
    plan["lin_b"] = add_vec(params["lin_b"])

    w_rows = max(cursor[0], 8)
    wpack = jnp.zeros((w_rows, PACK_LANES), jnp.bfloat16)
    for off, m in mats:
        wpack = wpack.at[off:off + m.shape[0], 0:m.shape[1]].set(m.astype(jnp.bfloat16))

    v_rows = ((len(vecs) + 7) // 8) * 8
    vpack = jnp.zeros((v_rows, PACK_LANES), jnp.float32)
    for i, v in enumerate(vecs):
        vpack = vpack.at[i, 0:v.shape[0]].set(v)
    return wpack, vpack, plan


# ------------------------------ fused Pallas kernel ------------------------------

def make_forward(plan):
    f32, bf16 = jnp.float32, jnp.bfloat16

    def kernel(x_ref, w_ref, v_ref, o_ref):
        def vec(row, c):                       # (1, c) f32 broadcast row
            return v_ref[row:row + 1, 0:c]

        def mat(off, r, c):                    # (r, c) bf16 weight matrix
            return w_ref[off:off + r, 0:c]

        def conv(h, cp):
            """Channels-last Conv1d: (L, cin) f32 -> (L_out, cout) f32 (+bias)."""
            L = h.shape[0]
            K, S, P = cp["K"], cp["stride"], cp["pad"]
            cin, cout = cp["cin"], cp["cout"]
            hb = h.astype(bf16)
            if K == 1 and S == 1 and P == 0:   # the residual block's 1x1 conv
                out = jnp.dot(hb, mat(cp["w_offs"][0], cin, cout),
                              preferred_element_type=f32)
                return out + vec(cp["b_row"], cout)
            L_out = (L + 2 * P - K) // S + 1
            acc = None
            for k in range(K):
                # full-length per-tap matmul, then a 0/1 selection matmul picks the
                # strided rows i = S*j + k - P (rows outside [0, L) contribute zero,
                # which implements the zero padding).
                q = jnp.dot(hb, mat(cp["w_offs"][k], cin, cout),
                            preferred_element_type=f32)                 # (L, cout)
                r = jax.lax.broadcasted_iota(jnp.int32, (L_out, L), 0)
                c = jax.lax.broadcasted_iota(jnp.int32, (L_out, L), 1)
                sel = jnp.where(c == S * r + (k - P), 1.0, 0.0).astype(bf16)
                part = jnp.dot(sel, q.astype(bf16), preferred_element_type=f32)
                acc = part if acc is None else acc + part
            return acc + vec(cp["b_row"], cout)

        h = x_ref[0].astype(f32)                           # (SEQ_LEN, NUM_FEATURES)
        h = conv(h, plan["conv1"])                         # (128, D)

        for bp in plan["blocks"]:
            cin, cout = bp["cin"], bp["cout"]
            a = jnp.maximum(h * vec(bp["bn1_s"], cin) + vec(bp["bn1_t"], cin), 0.0)
            a = conv(a, bp["c1"])                          # 1x1 conv
            a = jnp.maximum(a * vec(bp["bn2_s"], cin) + vec(bp["bn2_t"], cin), 0.0)
            # TODO(synk): Dropout(p=0.5) inside the residual block -> eval identity.
            hm = conv(a, bp["c2"])                         # main path, stride 2
            rs = conv(h, bp["ds"])                         # downsample conv (BN folded)
            h = A_VAL * rs + B_VAL * hm                    # (L/2, cout)

        # TODO(synk): top-level Dropout(p=0.5) -> eval identity.
        logits = jnp.dot(h.astype(bf16),
                         mat(plan["lin_off"], plan["lin_in"], NUM_CLASSES),
                         preferred_element_type=f32) + vec(plan["lin_b"], NUM_CLASSES)
        o_ref[0] = 1.0 / (1.0 + jnp.exp(-logits))          # exact sigmoid, stays in [0,1]

    @jax.jit
    def forward(x, wpack, vpack):
        B, L, F = x.shape
        out = pl.pallas_call(
            kernel,
            grid=(B,),
            in_specs=[
                pl.BlockSpec((1, L, F), lambda i: (i, 0, 0)),
                pl.BlockSpec(wpack.shape, lambda i: (0, 0)),
                pl.BlockSpec(vpack.shape, lambda i: (0, 0)),
            ],
            out_specs=pl.BlockSpec((1, 1, NUM_CLASSES), lambda i: (i, 0, 0)),
            out_shape=jax.ShapeDtypeStruct((B, 1, NUM_CLASSES), jnp.float32),
            compiler_params=pltpu.CompilerParams(
                # batch split across TensorCores on v7x; harmless sequential loop
                # on single-TC v5e/v6e.
                dimension_semantics=("parallel",)),
        )(x, wpack, vpack)
        return out.reshape(B, NUM_CLASSES)

    return forward


# ------------------------- plain-JAX reference (f32) ----------------------------

def _ref_conv1d(x_blc, w_oik, bias, stride, padding):
    B, L, Cin = x_blc.shape
    Cout, _, K = w_oik.shape
    xp = jnp.pad(x_blc, ((0, 0), (padding, padding), (0, 0)))
    L_out = (L + 2 * padding - K) // stride + 1
    idx = jnp.arange(L_out)[:, None] * stride + jnp.arange(K)[None, :]
    patches = xp[:, idx, :]                                  # (B, L_out, K, Cin)
    xm = patches.reshape(B * L_out, K * Cin)
    wm = jnp.transpose(w_oik, (2, 1, 0)).reshape(K * Cin, Cout)
    return (xm @ wm + bias).reshape(B, L_out, Cout)


def _ref_bn(x, bn, relu):
    s = bn["gamma"] / jnp.sqrt(bn["var"] + BN_EPS)
    y = x * s + (bn["beta"] - bn["mean"] * s)
    return jnp.maximum(y, 0.0) if relu else y


def reference_forward(params, x):
    out = _ref_conv1d(x, params["conv1_w"], params["conv1_b"], 2, 1)
    for p, pad in zip(params["blocks"], PADS):
        h = _ref_bn(out, p["bn1"], True)
        h = _ref_conv1d(h, p["conv1_w"], p["conv1_b"], 1, 0)
        h = _ref_bn(h, p["bn2"], True)
        h = _ref_conv1d(h, p["conv2_w"], p["conv2_b"], 2, pad)
        r = _ref_conv1d(out, p["ds_w"], p["ds_b"], 2, pad)
        r = _ref_bn(r, p["ds_bn"], False)
        out = A_VAL * r + B_VAL * h
    h = out.reshape(out.shape[0], -1)
    return jax.nn.sigmoid(h @ params["lin_w"] + params["lin_b"])


# ------------------------------------ main ---------------------------------------

if __name__ == "__main__":
    key = jax.random.PRNGKey(0)
    k_par, k_in = jax.random.split(key)
    params = init_params(k_par)
    wpack, vpack, plan = prepare_packed_params(params)
    forward = make_forward(plan)

    x_text = jax.random.normal(k_in, (BATCH, SEQ_LEN, NUM_FEATURES), jnp.float32)

    out = jax.block_until_ready(forward(x_text, wpack, vpack))

    assert out.shape == (BATCH, NUM_CLASSES), out.shape
    assert bool(jnp.all(jnp.isfinite(out)))
    assert bool(jnp.all((out >= 0.0) & (out <= 1.0)))        # sigmoid range

    # Numerical check vs. f32 plain-JAX reference (kernel uses bf16 matmul operands).
    ref = reference_forward(params, x_text)
    max_err = float(jnp.max(jnp.abs(out - ref)))
    assert max_err < 5e-2, f"max abs err vs reference: {max_err}"

    print("KERNEL_OK")
</pallas_src>

<mosaic_0001>
module attributes {stable_mosaic.version = 11 : i64} {
  func.func @kernel(%arg0: i32, %arg1: memref<1x256x8xf32, #tpu.memory_space<vmem>>, %arg2: memref<3160x128xbf16, #tpu.memory_space<vmem>>, %arg3: memref<48x128xf32, #tpu.memory_space<vmem>>, %arg4: memref<1x1x40xf32, #tpu.memory_space<vmem>>) attributes {dimension_semantics = [#tpu.dimension_semantics<parallel>], iteration_bounds = array<i64: 2>, scalar_prefetch = 0 : i64, scratch_operands = 0 : i64, tpu.core_type = #tpu.core_type<tc>, window_params = [{transform_indices = @transform_0, window_bounds = array<i64: 1, 256, 8>}, {pipeline_mode = #tpu.pipeline_mode<synchronous>, transform_indices = @transform_1, window_bounds = array<i64: 3160, 128>}, {pipeline_mode = #tpu.pipeline_mode<synchronous>, transform_indices = @transform_2, window_bounds = array<i64: 48, 128>}, {transform_indices = @transform_3, window_bounds = array<i64: 1, 1, 40>}]} {
    %c0 = arith.constant 0 : index
    %c0_0 = arith.constant 0 : index
    %c0_1 = arith.constant 0 : index
    %0 = vector.load %arg1[%c0, %c0_0, %c0_1] : memref<1x256x8xf32, #tpu.memory_space<vmem>>, vector<1x256x8xf32>
    %1 = vector.shape_cast %0 : vector<1x256x8xf32> to vector<256x8xf32>
    %2 = arith.truncf %1 : vector<256x8xf32> to vector<256x8xbf16>
    %c0_2 = arith.constant 0 : index
    %c0_3 = arith.constant 0 : index
    %3 = vector.load %arg2[%c0_2, %c0_3] : memref<3160x128xbf16, #tpu.memory_space<vmem>>, vector<8x16xbf16>
    %cst = arith.constant dense<0.000000e+00> : vector<256x16xf32>
    %4 = tpu.matmul %2, %3, %cst {dimension_numbers = #tpu.dot_dimension_numbers<[1], [0], [0], [1], [0, 0, 1, 1], [], []>} : vector<256x8xbf16>, vector<8x16xbf16>, vector<256x16xf32> -> vector<256x16xf32>
    %5 = tpu.iota {dimensions = array<i32: 0>} : vector<128x256xi32>
    %6 = tpu.iota {dimensions = array<i32: 1>} : vector<128x256xi32>
    %c2_i32 = arith.constant 2 : i32
    %7 = vector.broadcast %c2_i32 : i32 to vector<128x256xi32>
    %8 = arith.muli %7, %5 : vector<128x256xi32>
    %c-1_i32 = arith.constant -1 : i32
    %9 = vector.broadcast %c-1_i32 : i32 to vector<128x256xi32>
    %10 = arith.addi %8, %9 : vector<128x256xi32>
    %11 = arith.cmpi eq, %6, %10 : vector<128x256xi32>
    %cst_4 = arith.constant 1.000000e+00 : f32
    %cst_5 = arith.constant 0.000000e+00 : f32
    %12 = vector.broadcast %cst_4 : f32 to vector<128x256xf32>
    %13 = vector.broadcast %cst_5 : f32 to vector<128x256xf32>
    %14 = arith.select %11, %12, %13 : vector<128x256xi1>, vector<128x256xf32>
    %15 = arith.truncf %14 : vector<128x256xf32> to vector<128x256xbf16>
    %16 = arith.truncf %4 : vector<256x16xf32> to vector<256x16xbf16>
    %cst_6 = arith.constant dense<0.000000e+00> : vector<128x16xf32>
    %17 = tpu.matmul %15, %16, %cst_6 {dimension_numbers = #tpu.dot_dimension_numbers<[1], [0], [0], [1], [0, 0, 1, 1], [], []>} : vector<128x256xbf16>, vector<256x16xbf16>, vector<128x16xf32> -> vector<128x16xf32>
    %c8 = arith.constant 8 : index
    %c0_7 = arith.constant 0 : index
    %18 = vector.load %arg2[%c8, %c0_7] : memref<3160x128xbf16, #tpu.memory_space<vmem>>, vector<8x16xbf16>
    %cst_8 = arith.constant dense<0.000000e+00> : vector<256x16xf32>
    %19 = tpu.matmul %2, %18, %cst_8 {dimension_numbers = #tpu.dot_dimension_numbers<[1], [0], [0], [1], [0, 0, 1, 1], [], []>} : vector<256x8xbf16>, vector<8x16xbf16>, vector<256x16xf32> -> vector<256x16xf32>
    %20 = tpu.iota {dimensions = array<i32: 0>} : vector<128x256xi32>
    %21 = tpu.iota {dimensions = array<i32: 1>} : vector<128x256xi32>
    %c2_i32_9 = arith.constant 2 : i32
    %22 = vector.broadcast %c2_i32_9 : i32 to vector<128x256xi32>
    %23 = arith.muli %22, %20 : vector<128x256xi32>
    %c0_i32 = arith.constant 0 : i32
    %24 = vector.broadcast %c0_i32 : i32 to vector<128x256xi32>
    %25 = arith.addi %23, %24 : vector<128x256xi32>
    %26 = arith.cmpi eq, %21, %25 : vector<128x256xi32>
    %cst_10 = arith.constant 1.000000e+00 : f32
    %cst_11 = arith.constant 0.000000e+00 : f32
    %27 = vector.broadcast %cst_10 : f32 to vector<128x256xf32>
    %28 = vector.broadcast %cst_11 : f32 to vector<128x256xf32>
    %29 = arith.select %26, %27, %28 : vector<128x256xi1>, vector<128x256xf32>
    %30 = arith.truncf %29 : vector<128x256xf32> to vector<128x256xbf16>
    %31 = arith.truncf %19 : vector<256x16xf32> to vector<256x16xbf16>
    %cst_12 = arith.constant dense<0.000000e+00> : vector<128x16xf32>
    %32 = tpu.matmul %30, %31, %cst_12 {dimension_numbers = #tpu.dot_dimension_numbers<[1], [0], [0], [1], [0, 0, 1, 1], [], []>} : vector<128x256xbf16>, vector<256x16xbf16>, vector<128x16xf32> -> vector<128x16xf32>
    %33 = arith.addf %17, %32 : vector<128x16xf32>
    %c16 = arith.constant 16 : index
    %c0_13 = arith.constant 0 : index
    %34 = vector.load %arg2[%c16, %c0_13] : memref<3160x128xbf16, #tpu.memory_space<vmem>>, vector<8x16xbf16>
    %cst_14 = arith.constant dense<0.000000e+00> : vector<256x16xf32>
    %35 = tpu.matmul %2, %34, %cst_14 {dimension_numbers = #tpu.dot_dimension_numbers<[1], [0], [0], [1], [0, 0, 1, 1], [], []>} : vector<256x8xbf16>, vector<8x16xbf16>, vector<256x16xf32> -> vector<256x16xf32>
    %36 = tpu.iota {dimensions = array<i32: 0>} : vector<128x256xi32>
    %37 = tpu.iota {dimensions = array<i32: 1>} : vector<128x256xi32>
    %c2_i32_15 = arith.constant 2 : i32
    %38 = vector.broadcast %c2_i32_15 : i32 to vector<128x256xi32>
    %39 = arith.muli %38, %36 : vector<128x256xi32>
    %c1_i32 = arith.constant 1 : i32
    %40 = vector.broadcast %c1_i32 : i32 to vector<128x256xi32>
    %41 = arith.addi %39, %40 : vector<128x256xi32>
    %42 = arith.cmpi eq, %37, %41 : vector<128x256xi32>
    %cst_16 = arith.constant 1.000000e+00 : f32
    %cst_17 = arith.constant 0.000000e+00 : f32
    %43 = vector.broadcast %cst_16 : f32 to vector<128x256xf32>
    %44 = vector.broadcast %cst_17 : f32 to vector<128x256xf32>
    %45 = arith.select %42, %43, %44 : vector<128x256xi1>, vector<128x256xf32>
    %46 = arith.truncf %45 : vector<128x256xf32> to vector<128x256xbf16>
    %47 = arith.truncf %35 : vector<256x16xf32> to vector<256x16xbf16>
    %cst_18 = arith.constant dense<0.000000e+00> : vector<128x16xf32>
    %48 = tpu.matmul %46, %47, %cst_18 {dimension_numbers = #tpu.dot_dimension_numbers<[1], [0], [0], [1], [0, 0, 1, 1], [], []>} : vector<128x256xbf16>, vector<256x16xbf16>, vector<128x16xf32> -> vector<128x16xf32>
    %49 = arith.addf %33, %48 : vector<128x16xf32>
    %c0_19 = arith.constant 0 : index
    %c0_20 = arith.constant 0 : index
    %50 = vector.load %arg3[%c0_19, %c0_20] : memref<48x128xf32, #tpu.memory_space<vmem>>, vector<1x16xf32>
    %51 = vector.broadcast %50 : vector<1x16xf32> to vector<128x16xf32>
    %52 = arith.addf %49, %51 : vector<128x16xf32>
    %c1 = arith.constant 1 : index
    %c0_21 = arith.constant 0 : index
    %53 = vector.load %arg3[%c1, %c0_21] : memref<48x128xf32, #tpu.memory_space<vmem>>, vector<1x16xf32>
    %54 = vector.broadcast %53 : vector<1x16xf32> to vector<128x16xf32>
    %55 = arith.mulf %52, %54 : vector<128x16xf32>
    %c2 = arith.constant 2 : index
    %c0_22 = arith.constant 0 : index
    %56 = vector.load %arg3[%c2, %c0_22] : memref<48x128xf32, #tpu.memory_space<vmem>>, vector<1x16xf32>
    %57 = vector.broadcast %56 : vector<1x16xf32> to vector<128x16xf32>
    %58 = arith.addf %55, %57 : vector<128x16xf32>
    %cst_23 = arith.constant 0.000000e+00 : f32
    %59 = vector.broadcast %cst_23 : f32 to vector<128x16xf32>
    %60 = arith.maximumf %58, %59 : vector<128x16xf32>
    %61 = arith.truncf %60 : vector<128x16xf32> to vector<128x16xbf16>
    %c24 = arith.constant 24 : index
    %c0_24 = arith.constant 0 : index
    %62 = vector.load %arg2[%c24, %c0_24] : memref<3160x128xbf16, #tpu.memory_space<vmem>>, vector<16x16xbf16>
    %cst_25 = arith.constant dense<0.000000e+00> : vector<128x16xf32>
    %63 = tpu.matmul %61, %62, %cst_25 {dimension_numbers = #tpu.dot_dimension_numbers<[1], [0], [0], [1], [0, 0, 1, 1], [], []>} : vector<128x16xbf16>, vector<16x16xbf16>, vector<128x16xf32> -> vector<128x16xf32>
    %c5 = arith.constant 5 : index
    %c0_26 = arith.constant 0 : index
    %64 = vector.load %arg3[%c5, %c0_26] : memref<48x128xf32, #tpu.memory_space<vmem>>, vector<1x16xf32>
    %65 = vector.broadcast %64 : vector<1x16xf32> to vector<128x16xf32>
    %66 = arith.addf %63, %65 : vector<128x16xf32>
    %c3 = arith.constant 3 : index
    %c0_27 = arith.constant 0 : index
    %67 = vector.load %arg3[%c3, %c0_27] : memref<48x128xf32, #tpu.memory_space<vmem>>, vector<1x16xf32>
    %68 = vector.broadcast %67 : vector<1x16xf32> to vector<128x16xf32>
    %69 = arith.mulf %66, %68 : vector<128x16xf32>
    %c4 = arith.constant 4 : index
    %c0_28 = arith.constant 0 : index
    %70 = vector.load %arg3[%c4, %c0_28] : memref<48x128xf32, #tpu.memory_space<vmem>>, vector<1x16xf32>
    %71 = vector.broadcast %70 : vector<1x16xf32> to vector<128x16xf32>
    %72 = arith.addf %69, %71 : vector<128x16xf32>
    %cst_29 = arith.constant 0.000000e+00 : f32
    %73 = vector.broadcast %cst_29 : f32 to vector<128x16xf32>
    %74 = arith.maximumf %72, %73 : vector<128x16xf32>
    %75 = arith.truncf %74 : vector<128x16xf32> to vector<128x16xbf16>
    %c40 = arith.constant 40 : index
    %c0_30 = arith.constant 0 : index
    %76 = vector.load %arg2[%c40, %c0_30] : memref<3160x128xbf16, #tpu.memory_space<vmem>>, vector<16x32xbf16>
    %cst_31 = arith.constant dense<0.000000e+00> : vector<128x32xf32>
    %77 = tpu.matmul %75, %76, %cst_31 {dimension_numbers = #tpu.dot_dimension_numbers<[1], [0], [0], [1], [0, 0, 1, 1], [], []>} : vector<128x16xbf16>, vector<16x32xbf16>, vector<128x32xf32> -> vector<128x32xf32>
    %78 = tpu.iota {dimensions = array<i32: 0>} : vector<64x128xi32>
    %79 = tpu.iota {dimensions = array<i32: 1>} : vector<64x128xi32>
    %c2_i32_32 = arith.constant 2 : i32
    %80 = vector.broadcast %c2_i32_32 : i32 to vector<64x128xi32>
    %81 = arith.muli %80, %78 : vector<64x128xi32>
    %c-1_i32_33 = arith.constant -1 : i32
    %82 = vector.broadcast %c-1_i32_33 : i32 to vector<64x128xi32>
    %83 = arith.addi %81, %82 : vector<64x128xi32>
    %84 = arith.cmpi eq, %79, %83 : vector<64x128xi32>
    %cst_34 = arith.constant 1.000000e+00 : f32
    %cst_35 = arith.constant 0.000000e+00 : f32
    %85 = vector.broadcast %cst_34 : f32 to vector<64x128xf32>
    %86 = vector.broadcast %cst_35 : f32 to vector<64x128xf32>
    %87 = arith.select %84, %85, %86 : vector<64x128xi1>, vector<64x128xf32>
    %88 = arith.truncf %87 : vector<64x128xf32> to vector<64x128xbf16>
    %89 = arith.truncf %77 : vector<128x32xf32> to vector<128x32xbf16>
    %cst_36 = arith.constant dense<0.000000e+00> : vector<64x32xf32>
    %90 = tpu.matmul %88, %89, %cst_36 {dimension_numbers = #tpu.dot_dimension_numbers<[1], [0], [0], [1], [0, 0, 1, 1], [], []>} : vector<64x128xbf16>, vector<128x32xbf16>, vector<64x32xf32> -> vector<64x32xf32>
    %c56 = arith.constant 56 : index
    %c0_37 = arith.constant 0 : index
    %91 = vector.load %arg2[%c56, %c0_37] : memref<3160x128xbf16, #tpu.memory_space<vmem>>, vector<16x32xbf16>
    %cst_38 = arith.constant dense<0.000000e+00> : vector<128x32xf32>
    %92 = tpu.matmul %75, %91, %cst_38 {dimension_numbers = #tpu.dot_dimension_numbers<[1], [0], [0], [1], [0, 0, 1, 1], [], []>} : vector<128x16xbf16>, vector<16x32xbf16>, vector<128x32xf32> -> vector<128x32xf32>
    %93 = tpu.iota {dimensions = array<i32: 0>} : vector<64x128xi32>
    %94 = tpu.iota {dimensions = array<i32: 1>} : vector<64x128xi32>
    %c2_i32_39 = arith.constant 2 : i32
    %95 = vector.broadcast %c2_i32_39 : i32 to vector<64x128xi32>
    %96 = arith.muli %95, %93 : vector<64x128xi32>
    %c0_i32_40 = arith.constant 0 : i32
    %97 = vector.broadcast %c0_i32_40 : i32 to vector<64x128xi32>
    %98 = arith.addi %96, %97 : vector<64x128xi32>
    %99 = arith.cmpi eq, %94, %98 : vector<64x128xi32>
    %cst_41 = arith.constant 1.000000e+00 : f32
    %cst_42 = arith.constant 0.000000e+00 : f32
    %100 = vector.broadcast %cst_41 : f32 to vector<64x128xf32>
    %101 = vector.broadcast %cst_42 : f32 to vector<64x128xf32>
    %102 = arith.select %99, %100, %101 : vector<64x128xi1>, vector<64x128xf32>
    %103 = arith.truncf %102 : vector<64x128xf32> to vector<64x128xbf16>
    %104 = arith.truncf %92 : vector<128x32xf32> to vector<128x32xbf16>
    %cst_43 = arith.constant dense<0.000000e+00> : vector<64x32xf32>
    %105 = tpu.matmul %103, %104, %cst_43 {dimension_numbers = #tpu.dot_dimension_numbers<[1], [0], [0], [1], [0, 0, 1, 1], [], []>} : vector<64x128xbf16>, vector<128x32xbf16>, vector<64x32xf32> -> vector<64x32xf32>
    %106 = arith.addf %90, %105 : vector<64x32xf32>
    %c72 = arith.constant 72 : index
    %c0_44 = arith.constant 0 : index
    %107 = vector.load %arg2[%c72, %c0_44] : memref<3160x128xbf16, #tpu.memory_space<vmem>>, vector<16x32xbf16>
    %cst_45 = arith.constant dense<0.000000e+00> : vector<128x32xf32>
    %108 = tpu.matmul %75, %107, %cst_45 {dimension_numbers = #tpu.dot_dimension_numbers<[1], [0], [0], [1], [0, 0, 1, 1], [], []>} : vector<128x16xbf16>, vector<16x32xbf16>, vector<128x32xf32> -> vector<128x32xf32>
    %109 = tpu.iota {dimensions = array<i32: 0>} : vector<64x128xi32>
    %110 = tpu.iota {dimensions = array<i32: 1>} : vector<64x128xi32>
    %c2_i32_46 = arith.constant 2 : i32
    %111 = vector.broadcast %c2_i32_46 : i32 to vector<64x128xi32>
    %112 = arith.muli %111, %109 : vector<64x128xi32>
    %c1_i32_47 = arith.constant 1 : i32
    %113 = vector.broadcast %c1_i32_47 : i32 to vector<64x128xi32>
    %114 = arith.addi %112, %113 : vector<64x128xi32>
    %115 = arith.cmpi eq, %110, %114 : vector<64x128xi32>
    %cst_48 = arith.constant 1.000000e+00 : f32
    %cst_49 = arith.constant 0.000000e+00 : f32
    %116 = vector.broadcast %cst_48 : f32 to vector<64x128xf32>
    %117 = vector.broadcast %cst_49 : f32 to vector<64x128xf32>
    %118 = arith.select %115, %116, %117 : vector<64x128xi1>, vector<64x128xf32>
    %119 = arith.truncf %118 : vector<64x128xf32> to vector<64x128xbf16>
    %120 = arith.truncf %108 : vector<128x32xf32> to vector<128x32xbf16>
    %cst_50 = arith.constant dense<0.000000e+00> : vector<64x32xf32>
    %121 = tpu.matmul %119, %120, %cst_50 {dimension_numbers = #tpu.dot_dimension_numbers<[1], [0], [0], [1], [0, 0, 1, 1], [], []>} : vector<64x128xbf16>, vector<128x32xbf16>, vector<64x32xf32> -> vector<64x32xf32>
    %122 = arith.addf %106, %121 : vector<64x32xf32>
    %c88 = arith.constant 88 : index
    %c0_51 = arith.constant 0 : index
    %123 = vector.load %arg2[%c88, %c0_51] : memref<3160x128xbf16, #tpu.memory_space<vmem>>, vector<16x32xbf16>
    %cst_52 = arith.constant dense<0.000000e+00> : vector<128x32xf32>
    %124 = tpu.matmul %75, %123, %cst_52 {dimension_numbers = #tpu.dot_dimension_numbers<[1], [0], [0], [1], [0, 0, 1, 1], [], []>} : vector<128x16xbf16>, vector<16x32xbf16>, vector<128x32xf32> -> vector<128x32xf32>
    %125 = tpu.iota {dimensions = array<i32: 0>} : vector<64x128xi32>
    %126 = tpu.iota {dimensions = array<i32: 1>} : vector<64x128xi32>
    %c2_i32_53 = arith.constant 2 : i32
    %127 = vector.broadcast %c2_i32_53 : i32 to vector<64x128xi32>
    %128 = arith.muli %127, %125 : vector<64x128xi32>
    %c2_i32_54 = arith.constant 2 : i32
    %129 = vector.broadcast %c2_i32_54 : i32 to vector<64x128xi32>
    %130 = arith.addi %128, %129 : vector<64x128xi32>
    %131 = arith.cmpi eq, %126, %130 : vector<64x128xi32>
    %cst_55 = arith.constant 1.000000e+00 : f32
    %cst_56 = arith.constant 0.000000e+00 : f32
    %132 = vector.broadcast %cst_55 : f32 to vector<64x128xf32>
    %133 = vector.broadcast %cst_56 : f32 to vector<64x128xf32>
    %134 = arith.select %131, %132, %133 : vector<64x128xi1>, vector<64x128xf32>
    %135 = arith.truncf %134 : vector<64x128xf32> to vector<64x128xbf16>
    %136 = arith.truncf %124 : vector<128x32xf32> to vector<128x32xbf16>
    %cst_57 = arith.constant dense<0.000000e+00> : vector<64x32xf32>
    %137 = tpu.matmul %135, %136, %cst_57 {dimension_numbers = #tpu.dot_dimension_numbers<[1], [0], [0], [1], [0, 0, 1, 1], [], []>} : vector<64x128xbf16>, vector<128x32xbf16>, vector<64x32xf32> -> vector<64x32xf32>
    %138 = arith.addf %122, %137 : vector<64x32xf32>
    %c6 = arith.constant 6 : index
    %c0_58 = arith.constant 0 : index
    %139 = vector.load %arg3[%c6, %c0_58] : memref<48x128xf32, #tpu.memory_space<vmem>>, vector<1x32xf32>
    %140 = vector.broadcast %139 : vector<1x32xf32> to vector<64x32xf32>
    %141 = arith.addf %138, %140 : vector<64x32xf32>
    %142 = arith.truncf %52 : vector<128x16xf32> to vector<128x16xbf16>
    %c104 = arith.constant 104 : index
    %c0_59 = arith.constant 0 : index
    %143 = vector.load %arg2[%c104, %c0_59] : memref<3160x128xbf16, #tpu.memory_space<vmem>>, vector<16x32xbf16>
    %cst_60 = arith.constant dense<0.000000e+00> : vector<128x32xf32>
    %144 = tpu.matmul %142, %143, %cst_60 {dimension_numbers = #tpu.dot_dimension_numbers<[1], [0], [0], [1], [0, 0, 1, 1], [], []>} : vector<128x16xbf16>, vector<16x32xbf16>, vector<128x32xf32> -> vector<128x32xf32>
    %145 = tpu.iota {dimensions = array<i32: 0>} : vector<64x128xi32>
    %146 = tpu.iota {dimensions = array<i32: 1>} : vector<64x128xi32>
    %c2_i32_61 = arith.constant 2 : i32
    %147 = vector.broadcast %c2_i32_61 : i32 to vector<64x128xi32>
    %148 = arith.muli %147, %145 : vector<64x128xi32>
    %c-1_i32_62 = arith.constant -1 : i32
    %149 = vector.broadcast %c-1_i32_62 : i32 to vector<64x128xi32>
    %150 = arith.addi %148, %149 : vector<64x128xi32>
    %151 = arith.cmpi eq, %146, %150 : vector<64x128xi32>
    %cst_63 = arith.constant 1.000000e+00 : f32
    %cst_64 = arith.constant 0.000000e+00 : f32
    %152 = vector.broadcast %cst_63 : f32 to vector<64x128xf32>
    %153 = vector.broadcast %cst_64 : f32 to vector<64x128xf32>
    %154 = arith.select %151, %152, %153 : vector<64x128xi1>, vector<64x128xf32>
    %155 = arith.truncf %154 : vector<64x128xf32> to vector<64x128xbf16>
    %156 = arith.truncf %144 : vector<128x32xf32> to vector<128x32xbf16>
    %cst_65 = arith.constant dense<0.000000e+00> : vector<64x32xf32>
    %157 = tpu.matmul %155, %156, %cst_65 {dimension_numbers = #tpu.dot_dimension_numbers<[1], [0], [0], [1], [0, 0, 1, 1], [], []>} : vector<64x128xbf16>, vector<128x32xbf16>, vector<64x32xf32> -> vector<64x32xf32>
    %c120 = arith.constant 120 : index
    %c0_66 = arith.constant 0 : index
    %158 = vector.load %arg2[%c120, %c0_66] : memref<3160x128xbf16, #tpu.memory_space<vmem>>, vector<16x32xbf16>
    %cst_67 = arith.constant dense<0.000000e+00> : vector<128x32xf32>
    %159 = tpu.matmul %142, %158, %cst_67 {dimension_numbers = #tpu.dot_dimension_numbers<[1], [0], [0], [1], [0, 0, 1, 1], [], []>} : vector<128x16xbf16>, vector<16x32xbf16>, vector<128x32xf32> -> vector<128x32xf32>
    %160 = tpu.iota {dimensions = array<i32: 0>} : vector<64x128xi32>
    %161 = tpu.iota {dimensions = array<i32: 1>} : vector<64x128xi32>
    %c2_i32_68 = arith.constant 2 : i32
    %162 = vector.broadcast %c2_i32_68 : i32 to vector<64x128xi32>
    %163 = arith.muli %162, %160 : vector<64x128xi32>
    %c0_i32_69 = arith.constant 0 : i32
    %164 = vector.broadcast %c0_i32_69 : i32 to vector<64x128xi32>
    %165 = arith.addi %163, %164 : vector<64x128xi32>
    %166 = arith.cmpi eq, %161, %165 : vector<64x128xi32>
    %cst_70 = arith.constant 1.000000e+00 : f32
    %cst_71 = arith.constant 0.000000e+00 : f32
    %167 = vector.broadcast %cst_70 : f32 to vector<64x128xf32>
    %168 = vector.broadcast %cst_71 : f32 to vector<64x128xf32>
    %169 = arith.select %166, %167, %168 : vector<64x128xi1>, vector<64x128xf32>
    %170 = arith.truncf %169 : vector<64x128xf32> to vector<64x128xbf16>
    %171 = arith.truncf %159 : vector<128x32xf32> to vector<128x32xbf16>
    %cst_72 = arith.constant dense<0.000000e+00> : vector<64x32xf32>
    %172 = tpu.matmul %170, %171, %cst_72 {dimension_numbers = #tpu.dot_dimension_numbers<[1], [0], [0], [1], [0, 0, 1, 1], [], []>} : vector<64x128xbf16>, vector<128x32xbf16>, vector<64x32xf32> -> vector<64x32xf32>
    %173 = arith.addf %157, %172 : vector<64x32xf32>
    %c136 = arith.constant 136 : index
    %c0_73 = arith.constant 0 : index
    %174 = vector.load %arg2[%c136, %c0_73] : memref<3160x128xbf16, #tpu.memory_space<vmem>>, vector<16x32xbf16>
    %cst_74 = arith.constant dense<0.000000e+00> : vector<128x32xf32>
    %175 = tpu.matmul %142, %174, %cst_74 {dimension_numbers = #tpu.dot_dimension_numbers<[1], [0], [0], [1], [0, 0, 1, 1], [], []>} : vector<128x16xbf16>, vector<16x32xbf16>, vector<128x32xf32> -> vector<128x32xf32>
    %176 = tpu.iota {dimensions = array<i32: 0>} : vector<64x128xi32>
    %177 = tpu.iota {dimensions = array<i32: 1>} : vector<64x128xi32>
    %c2_i32_75 = arith.constant 2 : i32
    %178 = vector.broadcast %c2_i32_75 : i32 to vector<64x128xi32>
    %179 = arith.muli %178, %176 : vector<64x128xi32>
    %c1_i32_76 = arith.constant 1 : i32
    %180 = vector.broadcast %c1_i32_76 : i32 to vector<64x128xi32>
    %181 = arith.addi %179, %180 : vector<64x128xi32>
    %182 = arith.cmpi eq, %177, %181 : vector<64x128xi32>
    %cst_77 = arith.constant 1.000000e+00 : f32
    %cst_78 = arith.constant 0.000000e+00 : f32
    %183 = vector.broadcast %cst_77 : f32 to vector<64x128xf32>
    %184 = vector.broadcast %cst_78 : f32 to vector<64x128xf32>
    %185 = arith.select %182, %183, %184 : vector<64x128xi1>, vector<64x128xf32>
    %186 = arith.truncf %185 : vector<64x128xf32> to vector<64x128xbf16>
    %187 = arith.truncf %175 : vector<128x32xf32> to vector<128x32xbf16>
    %cst_79 = arith.constant dense<0.000000e+00> : vector<64x32xf32>
    %188 = tpu.matmul %186, %187, %cst_79 {dimension_numbers = #tpu.dot_dimension_numbers<[1], [0], [0], [1], [0, 0, 1, 1], [], []>} : vector<64x128xbf16>, vector<128x32xbf16>, vector<64x32xf32> -> vector<64x32xf32>
    %189 = arith.addf %173, %188 : vector<64x32xf32>
    %c152 = arith.constant 152 : index
    %c0_80 = arith.constant 0 : index
    %190 = vector.load %arg2[%c152, %c0_80] : memref<3160x128xbf16, #tpu.memory_space<vmem>>, vector<16x32xbf16>
    %cst_81 = arith.constant dense<0.000000e+00> : vector<128x32xf32>
    %191 = tpu.matmul %142, %190, %cst_81 {dimension_numbers = #tpu.dot_dimension_numbers<[1], [0], [0], [1], [0, 0, 1, 1], [], []>} : vector<128x16xbf16>, vector<16x32xbf16>, vector<128x32xf32> -> vector<128x32xf32>
    %192 = tpu.iota {dimensions = array<i32: 0>} : vector<64x128xi32>
    %193 = tpu.iota {dimensions = array<i32: 1>} : vector<64x128xi32>
    %c2_i32_82 = arith.constant 2 : i32
    %194 = vector.broadcast %c2_i32_82 : i32 to vector<64x128xi32>
    %195 = arith.muli %194, %192 : vector<64x128xi32>
    %c2_i32_83 = arith.constant 2 : i32
    %196 = vector.broadcast %c2_i32_83 : i32 to vector<64x128xi32>
    %197 = arith.addi %195, %196 : vector<64x128xi32>
    %198 = arith.cmpi eq, %193, %197 : vector<64x128xi32>
    %cst_84 = arith.constant 1.000000e+00 : f32
    %cst_85 = arith.constant 0.000000e+00 : f32
    %199 = vector.broadcast %cst_84 : f32 to vector<64x128xf32>
    %200 = vector.broadcast %cst_85 : f32 to vector<64x128xf32>
    %201 = arith.select %198, %199, %200 : vector<64x128xi1>, vector<64x128xf32>
    %202 = arith.truncf %201 : vector<64x128xf32> to vector<64x128xbf16>
    %203 = arith.truncf %191 : vector<128x32xf32> to vector<128x32xbf16>
    %cst_86 = arith.constant dense<0.000000e+00> : vector<64x32xf32>
    %204 = tpu.matmul %202, %203, %cst_86 {dimension_numbers = #tpu.dot_dimension_numbers<[1], [0], [0], [1], [0, 0, 1, 1], [], []>} : vector<64x128xbf16>, vector<128x32xbf16>, vector<64x32xf32> -> vector<64x32xf32>
    %205 = arith.addf %189, %204 : vector<64x32xf32>
    %c7 = arith.constant 7 : index
    %c0_87 = arith.constant 0 : index
    %206 = vector.load %arg3[%c7, %c0_87] : memref<48x128xf32, #tpu.memory_space<vmem>>, vector<1x32xf32>
    %207 = vector.broadcast %206 : vector<1x32xf32> to vector<64x32xf32>
    %208 = arith.addf %205, %207 : vector<64x32xf32>
    %cst_88 = arith.constant 2.000000e+00 : f32
    %209 = vector.broadcast %cst_88 : f32 to vector<64x32xf32>
    %210 = arith.mulf %209, %208 : vector<64x32xf32>
    %cst_89 = arith.constant 3.000000e-01 : f32
    %211 = vector.broadcast %cst_89 : f32 to vector<64x32xf32>
    %212 = arith.mulf %211, %141 : vector<64x32xf32>
    %213 = arith.addf %210, %212 : vector<64x32xf32>
    %c8_90 = arith.constant 8 : index
    %c0_91 = arith.constant 0 : index
    %214 = vector.load %arg3[%c8_90, %c0_91] : memref<48x128xf32, #tpu.memory_space<vmem>>, vector<1x32xf32>
    %215 = vector.broadcast %214 : vector<1x32xf32> to vector<64x32xf32>
    %216 = arith.mulf %213, %215 : vector<64x32xf32>
    %c9 = arith.constant 9 : index
    %c0_92 = arith.constant 0 : index
    %217 = vector.load %arg3[%c9, %c0_92] : memref<48x128xf32, #tpu.memory_space<vmem>>, vector<1x32xf32>
    %218 = vector.broadcast %217 : vector<1x32xf32> to vector<64x32xf32>
    %219 = arith.addf %216, %218 : vector<64x32xf32>
    %cst_93 = arith.constant 0.000000e+00 : f32
    %220 = vector.broadcast %cst_93 : f32 to vector<64x32xf32>
    %221 = arith.maximumf %219, %220 : vector<64x32xf32>
    %222 = arith.truncf %221 : vector<64x32xf32> to vector<64x32xbf16>
    %c168 = arith.constant 168 : index
    %c0_94 = arith.constant 0 : index
    %223 = vector.load %arg2[%c168, %c0_94] : memref<3160x128xbf16, #tpu.memory_space<vmem>>, vector<32x32xbf16>
    %cst_95 = arith.constant dense<0.000000e+00> : vector<64x32xf32>
    %224 = tpu.matmul %222, %223, %cst_95 {dimension_numbers = #tpu.dot_dimension_numbers<[1], [0], [0], [1], [0, 0, 1, 1], [], []>} : vector<64x32xbf16>, vector<32x32xbf16>, vector<64x32xf32> -> vector<64x32xf32>
    %c12 = arith.constant 12 : index
    %c0_96 = arith.constant 0 : index
    %225 = vector.load %arg3[%c12, %c0_96] : memref<48x128xf32, #tpu.memory_space<vmem>>, vector<1x32xf32>
    %226 = vector.broadcast %225 : vector<1x32xf32> to vector<64x32xf32>
    %227 = arith.addf %224, %226 : vector<64x32xf32>
    %c10 = arith.constant 10 : index
    %c0_97 = arith.constant 0 : index
    %228 = vector.load %arg3[%c10, %c0_97] : memref<48x128xf32, #tpu.memory_space<vmem>>, vector<1x32xf32>
    %229 = vector.broadcast %228 : vector<1x32xf32> to vector<64x32xf32>
    %230 = arith.mulf %227, %229 : vector<64x32xf32>
    %c11 = arith.constant 11 : index
    %c0_98 = arith.constant 0 : index
    %231 = vector.load %arg3[%c11, %c0_98] : memref<48x128xf32, #tpu.memory_space<vmem>>, vector<1x32xf32>
    %232 = vector.broadcast %231 : vector<1x32xf32> to vector<64x32xf32>
    %233 = arith.addf %230, %232 : vector<64x32xf32>
    %cst_99 = arith.constant 0.000000e+00 : f32
    %234 = vector.broadcast %cst_99 : f32 to vector<64x32xf32>
    %235 = arith.maximumf %233, %234 : vector<64x32xf32>
    %236 = arith.truncf %235 : vector<64x32xf32> to vector<64x32xbf16>
    %c200 = arith.constant 200 : index
    %c0_100 = arith.constant 0 : index
    %237 = vector.load %arg2[%c200, %c0_100] : memref<3160x128xbf16, #tpu.memory_space<vmem>>, vector<32x48xbf16>
    %cst_101 = arith.constant dense<0.000000e+00> : vector<64x48xf32>
    %238 = tpu.matmul %236, %237, %cst_101 {dimension_numbers = #tpu.dot_dimension_numbers<[1], [0], [0], [1], [0, 0, 1, 1], [], []>} : vector<64x32xbf16>, vector<32x48xbf16>, vector<64x48xf32> -> vector<64x48xf32>
    %239 = tpu.iota {dimensions = array<i32: 0>} : vector<32x64xi32>
    %240 = tpu.iota {dimensions = array<i32: 1>} : vector<32x64xi32>
    %c2_i32_102 = arith.constant 2 : i32
    %241 = vector.broadcast %c2_i32_102 : i32 to vector<32x64xi32>
    %242 = arith.muli %241, %239 : vector<32x64xi32>
    %c-1_i32_103 = arith.constant -1 : i32
    %243 = vector.broadcast %c-1_i32_103 : i32 to vector<32x64xi32>
    %244 = arith.addi %242, %243 : vector<32x64xi32>
    %245 = arith.cmpi eq, %240, %244 : vector<32x64xi32>
    %cst_104 = arith.constant 1.000000e+00 : f32
    %cst_105 = arith.constant 0.000000e+00 : f32
    %246 = vector.broadcast %cst_104 : f32 to vector<32x64xf32>
    %247 = vector.broadcast %cst_105 : f32 to vector<32x64xf32>
    %248 = arith.select %245, %246, %247 : vector<32x64xi1>, vector<32x64xf32>
    %249 = arith.truncf %248 : vector<32x64xf32> to vector<32x64xbf16>
    %250 = arith.truncf %238 : vector<64x48xf32> to vector<64x48xbf16>
    %cst_106 = arith.constant dense<0.000000e+00> : vector<32x48xf32>
    %251 = tpu.matmul %249, %250, %cst_106 {dimension_numbers = #tpu.dot_dimension_numbers<[1], [0], [0], [1], [0, 0, 1, 1], [], []>} : vector<32x64xbf16>, vector<64x48xbf16>, vector<32x48xf32> -> vector<32x48xf32>
    %c232 = arith.constant 232 : index
    %c0_107 = arith.constant 0 : index
    %252 = vector.load %arg2[%c232, %c0_107] : memref<3160x128xbf16, #tpu.memory_space<vmem>>, vector<32x48xbf16>
    %cst_108 = arith.constant dense<0.000000e+00> : vector<64x48xf32>
    %253 = tpu.matmul %236, %252, %cst_108 {dimension_numbers = #tpu.dot_dimension_numbers<[1], [0], [0], [1], [0, 0, 1, 1], [], []>} : vector<64x32xbf16>, vector<32x48xbf16>, vector<64x48xf32> -> vector<64x48xf32>
    %254 = tpu.iota {dimensions = array<i32: 0>} : vector<32x64xi32>
    %255 = tpu.iota {dimensions = array<i32: 1>} : vector<32x64xi32>
    %c2_i32_109 = arith.constant 2 : i32
    %256 = vector.broadcast %c2_i32_109 : i32 to vector<32x64xi32>
    %257 = arith.muli %256, %254 : vector<32x64xi32>
    %c0_i32_110 = arith.constant 0 : i32
    %258 = vector.broadcast %c0_i32_110 : i32 to vector<32x64xi32>
    %259 = arith.addi %257, %258 : vector<32x64xi32>
    %260 = arith.cmpi eq, %255, %259 : vector<32x64xi32>
    %cst_111 = arith.constant 1.000000e+00 : f32
    %cst_112 = arith.constant 0.000000e+00 : f32
    %261 = vector.broadcast %cst_111 : f32 to vector<32x64xf32>
    %262 = vector.broadcast %cst_112 : f32 to vector<32x64xf32>
    %263 = arith.select %260, %261, %262 : vector<32x64xi1>, vector<32x64xf32>
    %264 = arith.truncf %263 : vector<32x64xf32> to vector<32x64xbf16>
    %265 = arith.truncf %253 : vector<64x48xf32> to vector<64x48xbf16>
    %cst_113 = arith.constant dense<0.000000e+00> : vector<32x48xf32>
    %266 = tpu.matmul %264, %265, %cst_113 {dimension_numbers = #tpu.dot_dimension_numbers<[1], [0], [0], [1], [0, 0, 1, 1], [], []>} : vector<32x64xbf16>, vector<64x48xbf16>, vector<32x48xf32> -> vector<32x48xf32>
    %267 = arith.addf %251, %266 : vector<32x48xf32>
    %c264 = arith.constant 264 : index
    %c0_114 = arith.constant 0 : index
    %268 = vector.load %arg2[%c264, %c0_114] : memref<3160x128xbf16, #tpu.memory_space<vmem>>, vector<32x48xbf16>
    %cst_115 = arith.constant dense<0.000000e+00> : vector<64x48xf32>
    %269 = tpu.matmul %236, %268, %cst_115 {dimension_numbers = #tpu.dot_dimension_numbers<[1], [0], [0], [1], [0, 0, 1, 1], [], []>} : vector<64x32xbf16>, vector<32x48xbf16>, vector<64x48xf32> -> vector<64x48xf32>
    %270 = tpu.iota {dimensions = array<i32: 0>} : vector<32x64xi32>
    %271 = tpu.iota {dimensions = array<i32: 1>} : vector<32x64xi32>
    %c2_i32_116 = arith.constant 2 : i32
    %272 = vector.broadcast %c2_i32_116 : i32 to vector<32x64xi32>
    %273 = arith.muli %272, %270 : vector<32x64xi32>
    %c1_i32_117 = arith.constant 1 : i32
    %274 = vector.broadcast %c1_i32_117 : i32 to vector<32x64xi32>
    %275 = arith.addi %273, %274 : vector<32x64xi32>
    %276 = arith.cmpi eq, %271, %275 : vector<32x64xi32>
    %cst_118 = arith.constant 1.000000e+00 : f32
    %cst_119 = arith.constant 0.000000e+00 : f32
    %277 = vector.broadcast %cst_118 : f32 to vector<32x64xf32>
    %278 = vector.broadcast %cst_119 : f32 to vector<32x64xf32>
    %279 = arith.select %276, %277, %278 : vector<32x64xi1>, vector<32x64xf32>
    %280 = arith.truncf %279 : vector<32x64xf32> to vector<32x64xbf16>
    %281 = arith.truncf %269 : vector<64x48xf32> to vector<64x48xbf16>
    %cst_120 = arith.constant dense<0.000000e+00> : vector<32x48xf32>
    %282 = tpu.matmul %280, %281, %cst_120 {dimension_numbers = #tpu.dot_dimension_numbers<[1], [0], [0], [1], [0, 0, 1, 1], [], []>} : vector<32x64xbf16>, vector<64x48xbf16>, vector<32x48xf32> -> vector<32x48xf32>
    %283 = arith.addf %267, %282 : vector<32x48xf32>
    %c296 = arith.constant 296 : index
    %c0_121 = arith.constant 0 : index
    %284 = vector.load %arg2[%c296, %c0_121] : memref<3160x128xbf16, #tpu.memory_space<vmem>>, vector<32x48xbf16>
    %cst_122 = arith.constant dense<0.000000e+00> : vector<64x48xf32>
    %285 = tpu.matmul %236, %284, %cst_122 {dimension_numbers = #tpu.dot_dimension_numbers<[1], [0], [0], [1], [0, 0, 1, 1], [], []>} : vector<64x32xbf16>, vector<32x48xbf16>, vector<64x48xf32> -> vector<64x48xf32>
    %286 = tpu.iota {dimensions = array<i32: 0>} : vector<32x64xi32>
    %287 = tpu.iota {dimensions = array<i32: 1>} : vector<32x64xi32>
    %c2_i32_123 = arith.constant 2 : i32
    %288 = vector.broadcast %c2_i32_123 : i32 to vector<32x64xi32>
    %289 = arith.muli %288, %286 : vector<32x64xi32>
    %c2_i32_124 = arith.constant 2 : i32
    %290 = vector.broadcast %c2_i32_124 : i32 to vector<32x64xi32>
    %291 = arith.addi %289, %290 : vector<32x64xi32>
    %292 = arith.cmpi eq, %287, %291 : vector<32x64xi32>
    %cst_125 = arith.constant 1.000000e+00 : f32
    %cst_126 = arith.constant 0.000000e+00 : f32
    %293 = vector.broadcast %cst_125 : f32 to vector<32x64xf32>
    %294 = vector.broadcast %cst_126 : f32 to vector<32x64xf32>
    %295 = arith.select %292, %293, %294 : vector<32x64xi1>, vector<32x64xf32>
    %296 = arith.truncf %295 : vector<32x64xf32> to vector<32x64xbf16>
    %297 = arith.truncf %285 : vector<64x48xf32> to vector<64x48xbf16>
    %cst_127 = arith.constant dense<0.000000e+00> : vector<32x48xf32>
    %298 = tpu.matmul %296, %297, %cst_127 {dimension_numbers = #tpu.dot_dimension_numbers<[1], [0], [0], [1], [0, 0, 1, 1], [], []>} : vector<32x64xbf16>, vector<64x48xbf16>, vector<32x48xf32> -> vector<32x48xf32>
    %299 = arith.addf %283, %298 : vector<32x48xf32>
    %c13 = arith.constant 13 : index
    %c0_128 = arith.constant 0 : index
    %300 = vector.load %arg3[%c13, %c0_128] : memref<48x128xf32, #tpu.memory_space<vmem>>, vector<1x48xf32>
    %301 = vector.broadcast %300 : vector<1x48xf32> to vector<32x48xf32>
    %302 = arith.addf %299, %301 : vector<32x48xf32>
    %303 = arith.truncf %213 : vector<64x32xf32> to vector<64x32xbf16>
    %c328 = arith.constant 328 : index
    %c0_129 = arith.constant 0 : index
    %304 = vector.load %arg2[%c328, %c0_129] : memref<3160x128xbf16, #tpu.memory_space<vmem>>, vector<32x48xbf16>
    %cst_130 = arith.constant dense<0.000000e+00> : vector<64x48xf32>
    %305 = tpu.matmul %303, %304, %cst_130 {dimension_numbers = #tpu.dot_dimension_numbers<[1], [0], [0], [1], [0, 0, 1, 1], [], []>} : vector<64x32xbf16>, vector<32x48xbf16>, vector<64x48xf32> -> vector<64x48xf32>
    %306 = tpu.iota {dimensions = array<i32: 0>} : vector<32x64xi32>
    %307 = tpu.iota {dimensions = array<i32: 1>} : vector<32x64xi32>
    %c2_i32_131 = arith.constant 2 : i32
    %308 = vector.broadcast %c2_i32_131 : i32 to vector<32x64xi32>
    %309 = arith.muli %308, %306 : vector<32x64xi32>
    %c-1_i32_132 = arith.constant -1 : i32
    %310 = vector.broadcast %c-1_i32_132 : i32 to vector<32x64xi32>
    %311 = arith.addi %309, %310 : vector<32x64xi32>
    %312 = arith.cmpi eq, %307, %311 : vector<32x64xi32>
    %cst_133 = arith.constant 1.000000e+00 : f32
    %cst_134 = arith.constant 0.000000e+00 : f32
    %313 = vector.broadcast %cst_133 : f32 to vector<32x64xf32>
    %314 = vector.broadcast %cst_134 : f32 to vector<32x64xf32>
    %315 = arith.select %312, %313, %314 : vector<32x64xi1>, vector<32x64xf32>
    %316 = arith.truncf %315 : vector<32x64xf32> to vector<32x64xbf16>
    %317 = arith.truncf %305 : vector<64x48xf32> to vector<64x48xbf16>
    %cst_135 = arith.constant dense<0.000000e+00> : vector<32x48xf32>
    %318 = tpu.matmul %316, %317, %cst_135 {dimension_numbers = #tpu.dot_dimension_numbers<[1], [0], [0], [1], [0, 0, 1, 1], [], []>} : vector<32x64xbf16>, vector<64x48xbf16>, vector<32x48xf32> -> vector<32x48xf32>
    %c360 = arith.constant 360 : index
    %c0_136 = arith.constant 0 : index
    %319 = vector.load %arg2[%c360, %c0_136] : memref<3160x128xbf16, #tpu.memory_space<vmem>>, vector<32x48xbf16>
    %cst_137 = arith.constant dense<0.000000e+00> : vector<64x48xf32>
    %320 = tpu.matmul %303, %319, %cst_137 {dimension_numbers = #tpu.dot_dimension_numbers<[1], [0], [0], [1], [0, 0, 1, 1], [], []>} : vector<64x32xbf16>, vector<32x48xbf16>, vector<64x48xf32> -> vector<64x48xf32>
    %321 = tpu.iota {dimensions = array<i32: 0>} : vector<32x64xi32>
    %322 = tpu.iota {dimensions = array<i32: 1>} : vector<32x64xi32>
    %c2_i32_138 = arith.constant 2 : i32
    %323 = vector.broadcast %c2_i32_138 : i32 to vector<32x64xi32>
    %324 = arith.muli %323, %321 : vector<32x64xi32>
    %c0_i32_139 = arith.constant 0 : i32
    %325 = vector.broadcast %c0_i32_139 : i32 to vector<32x64xi32>
    %326 = arith.addi %324, %325 : vector<32x64xi32>
    %327 = arith.cmpi eq, %322, %326 : vector<32x64xi32>
    %cst_140 = arith.constant 1.000000e+00 : f32
    %cst_141 = arith.constant 0.000000e+00 : f32
    %328 = vector.broadcast %cst_140 : f32 to vector<32x64xf32>
    %329 = vector.broadcast %cst_141 : f32 to vector<32x64xf32>
    %330 = arith.select %327, %328, %329 : vector<32x64xi1>, vector<32x64xf32>
    %331 = arith.truncf %330 : vector<32x64xf32> to vector<32x64xbf16>
    %332 = arith.truncf %320 : vector<64x48xf32> to vector<64x48xbf16>
    %cst_142 = arith.constant dense<0.000000e+00> : vector<32x48xf32>
    %333 = tpu.matmul %331, %332, %cst_142 {dimension_numbers = #tpu.dot_dimension_numbers<[1], [0], [0], [1], [0, 0, 1, 1], [], []>} : vector<32x64xbf16>, vector<64x48xbf16>, vector<32x48xf32> -> vector<32x48xf32>
    %334 = arith.addf %318, %333 : vector<32x48xf32>
    %c392 = arith.constant 392 : index
    %c0_143 = arith.constant 0 : index
    %335 = vector.load %arg2[%c392, %c0_143] : memref<3160x128xbf16, #tpu.memory_space<vmem>>, vector<32x48xbf16>
    %cst_144 = arith.constant dense<0.000000e+00> : vector<64x48xf32>
    %336 = tpu.matmul %303, %335, %cst_144 {dimension_numbers = #tpu.dot_dimension_numbers<[1], [0], [0], [1], [0, 0, 1, 1], [], []>} : vector<64x32xbf16>, vector<32x48xbf16>, vector<64x48xf32> -> vector<64x48xf32>
    %337 = tpu.iota {dimensions = array<i32: 0>} : vector<32x64xi32>
    %338 = tpu.iota {dimensions = array<i32: 1>} : vector<32x64xi32>
    %c2_i32_145 = arith.constant 2 : i32
    %339 = vector.broadcast %c2_i32_145 : i32 to vector<32x64xi32>
    %340 = arith.muli %339, %337 : vector<32x64xi32>
    %c1_i32_146 = arith.constant 1 : i32
    %341 = vector.broadcast %c1_i32_146 : i32 to vector<32x64xi32>
    %342 = arith.addi %340, %341 : vector<32x64xi32>
    %343 = arith.cmpi eq, %338, %342 : vector<32x64xi32>
    %cst_147 = arith.constant 1.000000e+00 : f32
    %cst_148 = arith.constant 0.000000e+00 : f32
    %344 = vector.broadcast %cst_147 : f32 to vector<32x64xf32>
    %345 = vector.broadcast %cst_148 : f32 to vector<32x64xf32>
    %346 = arith.select %343, %344, %345 : vector<32x64xi1>, vector<32x64xf32>
    %347 = arith.truncf %346 : vector<32x64xf32> to vector<32x64xbf16>
    %348 = arith.truncf %336 : vector<64x48xf32> to vector<64x48xbf16>
    %cst_149 = arith.constant dense<0.000000e+00> : vector<32x48xf32>
    %349 = tpu.matmul %347, %348, %cst_149 {dimension_numbers = #tpu.dot_dimension_numbers<[1], [0], [0], [1], [0, 0, 1, 1], [], []>} : vector<32x64xbf16>, vector<64x48xbf16>, vector<32x48xf32> -> vector<32x48xf32>
    %350 = arith.addf %334, %349 : vector<32x48xf32>
    %c424 = arith.constant 424 : index
    %c0_150 = arith.constant 0 : index
    %351 = vector.load %arg2[%c424, %c0_150] : memref<3160x128xbf16, #tpu.memory_space<vmem>>, vector<32x48xbf16>
    %cst_151 = arith.constant dense<0.000000e+00> : vector<64x48xf32>
    %352 = tpu.matmul %303, %351, %cst_151 {dimension_numbers = #tpu.dot_dimension_numbers<[1], [0], [0], [1], [0, 0, 1, 1], [], []>} : vector<64x32xbf16>, vector<32x48xbf16>, vector<64x48xf32> -> vector<64x48xf32>
    %353 = tpu.iota {dimensions = array<i32: 0>} : vector<32x64xi32>
    %354 = tpu.iota {dimensions = array<i32: 1>} : vector<32x64xi32>
    %c2_i32_152 = arith.constant 2 : i32
    %355 = vector.broadcast %c2_i32_152 : i32 to vector<32x64xi32>
    %356 = arith.muli %355, %353 : vector<32x64xi32>
    %c2_i32_153 = arith.constant 2 : i32
    %357 = vector.broadcast %c2_i32_153 : i32 to vector<32x64xi32>
    %358 = arith.addi %356, %357 : vector<32x64xi32>
    %359 = arith.cmpi eq, %354, %358 : vector<32x64xi32>
    %cst_154 = arith.constant 1.000000e+00 : f32
    %cst_155 = arith.constant 0.000000e+00 : f32
    %360 = vector.broadcast %cst_154 : f32 to vector<32x64xf32>
    %361 = vector.broadcast %cst_155 : f32 to vector<32x64xf32>
    %362 = arith.select %359, %360, %361 : vector<32x64xi1>, vector<32x64xf32>
    %363 = arith.truncf %362 : vector<32x64xf32> to vector<32x64xbf16>
    %364 = arith.truncf %352 : vector<64x48xf32> to vector<64x48xbf16>
    %cst_156 = arith.constant dense<0.000000e+00> : vector<32x48xf32>
    %365 = tpu.matmul %363, %364, %cst_156 {dimension_numbers = #tpu.dot_dimension_numbers<[1], [0], [0], [1], [0, 0, 1, 1], [], []>} : vector<32x64xbf16>, vector<64x48xbf16>, vector<32x48xf32> -> vector<32x48xf32>
    %366 = arith.addf %350, %365 : vector<32x48xf32>
    %c14 = arith.constant 14 : index
    %c0_157 = arith.constant 0 : index
    %367 = vector.load %arg3[%c14, %c0_157] : memref<48x128xf32, #tpu.memory_space<vmem>>, vector<1x48xf32>
    %368 = vector.broadcast %367 : vector<1x48xf32> to vector<32x48xf32>
    %369 = arith.addf %366, %368 : vector<32x48xf32>
    %cst_158 = arith.constant 2.000000e+00 : f32
    %370 = vector.broadcast %cst_158 : f32 to vector<32x48xf32>
    %371 = arith.mulf %370, %369 : vector<32x48xf32>
    %cst_159 = arith.constant 3.000000e-01 : f32
    %372 = vector.broadcast %cst_159 : f32 to vector<32x48xf32>
    %373 = arith.mulf %372, %302 : vector<32x48xf32>
    %374 = arith.addf %371, %373 : vector<32x48xf32>
    %c15 = arith.constant 15 : index
    %c0_160 = arith.constant 0 : index
    %375 = vector.load %arg3[%c15, %c0_160] : memref<48x128xf32, #tpu.memory_space<vmem>>, vector<1x48xf32>
    %376 = vector.broadcast %375 : vector<1x48xf32> to vector<32x48xf32>
    %377 = arith.mulf %374, %376 : vector<32x48xf32>
    %c16_161 = arith.constant 16 : index
    %c0_162 = arith.constant 0 : index
    %378 = vector.load %arg3[%c16_161, %c0_162] : memref<48x128xf32, #tpu.memory_space<vmem>>, vector<1x48xf32>
    %379 = vector.broadcast %378 : vector<1x48xf32> to vector<32x48xf32>
    %380 = arith.addf %377, %379 : vector<32x48xf32>
    %cst_163 = arith.constant 0.000000e+00 : f32
    %381 = vector.broadcast %cst_163 : f32 to vector<32x48xf32>
    %382 = arith.maximumf %380, %381 : vector<32x48xf32>
    %383 = arith.truncf %382 : vector<32x48xf32> to vector<32x48xbf16>
    %c456 = arith.constant 456 : index
    %c0_164 = arith.constant 0 : index
    %384 = vector.load %arg2[%c456, %c0_164] : memref<3160x128xbf16, #tpu.memory_space<vmem>>, vector<48x48xbf16>
    %cst_165 = arith.constant dense<0.000000e+00> : vector<32x48xf32>
    %385 = tpu.matmul %383, %384, %cst_165 {dimension_numbers = #tpu.dot_dimension_numbers<[1], [0], [0], [1], [0, 0, 1, 1], [], []>} : vector<32x48xbf16>, vector<48x48xbf16>, vector<32x48xf32> -> vector<32x48xf32>
    %c19 = arith.constant 19 : index
    %c0_166 = arith.constant 0 : index
    %386 = vector.load %arg3[%c19, %c0_166] : memref<48x128xf32, #tpu.memory_space<vmem>>, vector<1x48xf32>
    %387 = vector.broadcast %386 : vector<1x48xf32> to vector<32x48xf32>
    %388 = arith.addf %385, %387 : vector<32x48xf32>
    %c17 = arith.constant 17 : index
    %c0_167 = arith.constant 0 : index
    %389 = vector.load %arg3[%c17, %c0_167] : memref<48x128xf32, #tpu.memory_space<vmem>>, vector<1x48xf32>
    %390 = vector.broadcast %389 : vector<1x48xf32> to vector<32x48xf32>
    %391 = arith.mulf %388, %390 : vector<32x48xf32>
    %c18 = arith.constant 18 : index
    %c0_168 = arith.constant 0 : index
    %392 = vector.load %arg3[%c18, %c0_168] : memref<48x128xf32, #tpu.memory_space<vmem>>, vector<1x48xf32>
    %393 = vector.broadcast %392 : vector<1x48xf32> to vector<32x48xf32>
    %394 = arith.addf %391, %393 : vector<32x48xf32>
    %cst_169 = arith.constant 0.000000e+00 : f32
    %395 = vector.broadcast %cst_169 : f32 to vector<32x48xf32>
    %396 = arith.maximumf %394, %395 : vector<32x48xf32>
    %397 = arith.truncf %396 : vector<32x48xf32> to vector<32x48xbf16>
    %c504 = arith.constant 504 : index
    %c0_170 = arith.constant 0 : index
    %398 = vector.load %arg2[%c504, %c0_170] : memref<3160x128xbf16, #tpu.memory_space<vmem>>, vector<48x64xbf16>
    %cst_171 = arith.constant dense<0.000000e+00> : vector<32x64xf32>
    %399 = tpu.matmul %397, %398, %cst_171 {dimension_numbers = #tpu.dot_dimension_numbers<[1], [0], [0], [1], [0, 0, 1, 1], [], []>} : vector<32x48xbf16>, vector<48x64xbf16>, vector<32x64xf32> -> vector<32x64xf32>
    %400 = tpu.iota {dimensions = array<i32: 0>} : vector<16x32xi32>
    %401 = tpu.iota {dimensions = array<i32: 1>} : vector<16x32xi32>
    %c2_i32_172 = arith.constant 2 : i32
    %402 = vector.broadcast %c2_i32_172 : i32 to vector<16x32xi32>
    %403 = arith.muli %402, %400 : vector<16x32xi32>
    %c-1_i32_173 = arith.constant -1 : i32
    %404 = vector.broadcast %c-1_i32_173 : i32 to vector<16x32xi32>
    %405 = arith.addi %403, %404 : vector<16x32xi32>
    %406 = arith.cmpi eq, %401, %405 : vector<16x32xi32>
    %cst_174 = arith.constant 1.000000e+00 : f32
    %cst_175 = arith.constant 0.000000e+00 : f32
    %407 = vector.broadcast %cst_174 : f32 to vector<16x32xf32>
    %408 = vector.broadcast %cst_175 : f32 to vector<16x32xf32>
    %409 = arith.select %406, %407, %408 : vector<16x32xi1>, vector<16x32xf32>
    %410 = arith.truncf %409 : vector<16x32xf32> to vector<16x32xbf16>
    %411 = arith.truncf %399 : vector<32x64xf32> to vector<32x64xbf16>
    %cst_176 = arith.constant dense<0.000000e+00> : vector<16x64xf32>
    %412 = tpu.matmul %410, %411, %cst_176 {dimension_numbers = #tpu.dot_dimension_numbers<[1], [0], [0], [1], [0, 0, 1, 1], [], []>} : vector<16x32xbf16>, vector<32x64xbf16>, vector<16x64xf32> -> vector<16x64xf32>
    %c552 = arith.constant 552 : index
    %c0_177 = arith.constant 0 : index
    %413 = vector.load %arg2[%c552, %c0_177] : memref<3160x128xbf16, #tpu.memory_space<vmem>>, vector<48x64xbf16>
    %cst_178 = arith.constant dense<0.000000e+00> : vector<32x64xf32>
    %414 = tpu.matmul %397, %413, %cst_178 {dimension_numbers = #tpu.dot_dimension_numbers<[1], [0], [0], [1], [0, 0, 1, 1], [], []>} : vector<32x48xbf16>, vector<48x64xbf16>, vector<32x64xf32> -> vector<32x64xf32>
    %415 = tpu.iota {dimensions = array<i32: 0>} : vector<16x32xi32>
    %416 = tpu.iota {dimensions = array<i32: 1>} : vector<16x32xi32>
    %c2_i32_179 = arith.constant 2 : i32
    %417 = vector.broadcast %c2_i32_179 : i32 to vector<16x32xi32>
    %418 = arith.muli %417, %415 : vector<16x32xi32>
    %c0_i32_180 = arith.constant 0 : i32
    %419 = vector.broadcast %c0_i32_180 : i32 to vector<16x32xi32>
    %420 = arith.addi %418, %419 : vector<16x32xi32>
    %421 = arith.cmpi eq, %416, %420 : vector<16x32xi32>
    %cst_181 = arith.constant 1.000000e+00 : f32
    %cst_182 = arith.constant 0.000000e+00 : f32
    %422 = vector.broadcast %cst_181 : f32 to vector<16x32xf32>
    %423 = vector.broadcast %cst_182 : f32 to vector<16x32xf32>
    %424 = arith.select %421, %422, %423 : vector<16x32xi1>, vector<16x32xf32>
    %425 = arith.truncf %424 : vector<16x32xf32> to vector<16x32xbf16>
    %426 = arith.truncf %414 : vector<32x64xf32> to vector<32x64xbf16>
    %cst_183 = arith.constant dense<0.000000e+00> : vector<16x64xf32>
    %427 = tpu.matmul %425, %426, %cst_183 {dimension_numbers = #tpu.dot_dimension_numbers<[1], [0], [0], [1], [0, 0, 1, 1], [], []>} : vector<16x32xbf16>, vector<32x64xbf16>, vector<16x64xf32> -> vector<16x64xf32>
    %428 = arith.addf %412, %427 : vector<16x64xf32>
    %c600 = arith.constant 600 : index
    %c0_184 = arith.constant 0 : index
    %429 = vector.load %arg2[%c600, %c0_184] : memref<3160x128xbf16, #tpu.memory_space<vmem>>, vector<48x64xbf16>
    %cst_185 = arith.constant dense<0.000000e+00> : vector<32x64xf32>
    %430 = tpu.matmul %397, %429, %cst_185 {dimension_numbers = #tpu.dot_dimension_numbers<[1], [0], [0], [1], [0, 0, 1, 1], [], []>} : vector<32x48xbf16>, vector<48x64xbf16>, vector<32x64xf32> -> vector<32x64xf32>
    %431 = tpu.iota {dimensions = array<i32: 0>} : vector<16x32xi32>
    %432 = tpu.iota {dimensions = array<i32: 1>} : vector<16x32xi32>
    %c2_i32_186 = arith.constant 2 : i32
    %433 = vector.broadcast %c2_i32_186 : i32 to vector<16x32xi32>
    %434 = arith.muli %433, %431 : vector<16x32xi32>
    %c1_i32_187 = arith.constant 1 : i32
    %435 = vector.broadcast %c1_i32_187 : i32 to vector<16x32xi32>
    %436 = arith.addi %434, %435 : vector<16x32xi32>
    %437 = arith.cmpi eq, %432, %436 : vector<16x32xi32>
    %cst_188 = arith.constant 1.000000e+00 : f32
    %cst_189 = arith.constant 0.000000e+00 : f32
    %438 = vector.broadcast %cst_188 : f32 to vector<16x32xf32>
    %439 = vector.broadcast %cst_189 : f32 to vector<16x32xf32>
    %440 = arith.select %437, %438, %439 : vector<16x32xi1>, vector<16x32xf32>
    %441 = arith.truncf %440 : vector<16x32xf32> to vector<16x32xbf16>
    %442 = arith.truncf %430 : vector<32x64xf32> to vector<32x64xbf16>
    %cst_190 = arith.constant dense<0.000000e+00> : vector<16x64xf32>
    %443 = tpu.matmul %441, %442, %cst_190 {dimension_numbers = #tpu.dot_dimension_numbers<[1], [0], [0], [1], [0, 0, 1, 1], [], []>} : vector<16x32xbf16>, vector<32x64xbf16>, vector<16x64xf32> -> vector<16x64xf32>
    %444 = arith.addf %428, %443 : vector<16x64xf32>
    %c648 = arith.constant 648 : index
    %c0_191 = arith.constant 0 : index
    %445 = vector.load %arg2[%c648, %c0_191] : memref<3160x128xbf16, #tpu.memory_space<vmem>>, vector<48x64xbf16>
    %cst_192 = arith.constant dense<0.000000e+00> : vector<32x64xf32>
    %446 = tpu.matmul %397, %445, %cst_192 {dimension_numbers = #tpu.dot_dimension_numbers<[1], [0], [0], [1], [0, 0, 1, 1], [], []>} : vector<32x48xbf16>, vector<48x64xbf16>, vector<32x64xf32> -> vector<32x64xf32>
    %447 = tpu.iota {dimensions = array<i32: 0>} : vector<16x32xi32>
    %448 = tpu.iota {dimensions = array<i32: 1>} : vector<16x32xi32>
    %c2_i32_193 = arith.constant 2 : i32
    %449 = vector.broadcast %c2_i32_193 : i32 to vector<16x32xi32>
    %450 = arith.muli %449, %447 : vector<16x32xi32>
    %c2_i32_194 = arith.constant 2 : i32
    %451 = vector.broadcast %c2_i32_194 : i32 to vector<16x32xi32>
    %452 = arith.addi %450, %451 : vector<16x32xi32>
    %453 = arith.cmpi eq, %448, %452 : vector<16x32xi32>
    %cst_195 = arith.constant 1.000000e+00 : f32
    %cst_196 = arith.constant 0.000000e+00 : f32
    %454 = vector.broadcast %cst_195 : f32 to vector<16x32xf32>
    %455 = vector.broadcast %cst_196 : f32 to vector<16x32xf32>
    %456 = arith.select %453, %454, %455 : vector<16x32xi1>, vector<16x32xf32>
    %457 = arith.truncf %456 : vector<16x32xf32> to vector<16x32xbf16>
    %458 = arith.truncf %446 : vector<32x64xf32> to vector<32x64xbf16>
    %cst_197 = arith.constant dense<0.000000e+00> : vector<16x64xf32>
    %459 = tpu.matmul %457, %458, %cst_197 {dimension_numbers = #tpu.dot_dimension_numbers<[1], [0], [0], [1], [0, 0, 1, 1], [], []>} : vector<16x32xbf16>, vector<32x64xbf16>, vector<16x64xf32> -> vector<16x64xf32>
    %460 = arith.addf %444, %459 : vector<16x64xf32>
    %c20 = arith.constant 20 : index
    %c0_198 = arith.constant 0 : index
    %461 = vector.load %arg3[%c20, %c0_198] : memref<48x128xf32, #tpu.memory_space<vmem>>, vector<1x64xf32>
    %462 = vector.broadcast %461 : vector<1x64xf32> to vector<16x64xf32>
    %463 = arith.addf %460, %462 : vector<16x64xf32>
    %464 = arith.truncf %374 : vector<32x48xf32> to vector<32x48xbf16>
    %c696 = arith.constant 696 : index
    %c0_199 = arith.constant 0 : index
    %465 = vector.load %arg2[%c696, %c0_199] : memref<3160x128xbf16, #tpu.memory_space<vmem>>, vector<48x64xbf16>
    %cst_200 = arith.constant dense<0.000000e+00> : vector<32x64xf32>
    %466 = tpu.matmul %464, %465, %cst_200 {dimension_numbers = #tpu.dot_dimension_numbers<[1], [0], [0], [1], [0, 0, 1, 1], [], []>} : vector<32x48xbf16>, vector<48x64xbf16>, vector<32x64xf32> -> vector<32x64xf32>
    %467 = tpu.iota {dimensions = array<i32: 0>} : vector<16x32xi32>
    %468 = tpu.iota {dimensions = array<i32: 1>} : vector<16x32xi32>
    %c2_i32_201 = arith.constant 2 : i32
    %469 = vector.broadcast %c2_i32_201 : i32 to vector<16x32xi32>
    %470 = arith.muli %469, %467 : vector<16x32xi32>
    %c-1_i32_202 = arith.constant -1 : i32
    %471 = vector.broadcast %c-1_i32_202 : i32 to vector<16x32xi32>
    %472 = arith.addi %470, %471 : vector<16x32xi32>
    %473 = arith.cmpi eq, %468, %472 : vector<16x32xi32>
    %cst_203 = arith.constant 1.000000e+00 : f32
    %cst_204 = arith.constant 0.000000e+00 : f32
    %474 = vector.broadcast %cst_203 : f32 to vector<16x32xf32>
    %475 = vector.broadcast %cst_204 : f32 to vector<16x32xf32>
    %476 = arith.select %473, %474, %475 : vector<16x32xi1>, vector<16x32xf32>
    %477 = arith.truncf %476 : vector<16x32xf32> to vector<16x32xbf16>
    %478 = arith.truncf %466 : vector<32x64xf32> to vector<32x64xbf16>
    %cst_205 = arith.constant dense<0.000000e+00> : vector<16x64xf32>
    %479 = tpu.matmul %477, %478, %cst_205 {dimension_numbers = #tpu.dot_dimension_numbers<[1], [0], [0], [1], [0, 0, 1, 1], [], []>} : vector<16x32xbf16>, vector<32x64xbf16>, vector<16x64xf32> -> vector<16x64xf32>
    %c744 = arith.constant 744 : index
    %c0_206 = arith.constant 0 : index
    %480 = vector.load %arg2[%c744, %c0_206] : memref<3160x128xbf16, #tpu.memory_space<vmem>>, vector<48x64xbf16>
    %cst_207 = arith.constant dense<0.000000e+00> : vector<32x64xf32>
    %481 = tpu.matmul %464, %480, %cst_207 {dimension_numbers = #tpu.dot_dimension_numbers<[1], [0], [0], [1], [0, 0, 1, 1], [], []>} : vector<32x48xbf16>, vector<48x64xbf16>, vector<32x64xf32> -> vector<32x64xf32>
    %482 = tpu.iota {dimensions = array<i32: 0>} : vector<16x32xi32>
    %483 = tpu.iota {dimensions = array<i32: 1>} : vector<16x32xi32>
    %c2_i32_208 = arith.constant 2 : i32
    %484 = vector.broadcast %c2_i32_208 : i32 to vector<16x32xi32>
    %485 = arith.muli %484, %482 : vector<16x32xi32>
    %c0_i32_209 = arith.constant 0 : i32
    %486 = vector.broadcast %c0_i32_209 : i32 to vector<16x32xi32>
    %487 = arith.addi %485, %486 : vector<16x32xi32>
    %488 = arith.cmpi eq, %483, %487 : vector<16x32xi32>
    %cst_210 = arith.constant 1.000000e+00 : f32
    %cst_211 = arith.constant 0.000000e+00 : f32
    %489 = vector.broadcast %cst_210 : f32 to vector<16x32xf32>
    %490 = vector.broadcast %cst_211 : f32 to vector<16x32xf32>
    %491 = arith.select %488, %489, %490 : vector<16x32xi1>, vector<16x32xf32>
    %492 = arith.truncf %491 : vector<16x32xf32> to vector<16x32xbf16>
    %493 = arith.truncf %481 : vector<32x64xf32> to vector<32x64xbf16>
    %cst_212 = arith.constant dense<0.000000e+00> : vector<16x64xf32>
    %494 = tpu.matmul %492, %493, %cst_212 {dimension_numbers = #tpu.dot_dimension_numbers<[1], [0], [0], [1], [0, 0, 1, 1], [], []>} : vector<16x32xbf16>, vector<32x64xbf16>, vector<16x64xf32> -> vector<16x64xf32>
    %495 = arith.addf %479, %494 : vector<16x64xf32>
    %c792 = arith.constant 792 : index
    %c0_213 = arith.constant 0 : index
    %496 = vector.load %arg2[%c792, %c0_213] : memref<3160x128xbf16, #tpu.memory_space<vmem>>, vector<48x64xbf16>
    %cst_214 = arith.constant dense<0.000000e+00> : vector<32x64xf32>
    %497 = tpu.matmul %464, %496, %cst_214 {dimension_numbers = #tpu.dot_dimension_numbers<[1], [0], [0], [1], [0, 0, 1, 1], [], []>} : vector<32x48xbf16>, vector<48x64xbf16>, vector<32x64xf32> -> vector<32x64xf32>
    %498 = tpu.iota {dimensions = array<i32: 0>} : vector<16x32xi32>
    %499 = tpu.iota {dimensions = array<i32: 1>} : vector<16x32xi32>
    %c2_i32_215 = arith.constant 2 : i32
    %500 = vector.broadcast %c2_i32_215 : i32 to vector<16x32xi32>
    %501 = arith.muli %500, %498 : vector<16x32xi32>
    %c1_i32_216 = arith.constant 1 : i32
    %502 = vector.broadcast %c1_i32_216 : i32 to vector<16x32xi32>
    %503 = arith.addi %501, %502 : vector<16x32xi32>
    %504 = arith.cmpi eq, %499, %503 : vector<16x32xi32>
    %cst_217 = arith.constant 1.000000e+00 : f32
    %cst_218 = arith.constant 0.000000e+00 : f32
    %505 = vector.broadcast %cst_217 : f32 to vector<16x32xf32>
    %506 = vector.broadcast %cst_218 : f32 to vector<16x32xf32>
    %507 = arith.select %504, %505, %506 : vector<16x32xi1>, vector<16x32xf32>
    %508 = arith.truncf %507 : vector<16x32xf32> to vector<16x32xbf16>
    %509 = arith.truncf %497 : vector<32x64xf32> to vector<32x64xbf16>
    %cst_219 = arith.constant dense<0.000000e+00> : vector<16x64xf32>
    %510 = tpu.matmul %508, %509, %cst_219 {dimension_numbers = #tpu.dot_dimension_numbers<[1], [0], [0], [1], [0, 0, 1, 1], [], []>} : vector<16x32xbf16>, vector<32x64xbf16>, vector<16x64xf32> -> vector<16x64xf32>
    %511 = arith.addf %495, %510 : vector<16x64xf32>
    %c840 = arith.constant 840 : index
    %c0_220 = arith.constant 0 : index
    %512 = vector.load %arg2[%c840, %c0_220] : memref<3160x128xbf16, #tpu.memory_space<vmem>>, vector<48x64xbf16>
    %cst_221 = arith.constant dense<0.000000e+00> : vector<32x64xf32>
    %513 = tpu.matmul %464, %512, %cst_221 {dimension_numbers = #tpu.dot_dimension_numbers<[1], [0], [0], [1], [0, 0, 1, 1], [], []>} : vector<32x48xbf16>, vector<48x64xbf16>, vector<32x64xf32> -> vector<32x64xf32>
    %514 = tpu.iota {dimensions = array<i32: 0>} : vector<16x32xi32>
    %515 = tpu.iota {dimensions = array<i32: 1>} : vector<16x32xi32>
    %c2_i32_222 = arith.constant 2 : i32
    %516 = vector.broadcast %c2_i32_222 : i32 to vector<16x32xi32>
    %517 = arith.muli %516, %514 : vector<16x32xi32>
    %c2_i32_223 = arith.constant 2 : i32
    %518 = vector.broadcast %c2_i32_223 : i32 to vector<16x32xi32>
    %519 = arith.addi %517, %518 : vector<16x32xi32>
    %520 = arith.cmpi eq, %515, %519 : vector<16x32xi32>
    %cst_224 = arith.constant 1.000000e+00 : f32
    %cst_225 = arith.constant 0.000000e+00 : f32
    %521 = vector.broadcast %cst_224 : f32 to vector<16x32xf32>
    %522 = vector.broadcast %cst_225 : f32 to vector<16x32xf32>
    %523 = arith.select %520, %521, %522 : vector<16x32xi1>, vector<16x32xf32>
    %524 = arith.truncf %523 : vector<16x32xf32> to vector<16x32xbf16>
    %525 = arith.truncf %513 : vector<32x64xf32> to vector<32x64xbf16>
    %cst_226 = arith.constant dense<0.000000e+00> : vector<16x64xf32>
    %526 = tpu.matmul %524, %525, %cst_226 {dimension_numbers = #tpu.dot_dimension_numbers<[1], [0], [0], [1], [0, 0, 1, 1], [], []>} : vector<16x32xbf16>, vector<32x64xbf16>, vector<16x64xf32> -> vector<16x64xf32>
    %527 = arith.addf %511, %526 : vector<16x64xf32>
    %c21 = arith.constant 21 : index
    %c0_227 = arith.constant 0 : index
    %528 = vector.load %arg3[%c21, %c0_227] : memref<48x128xf32, #tpu.memory_space<vmem>>, vector<1x64xf32>
    %529 = vector.broadcast %528 : vector<1x64xf32> to vector<16x64xf32>
    %530 = arith.addf %527, %529 : vector<16x64xf32>
    %cst_228 = arith.constant 2.000000e+00 : f32
    %531 = vector.broadcast %cst_228 : f32 to vector<16x64xf32>
    %532 = arith.mulf %531, %530 : vector<16x64xf32>
    %cst_229 = arith.constant 3.000000e-01 : f32
    %533 = vector.broadcast %cst_229 : f32 to vector<16x64xf32>
    %534 = arith.mulf %533, %463 : vector<16x64xf32>
    %535 = arith.addf %532, %534 : vector<16x64xf32>
    %c22 = arith.constant 22 : index
    %c0_230 = arith.constant 0 : index
    %536 = vector.load %arg3[%c22, %c0_230] : memref<48x128xf32, #tpu.memory_space<vmem>>, vector<1x64xf32>
    %537 = vector.broadcast %536 : vector<1x64xf32> to vector<16x64xf32>
    %538 = arith.mulf %535, %537 : vector<16x64xf32>
    %c23 = arith.constant 23 : index
    %c0_231 = arith.constant 0 : index
    %539 = vector.load %arg3[%c23, %c0_231] : memref<48x128xf32, #tpu.memory_space<vmem>>, vector<1x64xf32>
    %540 = vector.broadcast %539 : vector<1x64xf32> to vector<16x64xf32>
    %541 = arith.addf %538, %540 : vector<16x64xf32>
    %cst_232 = arith.constant 0.000000e+00 : f32
    %542 = vector.broadcast %cst_232 : f32 to vector<16x64xf32>
    %543 = arith.maximumf %541, %542 : vector<16x64xf32>
    %544 = arith.truncf %543 : vector<16x64xf32> to vector<16x64xbf16>
    %c888 = arith.constant 888 : index
    %c0_233 = arith.constant 0 : index
    %545 = vector.load %arg2[%c888, %c0_233] : memref<3160x128xbf16, #tpu.memory_space<vmem>>, vector<64x64xbf16>
    %cst_234 = arith.constant dense<0.000000e+00> : vector<16x64xf32>
    %546 = tpu.matmul %544, %545, %cst_234 {dimension_numbers = #tpu.dot_dimension_numbers<[1], [0], [0], [1], [0, 0, 1, 1], [], []>} : vector<16x64xbf16>, vector<64x64xbf16>, vector<16x64xf32> -> vector<16x64xf32>
    %c26 = arith.constant 26 : index
    %c0_235 = arith.constant 0 : index
    %547 = vector.load %arg3[%c26, %c0_235] : memref<48x128xf32, #tpu.memory_space<vmem>>, vector<1x64xf32>
    %548 = vector.broadcast %547 : vector<1x64xf32> to vector<16x64xf32>
    %549 = arith.addf %546, %548 : vector<16x64xf32>
    %c24_236 = arith.constant 24 : index
    %c0_237 = arith.constant 0 : index
    %550 = vector.load %arg3[%c24_236, %c0_237] : memref<48x128xf32, #tpu.memory_space<vmem>>, vector<1x64xf32>
    %551 = vector.broadcast %550 : vector<1x64xf32> to vector<16x64xf32>
    %552 = arith.mulf %549, %551 : vector<16x64xf32>
    %c25 = arith.constant 25 : index
    %c0_238 = arith.constant 0 : index
    %553 = vector.load %arg3[%c25, %c0_238] : memref<48x128xf32, #tpu.memory_space<vmem>>, vector<1x64xf32>
    %554 = vector.broadcast %553 : vector<1x64xf32> to vector<16x64xf32>
    %555 = arith.addf %552, %554 : vector<16x64xf32>
    %cst_239 = arith.constant 0.000000e+00 : f32
    %556 = vector.broadcast %cst_239 : f32 to vector<16x64xf32>
    %557 = arith.maximumf %555, %556 : vector<16x64xf32>
    %558 = arith.truncf %557 : vector<16x64xf32> to vector<16x64xbf16>
    %c952 = arith.constant 952 : index
    %c0_240 = arith.constant 0 : index
    %559 = vector.load %arg2[%c952, %c0_240] : memref<3160x128xbf16, #tpu.memory_space<vmem>>, vector<64x80xbf16>
    %cst_241 = arith.constant dense<0.000000e+00> : vector<16x80xf32>
    %560 = tpu.matmul %558, %559, %cst_241 {dimension_numbers = #tpu.dot_dimension_numbers<[1], [0], [0], [1], [0, 0, 1, 1], [], []>} : vector<16x64xbf16>, vector<64x80xbf16>, vector<16x80xf32> -> vector<16x80xf32>
    %561 = tpu.iota {dimensions = array<i32: 0>} : vector<8x16xi32>
    %562 = tpu.iota {dimensions = array<i32: 1>} : vector<8x16xi32>
    %c2_i32_242 = arith.constant 2 : i32
    %563 = vector.broadcast %c2_i32_242 : i32 to vector<8x16xi32>
    %564 = arith.muli %563, %561 : vector<8x16xi32>
    %c-1_i32_243 = arith.constant -1 : i32
    %565 = vector.broadcast %c-1_i32_243 : i32 to vector<8x16xi32>
    %566 = arith.addi %564, %565 : vector<8x16xi32>
    %567 = arith.cmpi eq, %562, %566 : vector<8x16xi32>
    %cst_244 = arith.constant 1.000000e+00 : f32
    %cst_245 = arith.constant 0.000000e+00 : f32
    %568 = vector.broadcast %cst_244 : f32 to vector<8x16xf32>
    %569 = vector.broadcast %cst_245 : f32 to vector<8x16xf32>
    %570 = arith.select %567, %568, %569 : vector<8x16xi1>, vector<8x16xf32>
    %571 = arith.truncf %570 : vector<8x16xf32> to vector<8x16xbf16>
    %572 = arith.truncf %560 : vector<16x80xf32> to vector<16x80xbf16>
    %cst_246 = arith.constant dense<0.000000e+00> : vector<8x80xf32>
    %573 = tpu.matmul %571, %572, %cst_246 {dimension_numbers = #tpu.dot_dimension_numbers<[1], [0], [0], [1], [0, 0, 1, 1], [], []>} : vector<8x16xbf16>, vector<16x80xbf16>, vector<8x80xf32> -> vector<8x80xf32>
    %c1016 = arith.constant 1016 : index
    %c0_247 = arith.constant 0 : index
    %574 = vector.load %arg2[%c1016, %c0_247] : memref<3160x128xbf16, #tpu.memory_space<vmem>>, vector<64x80xbf16>
    %cst_248 = arith.constant dense<0.000000e+00> : vector<16x80xf32>
    %575 = tpu.matmul %558, %574, %cst_248 {dimension_numbers = #tpu.dot_dimension_numbers<[1], [0], [0], [1], [0, 0, 1, 1], [], []>} : vector<16x64xbf16>, vector<64x80xbf16>, vector<16x80xf32> -> vector<16x80xf32>
    %576 = tpu.iota {dimensions = array<i32: 0>} : vector<8x16xi32>
    %577 = tpu.iota {dimensions = array<i32: 1>} : vector<8x16xi32>
    %c2_i32_249 = arith.constant 2 : i32
    %578 = vector.broadcast %c2_i32_249 : i32 to vector<8x16xi32>
    %579 = arith.muli %578, %576 : vector<8x16xi32>
    %c0_i32_250 = arith.constant 0 : i32
    %580 = vector.broadcast %c0_i32_250 : i32 to vector<8x16xi32>
    %581 = arith.addi %579, %580 : vector<8x16xi32>
    %582 = arith.cmpi eq, %577, %581 : vector<8x16xi32>
    %cst_251 = arith.constant 1.000000e+00 : f32
    %cst_252 = arith.constant 0.000000e+00 : f32
    %583 = vector.broadcast %cst_251 : f32 to vector<8x16xf32>
    %584 = vector.broadcast %cst_252 : f32 to vector<8x16xf32>
    %585 = arith.select %582, %583, %584 : vector<8x16xi1>, vector<8x16xf32>
    %586 = arith.truncf %585 : vector<8x16xf32> to vector<8x16xbf16>
    %587 = arith.truncf %575 : vector<16x80xf32> to vector<16x80xbf16>
    %cst_253 = arith.constant dense<0.000000e+00> : vector<8x80xf32>
    %588 = tpu.matmul %586, %587, %cst_253 {dimension_numbers = #tpu.dot_dimension_numbers<[1], [0], [0], [1], [0, 0, 1, 1], [], []>} : vector<8x16xbf16>, vector<16x80xbf16>, vector<8x80xf32> -> vector<8x80xf32>
    %589 = arith.addf %573, %588 : vector<8x80xf32>
    %c1080 = arith.constant 1080 : index
    %c0_254 = arith.constant 0 : index
    %590 = vector.load %arg2[%c1080, %c0_254] : memref<3160x128xbf16, #tpu.memory_space<vmem>>, vector<64x80xbf16>
    %cst_255 = arith.constant dense<0.000000e+00> : vector<16x80xf32>
    %591 = tpu.matmul %558, %590, %cst_255 {dimension_numbers = #tpu.dot_dimension_numbers<[1], [0], [0], [1], [0, 0, 1, 1], [], []>} : vector<16x64xbf16>, vector<64x80xbf16>, vector<16x80xf32> -> vector<16x80xf32>
    %592 = tpu.iota {dimensions = array<i32: 0>} : vector<8x16xi32>
    %593 = tpu.iota {dimensions = array<i32: 1>} : vector<8x16xi32>
    %c2_i32_256 = arith.constant 2 : i32
    %594 = vector.broadcast %c2_i32_256 : i32 to vector<8x16xi32>
    %595 = arith.muli %594, %592 : vector<8x16xi32>
    %c1_i32_257 = arith.constant 1 : i32
    %596 = vector.broadcast %c1_i32_257 : i32 to vector<8x16xi32>
    %597 = arith.addi %595, %596 : vector<8x16xi32>
    %598 = arith.cmpi eq, %593, %597 : vector<8x16xi32>
    %cst_258 = arith.constant 1.000000e+00 : f32
    %cst_259 = arith.constant 0.000000e+00 : f32
    %599 = vector.broadcast %cst_258 : f32 to vector<8x16xf32>
    %600 = vector.broadcast %cst_259 : f32 to vector<8x16xf32>
    %601 = arith.select %598, %599, %600 : vector<8x16xi1>, vector<8x16xf32>
    %602 = arith.truncf %601 : vector<8x16xf32> to vector<8x16xbf16>
    %603 = arith.truncf %591 : vector<16x80xf32> to vector<16x80xbf16>
    %cst_260 = arith.constant dense<0.000000e+00> : vector<8x80xf32>
    %604 = tpu.matmul %602, %603, %cst_260 {dimension_numbers = #tpu.dot_dimension_numbers<[1], [0], [0], [1], [0, 0, 1, 1], [], []>} : vector<8x16xbf16>, vector<16x80xbf16>, vector<8x80xf32> -> vector<8x80xf32>
    %605 = arith.addf %589, %604 : vector<8x80xf32>
    %c1144 = arith.constant 1144 : index
    %c0_261 = arith.constant 0 : index
    %606 = vector.load %arg2[%c1144, %c0_261] : memref<3160x128xbf16, #tpu.memory_space<vmem>>, vector<64x80xbf16>
    %cst_262 = arith.constant dense<0.000000e+00> : vector<16x80xf32>
    %607 = tpu.matmul %558, %606, %cst_262 {dimension_numbers = #tpu.dot_dimension_numbers<[1], [0], [0], [1], [0, 0, 1, 1], [], []>} : vector<16x64xbf16>, vector<64x80xbf16>, vector<16x80xf32> -> vector<16x80xf32>
    %608 = tpu.iota {dimensions = array<i32: 0>} : vector<8x16xi32>
    %609 = tpu.iota {dimensions = array<i32: 1>} : vector<8x16xi32>
    %c2_i32_263 = arith.constant 2 : i32
    %610 = vector.broadcast %c2_i32_263 : i32 to vector<8x16xi32>
    %611 = arith.muli %610, %608 : vector<8x16xi32>
    %c2_i32_264 = arith.constant 2 : i32
    %612 = vector.broadcast %c2_i32_264 : i32 to vector<8x16xi32>
    %613 = arith.addi %611, %612 : vector<8x16xi32>
    %614 = arith.cmpi eq, %609, %613 : vector<8x16xi32>
    %cst_265 = arith.constant 1.000000e+00 : f32
    %cst_266 = arith.constant 0.000000e+00 : f32
    %615 = vector.broadcast %cst_265 : f32 to vector<8x16xf32>
    %616 = vector.broadcast %cst_266 : f32 to vector<8x16xf32>
    %617 = arith.select %614, %615, %616 : vector<8x16xi1>, vector<8x16xf32>
    %618 = arith.truncf %617 : vector<8x16xf32> to vector<8x16xbf16>
    %619 = arith.truncf %607 : vector<16x80xf32> to vector<16x80xbf16>
    %cst_267 = arith.constant dense<0.000000e+00> : vector<8x80xf32>
    %620 = tpu.matmul %618, %619, %cst_267 {dimension_numbers = #tpu.dot_dimension_numbers<[1], [0], [0], [1], [0, 0, 1, 1], [], []>} : vector<8x16xbf16>, vector<16x80xbf16>, vector<8x80xf32> -> vector<8x80xf32>
    %621 = arith.addf %605, %620 : vector<8x80xf32>
    %c27 = arith.constant 27 : index
    %c0_268 = arith.constant 0 : index
    %622 = vector.load %arg3[%c27, %c0_268] : memref<48x128xf32, #tpu.memory_space<vmem>>, vector<1x80xf32>
    %623 = vector.broadcast %622 : vector<1x80xf32> to vector<8x80xf32>
    %624 = arith.addf %621, %623 : vector<8x80xf32>
    %625 = arith.truncf %535 : vector<16x64xf32> to vector<16x64xbf16>
    %c1208 = arith.constant 1208 : index
    %c0_269 = arith.constant 0 : index
    %626 = vector.load %arg2[%c1208, %c0_269] : memref<3160x128xbf16, #tpu.memory_space<vmem>>, vector<64x80xbf16>
    %cst_270 = arith.constant dense<0.000000e+00> : vector<16x80xf32>
    %627 = tpu.matmul %625, %626, %cst_270 {dimension_numbers = #tpu.dot_dimension_numbers<[1], [0], [0], [1], [0, 0, 1, 1], [], []>} : vector<16x64xbf16>, vector<64x80xbf16>, vector<16x80xf32> -> vector<16x80xf32>
    %628 = tpu.iota {dimensions = array<i32: 0>} : vector<8x16xi32>
    %629 = tpu.iota {dimensions = array<i32: 1>} : vector<8x16xi32>
    %c2_i32_271 = arith.constant 2 : i32
    %630 = vector.broadcast %c2_i32_271 : i32 to vector<8x16xi32>
    %631 = arith.muli %630, %628 : vector<8x16xi32>
    %c-1_i32_272 = arith.constant -1 : i32
    %632 = vector.broadcast %c-1_i32_272 : i32 to vector<8x16xi32>
    %633 = arith.addi %631, %632 : vector<8x16xi32>
    %634 = arith.cmpi eq, %629, %633 : vector<8x16xi32>
    %cst_273 = arith.constant 1.000000e+00 : f32
    %cst_274 = arith.constant 0.000000e+00 : f32
    %635 = vector.broadcast %cst_273 : f32 to vector<8x16xf32>
    %636 = vector.broadcast %cst_274 : f32 to vector<8x16xf32>
    %637 = arith.select %634, %635, %636 : vector<8x16xi1>, vector<8x16xf32>
    %638 = arith.truncf %637 : vector<8x16xf32> to vector<8x16xbf16>
    %639 = arith.truncf %627 : vector<16x80xf32> to vector<16x80xbf16>
    %cst_275 = arith.constant dense<0.000000e+00> : vector<8x80xf32>
    %640 = tpu.matmul %638, %639, %cst_275 {dimension_numbers = #tpu.dot_dimension_numbers<[1], [0], [0], [1], [0, 0, 1, 1], [], []>} : vector<8x16xbf16>, vector<16x80xbf16>, vector<8x80xf32> -> vector<8x80xf32>
    %c1272 = arith.constant 1272 : index
    %c0_276 = arith.constant 0 : index
    %641 = vector.load %arg2[%c1272, %c0_276] : memref<3160x128xbf16, #tpu.memory_space<vmem>>, vector<64x80xbf16>
    %cst_277 = arith.constant dense<0.000000e+00> : vector<16x80xf32>
    %642 = tpu.matmul %625, %641, %cst_277 {dimension_numbers = #tpu.dot_dimension_numbers<[1], [0], [0], [1], [0, 0, 1, 1], [], []>} : vector<16x64xbf16>, vector<64x80xbf16>, vector<16x80xf32> -> vector<16x80xf32>
    %643 = tpu.iota {dimensions = array<i32: 0>} : vector<8x16xi32>
    %644 = tpu.iota {dimensions = array<i32: 1>} : vector<8x16xi32>
    %c2_i32_278 = arith.constant 2 : i32
    %645 = vector.broadcast %c2_i32_278 : i32 to vector<8x16xi32>
    %646 = arith.muli %645, %643 : vector<8x16xi32>
    %c0_i32_279 = arith.constant 0 : i32
    %647 = vector.broadcast %c0_i32_279 : i32 to vector<8x16xi32>
    %648 = arith.addi %646, %647 : vector<8x16xi32>
    %649 = arith.cmpi eq, %644, %648 : vector<8x16xi32>
    %cst_280 = arith.constant 1.000000e+00 : f32
    %cst_281 = arith.constant 0.000000e+00 : f32
    %650 = vector.broadcast %cst_280 : f32 to vector<8x16xf32>
    %651 = vector.broadcast %cst_281 : f32 to vector<8x16xf32>
    %652 = arith.select %649, %650, %651 : vector<8x16xi1>, vector<8x16xf32>
    %653 = arith.truncf %652 : vector<8x16xf32> to vector<8x16xbf16>
    %654 = arith.truncf %642 : vector<16x80xf32> to vector<16x80xbf16>
    %cst_282 = arith.constant dense<0.000000e+00> : vector<8x80xf32>
    %655 = tpu.matmul %653, %654, %cst_282 {dimension_numbers = #tpu.dot_dimension_numbers<[1], [0], [0], [1], [0, 0, 1, 1], [], []>} : vector<8x16xbf16>, vector<16x80xbf16>, vector<8x80xf32> -> vector<8x80xf32>
    %656 = arith.addf %640, %655 : vector<8x80xf32>
    %c1336 = arith.constant 1336 : index
    %c0_283 = arith.constant 0 : index
    %657 = vector.load %arg2[%c1336, %c0_283] : memref<3160x128xbf16, #tpu.memory_space<vmem>>, vector<64x80xbf16>
    %cst_284 = arith.constant dense<0.000000e+00> : vector<16x80xf32>
    %658 = tpu.matmul %625, %657, %cst_284 {dimension_numbers = #tpu.dot_dimension_numbers<[1], [0], [0], [1], [0, 0, 1, 1], [], []>} : vector<16x64xbf16>, vector<64x80xbf16>, vector<16x80xf32> -> vector<16x80xf32>
    %659 = tpu.iota {dimensions = array<i32: 0>} : vector<8x16xi32>
    %660 = tpu.iota {dimensions = array<i32: 1>} : vector<8x16xi32>
    %c2_i32_285 = arith.constant 2 : i32
    %661 = vector.broadcast %c2_i32_285 : i32 to vector<8x16xi32>
    %662 = arith.muli %661, %659 : vector<8x16xi32>
    %c1_i32_286 = arith.constant 1 : i32
    %663 = vector.broadcast %c1_i32_286 : i32 to vector<8x16xi32>
    %664 = arith.addi %662, %663 : vector<8x16xi32>
    %665 = arith.cmpi eq, %660, %664 : vector<8x16xi32>
    %cst_287 = arith.constant 1.000000e+00 : f32
    %cst_288 = arith.constant 0.000000e+00 : f32
    %666 = vector.broadcast %cst_287 : f32 to vector<8x16xf32>
    %667 = vector.broadcast %cst_288 : f32 to vector<8x16xf32>
    %668 = arith.select %665, %666, %667 : vector<8x16xi1>, vector<8x16xf32>
    %669 = arith.truncf %668 : vector<8x16xf32> to vector<8x16xbf16>
    %670 = arith.truncf %658 : vector<16x80xf32> to vector<16x80xbf16>
    %cst_289 = arith.constant dense<0.000000e+00> : vector<8x80xf32>
    %671 = tpu.matmul %669, %670, %cst_289 {dimension_numbers = #tpu.dot_dimension_numbers<[1], [0], [0], [1], [0, 0, 1, 1], [], []>} : vector<8x16xbf16>, vector<16x80xbf16>, vector<8x80xf32> -> vector<8x80xf32>
    %672 = arith.addf %656, %671 : vector<8x80xf32>
    %c1400 = arith.constant 1400 : index
    %c0_290 = arith.constant 0 : index
    %673 = vector.load %arg2[%c1400, %c0_290] : memref<3160x128xbf16, #tpu.memory_space<vmem>>, vector<64x80xbf16>
    %cst_291 = arith.constant dense<0.000000e+00> : vector<16x80xf32>
    %674 = tpu.matmul %625, %673, %cst_291 {dimension_numbers = #tpu.dot_dimension_numbers<[1], [0], [0], [1], [0, 0, 1, 1], [], []>} : vector<16x64xbf16>, vector<64x80xbf16>, vector<16x80xf32> -> vector<16x80xf32>
    %675 = tpu.iota {dimensions = array<i32: 0>} : vector<8x16xi32>
    %676 = tpu.iota {dimensions = array<i32: 1>} : vector<8x16xi32>
    %c2_i32_292 = arith.constant 2 : i32
    %677 = vector.broadcast %c2_i32_292 : i32 to vector<8x16xi32>
    %678 = arith.muli %677, %675 : vector<8x16xi32>
    %c2_i32_293 = arith.constant 2 : i32
    %679 = vector.broadcast %c2_i32_293 : i32 to vector<8x16xi32>
    %680 = arith.addi %678, %679 : vector<8x16xi32>
    %681 = arith.cmpi eq, %676, %680 : vector<8x16xi32>
    %cst_294 = arith.constant 1.000000e+00 : f32
    %cst_295 = arith.constant 0.000000e+00 : f32
    %682 = vector.broadcast %cst_294 : f32 to vector<8x16xf32>
    %683 = vector.broadcast %cst_295 : f32 to vector<8x16xf32>
    %684 = arith.select %681, %682, %683 : vector<8x16xi1>, vector<8x16xf32>
    %685 = arith.truncf %684 : vector<8x16xf32> to vector<8x16xbf16>
    %686 = arith.truncf %674 : vector<16x80xf32> to vector<16x80xbf16>
    %cst_296 = arith.constant dense<0.000000e+00> : vector<8x80xf32>
    %687 = tpu.matmul %685, %686, %cst_296 {dimension_numbers = #tpu.dot_dimension_numbers<[1], [0], [0], [1], [0, 0, 1, 1], [], []>} : vector<8x16xbf16>, vector<16x80xbf16>, vector<8x80xf32> -> vector<8x80xf32>
    %688 = arith.addf %672, %687 : vector<8x80xf32>
    %c28 = arith.constant 28 : index
    %c0_297 = arith.constant 0 : index
    %689 = vector.load %arg3[%c28, %c0_297] : memref<48x128xf32, #tpu.memory_space<vmem>>, vector<1x80xf32>
    %690 = vector.broadcast %689 : vector<1x80xf32> to vector<8x80xf32>
    %691 = arith.addf %688, %690 : vector<8x80xf32>
    %cst_298 = arith.constant 2.000000e+00 : f32
    %692 = vector.broadcast %cst_298 : f32 to vector<8x80xf32>
    %693 = arith.mulf %692, %691 : vector<8x80xf32>
    %cst_299 = arith.constant 3.000000e-01 : f32
    %694 = vector.broadcast %cst_299 : f32 to vector<8x80xf32>
    %695 = arith.mulf %694, %624 : vector<8x80xf32>
    %696 = arith.addf %693, %695 : vector<8x80xf32>
    %c29 = arith.constant 29 : index
    %c0_300 = arith.constant 0 : index
    %697 = vector.load %arg3[%c29, %c0_300] : memref<48x128xf32, #tpu.memory_space<vmem>>, vector<1x80xf32>
    %698 = vector.broadcast %697 : vector<1x80xf32> to vector<8x80xf32>
    %699 = arith.mulf %696, %698 : vector<8x80xf32>
    %c30 = arith.constant 30 : index
    %c0_301 = arith.constant 0 : index
    %700 = vector.load %arg3[%c30, %c0_301] : memref<48x128xf32, #tpu.memory_space<vmem>>, vector<1x80xf32>
    %701 = vector.broadcast %700 : vector<1x80xf32> to vector<8x80xf32>
    %702 = arith.addf %699, %701 : vector<8x80xf32>
    %cst_302 = arith.constant 0.000000e+00 : f32
    %703 = vector.broadcast %cst_302 : f32 to vector<8x80xf32>
    %704 = arith.maximumf %702, %703 : vector<8x80xf32>
    %705 = arith.truncf %704 : vector<8x80xf32> to vector<8x80xbf16>
    %c1464 = arith.constant 1464 : index
    %c0_303 = arith.constant 0 : index
    %706 = vector.load %arg2[%c1464, %c0_303] : memref<3160x128xbf16, #tpu.memory_space<vmem>>, vector<80x80xbf16>
    %cst_304 = arith.constant dense<0.000000e+00> : vector<8x80xf32>
    %707 = tpu.matmul %705, %706, %cst_304 {dimension_numbers = #tpu.dot_dimension_numbers<[1], [0], [0], [1], [0, 0, 1, 1], [], []>} : vector<8x80xbf16>, vector<80x80xbf16>, vector<8x80xf32> -> vector<8x80xf32>
    %c33 = arith.constant 33 : index
    %c0_305 = arith.constant 0 : index
    %708 = vector.load %arg3[%c33, %c0_305] : memref<48x128xf32, #tpu.memory_space<vmem>>, vector<1x80xf32>
    %709 = vector.broadcast %708 : vector<1x80xf32> to vector<8x80xf32>
    %710 = arith.addf %707, %709 : vector<8x80xf32>
    %c31 = arith.constant 31 : index
    %c0_306 = arith.constant 0 : index
    %711 = vector.load %arg3[%c31, %c0_306] : memref<48x128xf32, #tpu.memory_space<vmem>>, vector<1x80xf32>
    %712 = vector.broadcast %711 : vector<1x80xf32> to vector<8x80xf32>
    %713 = arith.mulf %710, %712 : vector<8x80xf32>
    %c32 = arith.constant 32 : index
    %c0_307 = arith.constant 0 : index
    %714 = vector.load %arg3[%c32, %c0_307] : memref<48x128xf32, #tpu.memory_space<vmem>>, vector<1x80xf32>
    %715 = vector.broadcast %714 : vector<1x80xf32> to vector<8x80xf32>
    %716 = arith.addf %713, %715 : vector<8x80xf32>
    %cst_308 = arith.constant 0.000000e+00 : f32
    %717 = vector.broadcast %cst_308 : f32 to vector<8x80xf32>
    %718 = arith.maximumf %716, %717 : vector<8x80xf32>
    %719 = arith.truncf %718 : vector<8x80xf32> to vector<8x80xbf16>
    %c1544 = arith.constant 1544 : index
    %c0_309 = arith.constant 0 : index
    %720 = vector.load %arg2[%c1544, %c0_309] : memref<3160x128xbf16, #tpu.memory_space<vmem>>, vector<80x96xbf16>
    %cst_310 = arith.constant dense<0.000000e+00> : vector<8x96xf32>
    %721 = tpu.matmul %719, %720, %cst_310 {dimension_numbers = #tpu.dot_dimension_numbers<[1], [0], [0], [1], [0, 0, 1, 1], [], []>} : vector<8x80xbf16>, vector<80x96xbf16>, vector<8x96xf32> -> vector<8x96xf32>
    %722 = tpu.iota {dimensions = array<i32: 0>} : vector<4x8xi32>
    %723 = tpu.iota {dimensions = array<i32: 1>} : vector<4x8xi32>
    %c2_i32_311 = arith.constant 2 : i32
    %724 = vector.broadcast %c2_i32_311 : i32 to vector<4x8xi32>
    %725 = arith.muli %724, %722 : vector<4x8xi32>
    %c-1_i32_312 = arith.constant -1 : i32
    %726 = vector.broadcast %c-1_i32_312 : i32 to vector<4x8xi32>
    %727 = arith.addi %725, %726 : vector<4x8xi32>
    %728 = arith.cmpi eq, %723, %727 : vector<4x8xi32>
    %cst_313 = arith.constant 1.000000e+00 : f32
    %cst_314 = arith.constant 0.000000e+00 : f32
    %729 = vector.broadcast %cst_313 : f32 to vector<4x8xf32>
    %730 = vector.broadcast %cst_314 : f32 to vector<4x8xf32>
    %731 = arith.select %728, %729, %730 : vector<4x8xi1>, vector<4x8xf32>
    %732 = arith.truncf %731 : vector<4x8xf32> to vector<4x8xbf16>
    %733 = arith.truncf %721 : vector<8x96xf32> to vector<8x96xbf16>
    %cst_315 = arith.constant dense<0.000000e+00> : vector<4x96xf32>
    %734 = tpu.matmul %732, %733, %cst_315 {dimension_numbers = #tpu.dot_dimension_numbers<[1], [0], [0], [1], [0, 0, 1, 1], [], []>} : vector<4x8xbf16>, vector<8x96xbf16>, vector<4x96xf32> -> vector<4x96xf32>
    %c1624 = arith.constant 1624 : index
    %c0_316 = arith.constant 0 : index
    %735 = vector.load %arg2[%c1624, %c0_316] : memref<3160x128xbf16, #tpu.memory_space<vmem>>, vector<80x96xbf16>
    %cst_317 = arith.constant dense<0.000000e+00> : vector<8x96xf32>
    %736 = tpu.matmul %719, %735, %cst_317 {dimension_numbers = #tpu.dot_dimension_numbers<[1], [0], [0], [1], [0, 0, 1, 1], [], []>} : vector<8x80xbf16>, vector<80x96xbf16>, vector<8x96xf32> -> vector<8x96xf32>
    %737 = tpu.iota {dimensions = array<i32: 0>} : vector<4x8xi32>
    %738 = tpu.iota {dimensions = array<i32: 1>} : vector<4x8xi32>
    %c2_i32_318 = arith.constant 2 : i32
    %739 = vector.broadcast %c2_i32_318 : i32 to vector<4x8xi32>
    %740 = arith.muli %739, %737 : vector<4x8xi32>
    %c0_i32_319 = arith.constant 0 : i32
    %741 = vector.broadcast %c0_i32_319 : i32 to vector<4x8xi32>
    %742 = arith.addi %740, %741 : vector<4x8xi32>
    %743 = arith.cmpi eq, %738, %742 : vector<4x8xi32>
    %cst_320 = arith.constant 1.000000e+00 : f32
    %cst_321 = arith.constant 0.000000e+00 : f32
    %744 = vector.broadcast %cst_320 : f32 to vector<4x8xf32>
    %745 = vector.broadcast %cst_321 : f32 to vector<4x8xf32>
    %746 = arith.select %743, %744, %745 : vector<4x8xi1>, vector<4x8xf32>
    %747 = arith.truncf %746 : vector<4x8xf32> to vector<4x8xbf16>
    %748 = arith.truncf %736 : vector<8x96xf32> to vector<8x96xbf16>
    %cst_322 = arith.constant dense<0.000000e+00> : vector<4x96xf32>
    %749 = tpu.matmul %747, %748, %cst_322 {dimension_numbers = #tpu.dot_dimension_numbers<[1], [0], [0], [1], [0, 0, 1, 1], [], []>} : vector<4x8xbf16>, vector<8x96xbf16>, vector<4x96xf32> -> vector<4x96xf32>
    %750 = arith.addf %734, %749 : vector<4x96xf32>
    %c1704 = arith.constant 1704 : index
    %c0_323 = arith.constant 0 : index
    %751 = vector.load %arg2[%c1704, %c0_323] : memref<3160x128xbf16, #tpu.memory_space<vmem>>, vector<80x96xbf16>
    %cst_324 = arith.constant dense<0.000000e+00> : vector<8x96xf32>
    %752 = tpu.matmul %719, %751, %cst_324 {dimension_numbers = #tpu.dot_dimension_numbers<[1], [0], [0], [1], [0, 0, 1, 1], [], []>} : vector<8x80xbf16>, vector<80x96xbf16>, vector<8x96xf32> -> vector<8x96xf32>
    %753 = tpu.iota {dimensions = array<i32: 0>} : vector<4x8xi32>
    %754 = tpu.iota {dimensions = array<i32: 1>} : vector<4x8xi32>
    %c2_i32_325 = arith.constant 2 : i32
    %755 = vector.broadcast %c2_i32_325 : i32 to vector<4x8xi32>
    %756 = arith.muli %755, %753 : vector<4x8xi32>
    %c1_i32_326 = arith.constant 1 : i32
    %757 = vector.broadcast %c1_i32_326 : i32 to vector<4x8xi32>
    %758 = arith.addi %756, %757 : vector<4x8xi32>
    %759 = arith.cmpi eq, %754, %758 : vector<4x8xi32>
    %cst_327 = arith.constant 1.000000e+00 : f32
    %cst_328 = arith.constant 0.000000e+00 : f32
    %760 = vector.broadcast %cst_327 : f32 to vector<4x8xf32>
    %761 = vector.broadcast %cst_328 : f32 to vector<4x8xf32>
    %762 = arith.select %759, %760, %761 : vector<4x8xi1>, vector<4x8xf32>
    %763 = arith.truncf %762 : vector<4x8xf32> to vector<4x8xbf16>
    %764 = arith.truncf %752 : vector<8x96xf32> to vector<8x96xbf16>
    %cst_329 = arith.constant dense<0.000000e+00> : vector<4x96xf32>
    %765 = tpu.matmul %763, %764, %cst_329 {dimension_numbers = #tpu.dot_dimension_numbers<[1], [0], [0], [1], [0, 0, 1, 1], [], []>} : vector<4x8xbf16>, vector<8x96xbf16>, vector<4x96xf32> -> vector<4x96xf32>
    %766 = arith.addf %750, %765 : vector<4x96xf32>
    %c1784 = arith.constant 1784 : index
    %c0_330 = arith.constant 0 : index
    %767 = vector.load %arg2[%c1784, %c0_330] : memref<3160x128xbf16, #tpu.memory_space<vmem>>, vector<80x96xbf16>
    %cst_331 = arith.constant dense<0.000000e+00> : vector<8x96xf32>
    %768 = tpu.matmul %719, %767, %cst_331 {dimension_numbers = #tpu.dot_dimension_numbers<[1], [0], [0], [1], [0, 0, 1, 1], [], []>} : vector<8x80xbf16>, vector<80x96xbf16>, vector<8x96xf32> -> vector<8x96xf32>
    %769 = tpu.iota {dimensions = array<i32: 0>} : vector<4x8xi32>
    %770 = tpu.iota {dimensions = array<i32: 1>} : vector<4x8xi32>
    %c2_i32_332 = arith.constant 2 : i32
    %771 = vector.broadcast %c2_i32_332 : i32 to vector<4x8xi32>
    %772 = arith.muli %771, %769 : vector<4x8xi32>
    %c2_i32_333 = arith.constant 2 : i32
    %773 = vector.broadcast %c2_i32_333 : i32 to vector<4x8xi32>
    %774 = arith.addi %772, %773 : vector<4x8xi32>
    %775 = arith.cmpi eq, %770, %774 : vector<4x8xi32>
    %cst_334 = arith.constant 1.000000e+00 : f32
    %cst_335 = arith.constant 0.000000e+00 : f32
    %776 = vector.broadcast %cst_334 : f32 to vector<4x8xf32>
    %777 = vector.broadcast %cst_335 : f32 to vector<4x8xf32>
    %778 = arith.select %775, %776, %777 : vector<4x8xi1>, vector<4x8xf32>
    %779 = arith.truncf %778 : vector<4x8xf32> to vector<4x8xbf16>
    %780 = arith.truncf %768 : vector<8x96xf32> to vector<8x96xbf16>
    %cst_336 = arith.constant dense<0.000000e+00> : vector<4x96xf32>
    %781 = tpu.matmul %779, %780, %cst_336 {dimension_numbers = #tpu.dot_dimension_numbers<[1], [0], [0], [1], [0, 0, 1, 1], [], []>} : vector<4x8xbf16>, vector<8x96xbf16>, vector<4x96xf32> -> vector<4x96xf32>
    %782 = arith.addf %766, %781 : vector<4x96xf32>
    %c34 = arith.constant 34 : index
    %c0_337 = arith.constant 0 : index
    %783 = vector.load %arg3[%c34, %c0_337] : memref<48x128xf32, #tpu.memory_space<vmem>>, vector<1x96xf32>
    %784 = vector.broadcast %783 : vector<1x96xf32> to vector<4x96xf32>
    %785 = arith.addf %782, %784 : vector<4x96xf32>
    %786 = arith.truncf %696 : vector<8x80xf32> to vector<8x80xbf16>
    %c1864 = arith.constant 1864 : index
    %c0_338 = arith.constant 0 : index
    %787 = vector.load %arg2[%c1864, %c0_338] : memref<3160x128xbf16, #tpu.memory_space<vmem>>, vector<80x96xbf16>
    %cst_339 = arith.constant dense<0.000000e+00> : vector<8x96xf32>
    %788 = tpu.matmul %786, %787, %cst_339 {dimension_numbers = #tpu.dot_dimension_numbers<[1], [0], [0], [1], [0, 0, 1, 1], [], []>} : vector<8x80xbf16>, vector<80x96xbf16>, vector<8x96xf32> -> vector<8x96xf32>
    %789 = tpu.iota {dimensions = array<i32: 0>} : vector<4x8xi32>
    %790 = tpu.iota {dimensions = array<i32: 1>} : vector<4x8xi32>
    %c2_i32_340 = arith.constant 2 : i32
    %791 = vector.broadcast %c2_i32_340 : i32 to vector<4x8xi32>
    %792 = arith.muli %791, %789 : vector<4x8xi32>
    %c-1_i32_341 = arith.constant -1 : i32
    %793 = vector.broadcast %c-1_i32_341 : i32 to vector<4x8xi32>
    %794 = arith.addi %792, %793 : vector<4x8xi32>
    %795 = arith.cmpi eq, %790, %794 : vector<4x8xi32>
    %cst_342 = arith.constant 1.000000e+00 : f32
    %cst_343 = arith.constant 0.000000e+00 : f32
    %796 = vector.broadcast %cst_342 : f32 to vector<4x8xf32>
    %797 = vector.broadcast %cst_343 : f32 to vector<4x8xf32>
    %798 = arith.select %795, %796, %797 : vector<4x8xi1>, vector<4x8xf32>
    %799 = arith.truncf %798 : vector<4x8xf32> to vector<4x8xbf16>
    %800 = arith.truncf %788 : vector<8x96xf32> to vector<8x96xbf16>
    %cst_344 = arith.constant dense<0.000000e+00> : vector<4x96xf32>
    %801 = tpu.matmul %799, %800, %cst_344 {dimension_numbers = #tpu.dot_dimension_numbers<[1], [0], [0], [1], [0, 0, 1, 1], [], []>} : vector<4x8xbf16>, vector<8x96xbf16>, vector<4x96xf32> -> vector<4x96xf32>
    %c1944 = arith.constant 1944 : index
    %c0_345 = arith.constant 0 : index
    %802 = vector.load %arg2[%c1944, %c0_345] : memref<3160x128xbf16, #tpu.memory_space<vmem>>, vector<80x96xbf16>
    %cst_346 = arith.constant dense<0.000000e+00> : vector<8x96xf32>
    %803 = tpu.matmul %786, %802, %cst_346 {dimension_numbers = #tpu.dot_dimension_numbers<[1], [0], [0], [1], [0, 0, 1, 1], [], []>} : vector<8x80xbf16>, vector<80x96xbf16>, vector<8x96xf32> -> vector<8x96xf32>
    %804 = tpu.iota {dimensions = array<i32: 0>} : vector<4x8xi32>
    %805 = tpu.iota {dimensions = array<i32: 1>} : vector<4x8xi32>
    %c2_i32_347 = arith.constant 2 : i32
    %806 = vector.broadcast %c2_i32_347 : i32 to vector<4x8xi32>
    %807 = arith.muli %806, %804 : vector<4x8xi32>
    %c0_i32_348 = arith.constant 0 : i32
    %808 = vector.broadcast %c0_i32_348 : i32 to vector<4x8xi32>
    %809 = arith.addi %807, %808 : vector<4x8xi32>
    %810 = arith.cmpi eq, %805, %809 : vector<4x8xi32>
    %cst_349 = arith.constant 1.000000e+00 : f32
    %cst_350 = arith.constant 0.000000e+00 : f32
    %811 = vector.broadcast %cst_349 : f32 to vector<4x8xf32>
    %812 = vector.broadcast %cst_350 : f32 to vector<4x8xf32>
    %813 = arith.select %810, %811, %812 : vector<4x8xi1>, vector<4x8xf32>
    %814 = arith.truncf %813 : vector<4x8xf32> to vector<4x8xbf16>
    %815 = arith.truncf %803 : vector<8x96xf32> to vector<8x96xbf16>
    %cst_351 = arith.constant dense<0.000000e+00> : vector<4x96xf32>
    %816 = tpu.matmul %814, %815, %cst_351 {dimension_numbers = #tpu.dot_dimension_numbers<[1], [0], [0], [1], [0, 0, 1, 1], [], []>} : vector<4x8xbf16>, vector<8x96xbf16>, vector<4x96xf32> -> vector<4x96xf32>
    %817 = arith.addf %801, %816 : vector<4x96xf32>
    %c2024 = arith.constant 2024 : index
    %c0_352 = arith.constant 0 : index
    %818 = vector.load %arg2[%c2024, %c0_352] : memref<3160x128xbf16, #tpu.memory_space<vmem>>, vector<80x96xbf16>
    %cst_353 = arith.constant dense<0.000000e+00> : vector<8x96xf32>
    %819 = tpu.matmul %786, %818, %cst_353 {dimension_numbers = #tpu.dot_dimension_numbers<[1], [0], [0], [1], [0, 0, 1, 1], [], []>} : vector<8x80xbf16>, vector<80x96xbf16>, vector<8x96xf32> -> vector<8x96xf32>
    %820 = tpu.iota {dimensions = array<i32: 0>} : vector<4x8xi32>
    %821 = tpu.iota {dimensions = array<i32: 1>} : vector<4x8xi32>
    %c2_i32_354 = arith.constant 2 : i32
    %822 = vector.broadcast %c2_i32_354 : i32 to vector<4x8xi32>
    %823 = arith.muli %822, %820 : vector<4x8xi32>
    %c1_i32_355 = arith.constant 1 : i32
    %824 = vector.broadcast %c1_i32_355 : i32 to vector<4x8xi32>
    %825 = arith.addi %823, %824 : vector<4x8xi32>
    %826 = arith.cmpi eq, %821, %825 : vector<4x8xi32>
    %cst_356 = arith.constant 1.000000e+00 : f32
    %cst_357 = arith.constant 0.000000e+00 : f32
    %827 = vector.broadcast %cst_356 : f32 to vector<4x8xf32>
    %828 = vector.broadcast %cst_357 : f32 to vector<4x8xf32>
    %829 = arith.select %826, %827, %828 : vector<4x8xi1>, vector<4x8xf32>
    %830 = arith.truncf %829 : vector<4x8xf32> to vector<4x8xbf16>
    %831 = arith.truncf %819 : vector<8x96xf32> to vector<8x96xbf16>
    %cst_358 = arith.constant dense<0.000000e+00> : vector<4x96xf32>
    %832 = tpu.matmul %830, %831, %cst_358 {dimension_numbers = #tpu.dot_dimension_numbers<[1], [0], [0], [1], [0, 0, 1, 1], [], []>} : vector<4x8xbf16>, vector<8x96xbf16>, vector<4x96xf32> -> vector<4x96xf32>
    %833 = arith.addf %817, %832 : vector<4x96xf32>
    %c2104 = arith.constant 2104 : index
    %c0_359 = arith.constant 0 : index
    %834 = vector.load %arg2[%c2104, %c0_359] : memref<3160x128xbf16, #tpu.memory_space<vmem>>, vector<80x96xbf16>
    %cst_360 = arith.constant dense<0.000000e+00> : vector<8x96xf32>
    %835 = tpu.matmul %786, %834, %cst_360 {dimension_numbers = #tpu.dot_dimension_numbers<[1], [0], [0], [1], [0, 0, 1, 1], [], []>} : vector<8x80xbf16>, vector<80x96xbf16>, vector<8x96xf32> -> vector<8x96xf32>
    %836 = tpu.iota {dimensions = array<i32: 0>} : vector<4x8xi32>
    %837 = tpu.iota {dimensions = array<i32: 1>} : vector<4x8xi32>
    %c2_i32_361 = arith.constant 2 : i32
    %838 = vector.broadcast %c2_i32_361 : i32 to vector<4x8xi32>
    %839 = arith.muli %838, %836 : vector<4x8xi32>
    %c2_i32_362 = arith.constant 2 : i32
    %840 = vector.broadcast %c2_i32_362 : i32 to vector<4x8xi32>
    %841 = arith.addi %839, %840 : vector<4x8xi32>
    %842 = arith.cmpi eq, %837, %841 : vector<4x8xi32>
    %cst_363 = arith.constant 1.000000e+00 : f32
    %cst_364 = arith.constant 0.000000e+00 : f32
    %843 = vector.broadcast %cst_363 : f32 to vector<4x8xf32>
    %844 = vector.broadcast %cst_364 : f32 to vector<4x8xf32>
    %845 = arith.select %842, %843, %844 : vector<4x8xi1>, vector<4x8xf32>
    %846 = arith.truncf %845 : vector<4x8xf32> to vector<4x8xbf16>
    %847 = arith.truncf %835 : vector<8x96xf32> to vector<8x96xbf16>
    %cst_365 = arith.constant dense<0.000000e+00> : vector<4x96xf32>
    %848 = tpu.matmul %846, %847, %cst_365 {dimension_numbers = #tpu.dot_dimension_numbers<[1], [0], [0], [1], [0, 0, 1, 1], [], []>} : vector<4x8xbf16>, vector<8x96xbf16>, vector<4x96xf32> -> vector<4x96xf32>
    %849 = arith.addf %833, %848 : vector<4x96xf32>
    %c35 = arith.constant 35 : index
    %c0_366 = arith.constant 0 : index
    %850 = vector.load %arg3[%c35, %c0_366] : memref<48x128xf32, #tpu.memory_space<vmem>>, vector<1x96xf32>
    %851 = vector.broadcast %850 : vector<1x96xf32> to vector<4x96xf32>
    %852 = arith.addf %849, %851 : vector<4x96xf32>
    %cst_367 = arith.constant 2.000000e+00 : f32
    %853 = vector.broadcast %cst_367 : f32 to vector<4x96xf32>
    %854 = arith.mulf %853, %852 : vector<4x96xf32>
    %cst_368 = arith.constant 3.000000e-01 : f32
    %855 = vector.broadcast %cst_368 : f32 to vector<4x96xf32>
    %856 = arith.mulf %855, %785 : vector<4x96xf32>
    %857 = arith.addf %854, %856 : vector<4x96xf32>
    %c36 = arith.constant 36 : index
    %c0_369 = arith.constant 0 : index
    %858 = vector.load %arg3[%c36, %c0_369] : memref<48x128xf32, #tpu.memory_space<vmem>>, vector<1x96xf32>
    %859 = vector.broadcast %858 : vector<1x96xf32> to vector<4x96xf32>
    %860 = arith.mulf %857, %859 : vector<4x96xf32>
    %c37 = arith.constant 37 : index
    %c0_370 = arith.constant 0 : index
    %861 = vector.load %arg3[%c37, %c0_370] : memref<48x128xf32, #tpu.memory_space<vmem>>, vector<1x96xf32>
    %862 = vector.broadcast %861 : vector<1x96xf32> to vector<4x96xf32>
    %863 = arith.addf %860, %862 : vector<4x96xf32>
    %cst_371 = arith.constant 0.000000e+00 : f32
    %864 = vector.broadcast %cst_371 : f32 to vector<4x96xf32>
    %865 = arith.maximumf %863, %864 : vector<4x96xf32>
    %866 = arith.truncf %865 : vector<4x96xf32> to vector<4x96xbf16>
    %c2184 = arith.constant 2184 : index
    %c0_372 = arith.constant 0 : index
    %867 = vector.load %arg2[%c2184, %c0_372] : memref<3160x128xbf16, #tpu.memory_space<vmem>>, vector<96x96xbf16>
    %cst_373 = arith.constant dense<0.000000e+00> : vector<4x96xf32>
    %868 = tpu.matmul %866, %867, %cst_373 {dimension_numbers = #tpu.dot_dimension_numbers<[1], [0], [0], [1], [0, 0, 1, 1], [], []>} : vector<4x96xbf16>, vector<96x96xbf16>, vector<4x96xf32> -> vector<4x96xf32>
    %c40_374 = arith.constant 40 : index
    %c0_375 = arith.constant 0 : index
    %869 = vector.load %arg3[%c40_374, %c0_375] : memref<48x128xf32, #tpu.memory_space<vmem>>, vector<1x96xf32>
    %870 = vector.broadcast %869 : vector<1x96xf32> to vector<4x96xf32>
    %871 = arith.addf %868, %870 : vector<4x96xf32>
    %c38 = arith.constant 38 : index
    %c0_376 = arith.constant 0 : index
    %872 = vector.load %arg3[%c38, %c0_376] : memref<48x128xf32, #tpu.memory_space<vmem>>, vector<1x96xf32>
    %873 = vector.broadcast %872 : vector<1x96xf32> to vector<4x96xf32>
    %874 = arith.mulf %871, %873 : vector<4x96xf32>
    %c39 = arith.constant 39 : index
    %c0_377 = arith.constant 0 : index
    %875 = vector.load %arg3[%c39, %c0_377] : memref<48x128xf32, #tpu.memory_space<vmem>>, vector<1x96xf32>
    %876 = vector.broadcast %875 : vector<1x96xf32> to vector<4x96xf32>
    %877 = arith.addf %874, %876 : vector<4x96xf32>
    %cst_378 = arith.constant 0.000000e+00 : f32
    %878 = vector.broadcast %cst_378 : f32 to vector<4x96xf32>
    %879 = arith.maximumf %877, %878 : vector<4x96xf32>
    %880 = arith.truncf %879 : vector<4x96xf32> to vector<4x96xbf16>
    %c2280 = arith.constant 2280 : index
    %c0_379 = arith.constant 0 : index
    %881 = vector.load %arg2[%c2280, %c0_379] : memref<3160x128xbf16, #tpu.memory_space<vmem>>, vector<96x112xbf16>
    %cst_380 = arith.constant dense<0.000000e+00> : vector<4x112xf32>
    %882 = tpu.matmul %880, %881, %cst_380 {dimension_numbers = #tpu.dot_dimension_numbers<[1], [0], [0], [1], [0, 0, 1, 1], [], []>} : vector<4x96xbf16>, vector<96x112xbf16>, vector<4x112xf32> -> vector<4x112xf32>
    %883 = tpu.iota {dimensions = array<i32: 0>} : vector<1x4xi32>
    %884 = tpu.iota {dimensions = array<i32: 1>} : vector<1x4xi32>
    %c2_i32_381 = arith.constant 2 : i32
    %885 = vector.broadcast %c2_i32_381 : i32 to vector<1x4xi32>
    %886 = arith.muli %885, %883 : vector<1x4xi32>
    %c0_i32_382 = arith.constant 0 : i32
    %887 = vector.broadcast %c0_i32_382 : i32 to vector<1x4xi32>
    %888 = arith.addi %886, %887 : vector<1x4xi32>
    %889 = arith.cmpi eq, %884, %888 : vector<1x4xi32>
    %cst_383 = arith.constant 1.000000e+00 : f32
    %cst_384 = arith.constant 0.000000e+00 : f32
    %890 = vector.broadcast %cst_383 : f32 to vector<1x4xf32>
    %891 = vector.broadcast %cst_384 : f32 to vector<1x4xf32>
    %892 = arith.select %889, %890, %891 : vector<1x4xi1>, vector<1x4xf32>
    %893 = arith.truncf %892 : vector<1x4xf32> to vector<1x4xbf16>
    %894 = arith.truncf %882 : vector<4x112xf32> to vector<4x112xbf16>
    %cst_385 = arith.constant dense<0.000000e+00> : vector<1x112xf32>
    %895 = tpu.matmul %893, %894, %cst_385 {dimension_numbers = #tpu.dot_dimension_numbers<[1], [0], [0], [1], [0, 0, 1, 1], [], []>} : vector<1x4xbf16>, vector<4x112xbf16>, vector<1x112xf32> -> vector<1x112xf32>
    %c2376 = arith.constant 2376 : index
    %c0_386 = arith.constant 0 : index
    %896 = vector.load %arg2[%c2376, %c0_386] : memref<3160x128xbf16, #tpu.memory_space<vmem>>, vector<96x112xbf16>
    %cst_387 = arith.constant dense<0.000000e+00> : vector<4x112xf32>
    %897 = tpu.matmul %880, %896, %cst_387 {dimension_numbers = #tpu.dot_dimension_numbers<[1], [0], [0], [1], [0, 0, 1, 1], [], []>} : vector<4x96xbf16>, vector<96x112xbf16>, vector<4x112xf32> -> vector<4x112xf32>
    %898 = tpu.iota {dimensions = array<i32: 0>} : vector<1x4xi32>
    %899 = tpu.iota {dimensions = array<i32: 1>} : vector<1x4xi32>
    %c2_i32_388 = arith.constant 2 : i32
    %900 = vector.broadcast %c2_i32_388 : i32 to vector<1x4xi32>
    %901 = arith.muli %900, %898 : vector<1x4xi32>
    %c1_i32_389 = arith.constant 1 : i32
    %902 = vector.broadcast %c1_i32_389 : i32 to vector<1x4xi32>
    %903 = arith.addi %901, %902 : vector<1x4xi32>
    %904 = arith.cmpi eq, %899, %903 : vector<1x4xi32>
    %cst_390 = arith.constant 1.000000e+00 : f32
    %cst_391 = arith.constant 0.000000e+00 : f32
    %905 = vector.broadcast %cst_390 : f32 to vector<1x4xf32>
    %906 = vector.broadcast %cst_391 : f32 to vector<1x4xf32>
    %907 = arith.select %904, %905, %906 : vector<1x4xi1>, vector<1x4xf32>
    %908 = arith.truncf %907 : vector<1x4xf32> to vector<1x4xbf16>
    %909 = arith.truncf %897 : vector<4x112xf32> to vector<4x112xbf16>
    %cst_392 = arith.constant dense<0.000000e+00> : vector<1x112xf32>
    %910 = tpu.matmul %908, %909, %cst_392 {dimension_numbers = #tpu.dot_dimension_numbers<[1], [0], [0], [1], [0, 0, 1, 1], [], []>} : vector<1x4xbf16>, vector<4x112xbf16>, vector<1x112xf32> -> vector<1x112xf32>
    %911 = arith.addf %895, %910 : vector<1x112xf32>
    %c2472 = arith.constant 2472 : index
    %c0_393 = arith.constant 0 : index
    %912 = vector.load %arg2[%c2472, %c0_393] : memref<3160x128xbf16, #tpu.memory_space<vmem>>, vector<96x112xbf16>
    %cst_394 = arith.constant dense<0.000000e+00> : vector<4x112xf32>
    %913 = tpu.matmul %880, %912, %cst_394 {dimension_numbers = #tpu.dot_dimension_numbers<[1], [0], [0], [1], [0, 0, 1, 1], [], []>} : vector<4x96xbf16>, vector<96x112xbf16>, vector<4x112xf32> -> vector<4x112xf32>
    %914 = tpu.iota {dimensions = array<i32: 0>} : vector<1x4xi32>
    %915 = tpu.iota {dimensions = array<i32: 1>} : vector<1x4xi32>
    %c2_i32_395 = arith.constant 2 : i32
    %916 = vector.broadcast %c2_i32_395 : i32 to vector<1x4xi32>
    %917 = arith.muli %916, %914 : vector<1x4xi32>
    %c2_i32_396 = arith.constant 2 : i32
    %918 = vector.broadcast %c2_i32_396 : i32 to vector<1x4xi32>
    %919 = arith.addi %917, %918 : vector<1x4xi32>
    %920 = arith.cmpi eq, %915, %919 : vector<1x4xi32>
    %cst_397 = arith.constant 1.000000e+00 : f32
    %cst_398 = arith.constant 0.000000e+00 : f32
    %921 = vector.broadcast %cst_397 : f32 to vector<1x4xf32>
    %922 = vector.broadcast %cst_398 : f32 to vector<1x4xf32>
    %923 = arith.select %920, %921, %922 : vector<1x4xi1>, vector<1x4xf32>
    %924 = arith.truncf %923 : vector<1x4xf32> to vector<1x4xbf16>
    %925 = arith.truncf %913 : vector<4x112xf32> to vector<4x112xbf16>
    %cst_399 = arith.constant dense<0.000000e+00> : vector<1x112xf32>
    %926 = tpu.matmul %924, %925, %cst_399 {dimension_numbers = #tpu.dot_dimension_numbers<[1], [0], [0], [1], [0, 0, 1, 1], [], []>} : vector<1x4xbf16>, vector<4x112xbf16>, vector<1x112xf32> -> vector<1x112xf32>
    %927 = arith.addf %911, %926 : vector<1x112xf32>
    %c2568 = arith.constant 2568 : index
    %c0_400 = arith.constant 0 : index
    %928 = vector.load %arg2[%c2568, %c0_400] : memref<3160x128xbf16, #tpu.memory_space<vmem>>, vector<96x112xbf16>
    %cst_401 = arith.constant dense<0.000000e+00> : vector<4x112xf32>
    %929 = tpu.matmul %880, %928, %cst_401 {dimension_numbers = #tpu.dot_dimension_numbers<[1], [0], [0], [1], [0, 0, 1, 1], [], []>} : vector<4x96xbf16>, vector<96x112xbf16>, vector<4x112xf32> -> vector<4x112xf32>
    %930 = tpu.iota {dimensions = array<i32: 0>} : vector<1x4xi32>
    %931 = tpu.iota {dimensions = array<i32: 1>} : vector<1x4xi32>
    %c2_i32_402 = arith.constant 2 : i32
    %932 = vector.broadcast %c2_i32_402 : i32 to vector<1x4xi32>
    %933 = arith.muli %932, %930 : vector<1x4xi32>
    %c3_i32 = arith.constant 3 : i32
    %934 = vector.broadcast %c3_i32 : i32 to vector<1x4xi32>
    %935 = arith.addi %933, %934 : vector<1x4xi32>
    %936 = arith.cmpi eq, %931, %935 : vector<1x4xi32>
    %cst_403 = arith.constant 1.000000e+00 : f32
    %cst_404 = arith.constant 0.000000e+00 : f32
    %937 = vector.broadcast %cst_403 : f32 to vector<1x4xf32>
    %938 = vector.broadcast %cst_404 : f32 to vector<1x4xf32>
    %939 = arith.select %936, %937, %938 : vector<1x4xi1>, vector<1x4xf32>
    %940 = arith.truncf %939 : vector<1x4xf32> to vector<1x4xbf16>
    %941 = arith.truncf %929 : vector<4x112xf32> to vector<4x112xbf16>
    %cst_405 = arith.constant dense<0.000000e+00> : vector<1x112xf32>
    %942 = tpu.matmul %940, %941, %cst_405 {dimension_numbers = #tpu.dot_dimension_numbers<[1], [0], [0], [1], [0, 0, 1, 1], [], []>} : vector<1x4xbf16>, vector<4x112xbf16>, vector<1x112xf32> -> vector<1x112xf32>
    %943 = arith.addf %927, %942 : vector<1x112xf32>
    %c41 = arith.constant 41 : index
    %c0_406 = arith.constant 0 : index
    %944 = vector.load %arg3[%c41, %c0_406] : memref<48x128xf32, #tpu.memory_space<vmem>>, vector<1x112xf32>
    %945 = arith.addf %943, %944 : vector<1x112xf32>
    %946 = arith.truncf %857 : vector<4x96xf32> to vector<4x96xbf16>
    %c2664 = arith.constant 2664 : index
    %c0_407 = arith.constant 0 : index
    %947 = vector.load %arg2[%c2664, %c0_407] : memref<3160x128xbf16, #tpu.memory_space<vmem>>, vector<96x112xbf16>
    %cst_408 = arith.constant dense<0.000000e+00> : vector<4x112xf32>
    %948 = tpu.matmul %946, %947, %cst_408 {dimension_numbers = #tpu.dot_dimension_numbers<[1], [0], [0], [1], [0, 0, 1, 1], [], []>} : vector<4x96xbf16>, vector<96x112xbf16>, vector<4x112xf32> -> vector<4x112xf32>
    %949 = tpu.iota {dimensions = array<i32: 0>} : vector<1x4xi32>
    %950 = tpu.iota {dimensions = array<i32: 1>} : vector<1x4xi32>
    %c2_i32_409 = arith.constant 2 : i32
    %951 = vector.broadcast %c2_i32_409 : i32 to vector<1x4xi32>
    %952 = arith.muli %951, %949 : vector<1x4xi32>
    %c0_i32_410 = arith.constant 0 : i32
    %953 = vector.broadcast %c0_i32_410 : i32 to vector<1x4xi32>
    %954 = arith.addi %952, %953 : vector<1x4xi32>
    %955 = arith.cmpi eq, %950, %954 : vector<1x4xi32>
    %cst_411 = arith.constant 1.000000e+00 : f32
    %cst_412 = arith.constant 0.000000e+00 : f32
    %956 = vector.broadcast %cst_411 : f32 to vector<1x4xf32>
    %957 = vector.broadcast %cst_412 : f32 to vector<1x4xf32>
    %958 = arith.select %955, %956, %957 : vector<1x4xi1>, vector<1x4xf32>
    %959 = arith.truncf %958 : vector<1x4xf32> to vector<1x4xbf16>
    %960 = arith.truncf %948 : vector<4x112xf32> to vector<4x112xbf16>
    %cst_413 = arith.constant dense<0.000000e+00> : vector<1x112xf32>
    %961 = tpu.matmul %959, %960, %cst_413 {dimension_numbers = #tpu.dot_dimension_numbers<[1], [0], [0], [1], [0, 0, 1, 1], [], []>} : vector<1x4xbf16>, vector<4x112xbf16>, vector<1x112xf32> -> vector<1x112xf32>
    %c2760 = arith.constant 2760 : index
    %c0_414 = arith.constant 0 : index
    %962 = vector.load %arg2[%c2760, %c0_414] : memref<3160x128xbf16, #tpu.memory_space<vmem>>, vector<96x112xbf16>
    %cst_415 = arith.constant dense<0.000000e+00> : vector<4x112xf32>
    %963 = tpu.matmul %946, %962, %cst_415 {dimension_numbers = #tpu.dot_dimension_numbers<[1], [0], [0], [1], [0, 0, 1, 1], [], []>} : vector<4x96xbf16>, vector<96x112xbf16>, vector<4x112xf32> -> vector<4x112xf32>
    %964 = tpu.iota {dimensions = array<i32: 0>} : vector<1x4xi32>
    %965 = tpu.iota {dimensions = array<i32: 1>} : vector<1x4xi32>
    %c2_i32_416 = arith.constant 2 : i32
    %966 = vector.broadcast %c2_i32_416 : i32 to vector<1x4xi32>
    %967 = arith.muli %966, %964 : vector<1x4xi32>
    %c1_i32_417 = arith.constant 1 : i32
    %968 = vector.broadcast %c1_i32_417 : i32 to vector<1x4xi32>
    %969 = arith.addi %967, %968 : vector<1x4xi32>
    %970 = arith.cmpi eq, %965, %969 : vector<1x4xi32>
    %cst_418 = arith.constant 1.000000e+00 : f32
    %cst_419 = arith.constant 0.000000e+00 : f32
    %971 = vector.broadcast %cst_418 : f32 to vector<1x4xf32>
    %972 = vector.broadcast %cst_419 : f32 to vector<1x4xf32>
    %973 = arith.select %970, %971, %972 : vector<1x4xi1>, vector<1x4xf32>
    %974 = arith.truncf %973 : vector<1x4xf32> to vector<1x4xbf16>
    %975 = arith.truncf %963 : vector<4x112xf32> to vector<4x112xbf16>
    %cst_420 = arith.constant dense<0.000000e+00> : vector<1x112xf32>
    %976 = tpu.matmul %974, %975, %cst_420 {dimension_numbers = #tpu.dot_dimension_numbers<[1], [0], [0], [1], [0, 0, 1, 1], [], []>} : vector<1x4xbf16>, vector<4x112xbf16>, vector<1x112xf32> -> vector<1x112xf32>
    %977 = arith.addf %961, %976 : vector<1x112xf32>
    %c2856 = arith.constant 2856 : index
    %c0_421 = arith.constant 0 : index
    %978 = vector.load %arg2[%c2856, %c0_421] : memref<3160x128xbf16, #tpu.memory_space<vmem>>, vector<96x112xbf16>
    %cst_422 = arith.constant dense<0.000000e+00> : vector<4x112xf32>
    %979 = tpu.matmul %946, %978, %cst_422 {dimension_numbers = #tpu.dot_dimension_numbers<[1], [0], [0], [1], [0, 0, 1, 1], [], []>} : vector<4x96xbf16>, vector<96x112xbf16>, vector<4x112xf32> -> vector<4x112xf32>
    %980 = tpu.iota {dimensions = array<i32: 0>} : vector<1x4xi32>
    %981 = tpu.iota {dimensions = array<i32: 1>} : vector<1x4xi32>
    %c2_i32_423 = arith.constant 2 : i32
    %982 = vector.broadcast %c2_i32_423 : i32 to vector<1x4xi32>
    %983 = arith.muli %982, %980 : vector<1x4xi32>
    %c2_i32_424 = arith.constant 2 : i32
    %984 = vector.broadcast %c2_i32_424 : i32 to vector<1x4xi32>
    %985 = arith.addi %983, %984 : vector<1x4xi32>
    %986 = arith.cmpi eq, %981, %985 : vector<1x4xi32>
    %cst_425 = arith.constant 1.000000e+00 : f32
    %cst_426 = arith.constant 0.000000e+00 : f32
    %987 = vector.broadcast %cst_425 : f32 to vector<1x4xf32>
    %988 = vector.broadcast %cst_426 : f32 to vector<1x4xf32>
    %989 = arith.select %986, %987, %988 : vector<1x4xi1>, vector<1x4xf32>
    %990 = arith.truncf %989 : vector<1x4xf32> to vector<1x4xbf16>
    %991 = arith.truncf %979 : vector<4x112xf32> to vector<4x112xbf16>
    %cst_427 = arith.constant dense<0.000000e+00> : vector<1x112xf32>
    %992 = tpu.matmul %990, %991, %cst_427 {dimension_numbers = #tpu.dot_dimension_numbers<[1], [0], [0], [1], [0, 0, 1, 1], [], []>} : vector<1x4xbf16>, vector<4x112xbf16>, vector<1x112xf32> -> vector<1x112xf32>
    %993 = arith.addf %977, %992 : vector<1x112xf32>
    %c2952 = arith.constant 2952 : index
    %c0_428 = arith.constant 0 : index
    %994 = vector.load %arg2[%c2952, %c0_428] : memref<3160x128xbf16, #tpu.memory_space<vmem>>, vector<96x112xbf16>
    %cst_429 = arith.constant dense<0.000000e+00> : vector<4x112xf32>
    %995 = tpu.matmul %946, %994, %cst_429 {dimension_numbers = #tpu.dot_dimension_numbers<[1], [0], [0], [1], [0, 0, 1, 1], [], []>} : vector<4x96xbf16>, vector<96x112xbf16>, vector<4x112xf32> -> vector<4x112xf32>
    %996 = tpu.iota {dimensions = array<i32: 0>} : vector<1x4xi32>
    %997 = tpu.iota {dimensions = array<i32: 1>} : vector<1x4xi32>
    %c2_i32_430 = arith.constant 2 : i32
    %998 = vector.broadcast %c2_i32_430 : i32 to vector<1x4xi32>
    %999 = arith.muli %998, %996 : vector<1x4xi32>
    %c3_i32_431 = arith.constant 3 : i32
    %1000 = vector.broadcast %c3_i32_431 : i32 to vector<1x4xi32>
    %1001 = arith.addi %999, %1000 : vector<1x4xi32>
    %1002 = arith.cmpi eq, %997, %1001 : vector<1x4xi32>
    %cst_432 = arith.constant 1.000000e+00 : f32
    %cst_433 = arith.constant 0.000000e+00 : f32
    %1003 = vector.broadcast %cst_432 : f32 to vector<1x4xf32>
    %1004 = vector.broadcast %cst_433 : f32 to vector<1x4xf32>
    %1005 = arith.select %1002, %1003, %1004 : vector<1x4xi1>, vector<1x4xf32>
    %1006 = arith.truncf %1005 : vector<1x4xf32> to vector<1x4xbf16>
    %1007 = arith.truncf %995 : vector<4x112xf32> to vector<4x112xbf16>
    %cst_434 = arith.constant dense<0.000000e+00> : vector<1x112xf32>
    %1008 = tpu.matmul %1006, %1007, %cst_434 {dimension_numbers = #tpu.dot_dimension_numbers<[1], [0], [0], [1], [0, 0, 1, 1], [], []>} : vector<1x4xbf16>, vector<4x112xbf16>, vector<1x112xf32> -> vector<1x112xf32>
    %1009 = arith.addf %993, %1008 : vector<1x112xf32>
    %c42 = arith.constant 42 : index
    %c0_435 = arith.constant 0 : index
    %1010 = vector.load %arg3[%c42, %c0_435] : memref<48x128xf32, #tpu.memory_space<vmem>>, vector<1x112xf32>
    %1011 = arith.addf %1009, %1010 : vector<1x112xf32>
    %cst_436 = arith.constant 2.000000e+00 : f32
    %1012 = vector.broadcast %cst_436 : f32 to vector<1x112xf32>
    %1013 = arith.mulf %1012, %1011 : vector<1x112xf32>
    %cst_437 = arith.constant 3.000000e-01 : f32
    %1014 = vector.broadcast %cst_437 : f32 to vector<1x112xf32>
    %1015 = arith.mulf %1014, %945 : vector<1x112xf32>
    %1016 = arith.addf %1013, %1015 : vector<1x112xf32>
    %1017 = arith.truncf %1016 : vector<1x112xf32> to vector<1x112xbf16>
    %c3048 = arith.constant 3048 : index
    %c0_438 = arith.constant 0 : index
    %1018 = vector.load %arg2[%c3048, %c0_438] : memref<3160x128xbf16, #tpu.memory_space<vmem>>, vector<112x40xbf16>
    %cst_439 = arith.constant dense<0.000000e+00> : vector<1x40xf32>
    %1019 = tpu.matmul %1017, %1018, %cst_439 {dimension_numbers = #tpu.dot_dimension_numbers<[1], [0], [0], [1], [0, 0, 1, 1], [], []>} : vector<1x112xbf16>, vector<112x40xbf16>, vector<1x40xf32> -> vector<1x40xf32>
    %c43 = arith.constant 43 : index
    %c0_440 = arith.constant 0 : index
    %1020 = vector.load %arg3[%c43, %c0_440] : memref<48x128xf32, #tpu.memory_space<vmem>>, vector<1x40xf32>
    %1021 = arith.addf %1019, %1020 : vector<1x40xf32>
    %cst_441 = arith.constant 0.000000e+00 : f32
    %1022 = vector.broadcast %cst_441 : f32 to vector<1x40xf32>
    %1023 = arith.subf %1022, %1021 : vector<1x40xf32>
    %1024 = math.exp %1023 : vector<1x40xf32>
    %cst_442 = arith.constant 1.000000e+00 : f32
    %1025 = vector.broadcast %cst_442 : f32 to vector<1x40xf32>
    %1026 = arith.addf %1025, %1024 : vector<1x40xf32>
    %cst_443 = arith.constant 1.000000e+00 : f32
    %1027 = vector.broadcast %cst_443 : f32 to vector<1x40xf32>
    %1028 = arith.divf %1027, %1026 : vector<1x40xf32>
    %c0_444 = arith.constant 0 : index
    %c0_445 = arith.constant 0 : index
    %c0_446 = arith.constant 0 : index
    %1029 = vector.load %arg4[%c0_444, %c0_445, %c0_446] : memref<1x1x40xf32, #tpu.memory_space<vmem>>, vector<1x1x40xf32>
    %1030 = vector.shape_cast %1029 : vector<1x1x40xf32> to vector<1x40xf32>
    %1031 = vector.shape_cast %1028 : vector<1x40xf32> to vector<1x1x40xf32>
    tpu.vector_store %arg4[%c0_444, %c0_445, %c0_446], %1031 {strides = array<i32>} : memref<1x1x40xf32, #tpu.memory_space<vmem>>, vector<1x1x40xf32>,
    return
  }
  func.func @transform_0(%arg0: i32) -> (i32, i32, i32) {
    %c0_i32 = arith.constant 0 : i32
    %c0_i32_0 = arith.constant 0 : i32
    %c0_i32_1 = arith.constant 0 : i32
    return %arg0, %c0_i32, %c0_i32_0 : i32, i32, i32
  }
  func.func @transform_1(%arg0: i32) -> (i32, i32) {
    %c0_i32 = arith.constant 0 : i32
    %c0_i32_0 = arith.constant 0 : i32
    %c0_i32_1 = arith.constant 0 : i32
    return %c0_i32, %c0_i32_0 : i32, i32
  }
  func.func @transform_2(%arg0: i32) -> (i32, i32) {
    %c0_i32 = arith.constant 0 : i32
    %c0_i32_0 = arith.constant 0 : i32
    %c0_i32_1 = arith.constant 0 : i32
    return %c0_i32, %c0_i32_0 : i32, i32
  }
  func.func @transform_3(%arg0: i32) -> (i32, i32, i32) {
    %c0_i32 = arith.constant 0 : i32
    %c0_i32_0 = arith.constant 0 : i32
    %c0_i32_1 = arith.constant 0 : i32
    return %arg0, %c0_i32, %c0_i32_0 : i32, i32, i32
  }
}

</mosaic_0001>

<bundles_post_ra>
// kernel: forward.1
= control target key start
LH: loop header
LB: loop body
LE: loop exit
PB: predicated region body
PF: predicated region fallthrough
CT: control target
= control target key end

     0   :  { %8 = vsyncpa [#allocation3], 0  ;;  %s14925_s0 = inlined_call_operand.vmem [shape: f32[2,256,8], index: 0, kind: input, shape index: {}]   ;;  %s14926_s1 = inlined_call_operand.hbm [shape: bf16[3160,128], index: 1, kind: input, shape index: {}]   ;;  %s14927_s2 = inlined_call_operand.vmem [shape: f32[48,128], index: 2, kind: input, shape index: {}]   ;;  %s14928_s3 = inlined_call_operand.hbm [shape: f32[2,1,40], index: 3, kind: output, shape index: {}]  }
   0x1   :  { %9 = vsyncpa [#allocation4], 0 }
   0x2   :  { %11 = vsyncpa [#allocation4 + $0x1], 0  ;;  %s12666_s12 = smov 0   ;;  %s12668_s13 = smov 0  }
   0x3   :  { %s12670_s14 = smov 0   ;;  %s12672_s15 = smov 0  }
   0x4 LB: > { %s12687_s16 = sadd.s32 4294967295, %s12637_s15   ;;  %s9391_s17 = sadd.s32 4294967294, %s12637_s15   ;;  %s12637_s15 = sphi %s12672_s15, %s15185_s15   ;;  %s12633_s14 = sphi %s12670_s14, %s15184_s14   ;;  %s12629_s13 = sphi %s12668_s13, %s15183_s13   ;;  %s12625_s12 = sphi %s12666_s12, %s15182_s12  }
   0x5   : > { %s12691_s18 = sadd.s32 1, %s12637_s15   ;;  %s92_s19 = sadd.s32 1, %s12633_s14 }
   0x6   : > { %s89_s20 = ssub.s32 %s12637_s15, %s12691_s18  ;;  %p102_p0 = scmp.ne.s32.totalorder %s12633_s14, %s12629_s13 }
   0x7   : > { %p90_p1 = scmp.eq.s32.totalorder %s89_s20, 0  ;;  %p103_p2 = scmp.eq.s32.totalorder %s12687_s16, 1 }
   0x8   : > { %p108_p3 = scmp.ne.s32.totalorder %s12629_s13, %s12625_s12  ;;  %p109_p4 = scmp.eq.s32.totalorder %s9391_s17, 1 }
   0x9   : > { %s12702_s21 = scalar_select %p90_p1, %s12633_s14, %s92_s19  }
   0xa   : > { %p12704_p5 = por %p103_p2, %p102_p0  ;;  %p12708_p6 = por %p109_p4, %p108_p3 }
   0xb   : > { %p9392_p7 = scmp.ge.s32.totalorder %s12637_s15, 1  ;;  %p116_p8 = scmp.lt.s32.totalorder %s12637_s15, 3 }
   0xc   : > { %s14997_s22 = scalar_select %p12704_p5, 1, 0 }
   0xd   : > { %s14998_s23 = scalar_select %p12708_p6, 1, 0 }
   0xe   : > { %p14929_p9 = scmp.eq.s32.totalorder %s12687_s16, 0  ;;  %p12715_p10 = pnand %p9392_p7, %p116_p8 }
   0xf   : > { %s12639_s25 = smov [#allocation2]   ;;  %s12543_s30 = scalar_lea.hbm %s14926_s1, 25280 }
  0x10   : > { %s14999_s24 = scalar_select %p12715_p10, 1, 0 }
  0x11   : > { %s128_s26 = sshll.u32 %s12639_s25, 4  ;;  %p12294_p11 = pneg %p12715_p10  ;;  %s129_s26 = int_to_ptr.vmem [resolvable:$true] %s128_s26 }
  0x12   : > { %p12544_p13 = scmp.ne.s32.totalorder %s14926_s1, %s12543_s30  ;;  %p12550_p3 = scmp.lt.u32.totalorder %s12543_s30, %s14926_s1 }
  0x13   : > { %p12723_p12 = pnand %p14929_p9, %p12294_p11 }
  0x15   : > { %p12545_p0 = pneg %p12723_p12 }
  0x17   : > { %p12546_p1 = pnand %p12545_p0, %p12544_p13 }
  0x19   : > { %p12547_p2 = pneg %p12546_p1 }
  0x1b   : > { %p12552_p4 = pnand %p12550_p3, %p12547_p2 }
  0x1d   : > { %12555 = shalt.err (!%p12552_p4)
}
  0x1e   : > { %s12556_s8 = scalar_lea.vmem %s129_s26, 25280  ;;  %p12564_p9 = scmp.lt.s32.totalorder %s129_s26, %s129_s26 }
  0x1f   : > { %p12557_p7 = scmp.ne.s32.totalorder %s129_s26, %s12556_s8  ;;  %p12565_p6 = scmp.lt.s32.totalorder %s12556_s8, %s12556_s8 }
  0x21   : > { %p12559_p8 = pnand %p12557_p7, %p12545_p0  ;;  %p12566_p5 = por %p12565_p6, %p12564_p9 }
  0x23   : > { %p12560_p11 = pneg %p12559_p8 }
  0x25   : > { %p12567_p10 = pnand %p12566_p5, %p12560_p11 }
  0x27   : > { %12570 = shalt.err (!%p12567_p10)
}
  0x28   : > { %s12640_s9 = smov 64   ;;  %s12641_s10 = smov 4  }
  0x29   : > { %12297 = dma.hbm_to_vmem [thread:$0]  (!%p12723_p12), %s14926_s1, 25280, %s129_s26, [#allocation3], %s12640_s9, %s12640_s9, %s12641_s10  }
  0x2a   : > { %p15001_p13 = scmp.ne.s32.totalorder %s14999_s24, 0 }
  0x2c   : > { %155 = sbr.rel (%p15001_p13) target bundleno = 9782 (0x2636), region = 32 }
  0x33   : > { %p15002_p1 = scmp.eq.s32.totalorder %s12687_s16, 0 }
  0x35   : > { %12616 = dma.done.wait (%p15002_p1), [#allocation3], 25280   ;;  %p15003_p0 = pmov %p15002_p1 }
  0x36   : > { %p178_p5 = scmp.lt.s32.totalorder %s12687_s16, 1  ;;  %vm14951_vm0 = vcmask 1043456   ;;  %v232_v0 = vld [vmem:[#allocation2] sm:$0xf]  ;;  %v595_v1 = vld [vmem:[#allocation2 + $0x4] sm:$0xf]  ;;  %v447_v52 = vlaneseq }
  0x37   : > { %12618 = vsyncadd (%p15003_p0), [#allocation3], 4294942016  ;;  %12285 = vmatprep.subr.msk.bf16.mxu0 %vm14951_vm0, %v232_v0  ;;  %12286 = vmatprep.subr.msk.bf16.mxu1 %vm14951_vm0, %v595_v1  ;;  %v284_v3 = vsel %vm14951_vm0, %v232_v0, 0  ;;  %v597_v4 = vsel %vm14951_vm0, %v595_v1, 0  ;;  %vm14954_vm1 = vcmask 64512   ;;  %s176_s27 = sand.u32 1, %s12629_s13  }
  0x38   : > { %s179_s19 = scalar_select %p178_p5, %s12687_s16, 1  ;;  %10860 = vmatpush3.bf16.msra.mxu0 %v284_v3  ;;  %10894 = vmatpush3.bf16.msra.mxu1 %v597_v4  ;;  %v12888_v53 = vshrl.u32 %v447_v52, 7  ;;  %v12891_v55 = vand.u32 127, %v447_v52  ;;  %v14934_v61 = vmov 1.0|1.0   ;;  %v14932_v4 = vmov 0.0  }
  0x39   : > { %s177_s24 = scalar_lea.vmem [#allocation5], %s176_s27  ;;  %s9312_s5 = scalar_lea.sflag [#allocation4], %s176_s27 }
  0x3a   : > { %s10049_s20 = sshll.u32 %s179_s19, 8  ;;  %v449_v54 = vadd.s32 8, %v12888_v53  ;;  %v12894_v56 = vmul.u32 2, %v12888_v53  ;;  %v12899_v58 = vadd.s32 128, %v12891_v55  ;;  %v450_v62 = vadd.s32 16, %v12888_v53  ;;  %s9324_s26 = sshll.u32 %s177_s24, 4  ;;  %s14885_s26 = int_to_ptr.vmem [resolvable:$true] %s9324_s26 }
  0x3b   : > { %s12754_s28 = scalar_lea.vmem %s14925_s0, %s10049_s20  ;;  %v451_v63 = vadd.s32 24, %v12888_v53  ;;  %s12571_s6 = scalar_lea.vmem %s14885_s26, 16 }
  0x3c   : > { %v184_v2 = vld [vmem:[%s12754_s28] sm:$0xff]  ;;  %v185_v5 = vld [vmem:[%s12754_s28 + $0x8] sm:$0xff]  ;;  %v186_v6 = vld [vmem:[%s12754_s28 + $0x10] sm:$0xff]  ;;  %v12896_v57 = vmul.u32 2, %v449_v54  ;;  %v12902_v59 = vadd.s32 4294967295, %v12894_v56  ;;  %vm761_vm2 = vcmp.eq.s32.totalorder %v12899_v58, %v12894_v56  ;;  %v12919_v0 = vmul.u32 2, %v450_v62  ;;  %p12572_p6 = scmp.ne.s32.totalorder %s14885_s26, %s12571_s6 }
  0x3d   : > { %v187_v7 = vld [vmem:[%s12754_s28 + $0x18] sm:$0xff]  ;;  %v12764_v8 = vpack.c.bf16 %v185_v5, %v184_v2  ;;  %v188_v10 = vld [vmem:[%s12754_s28 + $0x20] sm:$0xff]  ;;  %v189_v11 = vld [vmem:[%s12754_s28 + $0x28] sm:$0xff]  ;;  %v12921_v1 = vmul.u32 2, %v451_v63  ;;  %vm14950_vm12 = vcmp.eq.s32.totalorder %v12891_v55, %v12894_v56  ;;  %p15180_p9 = scmp.ne.s32.totalorder %s14997_s22, 0 }
  0x3e   : > { %v12766_v9 = vpack.c.bf16 %v187_v7, %v186_v6  ;;  %v12770_v12 = vpack.c.bf16 %v189_v11, %v188_v10  ;;  %v190_v13 = vld [vmem:[%s12754_s28 + $0x30] sm:$0xff]  ;;  %v191_v14 = vld [vmem:[%s12754_s28 + $0x38] sm:$0xff]  ;;  %v192_v15 = vld [vmem:[%s12754_s28 + $0x40] sm:$0xff]  ;;  %15015 = vst [vmem:[#allocation19_spill] sm:$0xff] %v12902_v59  ;;  %v12905_v60 = vadd.s32 4294967295, %v12896_v57  ;;  %vm763_vm3 = vcmp.eq.s32.totalorder %v12899_v58, %v12896_v57 }
  0x3f   : > { %10861 = vmatprep.mubr.msk.bf16.mxu0 %vm14954_vm1, %v12764_v8  ;;  %10895 = vmatprep.mubr.msk.bf16.mxu1 %vm14954_vm1, %v12764_v8  ;;  %v193_v16 = vld [vmem:[%s12754_s28 + $0x48] sm:$0xff]  ;;  %v12788_v17 = vpack.c.bf16 %v191_v14, %v190_v13  ;;  %v194_v19 = vld [vmem:[%s12754_s28 + $0x50] sm:$0xff]  ;;  %v195_v20 = vld [vmem:[%s12754_s28 + $0x58] sm:$0xff]  ;;  %vm500_vm5 = vcmp.eq.s32.totalorder %v12899_v58, %v12902_v59  ;;  %15017 = vst [vmem:[#allocation21_spill] sm:$0xff] %v12921_v1  ;;  %v12924_v2 = vadd.s32 4294967295, %v12919_v0  ;;  %v12927_v3 = vadd.s32 4294967295, %v12921_v1  ;;  %p12573_p10 = pnand %p12572_p6, %p15180_p9 }
  0x40   : > { %10862 = vmatmul.mubr.msk.bf16.vlgmr.msra.gmra.mrb[0].mxu0 %vm14954_vm1, %v12766_v9  ;;  %10896 = vmatmul.mubr.msk.bf16.vlgmr.msra.gmra.mrb[0].mxu1 %vm14954_vm1, %v12766_v9  ;;  %v12790_v18 = vpack.c.bf16 %v193_v16, %v192_v15  ;;  %v196_v21 = vld [vmem:[%s12754_s28 + $0x60] sm:$0xff]  ;;  %v197_v22 = vld [vmem:[%s12754_s28 + $0x68] sm:$0xff]  ;;  %v12804_v23 = vpack.c.bf16 %v195_v20, %v194_v19  ;;  %v198_v25 = vld [vmem:[%s12754_s28 + $0x70] sm:$0xff]  ;;  %15016 = vst [vmem:[#allocation20_spill] sm:$0xff] %v12905_v60 }
  0x41   : > { %10865 = vmatprep.mubr.msk.bf16.mxu0 %vm14954_vm1, %v12770_v12  ;;  %10899 = vmatprep.mubr.msk.bf16.mxu1 %vm14954_vm1, %v12770_v12  ;;  %v12806_v24 = vpack.c.bf16 %v197_v22, %v196_v21  ;;  %v199_v26 = vld [vmem:[%s12754_s28 + $0x78] sm:$0xff]  ;;  %v200_v27 = vld [vmem:[%s12754_s28 + $0x80] sm:$0xff]  ;;  %v201_v28 = vld [vmem:[%s12754_s28 + $0x88] sm:$0xff]  ;;  %vm502_vm6 = vcmp.eq.s32.totalorder %v12899_v58, %v12905_v60  ;;  %vm764_vm8 = vcmp.eq.s32.totalorder %v12891_v55, %v12919_v0  ;;  %p12574_p12 = pneg %p12573_p10 }
  0x42   : > { %15004 = vst [vmem:[#allocation8_spill] sm:$0xff] %v12804_v23  ;;  %v12820_v29 = vpack.c.bf16 %v199_v26, %v198_v25  ;;  %v12822_v30 = vpack.c.bf16 %v201_v28, %v200_v27  ;;  %v202_v31 = vld [vmem:[%s12754_s28 + $0x90] sm:$0xff]  ;;  %v203_v32 = vld [vmem:[%s12754_s28 + $0x98] sm:$0xff]  ;;  %v204_v33 = vld [vmem:[%s12754_s28 + $0xa0] sm:$0xff]  ;;  %vm766_vm9 = vcmp.eq.s32.totalorder %v12891_v55, %v12921_v1  ;;  %v796_v5 = vsel %vm764_vm8, 1.0, %v14932_v4 }
  0x43   : > { %15005 = vst [vmem:[#allocation9_spill] sm:$0xff] %v12806_v24  ;;  %v205_v34 = vld [vmem:[%s12754_s28 + $0xa8] sm:$0xff]  ;;  %v12836_v35 = vpack.c.bf16 %v203_v32, %v202_v31  ;;  %v206_v37 = vld [vmem:[%s12754_s28 + $0xb0] sm:$0xff]  ;;  %v207_v38 = vld [vmem:[%s12754_s28 + $0xb8] sm:$0xff]  ;;  %v798_v6 = vsel %vm766_vm9, 1.0, %v14932_v4  ;;  %vm503_vm10 = vcmp.eq.s32.totalorder %v12891_v55, %v12924_v2  ;;  %vm505_vm11 = vcmp.eq.s32.totalorder %v12891_v55, %v12927_v3 }
  0x44   : > { %15006 = vst [vmem:[#allocation10_spill] sm:$0xff] %v12820_v29  ;;  %15007 = vst [vmem:[#allocation11_spill] sm:$0xff] %v12822_v30  ;;  %v12838_v36 = vpack.c.bf16 %v205_v34, %v204_v33  ;;  %v208_v39 = vld [vmem:[%s12754_s28 + $0xc0] sm:$0xff]  ;;  %v209_v40 = vld [vmem:[%s12754_s28 + $0xc8] sm:$0xff]  ;;  %v12852_v41 = vpack.c.bf16 %v207_v38, %v206_v37  ;;  %v12941_v7 = vpack.c.bf16 %v798_v6, %v796_v5  ;;  %v535_v10 = vsel %vm503_vm10, 1.0, %v14932_v4 }
  0x45   : > { %15008 = vst [vmem:[#allocation12_spill] sm:$0xff] %v12836_v35  ;;  %v12854_v42 = vpack.c.bf16 %v209_v40, %v208_v39  ;;  %v210_v43 = vld [vmem:[%s12754_s28 + $0xd0] sm:$0xff]  ;;  %v211_v44 = vld [vmem:[%s12754_s28 + $0xd8] sm:$0xff]  ;;  %v212_v45 = vld [vmem:[%s12754_s28 + $0xe0] sm:$0xff]  ;;  %v537_v11 = vsel %vm505_vm11, 1.0, %v14932_v4  ;;  %vm14949_vm13 = vcmp.eq.s32.totalorder %v12891_v55, %v12896_v57  ;;  %vm14953_vm14 = vcmp.eq.s32.totalorder %v12891_v55, %v12902_v59 }
  0x46   : > { %15009 = vst [vmem:[#allocation13_spill] sm:$0xff] %v12838_v36  ;;  %15010 = vst [vmem:[#allocation14_spill] sm:$0xff] %v12852_v41  ;;  %v213_v46 = vld [vmem:[%s12754_s28 + $0xe8] sm:$0xff]  ;;  %v12868_v47 = vpack.c.bf16 %v211_v44, %v210_v43  ;;  %v214_v49 = vld [vmem:[%s12754_s28 + $0xf0] sm:$0xff]  ;;  %v12955_v13 = vpack.c.bf16 %v537_v11, %v535_v10  ;;  %vm14952_vm15 = vcmp.eq.s32.totalorder %v12891_v55, %v12905_v60 }
  0x47   : > { %15011 = vst [vmem:[#allocation15_spill] sm:$0xff] %v12854_v42  ;;  %v12870_v48 = vpack.c.bf16 %v213_v46, %v212_v45  ;;  %v215_v50 = vld [vmem:[%s12754_s28 + $0xf8] sm:$0xff]  ;;  %vm9431_vm4 = vmpackc.low %vm763_vm3, %vm761_vm2  ;;  %vm765_vm2 = vcmp.eq.s32.totalorder %v12899_v58, %v12919_v0  ;;  %vm767_vm3 = vcmp.eq.s32.totalorder %v12899_v58, %v12921_v1  ;;  %s10046_s28 = sshll.u32 %s12687_s16, 4  ;;  %s12645_s16 = smov [#allocation5]  }
  0x48   : > { %10866 = vmatmul.mubr.msk.bf16.gmra.mrb[4].mxu0 %vm14954_vm1, %v12788_v17  ;;  %10900 = vmatmul.mubr.msk.bf16.gmra.mrb[4].mxu1 %vm14954_vm1, %v12788_v17  ;;  %15012 = vst [vmem:[#allocation16_spill] sm:$0xff] %v12868_v47  ;;  %v12882_v51 = vpack.c.bf16 %v215_v50, %v214_v49  ;;  %vm9463_vm7 = vmpackc.low %vm502_vm6, %vm500_vm5  ;;  %vm504_vm5 = vcmp.eq.s32.totalorder %v12899_v58, %v12924_v2  ;;  %v15044_v2 = vmov 0  ;;  %s14883_s4 = scalar_lea.hbm %s14928_s3, %s10046_s28  ;;  %s12575_s7 = sshll.u32 %s12645_s16, 4  ;;  %s12576_s7 = int_to_ptr.vmem [resolvable:$false] %s12575_s7 }
  0x49   : > { %10869 = vmatprep.mubr.msk.bf16.mxu0 %vm14954_vm1, %v12790_v18  ;;  %10903 = vmatprep.mubr.msk.bf16.mxu1 %vm14954_vm1, %v12790_v18  ;;  %15013 = vst [vmem:[#allocation17_spill] sm:$0xff] %v12870_v48  ;;  %15018 = vst [vmem:[#allocation22_spill] sm:$0xff] %v12941_v7  ;;  %vm506_vm6 = vcmp.eq.s32.totalorder %v12899_v58, %v12927_v3  ;;  %s12577_s8 = scalar_lea.vmem %s12576_s7, 32  ;;  %p12578_p2 = scmp.lt.s32.totalorder %s14885_s26, %s12576_s7 }
  0x4a   : > { %15014 = vst [vmem:[#allocation18_spill] sm:$0xff] %v12882_v51  ;;  %15019 = vst [vmem:[#allocation23_spill] sm:$0xff] %v12955_v13  ;;  %p12579_p3 = scmp.lt.s32.totalorder %s12577_s8, %s12571_s6 }
  0x4c   : > { %p12580_p4 = por %p12579_p3, %p12578_p2 }
  0x4e   : > { %p12581_p7 = pnand %p12580_p4, %p12574_p12 }
  0x50   : > { %10870 = vmatmul.mubr.msk.bf16.gmra.mrb[8].mxu0 %vm14954_vm1, %v12804_v23  ;;  %10904 = vmatmul.mubr.msk.bf16.gmra.mrb[8].mxu1 %vm14954_vm1, %v12804_v23 }
  0x51   : > { %10873 = vmatprep.mubr.msk.bf16.mxu0 %vm14954_vm1, %v12806_v24  ;;  %10907 = vmatprep.mubr.msk.bf16.mxu1 %vm14954_vm1, %v12806_v24 }
  0x58   : > { %10874 = vmatmul.mubr.msk.bf16.gmra.mrb[12].mxu0 %vm14954_vm1, %v12820_v29  ;;  %10908 = vmatmul.mubr.msk.bf16.gmra.mrb[12].mxu1 %vm14954_vm1, %v12820_v29 }
  0x59   : > { %10877 = vmatprep.mubr.msk.bf16.mxu0 %vm14954_vm1, %v12822_v30  ;;  %10911 = vmatprep.mubr.msk.bf16.mxu1 %vm14954_vm1, %v12822_v30 }
  0x60   : > { %10878 = vmatmul.mubr.msk.bf16.gmra.mrb[16].mxu0 %vm14954_vm1, %v12836_v35  ;;  %10912 = vmatmul.mubr.msk.bf16.gmra.mrb[16].mxu1 %vm14954_vm1, %v12836_v35 }
  0x61   : > { %10881 = vmatprep.mubr.msk.bf16.mxu0 %vm14954_vm1, %v12838_v36  ;;  %10915 = vmatprep.mubr.msk.bf16.mxu1 %vm14954_vm1, %v12838_v36 }
  0x68   : > { %10882 = vmatmul.mubr.msk.bf16.gmra.mrb[20].mxu0 %vm14954_vm1, %v12852_v41  ;;  %10916 = vmatmul.mubr.msk.bf16.gmra.mrb[20].mxu1 %vm14954_vm1, %v12852_v41 }
  0x69   : > { %10885 = vmatprep.mubr.msk.bf16.mxu0 %vm14954_vm1, %v12854_v42  ;;  %10919 = vmatprep.mubr.msk.bf16.mxu1 %vm14954_vm1, %v12854_v42 }
  0x70   : > { %10886 = vmatmul.mubr.msk.bf16.gmra.mrb[24].mxu0 %vm14954_vm1, %v12868_v47  ;;  %10920 = vmatmul.mubr.msk.bf16.gmra.mrb[24].mxu1 %vm14954_vm1, %v12868_v47 }
  0x71   : > { %10889 = vmatprep.mubr.msk.bf16.mxu0 %vm14954_vm1, %v12870_v48  ;;  %10923 = vmatprep.mubr.msk.bf16.mxu1 %vm14954_vm1, %v12870_v48 }
  0x78   : > { %10890 = vmatmul.mubr.msk.bf16.gmra.mrb[28].mxu0 %vm14954_vm1, %v12882_v51  ;;  %10924 = vmatmul.mubr.msk.bf16.gmra.mrb[28].mxu1 %vm14954_vm1, %v12882_v51 }
  0x79   : > { %9432 = vmatprep.mubr.msk.bf16.mxu0 %vm9431_vm4, %v14934_v61  ;;  %9464 = vmatprep.mubr.msk.bf16.mxu1 %vm9463_vm7, %v14934_v61  ;;  %vm13090_vm4 = vmpackc.low %vm14949_vm13, %vm14950_vm12 }
  0x7a   : > { %vm13106_vm7 = vmpackc.low %vm14952_vm15, %vm14953_vm14 }
  0x7b   : > { %vm9435_vm13 = vmpackc.low %vm767_vm3, %vm765_vm2 }
  0x7c   : > { %vm9467_vm12 = vmpackc.low %vm506_vm6, %vm504_vm5 }
  0x7d   : > { %vm13140_vm5 = vmpackc.low %vm766_vm9, %vm764_vm8 }
  0x7e   : > { %vm13156_vm6 = vmpackc.low %vm505_vm11, %vm503_vm10 }
 0x113   : > { %v12957_v14 = vpop.f32.mrb[0].mxu1  ;;  %v12959_v15 = vpop.f32.mrb[0].mxu0 }
 0x114   : > { %v633_v16 = vpop.f32.mrb[1].mxu1  ;;  %v320_v19 = vpop.f32.mrb[1].mxu0 }
 0x115   : > { %v12961_v20 = vpop.f32.mrb[2].mxu1  ;;  %v12963_v21 = vpop.f32.mrb[2].mxu0 }
 0x116   : > { %v636_v25 = vpop.f32.mrb[3].mxu1  ;;  %v323_v27 = vpop.f32.mrb[3].mxu0 }
 0x117   : > { %v840_v28 = vpack.c.bf16 %v636_v25, %v633_v16  ;;  %v579_v31 = vpack.c.bf16 %v323_v27, %v320_v19 }
 0x11b   : > { %v12969_v32 = vpop.f32.mrb[4].mxu1  ;;  %v12971_v33 = vpop.f32.mrb[4].mxu0 }
 0x11c   : > { %v12973_v34 = vpop.f32.mrb[5].mxu1  ;;  %v12975_v37 = vpop.f32.mrb[5].mxu0 }
 0x11d   : > { %v12977_v38 = vpop.f32.mrb[6].mxu1  ;;  %v12979_v39 = vpop.f32.mrb[6].mxu0 }
 0x11e   : > { %v12983_v43 = vpop.f32.mrb[7].mxu1  ;;  %v339_v45 = vpop.f32.mrb[7].mxu0 }
 0x11f   : > { %v842_v46 = vpack.c.bf16 %v12983_v43, %v12973_v34  ;;  %v581_v49 = vpack.c.bf16 %v339_v45, %v12975_v37 }
 0x123   : > { %v12990_v50 = vpop.f32.mrb[8].mxu1  ;;  %v12992_v52 = vpop.f32.mrb[8].mxu0 }
 0x124   : > { %v12994_v54 = vpop.f32.mrb[9].mxu1  ;;  %v12996_v62 = vpop.f32.mrb[9].mxu0 }
 0x125   : > { %v12998_v63 = vpop.f32.mrb[10].mxu1  ;;  %v13000_v5 = vpop.f32.mrb[10].mxu0 }
 0x126   : > { %v13004_v10 = vpop.f32.mrb[11].mxu1  ;;  %v13008_v16 = vpop.f32.mrb[11].mxu0 }
 0x12b   : > { %v13014_v27 = vpop.f32.mrb[12].mxu1  ;;  %v13016_v34 = vpop.f32.mrb[12].mxu0 }
 0x12c   : > { %v13018_v37 = vpop.f32.mrb[13].mxu1  ;;  %v13020_v43 = vpop.f32.mrb[13].mxu0 }
 0x12d   : > { %v13022_v45 = vpop.f32.mrb[14].mxu1  ;;  %v13024_v4 = vpop.f32.mrb[14].mxu0 }
 0x12e   : > { %v13028_v11 = vpop.f32.mrb[15].mxu1  ;;  %v13032_v25 = vpop.f32.mrb[15].mxu0 }
 0x133   : > { %v10879_v40 = vpop.f32.mrb[16].mxu0  ;;  %v10913_v26 = vpop.f32.mrb[16].mxu1 }
 0x134   : > { %v384_v22 = vpop.f32.mrb[17].mxu0  ;;  %v697_v13 = vpop.f32.mrb[17].mxu1 }
 0x135   : > { %v10880_v7 = vpop.f32.mrb[18].mxu0  ;;  %v10914_v51 = vpop.f32.mrb[18].mxu1 }
 0x136   : > { %v588_v61 = vpack.c.bf16 %v10880_v7, %v10879_v40  ;;  %v849_v48 = vpack.c.bf16 %v10914_v51, %v10913_v26  ;;  %v387_v47 = vpop.f32.mrb[19].mxu0  ;;  %v700_v42 = vpop.f32.mrb[19].mxu1 }
 0x137   : > { %v587_v41 = vpack.c.bf16 %v387_v47, %v384_v22  ;;  %v848_v6 = vpack.c.bf16 %v700_v42, %v697_v13  ;;  %v15020_v47 = vpack.c.bf16 %v12961_v20, %v12957_v14 }
 0x139   : > { %10084 = vmatprep.subr.bf16.mxu0 %v848_v6  ;;  %10148 = vmatprep.subr.bf16.mxu1 %v587_v41  ;;  %v15021_v41 = vpack.c.bf16 %v12963_v21, %v12959_v15  ;;  %v15022_v15 = vpack.c.bf16 %v12977_v38, %v12969_v32 }
 0x13a   : > { %10085 = vmatpush3.bf16.msra.mxu0 %v840_v28  ;;  %10149 = vmatpush3.bf16.msra.mxu1 %v579_v31 }
 0x13b   : > { %v10883_v19 = vpop.f32.mrb[20].mxu0  ;;  %v10917_v36 = vpop.f32.mrb[20].mxu1  ;;  %10086 = vmatprep.subr.bf16.mxu0 %v849_v48  ;;  %10150 = vmatprep.subr.bf16.mxu1 %v588_v61 }
 0x13c   : > { %v400_v44 = vpop.f32.mrb[21].mxu0  ;;  %v713_v35 = vpop.f32.mrb[21].mxu1 }
 0x13d   : > { %v10884_v30 = vpop.f32.mrb[22].mxu0  ;;  %v10918_v29 = vpop.f32.mrb[22].mxu1 }
 0x13e   : > { %v590_v24 = vpack.c.bf16 %v10884_v30, %v10883_v19  ;;  %v851_v23 = vpack.c.bf16 %v10918_v29, %v10917_v36  ;;  %v403_v7 = vpop.f32.mrb[23].mxu0  ;;  %v716_v51 = vpop.f32.mrb[23].mxu1  ;;  %10087 = vmatpush3.bf16.msra.mxu0 %v15020_v47  ;;  %10151 = vmatpush3.bf16.msra.mxu1 %v15021_v41  ;;  %v15036_v47 = vpack.c.bf16 %v13024_v4, %v13016_v34  ;;  %v15038_v4 = vmov 0 }
 0x13f   : > { %v589_v42 = vpack.c.bf16 %v403_v7, %v400_v44  ;;  %v850_v13 = vpack.c.bf16 %v716_v51, %v713_v35  ;;  %v15023_v35 = vpack.c.bf16 %v12979_v39, %v12971_v33  ;;  %v452_v7 = vadd.s32 32, %v12888_v53 }
 0x140   : > { %v453_v51 = vadd.s32 40, %v12888_v53  ;;  %v15039_v4 = vsel %vm13140_vm5, 4294967295, %v15038_v4 }
 0x141   : > { %10088 = vmatprep.subr.bf16.mxu0 %v850_v13  ;;  %10152 = vmatprep.subr.bf16.mxu1 %v589_v42  ;;  %v454_v13 = vadd.s32 48, %v12888_v53  ;;  %15040 = vst [vmem:[#allocation25_spill] sm:$0xff] %v15039_v4 }
 0x142   : > { %10089 = vmatpush3.bf16.msra.mxu0 %v842_v46  ;;  %10153 = vmatpush3.bf16.msra.mxu1 %v581_v49 }
 0x143   : > { %v10887_v48 = vpop.f32.mrb[24].mxu0  ;;  %v10921_v61 = vpop.f32.mrb[24].mxu1  ;;  %10090 = vmatprep.subr.bf16.mxu0 %v851_v23  ;;  %10154 = vmatprep.subr.bf16.mxu1 %v590_v24  ;;  %v15024_v23 = vpack.c.bf16 %v13004_v10, %v12994_v54  ;;  %v15025_v24 = vpack.c.bf16 %v13008_v16, %v12996_v62  ;;  %v15026_v54 = vpack.c.bf16 %v12998_v63, %v12990_v50  ;;  %v13082_v63 = vmul.u32 2, %v452_v7  ;;  %v15061_v7 = vld [vmem:[#allocation8_spill] sm:$0xff] }
 0x144   : > { %v416_v29 = vpop.f32.mrb[25].mxu0  ;;  %v729_v30 = vpop.f32.mrb[25].mxu1  ;;  %v15027_v62 = vpack.c.bf16 %v13000_v5, %v12992_v52  ;;  %v15028_v50 = vpack.c.bf16 %v13028_v11, %v13018_v37  ;;  %v15029_v52 = vpack.c.bf16 %v13032_v25, %v13020_v43  ;;  %v13098_v11 = vmul.u32 2, %v453_v51  ;;  %v1050_v25 = vld [vmem:[#allocation2 + $0x8] sm:$0xf]  ;;  %v15063_v51 = vld [vmem:[#allocation9_spill] sm:$0xff] }
 0x145   : > { %v10888_v36 = vpop.f32.mrb[26].mxu0  ;;  %v10922_v22 = vpop.f32.mrb[26].mxu1  ;;  %v15032_v37 = vmov 0  ;;  %v15035_v43 = vpack.c.bf16 %v13022_v45, %v13014_v27  ;;  %v487_v41 = vadd.s32 4294967295, %v13082_v63  ;;  %v15037_v27 = vmov 1.0|1.0  }
 0x146   : > { %v592_v14 = vpack.c.bf16 %v10888_v36, %v10887_v48  ;;  %v853_v20 = vpack.c.bf16 %v10922_v22, %v10921_v61  ;;  %v419_v26 = vpop.f32.mrb[27].mxu0  ;;  %v732_v28 = vpop.f32.mrb[27].mxu1  ;;  %10091 = vmatpush3.bf16.msra.mxu0 %v15022_v15  ;;  %10155 = vmatpush3.bf16.msra.mxu1 %v15023_v35  ;;  %v15033_v37 = vsel %vm13106_vm7, 4294967295, %v15032_v37  ;;  %v488_v42 = vadd.s32 4294967295, %v13098_v11 }
 0x147   : > { %v591_v21 = vpack.c.bf16 %v419_v26, %v416_v29  ;;  %v852_v31 = vpack.c.bf16 %v732_v28, %v729_v30  ;;  %15034 = vst [vmem:[#allocation24_spill] sm:$0xff] %v15033_v37  ;;  %v455_v48 = vadd.s32 56, %v12888_v53  ;;  %v1052_v61 = vsel %vm14951_vm0, %v1050_v25, 0 }
 0x148   : > { %vm769_vm2 = vcmp.eq.s32.totalorder %v12899_v58, %v13082_v63  ;;  %vm771_vm3 = vcmp.eq.s32.totalorder %v12899_v58, %v13098_v11  ;;  %v13146_v34 = vmul.u32 2, %v454_v13  ;;  %v15041_v29 = vmov 0 }
 0x149   : > { %10092 = vmatprep.subr.bf16.mxu0 %v852_v31  ;;  %10156 = vmatprep.subr.bf16.mxu1 %v591_v21  ;;  %v13148_v45 = vmul.u32 2, %v455_v48  ;;  %v15042_v29 = vsel %vm13156_vm6, 4294967295, %v15041_v29  ;;  %vm9439_vm8 = vmpackc.low %vm771_vm3, %vm769_vm2  ;;  %v456_v22 = vadd.s32 64, %v12888_v53  ;;  %vm768_vm10 = vcmp.eq.s32.totalorder %v12891_v55, %v13082_v63 }
 0x14a   : > { %10093 = vmatpush3.bf16.msra.mxu0 %v15024_v23  ;;  %10157 = vmatpush3.bf16.msra.mxu1 %v15025_v24  ;;  %15043 = vst [vmem:[#allocation26_spill] sm:$0xff] %v15042_v29  ;;  %v489_v30 = vadd.s32 4294967295, %v13146_v34  ;;  %vm770_vm11 = vcmp.eq.s32.totalorder %v12891_v55, %v13098_v11  ;;  %vm507_vm2 = vcmp.eq.s32.totalorder %v12891_v55, %v487_v41  ;;  %v15047_v26 = vmov 0 }
 0x14b   : > { %v10891_v40 = vpop.f32.mrb[28].mxu0  ;;  %v10925_v44 = vpop.f32.mrb[28].mxu1  ;;  %10094 = vmatprep.subr.bf16.mxu0 %v853_v20  ;;  %10158 = vmatprep.subr.bf16.mxu1 %v592_v14  ;;  %v490_v36 = vadd.s32 4294967295, %v13148_v45  ;;  %v457_v14 = vadd.s32 72, %v12888_v53  ;;  %vm509_vm3 = vcmp.eq.s32.totalorder %v12891_v55, %v488_v42  ;;  %v13188_v3 = vmul.u32 2, %v456_v22 }
 0x14c   : > { %v432_v32 = vpop.f32.mrb[29].mxu0  ;;  %v745_v38 = vpop.f32.mrb[29].mxu1  ;;  %vm512_vm15 = vcmp.eq.s32.totalorder %v12899_v58, %v489_v30  ;;  %v458_v35 = vadd.s32 80, %v12888_v53  ;;  %v459_v21 = vadd.s32 88, %v12888_v53  ;;  %v15050_v31 = vmov 0 }
 0x14d   : > { %v10892_v33 = vpop.f32.mrb[30].mxu0  ;;  %v10926_v39 = vpop.f32.mrb[30].mxu1  ;;  %v13190_v20 = vmul.u32 2, %v457_v14  ;;  %v491_v28 = vadd.s32 4294967295, %v13188_v3  ;;  %v13347_v48 = vadd.s32 1, %v12894_v56 }
 0x14e   : > { %v594_v46 = vpack.c.bf16 %v10892_v33, %v10891_v40  ;;  %v855_v49 = vpack.c.bf16 %v10926_v39, %v10925_v44  ;;  %v435_v6 = vpop.f32.mrb[31].mxu0  ;;  %v748_v19 = vpop.f32.mrb[31].mxu1  ;;  %10095 = vmatpush3.bf16.msra.mxu0 %v15026_v54  ;;  %10159 = vmatpush3.bf16.msra.mxu1 %v15027_v62  ;;  %v13224_v23 = vmul.u32 2, %v458_v35  ;;  %v13226_v24 = vmul.u32 2, %v459_v21 }
 0x14f   : > { %v593_v10 = vpack.c.bf16 %v435_v6, %v432_v32  ;;  %v854_v16 = vpack.c.bf16 %v748_v19, %v745_v38  ;;  %v492_v15 = vadd.s32 4294967295, %v13190_v20  ;;  %v15053_v40 = vmov 0 }
 0x150   : > { %v493_v44 = vadd.s32 4294967295, %v13224_v23  ;;  %v494_v32 = vadd.s32 4294967295, %v13226_v24  ;;  %v460_v38 = vadd.s32 96, %v12888_v53  ;;  %v461_v33 = vadd.s32 104, %v12888_v53 }
 0x151   : > { %10096 = vmatprep.subr.bf16.mxu0 %v854_v16  ;;  %10160 = vmatprep.subr.bf16.mxu1 %v593_v10  ;;  %v462_v19 = vadd.s32 112, %v12888_v53  ;;  %v463_v54 = vadd.s32 120, %v12888_v53 }
 0x152   : > { %10097 = vmatpush3.bf16.msra.mxu0 %v15028_v50  ;;  %10161 = vmatpush3.bf16.msra.mxu1 %v15029_v52  ;;  %v13256_v39 = vmul.u32 2, %v460_v38  ;;  %v15065_v50 = vld [vmem:[#allocation10_spill] sm:$0xff]  ;;  %v15077_v52 = vld [vmem:[#allocation16_spill] sm:$0xff]  ;;  %v13362_v38 = vadd.s32 1, %v12919_v0 }
 0x153   : > { %10098 = vmatprep.subr.bf16.mxu0 %v855_v49  ;;  %10162 = vmatprep.subr.bf16.mxu1 %v594_v46  ;;  %v13258_v46 = vmul.u32 2, %v461_v33  ;;  %v13280_v53 = vmul.u32 2, %v462_v19  ;;  %v13365_v33 = vadd.s32 1, %v12921_v1 }
 0x154   : > { %v495_v49 = vadd.s32 4294967295, %v13256_v39  ;;  %v13282_v62 = vmul.u32 2, %v463_v54 }
 0x155   : > { %v496_v6 = vadd.s32 4294967295, %v13258_v46  ;;  %v497_v10 = vadd.s32 4294967295, %v13280_v53 }
 0x156   : > { %10099 = vmatpush3.bf16.msra.mxu0 %v15035_v43  ;;  %10163 = vmatpush3.bf16.msra.mxu1 %v15036_v47  ;;  %v498_v16 = vadd.s32 4294967295, %v13282_v62  ;;  %v15081_v43 = vld [vmem:[#allocation18_spill] sm:$0xff] }
 0x157   : > { %12287 = vmatprep.subr.msk.bf16.mxu0 %vm14951_vm0, %v1050_v25  ;;  %vm13182_vm0 = vmpackc.low %vm770_vm11, %vm768_vm10  ;;  %vm772_vm10 = vcmp.eq.s32.totalorder %v12891_v55, %v13146_v34  ;;  %vm511_vm11 = vcmp.eq.s32.totalorder %v12891_v55, %v489_v30  ;;  %v15079_v25 = vld [vmem:[#allocation17_spill] sm:$0xff] }
 0x158   : > { %v15045_v2 = vsel %vm13182_vm0, 4294967295, %v15044_v2 }
 0x159   : > { %9434 = vmatmul.mubr.msk.bf16.vlgmr.msra.gmra.mrb[32].mxu0 %vm13090_vm4, %v15037_v27  ;;  %9466 = vmatmul.mubr.msk.bf16.vlgmr.msra.gmra.mrb[32].mxu1 %vm13106_vm7, %v15037_v27  ;;  %15046 = vst [vmem:[#allocation27_spill] sm:$0xff] %v15045_v2 }
 0x15a   : > { %9436 = vmatprep.mubr.msk.bf16.mxu0 %vm9435_vm13, %v15037_v27  ;;  %9468 = vmatprep.mubr.msk.bf16.mxu1 %vm9467_vm12, %v15037_v27  ;;  %vm508_vm13 = vcmp.eq.s32.totalorder %v12899_v58, %v487_v41  ;;  %vm510_vm12 = vcmp.eq.s32.totalorder %v12899_v58, %v488_v42 }
 0x15b   : > { %10928 = vmatpush3.bf16.msra.mxu0 %v1052_v61  ;;  %vm9471_vm9 = vmpackc.low %vm510_vm12, %vm508_vm13  ;;  %vm773_vm13 = vcmp.eq.s32.totalorder %v12899_v58, %v13146_v34  ;;  %vm775_vm12 = vcmp.eq.s32.totalorder %v12899_v58, %v13148_v45  ;;  %v13350_v61 = vadd.s32 1, %v12896_v57 }
 0x15c   : > { %vm9443_vm14 = vmpackc.low %vm775_vm12, %vm773_vm13  ;;  %vm779_vm13 = vcmp.eq.s32.totalorder %v12899_v58, %v13190_v20 }
 0x161   : > { %9438 = vmatmul.mubr.msk.bf16.gmra.mrb[36].mxu0 %vm13140_vm5, %v15037_v27  ;;  %9470 = vmatmul.mubr.msk.bf16.gmra.mrb[36].mxu1 %vm13156_vm6, %v15037_v27 }
 0x162   : > { %9440 = vmatprep.mubr.msk.bf16.mxu0 %vm9439_vm8, %v15037_v27  ;;  %9472 = vmatprep.mubr.msk.bf16.mxu1 %vm9471_vm9, %v15037_v27  ;;  %vm514_vm8 = vcmp.eq.s32.totalorder %v12899_v58, %v490_v36  ;;  %vm13192_vm9 = vmpackc.low %vm509_vm3, %vm507_vm2  ;;  %vm513_vm2 = vcmp.eq.s32.totalorder %v12891_v55, %v490_v36  ;;  %vm777_vm3 = vcmp.eq.s32.totalorder %v12899_v58, %v13188_v3 }
 0x163   : > { %v15048_v26 = vsel %vm13192_vm9, 4294967295, %v15047_v26  ;;  %vm9475_vm1 = vmpackc.low %vm514_vm8, %vm512_vm15  ;;  %vm774_vm15 = vcmp.eq.s32.totalorder %v12891_v55, %v13148_v45  ;;  %vm516_vm8 = vcmp.eq.s32.totalorder %v12899_v58, %v491_v28 }
 0x164   : > { %15049 = vst [vmem:[#allocation28_spill] sm:$0xff] %v15048_v26  ;;  %vm13218_vm12 = vmpackc.low %vm774_vm15, %vm772_vm10  ;;  %vm776_vm10 = vcmp.eq.s32.totalorder %v12891_v55, %v13188_v3  ;;  %vm778_vm15 = vcmp.eq.s32.totalorder %v12891_v55, %v13190_v20 }
 0x165   : > { %v15051_v31 = vsel %vm13218_vm12, 4294967295, %v15050_v31 }
 0x166   : > { %15052 = vst [vmem:[#allocation29_spill] sm:$0xff] %v15051_v31 }
 0x169   : > { %9442 = vmatmul.mubr.msk.bf16.gmra.mrb[40].mxu0 %vm13182_vm0, %v15037_v27  ;;  %9474 = vmatmul.mubr.msk.bf16.gmra.mrb[40].mxu1 %vm13192_vm9, %v15037_v27  ;;  %vm9447_vm9 = vmpackc.low %vm779_vm13, %vm777_vm3  ;;  %vm781_vm3 = vcmp.eq.s32.totalorder %v12899_v58, %v13224_v23  ;;  %vm783_vm13 = vcmp.eq.s32.totalorder %v12899_v58, %v13226_v24 }
 0x16a   : > { %9444 = vmatprep.mubr.msk.bf16.mxu0 %vm9443_vm14, %v15037_v27  ;;  %9476 = vmatprep.mubr.msk.bf16.mxu1 %vm9475_vm1, %v15037_v27  ;;  %vm518_vm14 = vcmp.eq.s32.totalorder %v12899_v58, %v492_v15  ;;  %vm13228_vm1 = vmpackc.low %vm513_vm2, %vm511_vm11  ;;  %vm515_vm11 = vcmp.eq.s32.totalorder %v12891_v55, %v491_v28  ;;  %vm517_vm2 = vcmp.eq.s32.totalorder %v12891_v55, %v492_v15 }
 0x16b   : > { %v15054_v40 = vsel %vm13228_vm1, 4294967295, %v15053_v40  ;;  %vm9479_vm6 = vmpackc.low %vm518_vm14, %vm516_vm8  ;;  %vm520_vm14 = vcmp.eq.s32.totalorder %v12899_v58, %v493_v44 }
 0x16c   : > { %15055 = vst [vmem:[#allocation30_spill] sm:$0xff] %v15054_v40  ;;  %vm9449_vm8 = vmpackc.low %vm778_vm15, %vm776_vm10  ;;  %vm780_vm10 = vcmp.eq.s32.totalorder %v12891_v55, %v13224_v23  ;;  %vm782_vm15 = vcmp.eq.s32.totalorder %v12891_v55, %v13226_v24 }
 0x171   : > { %9446 = vmatmul.mubr.msk.bf16.gmra.mrb[44].mxu0 %vm13218_vm12, %v15037_v27  ;;  %9478 = vmatmul.mubr.msk.bf16.gmra.mrb[44].mxu1 %vm13228_vm1, %v15037_v27  ;;  %vm522_vm1 = vcmp.eq.s32.totalorder %v12899_v58, %v494_v32 }
 0x172   : > { %9448 = vmatprep.mubr.msk.bf16.mxu0 %vm9447_vm9, %v15037_v27  ;;  %9480 = vmatprep.mubr.msk.bf16.mxu1 %vm9479_vm6, %v15037_v27  ;;  %vm9481_vm6 = vmpackc.low %vm517_vm2, %vm515_vm11  ;;  %vm521_vm11 = vcmp.eq.s32.totalorder %v12891_v55, %v494_v32  ;;  %vm785_vm2 = vcmp.eq.s32.totalorder %v12899_v58, %v13256_v39 }
 0x173   : > { %vm9451_vm9 = vmpackc.low %vm783_vm13, %vm781_vm3  ;;  %vm787_vm3 = vcmp.eq.s32.totalorder %v12899_v58, %v13258_v46 }
 0x174   : > { %vm9483_vm7 = vmpackc.low %vm522_vm1, %vm520_vm14  ;;  %vm519_vm1 = vcmp.eq.s32.totalorder %v12891_v55, %v493_v44  ;;  %vm526_vm14 = vcmp.eq.s32.totalorder %v12899_v58, %v496_v6 }
 0x175   : > { %vm9453_vm13 = vmpackc.low %vm782_vm15, %vm780_vm10  ;;  %vm784_vm10 = vcmp.eq.s32.totalorder %v12891_v55, %v13256_v39  ;;  %vm786_vm15 = vcmp.eq.s32.totalorder %v12891_v55, %v13258_v46 }
 0x179   : > { %9450 = vmatmul.mubr.msk.bf16.gmra.mrb[48].mxu0 %vm9449_vm8, %v15037_v27  ;;  %9482 = vmatmul.mubr.msk.bf16.gmra.mrb[48].mxu1 %vm9481_vm6, %v15037_v27  ;;  %vm524_vm8 = vcmp.eq.s32.totalorder %v12899_v58, %v495_v49  ;;  %vm9455_vm6 = vmpackc.low %vm787_vm3, %vm785_vm2  ;;  %vm789_vm2 = vcmp.eq.s32.totalorder %v12899_v58, %v13280_v53  ;;  %vm791_vm3 = vcmp.eq.s32.totalorder %v12899_v58, %v13282_v62 }
 0x17a   : > { %9452 = vmatprep.mubr.msk.bf16.mxu0 %vm9451_vm9, %v15037_v27  ;;  %9484 = vmatprep.mubr.msk.bf16.mxu1 %vm9483_vm7, %v15037_v27  ;;  %vm9485_vm7 = vmpackc.low %vm521_vm11, %vm519_vm1  ;;  %vm523_vm1 = vcmp.eq.s32.totalorder %v12891_v55, %v495_v49  ;;  %vm525_vm11 = vcmp.eq.s32.totalorder %v12891_v55, %v496_v6 }
 0x17b   : > { %vm9487_vm9 = vmpackc.low %vm526_vm14, %vm524_vm8  ;;  %vm528_vm8 = vcmp.eq.s32.totalorder %v12899_v58, %v497_v10  ;;  %vm530_vm14 = vcmp.eq.s32.totalorder %v12899_v58, %v498_v16 }
 0x17c   : > { %vm9459_vm12 = vmpackc.low %vm791_vm3, %vm789_vm2 }
 0x181   : > { %9454 = vmatmul.mubr.msk.bf16.gmra.mrb[52].mxu0 %vm9453_vm13, %v15037_v27  ;;  %9486 = vmatmul.mubr.msk.bf16.gmra.mrb[52].mxu1 %vm9485_vm7, %v15037_v27  ;;  %vm9457_vm13 = vmpackc.low %vm786_vm15, %vm784_vm10  ;;  %vm790_vm10 = vcmp.eq.s32.totalorder %v12891_v55, %v13282_v62  ;;  %vm527_vm15 = vcmp.eq.s32.totalorder %v12891_v55, %v497_v10  ;;  %v15083_v10 = vmov 0.0  }
 0x182   : > { %9456 = vmatprep.mubr.msk.bf16.mxu0 %vm9455_vm6, %v15037_v27  ;;  %9488 = vmatprep.mubr.msk.bf16.mxu1 %vm9487_vm9, %v15037_v27  ;;  %vm9489_vm7 = vmpackc.low %vm525_vm11, %vm523_vm1  ;;  %vm788_vm9 = vcmp.eq.s32.totalorder %v12891_v55, %v13280_v53  ;;  %vm529_vm1 = vcmp.eq.s32.totalorder %v12891_v55, %v498_v16 }
 0x183   : > { %vm9491_vm6 = vmpackc.low %vm530_vm14, %vm528_vm8 }
 0x184   : > { %vm9461_vm11 = vmpackc.low %vm790_vm10, %vm788_vm9 }
 0x185   : > { %vm9493_vm2 = vmpackc.low %vm529_vm1, %vm527_vm15 }
 0x189   : > { %9458 = vmatmul.mubr.msk.bf16.gmra.mrb[56].mxu0 %vm9457_vm13, %v15037_v27  ;;  %9490 = vmatmul.mubr.msk.bf16.gmra.mrb[56].mxu1 %vm9489_vm7, %v15037_v27 }
 0x18a   : > { %9460 = vmatprep.mubr.msk.bf16.mxu0 %vm9459_vm12, %v15037_v27  ;;  %9492 = vmatprep.mubr.msk.bf16.mxu1 %vm9491_vm6, %v15037_v27  ;;  %vm15056_vm12 = vcmask 64512  }
 0x18b   : > { %vm15057_vm3 = vmmov %vm15056_vm12 }
 0x18c   : > { %vm15058_vm13 = vmmov %vm15057_vm3 }
 0x18d   : > { %vm15059_vm8 = vmmov %vm15057_vm3 }
 0x18e   : > { %vm15060_vm14 = vmmov %vm15057_vm3 }
 0x18f   : > { %vm15062_vm7 = vmmov %vm15057_vm3 }
 0x190   : > { %vm15064_vm6 = vmmov %vm15057_vm3 }
 0x191   : > { %9462 = vmatmul.mubr.msk.bf16.gmra.mrb[60].mxu0 %vm9461_vm11, %v15037_v27  ;;  %9494 = vmatmul.mubr.msk.bf16.gmra.mrb[60].mxu1 %vm9493_vm2, %v15037_v27  ;;  %vm15066_vm9 = vmmov %vm15057_vm3 }
 0x192   : > { %10929 = vmatprep.mubr.msk.bf16.mxu0 %vm15056_vm12, %v12764_v8  ;;  %v15067_v8 = vld [vmem:[#allocation11_spill] sm:$0xff]  ;;  %vm15068_vm10 = vmmov %vm15057_vm3 }
 0x193   : > { %vm15070_vm15 = vmmov %vm15057_vm3 }
 0x194   : > { %vm15072_vm1 = vmmov %vm15057_vm3 }
 0x195   : > { %vm15074_vm11 = vmmov %vm15072_vm1 }
 0x196   : > { %vm15076_vm2 = vmmov %vm15072_vm1 }
 0x197   : > { %vm15078_vm12 = vmmov %vm15072_vm1 }
 0x199   : > { %10930 = vmatmul.mubr.msk.bf16.vlgmr.msra.gmra.mrb[64].mxu0 %vm15057_vm3, %v12766_v9  ;;  %v15069_v9 = vld [vmem:[#allocation12_spill] sm:$0xff]  ;;  %vm15080_vm3 = vmmov %vm15072_vm1 }
 0x19a   : > { %10933 = vmatprep.mubr.msk.bf16.mxu0 %vm15058_vm13, %v12770_v12  ;;  %v15071_v12 = vld [vmem:[#allocation13_spill] sm:$0xff]  ;;  %vm15082_vm13 = vmmov %vm15072_vm1 }
 0x1a1   : > { %10934 = vmatmul.mubr.msk.bf16.gmra.mrb[68].mxu0 %vm15059_vm8, %v12788_v17  ;;  %v15073_v17 = vld [vmem:[#allocation14_spill] sm:$0xff]  ;;  %vm1232_vm8 = vcmp.eq.s32.totalorder %v12899_v58, %v13347_v48 }
 0x1a2   : > { %10937 = vmatprep.mubr.msk.bf16.mxu0 %vm15060_vm14, %v12790_v18  ;;  %v15075_v18 = vld [vmem:[#allocation15_spill] sm:$0xff]  ;;  %vm1234_vm14 = vcmp.eq.s32.totalorder %v12899_v58, %v13350_v61 }
 0x1a9   : > { %10938 = vmatmul.mubr.msk.bf16.gmra.mrb[72].mxu0 %vm15062_vm7, %v15061_v7  ;;  %vm9511_vm7 = vmpackc.low %vm1234_vm14, %vm1232_vm8 }
 0x1aa   : > { %10941 = vmatprep.mubr.msk.bf16.mxu0 %vm15064_vm6, %v15063_v51  ;;  %9512 = vmatprep.mubr.msk.bf16.mxu1 %vm9511_vm7, %v15037_v27  ;;  %vm1235_vm6 = vcmp.eq.s32.totalorder %v12891_v55, %v13362_v38 }
 0x1ab   : > { %v1267_v16 = vsel %vm1235_vm6, 1.0, %v15083_v10 }
 0x1b1   : > { %10942 = vmatmul.mubr.msk.bf16.gmra.mrb[76].mxu0 %vm15066_vm9, %v15065_v50  ;;  %vm1237_vm9 = vcmp.eq.s32.totalorder %v12891_v55, %v13365_v33 }
 0x1b2   : > { %10945 = vmatprep.mubr.msk.bf16.mxu0 %vm15068_vm10, %v15067_v8  ;;  %v1269_v7 = vsel %vm1237_vm9, 1.0, %v15083_v10  ;;  %vm14985_vm10 = vcmp.eq.s32.totalorder %v12891_v55, %v13347_v48  ;;  %vm13441_vm8 = vmpackc.low %vm1237_vm9, %vm1235_vm6 }
 0x1b9   : > { %10946 = vmatmul.mubr.msk.bf16.gmra.mrb[80].mxu0 %vm15070_vm15, %v15069_v9  ;;  %vm14984_vm15 = vcmp.eq.s32.totalorder %v12891_v55, %v13350_v61 }
 0x1ba   : > { %10949 = vmatprep.mubr.msk.bf16.mxu0 %vm15072_vm1, %v15071_v12  ;;  %v13379_v12 = vpack.c.bf16 %v1269_v7, %v1267_v16  ;;  %vm1236_vm1 = vcmp.eq.s32.totalorder %v12899_v58, %v13362_v38  ;;  %v15089_v38 = vmov 0 }
 0x1bc   : > { %15084 = vst [vmem:[#allocation8_spill] sm:$0xff] %v13379_v12 }
 0x1c1   : > { %10950 = vmatmul.mubr.msk.bf16.gmra.mrb[84].mxu0 %vm15074_vm11, %v15073_v17  ;;  %vm1238_vm11 = vcmp.eq.s32.totalorder %v12899_v58, %v13365_v33  ;;  %v1223_v33 = vadd.s32 1, %v13188_v3  ;;  %v1225_v3 = vadd.s32 1, %v13224_v23  ;;  %v1227_v23 = vadd.s32 1, %v13256_v39 }
 0x1c2   : > { %10953 = vmatprep.mubr.msk.bf16.mxu0 %vm15076_vm2, %v15075_v18  ;;  %vm13423_vm2 = vmpackc.low %vm14984_vm15, %vm14985_vm10  ;;  %v1230_v39 = vadd.s32 1, %v13282_v62 }
 0x1c3   : > { %vm1256_vm10 = vcmp.eq.s32.totalorder %v12899_v58, %v1227_v23 }
 0x1c9   : > { %10954 = vmatmul.mubr.msk.bf16.gmra.mrb[88].mxu0 %vm15078_vm12, %v15077_v52  ;;  %vm9515_vm12 = vmpackc.low %vm1238_vm11, %vm1236_vm1 }
 0x1ca   : > { %10957 = vmatprep.mubr.msk.bf16.mxu0 %vm15080_vm3, %v15079_v25 }
 0x1d1   : > { %10958 = vmatmul.mubr.msk.bf16.gmra.mrb[92].mxu0 %vm15082_vm13, %v15081_v43 }
 0x22c   : > { %v10100_v47 = vpop.f32.mrb[32].mxu0  ;;  %v10164_v41 = vpop.f32.mrb[32].mxu1 }
 0x22d   : > { %v10101_v42 = vpop.f32.mrb[33].mxu0  ;;  %v10165_v13 = vpop.f32.mrb[33].mxu1 }
 0x22e   : > { %v10102_v30 = vadd.f32 %v10101_v42, %v10100_v47  ;;  %v10166_v36 = vadd.f32 %v10165_v13, %v10164_v41  ;;  %v10103_v22 = vpop.f32.mrb[34].mxu0  ;;  %v10167_v14 = vpop.f32.mrb[34].mxu1 }
 0x22f   : > { %v10104_v28 = vpop.f32.mrb[35].mxu0  ;;  %v10168_v15 = vpop.f32.mrb[35].mxu1 }
 0x230   : > { %v13356_v35 = vadd.f32 %v10166_v36, %v10102_v30  ;;  %v10105_v21 = vadd.f32 %v10104_v28, %v10103_v22  ;;  %v10169_v44 = vadd.f32 %v10168_v15, %v10167_v14 }
 0x232   : > { %v13359_v32 = vadd.f32 %v10169_v44, %v10105_v21 }
 0x234   : > { %v10106_v49 = vpop.f32.mrb[36].mxu0  ;;  %v10170_v6 = vpop.f32.mrb[36].mxu1 }
 0x235   : > { %v10107_v19 = vpop.f32.mrb[37].mxu0  ;;  %v10171_v54 = vpop.f32.mrb[37].mxu1 }
 0x236   : > { %v10108_v51 = vadd.f32 %v10107_v19, %v10106_v49  ;;  %v10172_v50 = vadd.f32 %v10171_v54, %v10170_v6  ;;  %v10109_v8 = vpop.f32.mrb[38].mxu0  ;;  %v10173_v9 = vpop.f32.mrb[38].mxu1 }
 0x237   : > { %v10110_v17 = vpop.f32.mrb[39].mxu0  ;;  %v10174_v18 = vpop.f32.mrb[39].mxu1 }
 0x238   : > { %v13381_v52 = vadd.f32 %v10172_v50, %v10108_v51  ;;  %v10111_v25 = vadd.f32 %v10110_v17, %v10109_v8  ;;  %v10175_v43 = vadd.f32 %v10174_v18, %v10173_v9 }
 0x23a   : > { %v13383_v47 = vadd.f32 %v10175_v43, %v10111_v25 }
 0x23c   : > { %v10112_v41 = vpop.f32.mrb[40].mxu0  ;;  %v10176_v42 = vpop.f32.mrb[40].mxu1 }
 0x23d   : > { %v10113_v13 = vpop.f32.mrb[41].mxu0  ;;  %v10177_v30 = vpop.f32.mrb[41].mxu1 }
 0x23e   : > { %v10114_v36 = vadd.f32 %v10113_v13, %v10112_v41  ;;  %v10178_v22 = vadd.f32 %v10177_v30, %v10176_v42  ;;  %v10115_v14 = vpop.f32.mrb[42].mxu0  ;;  %v10179_v28 = vpop.f32.mrb[42].mxu1 }
 0x23f   : > { %v10116_v15 = vpop.f32.mrb[43].mxu0  ;;  %v10180_v21 = vpop.f32.mrb[43].mxu1 }
 0x240   : > { %v13385_v44 = vadd.f32 %v10178_v22, %v10114_v36  ;;  %v10117_v49 = vadd.f32 %v10116_v15, %v10115_v14  ;;  %v10181_v6 = vadd.f32 %v10180_v21, %v10179_v28 }
 0x242   : > { %v13387_v19 = vadd.f32 %v10181_v6, %v10117_v49 }
 0x244   : > { %v10118_v54 = vpop.f32.mrb[44].mxu0  ;;  %v10182_v16 = vpop.f32.mrb[44].mxu1 }
 0x245   : > { %v10119_v7 = vpop.f32.mrb[45].mxu0  ;;  %v10183_v51 = vpop.f32.mrb[45].mxu1 }
 0x246   : > { %v10120_v50 = vadd.f32 %v10119_v7, %v10118_v54  ;;  %v10184_v8 = vadd.f32 %v10183_v51, %v10182_v16  ;;  %v10121_v9 = vpop.f32.mrb[46].mxu0  ;;  %v10185_v17 = vpop.f32.mrb[46].mxu1 }
 0x247   : > { %v10122_v18 = vpop.f32.mrb[47].mxu0  ;;  %v10186_v25 = vpop.f32.mrb[47].mxu1 }
 0x248   : > { %v13389_v43 = vadd.f32 %v10184_v8, %v10120_v50  ;;  %v10123_v41 = vadd.f32 %v10122_v18, %v10121_v9  ;;  %v10187_v42 = vadd.f32 %v10186_v25, %v10185_v17 }
 0x24a   : > { %v13391_v13 = vadd.f32 %v10187_v42, %v10123_v41 }
 0x24c   : > { %v10124_v30 = vpop.f32.mrb[48].mxu0  ;;  %v10188_v36 = vpop.f32.mrb[48].mxu1 }
 0x24d   : > { %v10125_v22 = vpop.f32.mrb[49].mxu0  ;;  %v10189_v14 = vpop.f32.mrb[49].mxu1 }
 0x24e   : > { %v10126_v28 = vadd.f32 %v10125_v22, %v10124_v30  ;;  %v10190_v15 = vadd.f32 %v10189_v14, %v10188_v36  ;;  %v10127_v21 = vpop.f32.mrb[50].mxu0  ;;  %v10191_v49 = vpop.f32.mrb[50].mxu1 }
 0x24f   : > { %v10128_v6 = vpop.f32.mrb[51].mxu0  ;;  %v10192_v54 = vpop.f32.mrb[51].mxu1 }
 0x250   : > { %v13393_v16 = vadd.f32 %v10190_v15, %v10126_v28  ;;  %v10129_v7 = vadd.f32 %v10128_v6, %v10127_v21  ;;  %v10193_v51 = vadd.f32 %v10192_v54, %v10191_v49 }
 0x252   : > { %v13395_v50 = vadd.f32 %v10193_v51, %v10129_v7 }
 0x254   : > { %v10130_v8 = vpop.f32.mrb[52].mxu0  ;;  %v10194_v9 = vpop.f32.mrb[52].mxu1 }
 0x255   : > { %v10131_v17 = vpop.f32.mrb[53].mxu0  ;;  %v10195_v18 = vpop.f32.mrb[53].mxu1 }
 0x256   : > { %v10132_v25 = vadd.f32 %v10131_v17, %v10130_v8  ;;  %v10196_v41 = vadd.f32 %v10195_v18, %v10194_v9  ;;  %v10133_v42 = vpop.f32.mrb[54].mxu0  ;;  %v10197_v12 = vpop.f32.mrb[54].mxu1 }
 0x257   : > { %v10134_v30 = vpop.f32.mrb[55].mxu0  ;;  %v10198_v36 = vpop.f32.mrb[55].mxu1 }
 0x258   : > { %v13397_v22 = vadd.f32 %v10196_v41, %v10132_v25  ;;  %v10135_v14 = vadd.f32 %v10134_v30, %v10133_v42  ;;  %v10199_v60 = vadd.f32 %v10198_v36, %v10197_v12 }
 0x25a   : > { %v13399_v28 = vadd.f32 %v10199_v60, %v10135_v14 }
 0x25c   : > { %v10136_v15 = vpop.f32.mrb[56].mxu0  ;;  %v10200_v21 = vpop.f32.mrb[56].mxu1 }
 0x25d   : > { %v10137_v49 = vpop.f32.mrb[57].mxu0  ;;  %v10201_v6 = vpop.f32.mrb[57].mxu1 }
 0x25e   : > { %v10138_v54 = vadd.f32 %v10137_v49, %v10136_v15  ;;  %v10202_v7 = vadd.f32 %v10201_v6, %v10200_v21  ;;  %v10139_v51 = vpop.f32.mrb[58].mxu0  ;;  %v10203_v59 = vpop.f32.mrb[58].mxu1 }
 0x25f   : > { %v10140_v8 = vpop.f32.mrb[59].mxu0  ;;  %v10204_v9 = vpop.f32.mrb[59].mxu1 }
 0x260   : > { %v13401_v17 = vadd.f32 %v10202_v7, %v10138_v54  ;;  %v10141_v18 = vadd.f32 %v10140_v8, %v10139_v51  ;;  %v10205_v40 = vadd.f32 %v10204_v9, %v10203_v59 }
 0x262   : > { %v13403_v25 = vadd.f32 %v10205_v40, %v10141_v18 }
 0x264   : > { %v10142_v41 = vpop.f32.mrb[60].mxu0  ;;  %v10206_v12 = vpop.f32.mrb[60].mxu1 }
 0x265   : > { %v10143_v60 = vpop.f32.mrb[61].mxu0  ;;  %v10207_v42 = vpop.f32.mrb[61].mxu1 }
 0x266   : > { %v10144_v30 = vadd.f32 %v10143_v60, %v10142_v41  ;;  %v10208_v36 = vadd.f32 %v10207_v42, %v10206_v12  ;;  %v10145_v14 = vpop.f32.mrb[62].mxu0  ;;  %v10209_v26 = vpop.f32.mrb[62].mxu1 }
 0x267   : > { %v10146_v15 = vpop.f32.mrb[63].mxu0  ;;  %v10210_v21 = vpop.f32.mrb[63].mxu1 }
 0x268   : > { %v13405_v49 = vadd.f32 %v10208_v36, %v10144_v30  ;;  %v10147_v6 = vadd.f32 %v10146_v15, %v10145_v14  ;;  %v10211_v29 = vadd.f32 %v10210_v21, %v10209_v26 }
 0x26a   : > { %v13407_v54 = vadd.f32 %v10211_v29, %v10147_v6 }
 0x26c   : > { %v10931_v7 = vpop.f32.mrb[64].mxu0 }
 0x26d   : > { %v1088_v59 = vpop.f32.mrb[65].mxu0 }
 0x26e   : > { %v10932_v40 = vpop.f32.mrb[66].mxu0 }
 0x26f   : > { %v1312_v51 = vpack.c.bf16 %v10932_v40, %v10931_v7  ;;  %v1091_v8 = vpop.f32.mrb[67].mxu0 }
 0x270   : > { %v1311_v9 = vpack.c.bf16 %v1091_v8, %v1088_v59 }
 0x274   : > { %v10935_v18 = vpop.f32.mrb[68].mxu0 }
 0x275   : > { %v1104_v37 = vpop.f32.mrb[69].mxu0 }
 0x276   : > { %v10936_v41 = vpop.f32.mrb[70].mxu0 }
 0x277   : > { %v1314_v12 = vpack.c.bf16 %v10936_v41, %v10935_v18  ;;  %v1107_v60 = vpop.f32.mrb[71].mxu0 }
 0x278   : > { %v1313_v42 = vpack.c.bf16 %v1107_v60, %v1104_v37 }
 0x27c   : > { %v10939_v31 = vpop.f32.mrb[72].mxu0 }
 0x27d   : > { %v1120_v2 = vpop.f32.mrb[73].mxu0 }
 0x27e   : > { %v10940_v30 = vpop.f32.mrb[74].mxu0 }
 0x27f   : > { %v1316_v36 = vpack.c.bf16 %v10940_v30, %v10939_v31  ;;  %v1123_v14 = vpop.f32.mrb[75].mxu0 }
 0x280   : > { %v1315_v26 = vpack.c.bf16 %v1123_v14, %v1120_v2 }
 0x284   : > { %v10943_v29 = vpop.f32.mrb[76].mxu0 }
 0x285   : > { %v1136_v15 = vpop.f32.mrb[77].mxu0 }
 0x286   : > { %v10944_v21 = vpop.f32.mrb[78].mxu0 }
 0x287   : > { %v1318_v6 = vpack.c.bf16 %v10944_v21, %v10943_v29  ;;  %v1139_v4 = vpop.f32.mrb[79].mxu0 }
 0x288   : > { %v1317_v7 = vpack.c.bf16 %v1139_v4, %v1136_v15 }
 0x28c   : > { %v10947_v40 = vpop.f32.mrb[80].mxu0 }
 0x28d   : > { %v1152_v59 = vpop.f32.mrb[81].mxu0 }
 0x28e   : > { %v10948_v8 = vpop.f32.mrb[82].mxu0 }
 0x28f   : > { %v1320_v10 = vpack.c.bf16 %v10948_v8, %v10947_v40  ;;  %v1155_v1 = vpop.f32.mrb[83].mxu0 }
 0x290   : > { %v1319_v18 = vpack.c.bf16 %v1155_v1, %v1152_v59 }
 0x292   : > { %10229 = vmatprep.subr.bf16.mxu1 %v1319_v18  ;;  %v1224_v18 = vadd.s32 1, %v13190_v20  ;;  %v1226_v20 = vadd.s32 1, %v13226_v24  ;;  %v1228_v24 = vadd.s32 1, %v13258_v46  ;;  %v12343_v46 = vld [vmem:[#allocation2 + $0xc] sm:$0xff]  }
 0x293   : > { %10230 = vmatpush3.bf16.msra.mxu1 %v1311_v9  ;;  %10961 = vmatprep.subr.bf16.mxu0 %v12343_v46 }
 0x294   : > { %v10951_v37 = vpop.f32.mrb[84].mxu0  ;;  %10231 = vmatprep.subr.bf16.mxu1 %v1320_v10  ;;  %10962 = vmatpush3.bf16.msra.mxu0 %v12343_v46 }
 0x295   : > { %v1168_v41 = vpop.f32.mrb[85].mxu0 }
 0x296   : > { %v10952_v31 = vpop.f32.mrb[86].mxu0 }
 0x297   : > { %v1322_v60 = vpack.c.bf16 %v10952_v31, %v10951_v37  ;;  %v1171_v2 = vpop.f32.mrb[87].mxu0  ;;  %10232 = vmatpush3.bf16.msra.mxu1 %v1312_v51  ;;  %v15091_v37 = vmov 0 }
 0x298   : > { %v1321_v30 = vpack.c.bf16 %v1171_v2, %v1168_v41  ;;  %v1229_v41 = vadd.s32 1, %v13280_v53 }
 0x29a   : > { %10233 = vmatprep.subr.bf16.mxu1 %v1321_v30 }
 0x29b   : > { %10234 = vmatpush3.bf16.msra.mxu1 %v1313_v42  ;;  %v1219_v42 = vadd.s32 1, %v13082_v63 }
 0x29c   : > { %v10955_v14 = vpop.f32.mrb[88].mxu0  ;;  %10235 = vmatprep.subr.bf16.mxu1 %v1322_v60  ;;  %v13507_v60 = vld [vmem:[%s14927_s2] ss:$0 sm:$0xff] }
 0x29d   : > { %v1184_v4 = vpop.f32.mrb[89].mxu0  ;;  %vm1240_vm3 = vcmp.eq.s32.totalorder %v12899_v58, %v1219_v42  ;;  %vm1239_vm7 = vcmp.eq.s32.totalorder %v12891_v55, %v1219_v42 }
 0x29e   : > { %v10956_v29 = vpop.f32.mrb[90].mxu0 }
 0x29f   : > { %v1324_v15 = vpack.c.bf16 %v10956_v29, %v10955_v14  ;;  %v1187_v21 = vpop.f32.mrb[91].mxu0  ;;  %10236 = vmatpush3.bf16.msra.mxu1 %v1314_v12  ;;  %v12352_v12 = vld [vmem:[#allocation2 + $0x54] sm:$0xff]  }
 0x2a0   : > { %v1323_v1 = vpack.c.bf16 %v1187_v21, %v1184_v4  ;;  %v13513_v4 = vld [vmem:[%s14927_s2 + $0x1] ss:$0 sm:$0xff]  ;;  %v13520_v21 = vld [vmem:[%s14927_s2 + $0x2] ss:$0 sm:$0xff] }
 0x2a2   : > { %10237 = vmatprep.subr.bf16.mxu1 %v1323_v1 }
 0x2a3   : > { %10238 = vmatpush3.bf16.msra.mxu1 %v1315_v26  ;;  %v15087_v26 = vmov 0 }
 0x2a4   : > { %v10959_v9 = vpop.f32.mrb[92].mxu0  ;;  %10239 = vmatprep.subr.bf16.mxu1 %v1324_v15  ;;  %v15088_v26 = vsel %vm13441_vm8, 4294967295, %v15087_v26 }
 0x2a5   : > { %v1200_v10 = vpop.f32.mrb[93].mxu0 }
 0x2a6   : > { %v10960_v40 = vpop.f32.mrb[94].mxu0 }
 0x2a7   : > { %v1326_v59 = vpack.c.bf16 %v10960_v40, %v10959_v9  ;;  %v1203_v8 = vpop.f32.mrb[95].mxu0  ;;  %10240 = vmatpush3.bf16.msra.mxu1 %v1316_v36  ;;  %v1220_v36 = vadd.s32 1, %v13098_v11 }
 0x2a8   : > { %v1325_v51 = vpack.c.bf16 %v1203_v8, %v1200_v10 }
 0x2a9   : > { %vm1242_vm13 = vcmp.eq.s32.totalorder %v12899_v58, %v1220_v36  ;;  %vm1241_vm1 = vcmp.eq.s32.totalorder %v12891_v55, %v1220_v36 }
 0x2aa   : > { %10241 = vmatprep.subr.bf16.mxu1 %v1325_v51  ;;  %vm9519_vm14 = vmpackc.low %vm1242_vm13, %vm1240_vm3 }
 0x2ab   : > { %10242 = vmatpush3.bf16.msra.mxu1 %v1317_v7  ;;  %v1222_v7 = vadd.s32 1, %v13148_v45  ;;  %vm13455_vm11 = vmpackc.low %vm1241_vm1, %vm1239_vm7  ;;  %vm1250_vm7 = vcmp.eq.s32.totalorder %v12899_v58, %v1224_v18 }
 0x2ac   : > { %10243 = vmatprep.subr.bf16.mxu1 %v1326_v59  ;;  %v15090_v38 = vsel %vm13455_vm11, 4294967295, %v15089_v38 }
 0x2ad   : > { %vm1246_vm9 = vcmp.eq.s32.totalorder %v12899_v58, %v1222_v7  ;;  %vm1245_vm13 = vcmp.eq.s32.totalorder %v12891_v55, %v1222_v7 }
 0x2af   : > { %10244 = vmatpush3.bf16.msra.mxu1 %v1318_v6  ;;  %v1221_v6 = vadd.s32 1, %v13146_v34 }
 0x2b1   : > { %vm1244_vm6 = vcmp.eq.s32.totalorder %v12899_v58, %v1221_v6  ;;  %vm1243_vm3 = vcmp.eq.s32.totalorder %v12891_v55, %v1221_v6 }
 0x2b2   : > { %9514 = vmatmul.mubr.msk.bf16.vlgmr.msra.gmra.mrb[64].mxu1 %vm13423_vm2, %v15037_v27  ;;  %vm13469_vm1 = vmpackc.low %vm1245_vm13, %vm1243_vm3  ;;  %vm1252_vm3 = vcmp.eq.s32.totalorder %v12899_v58, %v1225_v3  ;;  %vm1254_vm13 = vcmp.eq.s32.totalorder %v12899_v58, %v1226_v20 }
 0x2b3   : > { %9516 = vmatprep.mubr.msk.bf16.mxu1 %vm9515_vm12, %v15037_v27  ;;  %vm9523_vm12 = vmpackc.low %vm1246_vm9, %vm1244_vm6  ;;  %v15092_v37 = vsel %vm13469_vm1, 4294967295, %v15091_v37  ;;  %vm1247_vm9 = vcmp.eq.s32.totalorder %v12891_v55, %v1223_v33 }
 0x2ba   : > { %9518 = vmatmul.mubr.msk.bf16.gmra.mrb[68].mxu1 %vm13441_vm8, %v15037_v27 }
 0x2bb   : > { %9520 = vmatprep.mubr.msk.bf16.mxu1 %vm9519_vm14, %v15037_v27  ;;  %vm1248_vm14 = vcmp.eq.s32.totalorder %v12899_v58, %v1223_v33 }
 0x2bc   : > { %vm9527_vm6 = vmpackc.low %vm1250_vm7, %vm1248_vm14  ;;  %vm1251_vm7 = vcmp.eq.s32.totalorder %v12891_v55, %v1225_v3 }
 0x2bd   : > { %vm9531_vm14 = vmpackc.low %vm1254_vm13, %vm1252_vm3  ;;  %vm1262_vm3 = vcmp.eq.s32.totalorder %v12899_v58, %v1230_v39 }
 0x2c2   : > { %9522 = vmatmul.mubr.msk.bf16.gmra.mrb[72].mxu1 %vm13455_vm11, %v15037_v27 }
 0x2c3   : > { %9524 = vmatprep.mubr.msk.bf16.mxu1 %vm9523_vm12, %v15037_v27  ;;  %vm1249_vm12 = vcmp.eq.s32.totalorder %v12891_v55, %v1224_v18 }
 0x2c4   : > { %vm9529_vm15 = vmpackc.low %vm1249_vm12, %vm1247_vm9  ;;  %vm1257_vm9 = vcmp.eq.s32.totalorder %v12891_v55, %v1228_v24  ;;  %vm1260_vm12 = vcmp.eq.s32.totalorder %v12899_v58, %v1229_v41 }
 0x2ca   : > { %9526 = vmatmul.mubr.msk.bf16.gmra.mrb[76].mxu1 %vm13469_vm1, %v15037_v27  ;;  %vm1258_vm1 = vcmp.eq.s32.totalorder %v12899_v58, %v1228_v24 }
 0x2cb   : > { %9528 = vmatprep.mubr.msk.bf16.mxu1 %vm9527_vm6, %v15037_v27  ;;  %vm1253_vm6 = vcmp.eq.s32.totalorder %v12891_v55, %v1226_v20  ;;  %vm9535_vm8 = vmpackc.low %vm1258_vm1, %vm1256_vm10  ;;  %vm1259_vm10 = vcmp.eq.s32.totalorder %v12891_v55, %v1229_v41 }
 0x2cc   : > { %vm9533_vm11 = vmpackc.low %vm1253_vm6, %vm1251_vm7 }
 0x2d2   : > { %9530 = vmatmul.mubr.msk.bf16.gmra.mrb[80].mxu1 %vm9529_vm15, %v15037_v27  ;;  %vm1255_vm15 = vcmp.eq.s32.totalorder %v12891_v55, %v1227_v23 }
 0x2d3   : > { %9532 = vmatprep.mubr.msk.bf16.mxu1 %vm9531_vm14, %v15037_v27  ;;  %vm9537_vm13 = vmpackc.low %vm1257_vm9, %vm1255_vm15 }
 0x2d4   : > { %vm9539_vm14 = vmpackc.low %vm1262_vm3, %vm1260_vm12 }
 0x2da   : > { %9534 = vmatmul.mubr.msk.bf16.gmra.mrb[84].mxu1 %vm9533_vm11, %v15037_v27  ;;  %vm1261_vm11 = vcmp.eq.s32.totalorder %v12891_v55, %v1230_v39 }
 0x2db   : > { %9536 = vmatprep.mubr.msk.bf16.mxu1 %vm9535_vm8, %v15037_v27  ;;  %vm9541_vm1 = vmpackc.low %vm1261_vm11, %vm1259_vm10  ;;  %vm14992_vm8 = vcmask 130048   ;;  %vm15107_vm10 = vnez %v15088_v26  ;;  %vm15108_vm11 = vnez %v15090_v38  ;;  %v12353_v26 = vld [vmem:[#allocation2 + $0x5c] sm:$0xff]  }
 0x2e2   : > { %9538 = vmatmul.mubr.msk.bf16.gmra.mrb[88].mxu1 %vm9537_vm13, %v15037_v27 }
 0x2e3   : > { %9540 = vmatprep.mubr.msk.bf16.mxu1 %vm9539_vm14, %v15037_v27 }
 0x2ea   : > { %9542 = vmatmul.mubr.msk.bf16.gmra.mrb[92].mxu1 %vm9541_vm1, %v15037_v27 }
 0x385   : > { %v10245_v53 = vpop.f32.mrb[64].mxu1 }
 0x386   : > { %v10246_v62 = vpop.f32.mrb[65].mxu1 }
 0x387   : > { %v10247_v31 = vadd.f32 %v10246_v62, %v10245_v53  ;;  %v10248_v58 = vpop.f32.mrb[66].mxu1 }
 0x388   : > { %v10249_v2 = vpop.f32.mrb[67].mxu1 }
 0x389   : > { %v1424_v30 = vadd.f32 %v10247_v31, %v13356_v35  ;;  %v10250_v14 = vadd.f32 %v10249_v2, %v10248_v58 }
 0x38b   : > { %v1445_v29 = vadd.f32 %v13507_v60, %v1424_v30  ;;  %v1425_v15 = vadd.f32 %v10250_v14, %v13359_v32 }
 0x38d   : > { %v1466_v1 = vmul.f32 %v13513_v4, %v1445_v29  ;;  %v1446_v9 = vadd.f32 %v13507_v60, %v1425_v15  ;;  %v10251_v35 = vpop.f32.mrb[68].mxu1 }
 0x38e   : > { %v10252_v10 = vpop.f32.mrb[69].mxu1 }
 0x38f   : > { %v1467_v40 = vmul.f32 %v13513_v4, %v1446_v9  ;;  %v10253_v59 = vadd.f32 %v10252_v10, %v10251_v35  ;;  %v10254_v8 = vpop.f32.mrb[70].mxu1  ;;  %v1487_v51 = vadd.f32 %v13520_v21, %v1466_v1  ;;  %v13526_v42 = vpack.c.bf16 %v1446_v9, %v1445_v29 }
 0x390   : > { %v10255_v32 = vpop.f32.mrb[71].mxu1 }
 0x391   : > { %v1426_v36 = vadd.f32 %v10253_v59, %v13381_v52  ;;  %v10256_v6 = vadd.f32 %v10255_v32, %v10254_v8  ;;  %v1488_v7 = vadd.f32 %v13520_v21, %v1467_v40  ;;  %v1503_v3 = vmax.f32 %v1487_v51, 0.0 }
 0x393   : > { %v1447_v33 = vadd.f32 %v13507_v60, %v1426_v36  ;;  %v1427_v18 = vadd.f32 %v10256_v6, %v13383_v47  ;;  %v1504_v20 = vmax.f32 %v1488_v7, 0.0 }
 0x395   : > { %v1468_v23 = vmul.f32 %v13513_v4, %v1447_v33  ;;  %v1448_v24 = vadd.f32 %v13507_v60, %v1427_v18  ;;  %v10257_v41 = vpop.f32.mrb[72].mxu1  ;;  %v1519_v39 = vpack.c.bf16 %v1504_v20, %v1503_v3 }
 0x396   : > { %v10258_v46 = vpop.f32.mrb[73].mxu1 }
 0x397   : > { %v1489_v53 = vadd.f32 %v13520_v21, %v1468_v23  ;;  %v1469_v52 = vmul.f32 %v13513_v4, %v1448_v24  ;;  %v13536_v62 = vpack.c.bf16 %v1448_v24, %v1447_v33  ;;  %v10259_v31 = vadd.f32 %v10258_v46, %v10257_v41  ;;  %v10260_v58 = vpop.f32.mrb[74].mxu1  ;;  %10963 = vmatprep.mubr.msk.bf16.mxu0 %vm14992_vm8, %v1519_v39 }
 0x398   : > { %v10261_v47 = vpop.f32.mrb[75].mxu1 }
 0x399   : > { %v1490_v2 = vadd.f32 %v13520_v21, %v1469_v52  ;;  %v1428_v30 = vadd.f32 %v10259_v31, %v13385_v44  ;;  %v10262_v14 = vadd.f32 %v10261_v47, %v10260_v58  ;;  %v1505_v29 = vmax.f32 %v1489_v53, 0.0 }
 0x39b   : > { %v1506_v15 = vmax.f32 %v1490_v2, 0.0  ;;  %v1449_v1 = vadd.f32 %v13507_v60, %v1428_v30  ;;  %v1429_v9 = vadd.f32 %v10262_v14, %v13387_v19 }
 0x39d   : > { %v1520_v35 = vpack.c.bf16 %v1506_v15, %v1505_v29  ;;  %v1470_v10 = vmul.f32 %v13513_v4, %v1449_v1  ;;  %v1450_v40 = vadd.f32 %v13507_v60, %v1429_v9  ;;  %v10263_v59 = vpop.f32.mrb[76].mxu1 }
 0x39e   : > { %v10264_v8 = vpop.f32.mrb[77].mxu1 }
 0x39f   : > { %v1471_v51 = vmul.f32 %v13513_v4, %v1450_v40  ;;  %v10265_v32 = vadd.f32 %v10264_v8, %v10263_v59  ;;  %v10266_v36 = vpop.f32.mrb[78].mxu1  ;;  %10964 = vmatmul.mubr.msk.bf16.vlgmr.msra.gmra.mrb[96].mxu0 %vm14992_vm8, %v1520_v35  ;;  %v1491_v44 = vadd.f32 %v13520_v21, %v1470_v10  ;;  %v13548_v6 = vpack.c.bf16 %v1450_v40, %v1449_v1 }
 0x3a0   : > { %v10267_v7 = vpop.f32.mrb[79].mxu1 }
 0x3a1   : > { %v1430_v19 = vadd.f32 %v10265_v32, %v13389_v43  ;;  %v10268_v33 = vadd.f32 %v10267_v7, %v10266_v36  ;;  %v1492_v18 = vadd.f32 %v13520_v21, %v1471_v51  ;;  %v1507_v23 = vmax.f32 %v1491_v44, 0.0 }
 0x3a3   : > { %v1451_v3 = vadd.f32 %v13507_v60, %v1430_v19  ;;  %v1431_v20 = vadd.f32 %v10268_v33, %v13391_v13  ;;  %v1508_v24 = vmax.f32 %v1492_v18, 0.0 }
 0x3a5   : > { %v1472_v41 = vmul.f32 %v13513_v4, %v1451_v3  ;;  %v1452_v39 = vadd.f32 %v13507_v60, %v1431_v20  ;;  %v10269_v46 = vpop.f32.mrb[80].mxu1  ;;  %v1521_v53 = vpack.c.bf16 %v1508_v24, %v1507_v23 }
 0x3a6   : > { %v10270_v52 = vpop.f32.mrb[81].mxu1 }
 0x3a7   : > { %v1473_v31 = vmul.f32 %v13513_v4, %v1452_v39  ;;  %v10271_v58 = vadd.f32 %v10270_v52, %v10269_v46  ;;  %v10272_v43 = vpop.f32.mrb[82].mxu1  ;;  %10967 = vmatprep.mubr.msk.bf16.mxu0 %vm14992_vm8, %v1521_v53  ;;  %v1493_v47 = vadd.f32 %v13520_v21, %v1472_v41  ;;  %v13559_v2 = vpack.c.bf16 %v1452_v39, %v1451_v3 }
 0x3a8   : > { %v10273_v13 = vpop.f32.mrb[83].mxu1 }
 0x3a9   : > { %v1432_v30 = vadd.f32 %v10271_v58, %v13393_v16  ;;  %v10274_v14 = vadd.f32 %v10273_v13, %v10272_v43  ;;  %v1494_v29 = vadd.f32 %v13520_v21, %v1473_v31  ;;  %v1509_v9 = vmax.f32 %v1493_v47, 0.0 }
 0x3ab   : > { %v1453_v15 = vadd.f32 %v13507_v60, %v1432_v30  ;;  %v1433_v1 = vadd.f32 %v10274_v14, %v13395_v50  ;;  %v1510_v35 = vmax.f32 %v1494_v29, 0.0 }
 0x3ad   : > { %v1474_v10 = vmul.f32 %v13513_v4, %v1453_v15  ;;  %v1454_v40 = vadd.f32 %v13507_v60, %v1433_v1  ;;  %v10275_v59 = vpop.f32.mrb[84].mxu1  ;;  %v1522_v8 = vpack.c.bf16 %v1510_v35, %v1509_v9 }
 0x3ae   : > { %v10276_v51 = vpop.f32.mrb[85].mxu1 }
 0x3af   : > { %v1475_v32 = vmul.f32 %v13513_v4, %v1454_v40  ;;  %v10277_v36 = vadd.f32 %v10276_v51, %v10275_v59  ;;  %v10278_v16 = vpop.f32.mrb[86].mxu1  ;;  %10968 = vmatmul.mubr.msk.bf16.gmra.mrb[100].mxu0 %vm14992_vm8, %v1522_v8  ;;  %v1495_v44 = vadd.f32 %v13520_v21, %v1474_v10  ;;  %v13570_v7 = vpack.c.bf16 %v1454_v40, %v1453_v15 }
 0x3b0   : > { %v10279_v50 = vpop.f32.mrb[87].mxu1 }
 0x3b1   : > { %v1434_v19 = vadd.f32 %v10277_v36, %v13397_v22  ;;  %v10280_v33 = vadd.f32 %v10279_v50, %v10278_v16  ;;  %v1496_v18 = vadd.f32 %v13520_v21, %v1475_v32  ;;  %v1511_v23 = vmax.f32 %v1495_v44, 0.0 }
 0x3b3   : > { %v1455_v3 = vadd.f32 %v13507_v60, %v1434_v19  ;;  %v1435_v20 = vadd.f32 %v10280_v33, %v13399_v28  ;;  %v1512_v24 = vmax.f32 %v1496_v18, 0.0 }
 0x3b5   : > { %v1476_v41 = vmul.f32 %v13513_v4, %v1455_v3  ;;  %v1456_v39 = vadd.f32 %v13507_v60, %v1435_v20  ;;  %v10281_v46 = vpop.f32.mrb[88].mxu1  ;;  %v1523_v53 = vpack.c.bf16 %v1512_v24, %v1511_v23 }
 0x3b6   : > { %v10282_v52 = vpop.f32.mrb[89].mxu1 }
 0x3b7   : > { %v1477_v31 = vmul.f32 %v13513_v4, %v1456_v39  ;;  %v10283_v58 = vadd.f32 %v10282_v52, %v10281_v46  ;;  %v10284_v22 = vpop.f32.mrb[90].mxu1  ;;  %10971 = vmatprep.mubr.msk.bf16.mxu0 %vm14992_vm8, %v1523_v53  ;;  %v1497_v43 = vadd.f32 %v13520_v21, %v1476_v41  ;;  %v13581_v47 = vpack.c.bf16 %v1456_v39, %v1455_v3 }
 0x3b8   : > { %v10285_v28 = vpop.f32.mrb[91].mxu1 }
 0x3b9   : > { %v1436_v13 = vadd.f32 %v10283_v58, %v13401_v17  ;;  %v10286_v30 = vadd.f32 %v10285_v28, %v10284_v22  ;;  %v1498_v14 = vadd.f32 %v13520_v21, %v1477_v31  ;;  %v1513_v1 = vmax.f32 %v1497_v43, 0.0  ;;  %v12344_v58 = vld [vmem:[#allocation2 + $0x14] sm:$0xff]   ;;  %v12345_v22 = vld [vmem:[#allocation2 + $0x1c] sm:$0xff]  }
 0x3ba   : > { %10979 = vmatprep.subr.bf16.mxu1 %v12344_v58  ;;  %10997 = vmatprep.subr.bf16.mxu0 %v12345_v22 }
 0x3bb   : > { %v1457_v29 = vadd.f32 %v13507_v60, %v1436_v13  ;;  %v1437_v15 = vadd.f32 %v10286_v30, %v13403_v25  ;;  %v1514_v9 = vmax.f32 %v1498_v14, 0.0  ;;  %10980 = vmatpush3.bf16.msra.mxu1 %v12344_v58  ;;  %10998 = vmatpush3.bf16.msra.mxu0 %v12345_v22  ;;  %v13621_v30 = vld [vmem:[%s14927_s2 + $0x4] ss:$0 sm:$0xff] }
 0x3bd   : > { %v1478_v35 = vmul.f32 %v13513_v4, %v1457_v29  ;;  %v1458_v10 = vadd.f32 %v13507_v60, %v1437_v15  ;;  %v10287_v40 = vpop.f32.mrb[92].mxu1  ;;  %v1524_v59 = vpack.c.bf16 %v1514_v9, %v1513_v1 }
 0x3be   : > { %v10288_v8 = vpop.f32.mrb[93].mxu1 }
 0x3bf   : > { %v1479_v51 = vmul.f32 %v13513_v4, %v1458_v10  ;;  %v10289_v32 = vadd.f32 %v10288_v8, %v10287_v40  ;;  %v10290_v17 = vpop.f32.mrb[94].mxu1  ;;  %10972 = vmatmul.mubr.msk.bf16.gmra.mrb[104].mxu0 %vm14992_vm8, %v1524_v59  ;;  %v1499_v36 = vadd.f32 %v13520_v21, %v1478_v35  ;;  %v13592_v16 = vpack.c.bf16 %v1458_v10, %v1457_v29 }
 0x3c0   : > { %v10291_v25 = vpop.f32.mrb[95].mxu1 }
 0x3c1   : > { %v1438_v44 = vadd.f32 %v10289_v32, %v13405_v49  ;;  %v10292_v50 = vadd.f32 %v10291_v25, %v10290_v17  ;;  %v1500_v19 = vadd.f32 %v13520_v21, %v1479_v51  ;;  %v1515_v3 = vmax.f32 %v1499_v36, 0.0 }
 0x3c3   : > { %v1459_v33 = vadd.f32 %v13507_v60, %v1438_v44  ;;  %v1439_v18 = vadd.f32 %v10292_v50, %v13407_v54  ;;  %v1516_v20 = vmax.f32 %v1500_v19, 0.0 }
 0x3c5   : > { %v1480_v23 = vmul.f32 %v13513_v4, %v1459_v33  ;;  %v1460_v24 = vadd.f32 %v13507_v60, %v1439_v18  ;;  %v1525_v41 = vpack.c.bf16 %v1516_v20, %v1515_v3  ;;  %v12346_v60 = vld [vmem:[#allocation2 + $0x24] sm:$0xff]   ;;  %v13638_v18 = vld [vmem:[#allocation2 + $0x2c] sm:$0xff]  }
 0x3c6   : > { %11063 = vmatprep.subr.bf16.mxu0 %v12346_v60 }
 0x3c7   : > { %v1481_v39 = vmul.f32 %v13513_v4, %v1460_v24  ;;  %10975 = vmatprep.mubr.msk.bf16.mxu0 %vm14992_vm8, %v1525_v41  ;;  %v1501_v49 = vadd.f32 %v13520_v21, %v1480_v23  ;;  %v13603_v46 = vpack.c.bf16 %v1460_v24, %v1459_v33  ;;  %v13610_v4 = vld [vmem:[%s14927_s2 + $0x5] ss:$0 sm:$0xff] }
 0x3c9   : > { %v1502_v53 = vadd.f32 %v13520_v21, %v1481_v39  ;;  %v1517_v52 = vmax.f32 %v1501_v49, 0.0  ;;  %v13615_v21 = vld [vmem:[%s14927_s2 + $0x3] ss:$0 sm:$0xff] }
 0x3cb   : > { %v1518_v31 = vmax.f32 %v1502_v53, 0.0 }
 0x3cd   : > { %v1526_v54 = vpack.c.bf16 %v1518_v31, %v1517_v52 }
 0x3cf   : > { %10976 = vmatmul.mubr.msk.bf16.gmra.mrb[108].mxu0 %vm14992_vm8, %v1526_v54 }
 0x472   : > { %v10965_v43 = vpop.f32.mrb[96].mxu0 }
 0x473   : > { %v1608_v28 = vadd.f32 %v10965_v43, %v13610_v4  ;;  %v1599_v13 = vpop.f32.mrb[97].mxu0 }
 0x474   : > { %v1600_v14 = vadd.f32 %v13610_v4, %v1599_v13  ;;  %v10966_v29 = vpop.f32.mrb[98].mxu0 }
 0x475   : > { %v1669_v15 = vmul.f32 %v13615_v21, %v1608_v28  ;;  %v1611_v1 = vadd.f32 %v10966_v29, %v13610_v4  ;;  %v1602_v9 = vpop.f32.mrb[99].mxu0 }
 0x476   : > { %v1667_v35 = vmul.f32 %v13615_v21, %v1600_v14  ;;  %v1603_v10 = vadd.f32 %v13610_v4, %v1602_v9 }
 0x477   : > { %v1690_v40 = vadd.f32 %v13621_v30, %v1669_v15  ;;  %v1670_v59 = vmul.f32 %v13615_v21, %v1611_v1 }
 0x478   : > { %v1688_v8 = vadd.f32 %v13621_v30, %v1667_v35  ;;  %v1668_v51 = vmul.f32 %v13615_v21, %v1603_v10 }
 0x479   : > { %v1691_v32 = vadd.f32 %v13621_v30, %v1670_v59  ;;  %v1706_v36 = vmax.f32 %v1690_v40, 0.0 }
 0x47a   : > { %v1689_v17 = vadd.f32 %v13621_v30, %v1668_v51  ;;  %v1704_v44 = vmax.f32 %v1688_v8, 0.0 }
 0x47b   : > { %v1707_v25 = vmax.f32 %v1691_v32, 0.0 }
 0x47c   : > { %v1705_v50 = vmax.f32 %v1689_v17, 0.0 }
 0x47d   : > { %v13634_v19 = vpack.c.bf16 %v1707_v25, %v1706_v36 }
 0x47e   : > { %v13636_v33 = vpack.c.bf16 %v1705_v50, %v1704_v44 }
 0x480   : > { %10981 = vmatprep.mubr.msk.bf16.mxu1 %vm14992_vm8, %v13636_v33  ;;  %10999 = vmatprep.mubr.msk.bf16.mxu0 %vm14992_vm8, %v13636_v33 }
 0x481   : > { %10982 = vmatmul.mubr.msk.bf16.vlgmr.msra.gmra.mrb[96].mxu1 %vm14992_vm8, %v13634_v19  ;;  %11000 = vmatmul.mubr.msk.bf16.vlgmr.msra.gmra.mrb[112].mxu0 %vm14992_vm8, %v13634_v19 }
 0x482   : > { %v10969_v3 = vpop.f32.mrb[100].mxu0  ;;  %11064 = vmatpush3.bf16.msra.mxu0 %v12346_v60 }
 0x483   : > { %v1624_v20 = vadd.f32 %v10969_v3, %v13610_v4  ;;  %v1615_v23 = vpop.f32.mrb[101].mxu0  ;;  %11105 = vmatprep.subr.bf16.mxu0 %v13638_v18 }
 0x484   : > { %v1616_v24 = vadd.f32 %v13610_v4, %v1615_v23  ;;  %v10970_v41 = vpop.f32.mrb[102].mxu0 }
 0x485   : > { %v1673_v39 = vmul.f32 %v13615_v21, %v1624_v20  ;;  %v1627_v49 = vadd.f32 %v10970_v41, %v13610_v4  ;;  %v1618_v53 = vpop.f32.mrb[103].mxu0 }
 0x486   : > { %v1671_v52 = vmul.f32 %v13615_v21, %v1616_v24  ;;  %v1619_v31 = vadd.f32 %v13610_v4, %v1618_v53 }
 0x487   : > { %v1694_v54 = vadd.f32 %v13621_v30, %v1673_v39  ;;  %v1674_v58 = vmul.f32 %v13615_v21, %v1627_v49 }
 0x488   : > { %v1692_v22 = vadd.f32 %v13621_v30, %v1671_v52  ;;  %v1672_v60 = vmul.f32 %v13615_v21, %v1619_v31 }
 0x489   : > { %v1695_v43 = vadd.f32 %v13621_v30, %v1674_v58  ;;  %v1710_v13 = vmax.f32 %v1694_v54, 0.0 }
 0x48a   : > { %v1693_v28 = vadd.f32 %v13621_v30, %v1672_v60  ;;  %v1708_v29 = vmax.f32 %v1692_v22, 0.0 }
 0x48b   : > { %v1711_v14 = vmax.f32 %v1695_v43, 0.0 }
 0x48c   : > { %v1709_v15 = vmax.f32 %v1693_v28, 0.0 }
 0x48d   : > { %v13661_v1 = vpack.c.bf16 %v1711_v14, %v1710_v13 }
 0x48e   : > { %v13663_v9 = vpack.c.bf16 %v1709_v15, %v1708_v29 }
 0x490   : > { %10985 = vmatprep.mubr.msk.bf16.mxu1 %vm14992_vm8, %v13663_v9  ;;  %11003 = vmatprep.mubr.msk.bf16.mxu0 %vm14992_vm8, %v13663_v9 }
 0x491   : > { %10986 = vmatmul.mubr.msk.bf16.gmra.mrb[100].mxu1 %vm14992_vm8, %v13661_v1  ;;  %11004 = vmatmul.mubr.msk.bf16.gmra.mrb[116].mxu0 %vm14992_vm8, %v13661_v1 }
 0x492   : > { %v10973_v35 = vpop.f32.mrb[104].mxu0 }
 0x493   : > { %v1640_v10 = vadd.f32 %v10973_v35, %v13610_v4  ;;  %v1631_v40 = vpop.f32.mrb[105].mxu0 }
 0x494   : > { %v1632_v59 = vadd.f32 %v13610_v4, %v1631_v40  ;;  %v10974_v8 = vpop.f32.mrb[106].mxu0 }
 0x495   : > { %v1677_v51 = vmul.f32 %v13615_v21, %v1640_v10  ;;  %v1643_v32 = vadd.f32 %v10974_v8, %v13610_v4  ;;  %v1634_v17 = vpop.f32.mrb[107].mxu0 }
 0x496   : > { %v1675_v36 = vmul.f32 %v13615_v21, %v1632_v59  ;;  %v1635_v25 = vadd.f32 %v13610_v4, %v1634_v17 }
 0x497   : > { %v1698_v44 = vadd.f32 %v13621_v30, %v1677_v51  ;;  %v1678_v50 = vmul.f32 %v13615_v21, %v1643_v32 }
 0x498   : > { %v1696_v3 = vadd.f32 %v13621_v30, %v1675_v36  ;;  %v1676_v20 = vmul.f32 %v13615_v21, %v1635_v25 }
 0x499   : > { %v1699_v23 = vadd.f32 %v13621_v30, %v1678_v50  ;;  %v1714_v41 = vmax.f32 %v1698_v44, 0.0 }
 0x49a   : > { %v1697_v24 = vadd.f32 %v13621_v30, %v1676_v20  ;;  %v1712_v49 = vmax.f32 %v1696_v3, 0.0 }
 0x49b   : > { %v1715_v39 = vmax.f32 %v1699_v23, 0.0 }
 0x49c   : > { %v1713_v53 = vmax.f32 %v1697_v24, 0.0 }
 0x49d   : > { %v1725_v52 = vpack.c.bf16 %v1715_v39, %v1714_v41 }
 0x49e   : > { %v1724_v31 = vpack.c.bf16 %v1713_v53, %v1712_v49 }
 0x4a0   : > { %10989 = vmatprep.mubr.msk.bf16.mxu1 %vm14992_vm8, %v1724_v31  ;;  %11007 = vmatprep.mubr.msk.bf16.mxu0 %vm14992_vm8, %v1724_v31 }
 0x4a1   : > { %10990 = vmatmul.mubr.msk.bf16.gmra.mrb[104].mxu1 %vm14992_vm8, %v1725_v52  ;;  %11008 = vmatmul.mubr.msk.bf16.gmra.mrb[120].mxu0 %vm14992_vm8, %v1725_v52 }
 0x4a2   : > { %v10977_v54 = vpop.f32.mrb[108].mxu0 }
 0x4a3   : > { %v1656_v58 = vadd.f32 %v10977_v54, %v13610_v4  ;;  %v1647_v22 = vpop.f32.mrb[109].mxu0 }
 0x4a4   : > { %v1648_v60 = vadd.f32 %v13610_v4, %v1647_v22  ;;  %v10978_v43 = vpop.f32.mrb[110].mxu0 }
 0x4a5   : > { %v1681_v28 = vmul.f32 %v13615_v21, %v1656_v58  ;;  %v1659_v13 = vadd.f32 %v10978_v43, %v13610_v4  ;;  %v1650_v14 = vpop.f32.mrb[111].mxu0 }
 0x4a6   : > { %v1679_v29 = vmul.f32 %v13615_v21, %v1648_v60  ;;  %v1651_v15 = vadd.f32 %v13610_v4, %v1650_v14  ;;  %v12348_v4 = vld [vmem:[#allocation2 + $0x34] sm:$0xff]   ;;  %v13764_v14 = vadd.s32 2, %v12896_v57 }
 0x4a7   : > { %v1702_v35 = vadd.f32 %v13621_v30, %v1681_v28  ;;  %v1682_v10 = vmul.f32 %v13615_v21, %v1659_v13  ;;  %v13761_v13 = vadd.s32 2, %v12894_v56 }
 0x4a8   : > { %v1700_v40 = vadd.f32 %v13621_v30, %v1679_v29  ;;  %v1680_v59 = vmul.f32 %v13615_v21, %v1651_v15  ;;  %v13767_v29 = vadd.s32 2, %v12919_v0  ;;  %v15093_v15 = vld [vmem:[#allocation21_spill] sm:$0xff]  ;;  %vm2408_vm7 = vcmp.eq.s32.totalorder %v12891_v55, %v13764_v14 }
 0x4a9   : > { %v1703_v8 = vadd.f32 %v13621_v30, %v1682_v10  ;;  %v1718_v32 = vmax.f32 %v1702_v35, 0.0  ;;  %v13770_v35 = vadd.s32 2, %v15093_v15  ;;  %v15094_v10 = vmov 0.0  }
 0x4aa   : > { %v1701_v51 = vadd.f32 %v13621_v30, %v1680_v59  ;;  %v1716_v36 = vmax.f32 %v1700_v40, 0.0  ;;  %v2416_v0 = vsel %vm2408_vm7, 1.0, %v15094_v10  ;;  %vm2409_vm6 = vcmp.eq.s32.totalorder %v12891_v55, %v13767_v29 }
 0x4ab   : > { %v1719_v17 = vmax.f32 %v1703_v8, 0.0  ;;  %vm2410_vm15 = vcmp.eq.s32.totalorder %v12891_v55, %v13770_v35  ;;  %v2417_v8 = vsel %vm2409_vm6, 1.0, %v15094_v10 }
 0x4ac   : > { %v1717_v25 = vmax.f32 %v1701_v51, 0.0  ;;  %v2418_v51 = vsel %vm2410_vm15, 1.0, %v15094_v10 }
 0x4ad   : > { %v1727_v44 = vpack.c.bf16 %v1719_v17, %v1718_v32  ;;  %v13801_v32 = vpack.c.bf16 %v2418_v51, %v2417_v8 }
 0x4ae   : > { %v1726_v50 = vpack.c.bf16 %v1717_v25, %v1716_v36 }
 0x4b0   : > { %10993 = vmatprep.mubr.msk.bf16.mxu1 %vm14992_vm8, %v1726_v50  ;;  %11011 = vmatprep.mubr.msk.bf16.mxu0 %vm14992_vm8, %v1726_v50 }
 0x4b1   : > { %10994 = vmatmul.mubr.msk.bf16.gmra.mrb[108].mxu1 %vm14992_vm8, %v1727_v44  ;;  %11012 = vmatmul.mubr.msk.bf16.gmra.mrb[124].mxu0 %vm14992_vm8, %v1727_v44 }
 0x4b2   : > { %11065 = vmatprep.mubr.msk.bf16.mxu0 %vm14992_vm8, %v13636_v33  ;;  %11031 = vmatprep.mubr.msk.bf16.mxu1 %vm13090_vm4, %v15037_v27 }
 0x4b9   : > { %11066 = vmatmul.mubr.msk.bf16.vlgmr.msra.gmra.mrb[128].mxu0 %vm14992_vm8, %v13634_v19 }
 0x4ba   : > { %11069 = vmatprep.mubr.msk.bf16.mxu0 %vm14992_vm8, %v13663_v9  ;;  %11106 = vmatpush3.bf16.msra.mxu0 %v13638_v18 }
 0x4bb   : > { %11147 = vmatprep.subr.bf16.mxu0 %v12348_v4 }
 0x4c1   : > { %11070 = vmatmul.mubr.msk.bf16.gmra.mrb[132].mxu0 %vm14992_vm8, %v13661_v1 }
 0x4c2   : > { %11073 = vmatprep.mubr.msk.bf16.mxu0 %vm14992_vm8, %v1724_v31 }
 0x4c9   : > { %11074 = vmatmul.mubr.msk.bf16.gmra.mrb[136].mxu0 %vm14992_vm8, %v1725_v52 }
 0x4ca   : > { %11077 = vmatprep.mubr.msk.bf16.mxu0 %vm14992_vm8, %v1726_v50 }
 0x4d1   : > { %11078 = vmatmul.mubr.msk.bf16.gmra.mrb[140].mxu0 %vm14992_vm8, %v1727_v44 }
 0x4d2   : > { %11107 = vmatprep.mubr.msk.bf16.mxu0 %vm14992_vm8, %v13636_v33 }
 0x4d9   : > { %11108 = vmatmul.mubr.msk.bf16.vlgmr.msra.gmra.mrb[144].mxu0 %vm14992_vm8, %v13634_v19 }
 0x4da   : > { %11111 = vmatprep.mubr.msk.bf16.mxu0 %vm14992_vm8, %v13663_v9  ;;  %11148 = vmatpush3.bf16.msra.mxu0 %v12348_v4 }
 0x4e1   : > { %11112 = vmatmul.mubr.msk.bf16.gmra.mrb[148].mxu0 %vm14992_vm8, %v13661_v1 }
 0x4e2   : > { %11115 = vmatprep.mubr.msk.bf16.mxu0 %vm14992_vm8, %v1724_v31 }
 0x4e9   : > { %11116 = vmatmul.mubr.msk.bf16.gmra.mrb[152].mxu0 %vm14992_vm8, %v1725_v52 }
 0x4ea   : > { %11119 = vmatprep.mubr.msk.bf16.mxu0 %vm14992_vm8, %v1726_v50 }
 0x4f1   : > { %11120 = vmatmul.mubr.msk.bf16.gmra.mrb[156].mxu0 %vm14992_vm8, %v1727_v44 }
 0x4f2   : > { %11149 = vmatprep.mubr.msk.bf16.mxu0 %vm14992_vm8, %v13526_v42 }
 0x4f9   : > { %11150 = vmatmul.mubr.msk.bf16.vlgmr.msra.gmra.mrb[160].mxu0 %vm14992_vm8, %v13536_v62 }
 0x4fa   : > { %11153 = vmatprep.mubr.msk.bf16.mxu0 %vm14992_vm8, %v13548_v6 }
 0x501   : > { %11154 = vmatmul.mubr.msk.bf16.gmra.mrb[164].mxu0 %vm14992_vm8, %v13559_v2 }
 0x502   : > { %11157 = vmatprep.mubr.msk.bf16.mxu0 %vm14992_vm8, %v13570_v7 }
 0x509   : > { %11158 = vmatmul.mubr.msk.bf16.gmra.mrb[168].mxu0 %vm14992_vm8, %v13581_v47 }
 0x50a   : > { %11161 = vmatprep.mubr.msk.bf16.mxu0 %vm14992_vm8, %v13592_v16 }
 0x511   : > { %11162 = vmatmul.mubr.msk.bf16.gmra.mrb[172].mxu0 %vm14992_vm8, %v13603_v46  ;;  %vm15111_vm8 = vnez %v15092_v37 }
 0x512   : > { %11199 = vmatprep.mubr.msk.bf16.mxu0 %vm13090_vm4, %v15037_v27  ;;  %vm2407_vm4 = vcmp.eq.s32.totalorder %v12891_v55, %v13761_v13 }
 0x513   : > { %v13780_v40 = vsel %vm2407_vm4, 1.0, %v15094_v10  ;;  %vm13859_vm1 = vmpackc.low %vm2408_vm7, %vm2407_vm4 }
 0x514   : > { %v13791_v59 = vpack.c.bf16 %v2416_v0, %v13780_v40 }
 0x554   : > { %v10983_v21 = vpop.f32.mrb[96].mxu1  ;;  %v11001_v30 = vpop.f32.mrb[112].mxu0 }
 0x555   : > { %v1794_v19 = vpop.f32.mrb[97].mxu1  ;;  %v1907_v33 = vpop.f32.mrb[113].mxu0 }
 0x556   : > { %v10984_v18 = vpop.f32.mrb[98].mxu1  ;;  %v11002_v1 = vpop.f32.mrb[114].mxu0 }
 0x557   : > { %v13752_v9 = vpack.c.bf16 %v10984_v18, %v10983_v21  ;;  %v1971_v3 = vpack.c.bf16 %v11002_v1, %v11001_v30  ;;  %v1797_v20 = vpop.f32.mrb[99].mxu1  ;;  %v1910_v23 = vpop.f32.mrb[115].mxu0 }
 0x558   : > { %v13754_v24 = vpack.c.bf16 %v1797_v20, %v1794_v19  ;;  %v1970_v41 = vpack.c.bf16 %v1910_v23, %v1907_v33 }
 0x55a   : > { %11015 = vmatprep.subr.bf16.mxu1 %v1970_v41 }
 0x55b   : > { %11016 = vmatpush3.bf16.msra.mxu1 %v1970_v41 }
 0x55c   : > { %11017 = vmatprep.subr.bf16.mxu1 %v1971_v3 }
 0x55f   : > { %11018 = vmatpush3.bf16.msra.mxu1 %v1971_v3 }
 0x564   : > { %v10987_v5 = vpop.f32.mrb[100].mxu1  ;;  %v11005_v39 = vpop.f32.mrb[116].mxu0 }
 0x565   : > { %v1810_v49 = vpop.f32.mrb[101].mxu1  ;;  %v1923_v53 = vpop.f32.mrb[117].mxu0 }
 0x566   : > { %v10988_v52 = vpop.f32.mrb[102].mxu1  ;;  %v11006_v31 = vpop.f32.mrb[118].mxu0 }
 0x567   : > { %v13756_v54 = vpack.c.bf16 %v10988_v52, %v10987_v5  ;;  %v1973_v58 = vpack.c.bf16 %v11006_v31, %v11005_v39  ;;  %v1813_v22 = vpop.f32.mrb[103].mxu1  ;;  %v1926_v60 = vpop.f32.mrb[119].mxu0 }
 0x568   : > { %v13758_v43 = vpack.c.bf16 %v1813_v22, %v1810_v49  ;;  %v1972_v28 = vpack.c.bf16 %v1926_v60, %v1923_v53 }
 0x56a   : > { %11019 = vmatprep.subr.bf16.mxu1 %v1972_v28 }
 0x56b   : > { %11020 = vmatpush3.bf16.msra.mxu1 %v1972_v28 }
 0x56c   : > { %11021 = vmatprep.subr.bf16.mxu1 %v1973_v58 }
 0x56f   : > { %11022 = vmatpush3.bf16.msra.mxu1 %v1973_v58 }
 0x574   : > { %v10991_v17 = vpop.f32.mrb[104].mxu1  ;;  %v11009_v36 = vpop.f32.mrb[120].mxu0 }
 0x575   : > { %v1826_v25 = vpop.f32.mrb[105].mxu1  ;;  %v1939_v44 = vpop.f32.mrb[121].mxu0 }
 0x576   : > { %v10992_v50 = vpop.f32.mrb[106].mxu1  ;;  %v11010_v4 = vpop.f32.mrb[122].mxu0 }
 0x577   : > { %v13803_v21 = vpack.c.bf16 %v10992_v50, %v10991_v17  ;;  %v1975_v30 = vpack.c.bf16 %v11010_v4, %v11009_v36  ;;  %v1829_v19 = vpop.f32.mrb[107].mxu1  ;;  %v1942_v33 = vpop.f32.mrb[123].mxu0 }
 0x578   : > { %v1861_v18 = vpack.c.bf16 %v1829_v19, %v1826_v25  ;;  %v1974_v1 = vpack.c.bf16 %v1942_v33, %v1939_v44  ;;  %v15097_v33 = vld [vmem:[#allocation29_spill] sm:$0xff] }
 0x579   : > { %vm15098_vm9 = vnez %v15097_v33 }
 0x57a   : > { %11023 = vmatprep.subr.bf16.mxu1 %v1974_v1 }
 0x57b   : > { %11024 = vmatpush3.bf16.msra.mxu1 %v1974_v1 }
 0x57c   : > { %11025 = vmatprep.subr.bf16.mxu1 %v1975_v30 }
 0x57f   : > { %11026 = vmatpush3.bf16.msra.mxu1 %v1975_v30 }
 0x584   : > { %v10995_v3 = vpop.f32.mrb[108].mxu1  ;;  %v11013_v20 = vpop.f32.mrb[124].mxu0 }
 0x585   : > { %v1842_v23 = vpop.f32.mrb[109].mxu1  ;;  %v1955_v41 = vpop.f32.mrb[125].mxu0 }
 0x586   : > { %v10996_v5 = vpop.f32.mrb[110].mxu1  ;;  %v11014_v39 = vpop.f32.mrb[126].mxu0 }
 0x587   : > { %v1864_v49 = vpack.c.bf16 %v10996_v5, %v10995_v3  ;;  %v1977_v53 = vpack.c.bf16 %v11014_v39, %v11013_v20  ;;  %v1845_v52 = vpop.f32.mrb[111].mxu1  ;;  %v1958_v31 = vpop.f32.mrb[127].mxu0 }
 0x588   : > { %v1863_v58 = vpack.c.bf16 %v1845_v52, %v1842_v23  ;;  %v1976_v22 = vpack.c.bf16 %v1958_v31, %v1955_v41 }
 0x58a   : > { %11027 = vmatprep.subr.bf16.mxu1 %v1976_v22 }
 0x58b   : > { %11028 = vmatpush3.bf16.msra.mxu1 %v1976_v22 }
 0x58c   : > { %11029 = vmatprep.subr.bf16.mxu1 %v1977_v53  ;;  %v11067_v60 = vpop.f32.mrb[128].mxu0 }
 0x58d   : > { %v2150_v28 = vpop.f32.mrb[129].mxu0 }
 0x58e   : > { %v11068_v15 = vpop.f32.mrb[130].mxu0 }
 0x58f   : > { %v2214_v0 = vpack.c.bf16 %v11068_v15, %v11067_v60  ;;  %11030 = vmatpush3.bf16.msra.mxu1 %v1977_v53  ;;  %v2153_v8 = vpop.f32.mrb[131].mxu0 }
 0x590   : > { %v2213_v51 = vpack.c.bf16 %v2153_v8, %v2150_v28  ;;  %11039 = vmatprep.subr.bf16.mxu1 %v13754_v24  ;;  %v15101_v8 = vld [vmem:[#allocation26_spill] sm:$0xff] }
 0x591   : > { %vm15102_vm3 = vnez %v15101_v8 }
 0x592   : > { %11032 = vmatmul.mubr.msk.bf16.vlgmr.msra.gmra.mrb[112].mxu1 %vm13140_vm5, %v15037_v27 }
 0x593   : > { %11040 = vmatpush3.bf16.msra.mxu1 %v13754_v24  ;;  %11035 = vmatprep.mubr.msk.bf16.mxu1 %vm13182_vm0, %v15037_v27  ;;  %v15099_v24 = vld [vmem:[#allocation24_spill] sm:$0xff] }
 0x594   : > { %11041 = vmatprep.subr.bf16.mxu1 %v13752_v9  ;;  %v11071_v25 = vpop.f32.mrb[132].mxu0  ;;  %vm15100_vm12 = vnez %v15099_v24 }
 0x595   : > { %v2166_v44 = vpop.f32.mrb[133].mxu0 }
 0x596   : > { %v11072_v50 = vpop.f32.mrb[134].mxu0 }
 0x597   : > { %v2216_v4 = vpack.c.bf16 %v11072_v50, %v11071_v25  ;;  %11042 = vmatpush3.bf16.msra.mxu1 %v13752_v9  ;;  %v2169_v30 = vpop.f32.mrb[135].mxu0 }
 0x598   : > { %v2215_v19 = vpack.c.bf16 %v2169_v30, %v2166_v44  ;;  %11043 = vmatprep.subr.bf16.mxu1 %v13758_v43 }
 0x59a   : > { %11036 = vmatmul.mubr.msk.bf16.gmra.mrb[116].mxu1 %vm15098_vm9, %v15037_v27 }
 0x59b   : > { %11044 = vmatpush3.bf16.msra.mxu1 %v13758_v43  ;;  %11055 = vmatprep.mubr.msk.bf16.mxu1 %vm15100_vm12, %v15037_v27 }
 0x59c   : > { %11045 = vmatprep.subr.bf16.mxu1 %v13756_v54  ;;  %v11075_v1 = vpop.f32.mrb[136].mxu0 }
 0x59d   : > { %v2182_v3 = vpop.f32.mrb[137].mxu0 }
 0x59e   : > { %v11076_v20 = vpop.f32.mrb[138].mxu0 }
 0x59f   : > { %v2218_v9 = vpack.c.bf16 %v11076_v20, %v11075_v1  ;;  %11046 = vmatpush3.bf16.msra.mxu1 %v13756_v54  ;;  %v2185_v23 = vpop.f32.mrb[139].mxu0  ;;  %v15105_v1 = vld [vmem:[#allocation30_spill] sm:$0xff] }
 0x5a0   : > { %v2217_v41 = vpack.c.bf16 %v2185_v23, %v2182_v3  ;;  %11047 = vmatprep.subr.bf16.mxu1 %v1861_v18  ;;  %vm15106_vm14 = vnez %v15105_v1 }
 0x5a3   : > { %11048 = vmatpush3.bf16.msra.mxu1 %v1861_v18 }
 0x5a4   : > { %11049 = vmatprep.subr.bf16.mxu1 %v13803_v21  ;;  %v11079_v5 = vpop.f32.mrb[140].mxu0 }
 0x5a5   : > { %v2198_v43 = vpop.f32.mrb[141].mxu0 }
 0x5a6   : > { %v11080_v39 = vpop.f32.mrb[142].mxu0 }
 0x5a7   : > { %v2220_v53 = vpack.c.bf16 %v11080_v39, %v11079_v5  ;;  %11050 = vmatpush3.bf16.msra.mxu1 %v13803_v21  ;;  %v2201_v52 = vpop.f32.mrb[143].mxu0  ;;  %v15103_v21 = vld [vmem:[#allocation28_spill] sm:$0xff] }
 0x5a8   : > { %v2219_v31 = vpack.c.bf16 %v2201_v52, %v2198_v43  ;;  %11051 = vmatprep.subr.bf16.mxu1 %v1863_v58  ;;  %vm15104_vm13 = vnez %v15103_v21 }
 0x5ab   : > { %11052 = vmatpush3.bf16.msra.mxu1 %v1863_v58 }
 0x5ac   : > { %11053 = vmatprep.subr.bf16.mxu1 %v1864_v49  ;;  %v11109_v22 = vpop.f32.mrb[144].mxu0 }
 0x5ad   : > { %v2336_v60 = vpop.f32.mrb[145].mxu0 }
 0x5ae   : > { %v11110_v54 = vpop.f32.mrb[146].mxu0 }
 0x5af   : > { %v2428_v28 = vpack.c.bf16 %v11110_v54, %v11109_v22  ;;  %11054 = vmatpush3.bf16.msra.mxu1 %v1864_v49  ;;  %v2339_v15 = vpop.f32.mrb[147].mxu0 }
 0x5b0   : > { %v2427_v18 = vpack.c.bf16 %v2339_v15, %v2336_v60  ;;  %11081 = vmatprep.subr.bf16.mxu1 %v2213_v51 }
 0x5b2   : > { %11056 = vmatmul.mubr.msk.bf16.vlgmr.msra.gmra.mrb[112].mxu1 %vm15102_vm3, %v15037_v27 }
 0x5b3   : > { %11082 = vmatpush3.bf16.msra.mxu1 %v2213_v51  ;;  %11059 = vmatprep.mubr.msk.bf16.mxu1 %vm15104_vm13, %v15037_v27 }
 0x5b4   : > { %11083 = vmatprep.subr.bf16.mxu1 %v2214_v0  ;;  %v11113_v58 = vpop.f32.mrb[148].mxu0 }
 0x5b5   : > { %v2352_v25 = vpop.f32.mrb[149].mxu0 }
 0x5b6   : > { %v11114_v44 = vpop.f32.mrb[150].mxu0 }
 0x5b7   : > { %v2430_v50 = vpack.c.bf16 %v11114_v44, %v11113_v58  ;;  %11084 = vmatpush3.bf16.msra.mxu1 %v2214_v0  ;;  %v2355_v30 = vpop.f32.mrb[151].mxu0 }
 0x5b8   : > { %v2429_v49 = vpack.c.bf16 %v2355_v30, %v2352_v25  ;;  %11085 = vmatprep.subr.bf16.mxu1 %v2215_v19 }
 0x5ba   : > { %11060 = vmatmul.mubr.msk.bf16.gmra.mrb[116].mxu1 %vm15106_vm14, %v15037_v27 }
 0x5bb   : > { %11086 = vmatpush3.bf16.msra.mxu1 %v2215_v19  ;;  %11097 = vmatprep.mubr.msk.bf16.mxu1 %vm13423_vm2, %v15037_v27 }
 0x5bc   : > { %11087 = vmatprep.subr.bf16.mxu1 %v2216_v4  ;;  %v11117_v51 = vpop.f32.mrb[152].mxu0 }
 0x5bd   : > { %v2368_v3 = vpop.f32.mrb[153].mxu0 }
 0x5be   : > { %v11118_v20 = vpop.f32.mrb[154].mxu0 }
 0x5bf   : > { %v2432_v23 = vpack.c.bf16 %v11118_v20, %v11117_v51  ;;  %11088 = vmatpush3.bf16.msra.mxu1 %v2216_v4  ;;  %v2371_v5 = vpop.f32.mrb[155].mxu0 }
 0x5c0   : > { %v2431_v0 = vpack.c.bf16 %v2371_v5, %v2368_v3  ;;  %11089 = vmatprep.subr.bf16.mxu1 %v2217_v41 }
 0x5c3   : > { %11090 = vmatpush3.bf16.msra.mxu1 %v2217_v41 }
 0x5c4   : > { %11091 = vmatprep.subr.bf16.mxu1 %v2218_v9  ;;  %v11121_v43 = vpop.f32.mrb[156].mxu0 }
 0x5c5   : > { %v2384_v39 = vpop.f32.mrb[157].mxu0 }
 0x5c6   : > { %v11122_v52 = vpop.f32.mrb[158].mxu0 }
 0x5c7   : > { %v2434_v22 = vpack.c.bf16 %v11122_v52, %v11121_v43  ;;  %11092 = vmatpush3.bf16.msra.mxu1 %v2218_v9  ;;  %v2387_v19 = vpop.f32.mrb[159].mxu0 }
 0x5c8   : > { %v2433_v60 = vpack.c.bf16 %v2387_v19, %v2384_v39  ;;  %11093 = vmatprep.subr.bf16.mxu1 %v2219_v31 }
 0x5cb   : > { %11094 = vmatpush3.bf16.msra.mxu1 %v2219_v31 }
 0x5cc   : > { %11095 = vmatprep.subr.bf16.mxu1 %v2220_v53  ;;  %v11151_v54 = vpop.f32.mrb[160].mxu0 }
 0x5cd   : > { %v2595_v15 = vpop.f32.mrb[161].mxu0 }
 0x5ce   : > { %v11152_v58 = vpop.f32.mrb[162].mxu0 }
 0x5cf   : > { %v13839_v25 = vpack.c.bf16 %v11152_v58, %v11151_v54  ;;  %11096 = vmatpush3.bf16.msra.mxu1 %v2220_v53  ;;  %v2598_v4 = vpop.f32.mrb[163].mxu0  ;;  %v12349_v58 = vld [vmem:[#allocation2 + $0x3c] sm:$0xff]  }
 0x5d0   : > { %v13841_v44 = vpack.c.bf16 %v2598_v4, %v2595_v15  ;;  %11123 = vmatprep.subr.bf16.mxu1 %v2427_v18  ;;  %v2403_v15 = vadd.s32 2, %v13082_v63  ;;  %v15114_v63 = vmov 0 }
 0x5d2   : > { %11098 = vmatmul.mubr.msk.bf16.vlgmr.msra.gmra.mrb[112].mxu1 %vm15107_vm10, %v15037_v27  ;;  %vm2411_vm4 = vcmp.eq.s32.totalorder %v12891_v55, %v2403_v15 }
 0x5d3   : > { %11124 = vmatpush3.bf16.msra.mxu1 %v2427_v18  ;;  %11101 = vmatprep.mubr.msk.bf16.mxu1 %vm15108_vm11, %v15037_v27  ;;  %v15109_v18 = vmov 0 }
 0x5d4   : > { %11125 = vmatprep.subr.bf16.mxu1 %v2428_v28  ;;  %v11155_v9 = vpop.f32.mrb[164].mxu0  ;;  %v15110_v18 = vsel %vm13859_vm1, 4294967295, %v15109_v18 }
 0x5d5   : > { %v2611_v41 = vpop.f32.mrb[165].mxu0 }
 0x5d6   : > { %v11156_v31 = vpop.f32.mrb[166].mxu0 }
 0x5d7   : > { %v13849_v30 = vpack.c.bf16 %v11156_v31, %v11155_v9  ;;  %11126 = vmatpush3.bf16.msra.mxu1 %v2428_v28  ;;  %v2614_v53 = vpop.f32.mrb[167].mxu0 }
 0x5d8   : > { %v13851_v51 = vpack.c.bf16 %v2614_v53, %v2611_v41  ;;  %11127 = vmatprep.subr.bf16.mxu1 %v2429_v49 }
 0x5da   : > { %11102 = vmatmul.mubr.msk.bf16.gmra.mrb[116].mxu1 %vm15111_vm8, %v15037_v27 }
 0x5db   : > { %11128 = vmatpush3.bf16.msra.mxu1 %v2429_v49  ;;  %11139 = vmatprep.mubr.msk.bf16.mxu1 %vm13859_vm1, %v15037_v27  ;;  %vm13887_vm1 = vmpackc.low %vm2410_vm15, %vm2409_vm6 }
 0x5dc   : > { %11129 = vmatprep.subr.bf16.mxu1 %v2430_v50  ;;  %v11159_v28 = vpop.f32.mrb[168].mxu0 }
 0x5dd   : > { %v2627_v3 = vpop.f32.mrb[169].mxu0 }
 0x5de   : > { %v11160_v13 = vpop.f32.mrb[170].mxu0 }
 0x5df   : > { %v13869_v20 = vpack.c.bf16 %v11160_v13, %v11159_v28  ;;  %11130 = vmatpush3.bf16.msra.mxu1 %v2430_v50  ;;  %v2630_v14 = vpop.f32.mrb[171].mxu0  ;;  %v2404_v50 = vadd.s32 2, %v13098_v11  ;;  %v2405_v11 = vadd.s32 2, %v13146_v34  ;;  %v15116_v34 = vmov 0 }
 0x5e0   : > { %v13871_v5 = vpack.c.bf16 %v2630_v14, %v2627_v3  ;;  %11131 = vmatprep.subr.bf16.mxu1 %v2431_v0 }
 0x5e1   : > { %vm2412_vm7 = vcmp.eq.s32.totalorder %v12891_v55, %v2404_v50  ;;  %vm2413_vm6 = vcmp.eq.s32.totalorder %v12891_v55, %v2405_v11 }
 0x5e2   : > { %vm13891_vm8 = vmpackc.low %vm2412_vm7, %vm2411_vm4  ;;  %vm15118_vm7 = vcmask 130048  }
 0x5e3   : > { %11132 = vmatpush3.bf16.msra.mxu1 %v2431_v0  ;;  %v15115_v63 = vsel %vm13891_vm8, 4294967295, %v15114_v63  ;;  %v2406_v0 = vadd.s32 2, %v13148_v45  ;;  %v12351_v45 = vld [vmem:[#allocation2 + $0x4c] sm:$0xff]  }
 0x5e4   : > { %11133 = vmatprep.subr.bf16.mxu1 %v2432_v23  ;;  %v11163_v43 = vpop.f32.mrb[172].mxu0 }
 0x5e5   : > { %v2643_v39 = vpop.f32.mrb[173].mxu0  ;;  %vm2414_vm15 = vcmp.eq.s32.totalorder %v12891_v55, %v2406_v0 }
 0x5e6   : > { %v11164_v49 = vpop.f32.mrb[174].mxu0  ;;  %vm13905_vm4 = vmpackc.low %vm2414_vm15, %vm2413_vm6 }
 0x5e7   : > { %v13873_v52 = vpack.c.bf16 %v11164_v49, %v11163_v43  ;;  %11134 = vmatpush3.bf16.msra.mxu1 %v2432_v23  ;;  %v2646_v19 = vpop.f32.mrb[175].mxu0  ;;  %v15112_v23 = vmov 0  ;;  %v15117_v34 = vsel %vm13905_vm4, 4294967295, %v15116_v34 }
 0x5e8   : > { %v13875_v54 = vpack.c.bf16 %v2646_v19, %v2643_v39  ;;  %11135 = vmatprep.subr.bf16.mxu1 %v2433_v60  ;;  %v15113_v23 = vsel %vm13887_vm1, 4294967295, %v15112_v23 }
 0x5eb   : > { %11136 = vmatpush3.bf16.msra.mxu1 %v2433_v60 }
 0x5ec   : > { %11137 = vmatprep.subr.bf16.mxu1 %v2434_v22 }
 0x5ef   : > { %11138 = vmatpush3.bf16.msra.mxu1 %v2434_v22  ;;  %v12350_v22 = vld [vmem:[#allocation2 + $0x44] sm:$0xff]  }
 0x5f0   : > { %11165 = vmatprep.subr.bf16.mxu1 %v12349_v58 }
 0x5f2   : > { %11140 = vmatmul.mubr.msk.bf16.vlgmr.msra.gmra.mrb[112].mxu1 %vm13887_vm1, %v15037_v27  ;;  %vm15120_vm1 = vmmov %vm15118_vm7 }
 0x5f3   : > { %11143 = vmatprep.mubr.msk.bf16.mxu1 %vm13891_vm8, %v15037_v27  ;;  %11166 = vmatpush3.bf16.msra.mxu1 %v12349_v58  ;;  %vm15119_vm8 = vmmov %vm15118_vm7 }
 0x5f4   : > { %11231 = vmatprep.subr.bf16.mxu1 %v12350_v22  ;;  %vm15121_vm6 = vmmov %vm15120_vm1 }
 0x5f5   : > { %vm15122_vm15 = vmmov %vm15120_vm1 }
 0x5f6   : > { %vm15125_vm11 = vmmov %vm15120_vm1 }
 0x5fa   : > { %11144 = vmatmul.mubr.msk.bf16.gmra.mrb[116].mxu1 %vm13905_vm4, %v15037_v27  ;;  %vm15123_vm4 = vmmov %vm15120_vm1 }
 0x5fb   : > { %11167 = vmatprep.mubr.msk.bf16.mxu1 %vm15118_vm7, %v13526_v42  ;;  %vm15124_vm7 = vmmov %vm15120_vm1 }
 0x602   : > { %11168 = vmatmul.mubr.msk.bf16.vlgmr.msra.gmra.mrb[120].mxu1 %vm15119_vm8, %v13536_v62  ;;  %vm15126_vm8 = vmmov %vm15120_vm1 }
 0x603   : > { %11171 = vmatprep.mubr.msk.bf16.mxu1 %vm15120_vm1, %v13548_v6  ;;  %11232 = vmatpush3.bf16.msra.mxu1 %v12350_v22 }
 0x604   : > { %11273 = vmatprep.subr.bf16.mxu1 %v12351_v45 }
 0x60a   : > { %11172 = vmatmul.mubr.msk.bf16.gmra.mrb[124].mxu1 %vm15121_vm6, %v13559_v2  ;;  %vm15127_vm6 = vmmov %vm15120_vm1 }
 0x60b   : > { %11175 = vmatprep.mubr.msk.bf16.mxu1 %vm15122_vm15, %v13570_v7  ;;  %vm15128_vm15 = vmmov %vm15120_vm1 }
 0x612   : > { %11176 = vmatmul.mubr.msk.bf16.gmra.mrb[128].mxu1 %vm15123_vm4, %v13581_v47  ;;  %vm15129_vm4 = vmmov %vm15120_vm1 }
 0x613   : > { %11179 = vmatprep.mubr.msk.bf16.mxu1 %vm15124_vm7, %v13592_v16  ;;  %vm15130_vm7 = vmmov %vm15120_vm1 }
 0x61a   : > { %11180 = vmatmul.mubr.msk.bf16.gmra.mrb[132].mxu1 %vm15125_vm11, %v13603_v46  ;;  %vm15131_vm11 = vmmov %vm15120_vm1 }
 0x61b   : > { %11233 = vmatprep.mubr.msk.bf16.mxu1 %vm15126_vm8, %v13526_v42  ;;  %vm15132_vm8 = vmmov %vm15120_vm1 }
 0x622   : > { %11234 = vmatmul.mubr.msk.bf16.vlgmr.msra.gmra.mrb[136].mxu1 %vm15120_vm1, %v13536_v62 }
 0x623   : > { %11237 = vmatprep.mubr.msk.bf16.mxu1 %vm15127_vm6, %v13548_v6  ;;  %11274 = vmatpush3.bf16.msra.mxu1 %v12351_v45  ;;  %vm15133_vm6 = vmmov %vm15120_vm1 }
 0x624   : > { %11315 = vmatprep.subr.bf16.mxu1 %v12352_v12 }
 0x62a   : > { %11238 = vmatmul.mubr.msk.bf16.gmra.mrb[140].mxu1 %vm15128_vm15, %v13559_v2  ;;  %vm15134_vm15 = vmmov %vm15120_vm1 }
 0x62b   : > { %11241 = vmatprep.mubr.msk.bf16.mxu1 %vm15129_vm4, %v13570_v7  ;;  %vm15135_vm4 = vmmov %vm15120_vm1 }
 0x632   : > { %11242 = vmatmul.mubr.msk.bf16.gmra.mrb[144].mxu1 %vm15130_vm7, %v13581_v47  ;;  %vm15136_vm7 = vmmov %vm15120_vm1 }
 0x633   : > { %11245 = vmatprep.mubr.msk.bf16.mxu1 %vm15131_vm11, %v13592_v16  ;;  %vm15137_vm11 = vmmov %vm15120_vm1 }
 0x63a   : > { %11246 = vmatmul.mubr.msk.bf16.gmra.mrb[148].mxu1 %vm15132_vm8, %v13603_v46  ;;  %vm15138_vm8 = vmmov %vm15120_vm1 }
 0x63b   : > { %11275 = vmatprep.mubr.msk.bf16.mxu1 %vm15120_vm1, %v13526_v42 }
 0x642   : > { %11276 = vmatmul.mubr.msk.bf16.vlgmr.msra.gmra.mrb[152].mxu1 %vm15133_vm6, %v13536_v62  ;;  %vm3675_vm6 = vcmask 523264  }
 0x643   : > { %11279 = vmatprep.mubr.msk.bf16.mxu1 %vm15134_vm15, %v13548_v6  ;;  %11316 = vmatpush3.bf16.msra.mxu1 %v12352_v12 }
 0x644   : > { %11317 = vmatprep.subr.bf16.mxu1 %v12353_v26 }
 0x647   : > { %11318 = vmatpush3.bf16.msra.mxu1 %v12353_v26 }
 0x64a   : > { %11280 = vmatmul.mubr.msk.bf16.gmra.mrb[156].mxu1 %vm15135_vm4, %v13559_v2 }
 0x64b   : > { %11283 = vmatprep.mubr.msk.bf16.mxu1 %vm15136_vm7, %v13570_v7  ;;  %vm15153_vm7 = vcmp.eq.s32.totalorder %v12891_v55, %v13347_v48 }
 0x652   : > { %11284 = vmatmul.mubr.msk.bf16.gmra.mrb[160].mxu1 %vm15137_vm11, %v13581_v47  ;;  %vm15154_vm11 = vcmp.eq.s32.totalorder %v12891_v55, %v13350_v61 }
 0x653   : > { %11287 = vmatprep.mubr.msk.bf16.mxu1 %vm15138_vm8, %v13592_v16  ;;  %vm4717_vm8 = vcmask 392192  }
 0x65a   : > { %11288 = vmatmul.mubr.msk.bf16.gmra.mrb[164].mxu1 %vm15120_vm1, %v13603_v46  ;;  %vm12644_vm1 = vmmov 0  }
 0x6c5   : > { %v13960_v42 = vpop.f32.mrb[112].mxu1 }
 0x6c6   : > { %v13962_v62 = vpop.f32.mrb[113].mxu1 }
 0x6c7   : > { %v13964_v6 = vpop.f32.mrb[114].mxu1 }
 0x6c8   : > { %v13966_v29 = vpop.f32.mrb[115].mxu1 }
 0x6cd   : > { %v13968_v2 = vpop.f32.mrb[116].mxu1 }
 0x6ce   : > { %v13970_v7 = vpop.f32.mrb[117].mxu1 }
 0x6cf   : > { %v13972_v35 = vpop.f32.mrb[118].mxu1 }
 0x6d0   : > { %v13974_v47 = vpop.f32.mrb[119].mxu1 }
 0x6d5   : > { %v11169_v16 = vpop.f32.mrb[120].mxu1 }
 0x6d6   : > { %v2708_v60 = vpop.f32.mrb[121].mxu1 }
 0x6d7   : > { %v11170_v4 = vpop.f32.mrb[122].mxu1 }
 0x6d8   : > { %v2772_v46 = vpack.c.bf16 %v11170_v4, %v11169_v16  ;;  %v2711_v9 = vpop.f32.mrb[123].mxu1 }
 0x6d9   : > { %v2771_v41 = vpack.c.bf16 %v2711_v9, %v2708_v60 }
 0x6db   : > { %11183 = vmatprep.subr.bf16.mxu0 %v2771_v41 }
 0x6dc   : > { %11184 = vmatpush3.bf16.msra.mxu0 %v2771_v41 }
 0x6dd   : > { %v11173_v31 = vpop.f32.mrb[124].mxu1  ;;  %11185 = vmatprep.subr.bf16.mxu0 %v2772_v46 }
 0x6de   : > { %v2724_v53 = vpop.f32.mrb[125].mxu1 }
 0x6df   : > { %v11174_v28 = vpop.f32.mrb[126].mxu1 }
 0x6e0   : > { %v2774_v3 = vpack.c.bf16 %v11174_v28, %v11173_v31  ;;  %v2727_v13 = vpop.f32.mrb[127].mxu1  ;;  %11186 = vmatpush3.bf16.msra.mxu0 %v2772_v46 }
 0x6e1   : > { %v2773_v14 = vpack.c.bf16 %v2727_v13, %v2724_v53 }
 0x6e3   : > { %11187 = vmatprep.subr.bf16.mxu0 %v2773_v14 }
 0x6e4   : > { %11188 = vmatpush3.bf16.msra.mxu0 %v2773_v14 }
 0x6e5   : > { %v11177_v43 = vpop.f32.mrb[128].mxu1  ;;  %11189 = vmatprep.subr.bf16.mxu0 %v2774_v3 }
 0x6e6   : > { %v2740_v39 = vpop.f32.mrb[129].mxu1 }
 0x6e7   : > { %v11178_v49 = vpop.f32.mrb[130].mxu1 }
 0x6e8   : > { %v2776_v19 = vpack.c.bf16 %v11178_v49, %v11177_v43  ;;  %v2743_v15 = vpop.f32.mrb[131].mxu1  ;;  %11190 = vmatpush3.bf16.msra.mxu0 %v2774_v3 }
 0x6e9   : > { %v2775_v50 = vpack.c.bf16 %v2743_v15, %v2740_v39 }
 0x6eb   : > { %11191 = vmatprep.subr.bf16.mxu0 %v2775_v50 }
 0x6ec   : > { %11192 = vmatpush3.bf16.msra.mxu0 %v2775_v50 }
 0x6ed   : > { %v11181_v58 = vpop.f32.mrb[132].mxu1  ;;  %11193 = vmatprep.subr.bf16.mxu0 %v2776_v19 }
 0x6ee   : > { %v2756_v11 = vpop.f32.mrb[133].mxu1 }
 0x6ef   : > { %v11182_v0 = vpop.f32.mrb[134].mxu1 }
 0x6f0   : > { %v2778_v22 = vpack.c.bf16 %v11182_v0, %v11181_v58  ;;  %v2759_v45 = vpop.f32.mrb[135].mxu1  ;;  %11194 = vmatpush3.bf16.msra.mxu0 %v2776_v19 }
 0x6f1   : > { %v2777_v16 = vpack.c.bf16 %v2759_v45, %v2756_v11 }
 0x6f3   : > { %11195 = vmatprep.subr.bf16.mxu0 %v2777_v16 }
 0x6f4   : > { %11196 = vmatpush3.bf16.msra.mxu0 %v2777_v16 }
 0x6f5   : > { %11197 = vmatprep.subr.bf16.mxu0 %v2778_v22  ;;  %v11235_v60 = vpop.f32.mrb[136].mxu1 }
 0x6f6   : > { %v2951_v4 = vpop.f32.mrb[137].mxu1 }
 0x6f7   : > { %v11236_v46 = vpop.f32.mrb[138].mxu1 }
 0x6f8   : > { %v3015_v9 = vpack.c.bf16 %v11236_v46, %v11235_v60  ;;  %11198 = vmatpush3.bf16.msra.mxu0 %v2778_v22  ;;  %v2954_v41 = vpop.f32.mrb[139].mxu1 }
 0x6f9   : > { %v3014_v31 = vpack.c.bf16 %v2954_v41, %v2951_v4  ;;  %11207 = vmatprep.subr.bf16.mxu0 %v13841_v44 }
 0x6fb   : > { %11200 = vmatmul.mubr.msk.bf16.vlgmr.msra.gmra.mrb[176].mxu0 %vm13140_vm5, %v15037_v27  ;;  %vm15140_vm5 = vnez %v15092_v37  ;;  %v9695_v37 = vld [vmem:[%s14927_s2 + $0x7] ss:$0 sm:$0xff] }
 0x6fc   : > { %11208 = vmatpush3.bf16.msra.mxu0 %v13841_v44  ;;  %11203 = vmatprep.mubr.msk.bf16.mxu0 %vm13182_vm0, %v15037_v27  ;;  %vm15139_vm0 = vnez %v15090_v38  ;;  %v9626_v38 = vld [vmem:[%s14927_s2 + $0x6] ss:$0 sm:$0xff] }
 0x6fd   : > { %11209 = vmatprep.subr.bf16.mxu0 %v13839_v25  ;;  %v11239_v53 = vpop.f32.mrb[140].mxu1 }
 0x6fe   : > { %v2967_v28 = vpop.f32.mrb[141].mxu1 }
 0x6ff   : > { %v11240_v3 = vpop.f32.mrb[142].mxu1 }
 0x700   : > { %v3017_v13 = vpack.c.bf16 %v11240_v3, %v11239_v53  ;;  %11210 = vmatpush3.bf16.msra.mxu0 %v13839_v25  ;;  %v2970_v14 = vpop.f32.mrb[143].mxu1 }
 0x701   : > { %v3016_v43 = vpack.c.bf16 %v2970_v14, %v2967_v28  ;;  %11211 = vmatprep.subr.bf16.mxu0 %v13851_v51 }
 0x703   : > { %11204 = vmatmul.mubr.msk.bf16.gmra.mrb[180].mxu0 %vm15098_vm9, %v15037_v27  ;;  %vm15142_vm9 = vnez %v15113_v23  ;;  %v2513_v23 = vadd.f32 %v9626_v38, %v13962_v62  ;;  %v9696_v62 = vld [vmem:[%s14927_s2 + $0x8] ss:$0 sm:$0xff] }
 0x704   : > { %11212 = vmatpush3.bf16.msra.mxu0 %v13851_v51  ;;  %11223 = vmatprep.mubr.msk.bf16.mxu0 %vm15100_vm12, %v15037_v27  ;;  %vm15143_vm12 = vnez %v15115_v63 }
 0x705   : > { %11213 = vmatprep.subr.bf16.mxu0 %v13849_v30  ;;  %v11243_v17 = vpop.f32.mrb[144].mxu1 }
 0x706   : > { %v2983_v36 = vpop.f32.mrb[145].mxu1 }
 0x707   : > { %v11244_v44 = vpop.f32.mrb[146].mxu1 }
 0x708   : > { %v3019_v25 = vpack.c.bf16 %v11244_v44, %v11243_v17  ;;  %11214 = vmatpush3.bf16.msra.mxu0 %v13849_v30  ;;  %v2986_v39 = vpop.f32.mrb[147].mxu1 }
 0x709   : > { %v3018_v49 = vpack.c.bf16 %v2986_v39, %v2983_v36  ;;  %11215 = vmatprep.subr.bf16.mxu0 %v13871_v5 }
 0x70c   : > { %11216 = vmatpush3.bf16.msra.mxu0 %v13871_v5 }
 0x70d   : > { %11217 = vmatprep.subr.bf16.mxu0 %v13869_v20  ;;  %v11247_v33 = vpop.f32.mrb[148].mxu1 }
 0x70e   : > { %v2999_v51 = vpop.f32.mrb[149].mxu1 }
 0x70f   : > { %v11248_v24 = vpop.f32.mrb[150].mxu1 }
 0x710   : > { %v3021_v19 = vpack.c.bf16 %v11248_v24, %v11247_v33  ;;  %11218 = vmatpush3.bf16.msra.mxu0 %v13869_v20  ;;  %v3002_v15 = vpop.f32.mrb[151].mxu1 }
 0x711   : > { %v3020_v50 = vpack.c.bf16 %v3002_v15, %v2999_v51  ;;  %11219 = vmatprep.subr.bf16.mxu0 %v13875_v54  ;;  %v3302_v51 = vmul.f32 0.3, %v2513_v23 }
 0x714   : > { %11220 = vmatpush3.bf16.msra.mxu0 %v13875_v54 }
 0x715   : > { %11221 = vmatprep.subr.bf16.mxu0 %v13873_v52  ;;  %v11277_v30 = vpop.f32.mrb[152].mxu1 }
 0x716   : > { %v3137_v58 = vpop.f32.mrb[153].mxu1 }
 0x717   : > { %v11278_v11 = vpop.f32.mrb[154].mxu1 }
 0x718   : > { %v3201_v5 = vpack.c.bf16 %v11278_v11, %v11277_v30  ;;  %11222 = vmatpush3.bf16.msra.mxu0 %v13873_v52  ;;  %v3140_v0 = vpop.f32.mrb[155].mxu1 }
 0x719   : > { %v3200_v22 = vpack.c.bf16 %v3140_v0, %v3137_v58  ;;  %11249 = vmatprep.subr.bf16.mxu0 %v3014_v31 }
 0x71b   : > { %11224 = vmatmul.mubr.msk.bf16.vlgmr.msra.gmra.mrb[176].mxu0 %vm15102_vm3, %v15037_v27  ;;  %vm15144_vm3 = vnez %v15117_v34 }
 0x71c   : > { %11250 = vmatpush3.bf16.msra.mxu0 %v3014_v31  ;;  %11227 = vmatprep.mubr.msk.bf16.mxu0 %vm15104_vm13, %v15037_v27  ;;  %vm3377_vm13 = vcmask 261120  }
 0x71d   : > { %11251 = vmatprep.subr.bf16.mxu0 %v3015_v9  ;;  %v11281_v20 = vpop.f32.mrb[156].mxu1 }
 0x71e   : > { %v3153_v54 = vpop.f32.mrb[157].mxu1 }
 0x71f   : > { %v11282_v45 = vpop.f32.mrb[158].mxu1 }
 0x720   : > { %v3203_v16 = vpack.c.bf16 %v11282_v45, %v11281_v20  ;;  %11252 = vmatpush3.bf16.msra.mxu0 %v3015_v9  ;;  %v3156_v60 = vpop.f32.mrb[159].mxu1  ;;  %v2518_v20 = vadd.f32 %v9626_v38, %v13974_v47 }
 0x721   : > { %v3202_v52 = vpack.c.bf16 %v3156_v60, %v3153_v54  ;;  %11253 = vmatprep.subr.bf16.mxu0 %v3016_v43 }
 0x723   : > { %11228 = vmatmul.mubr.msk.bf16.gmra.mrb[180].mxu0 %vm15106_vm14, %v15037_v27  ;;  %vm15145_vm14 = vcmp.eq.s32.totalorder %v12891_v55, %v12894_v56 }
 0x724   : > { %11254 = vmatpush3.bf16.msra.mxu0 %v3016_v43  ;;  %11265 = vmatprep.mubr.msk.bf16.mxu0 %vm13423_vm2, %v15037_v27  ;;  %vm15141_vm2 = vnez %v15110_v18  ;;  %v2515_v18 = vadd.f32 %v13960_v42, %v9626_v38  ;;  %v2514_v43 = vadd.f32 %v9626_v38, %v13966_v29  ;;  %v2517_v42 = vadd.f32 %v9626_v38, %v13970_v7 }
 0x725   : > { %11255 = vmatprep.subr.bf16.mxu0 %v3017_v13  ;;  %v11285_v8 = vpop.f32.mrb[160].mxu1 }
 0x726   : > { %v3169_v21 = vpop.f32.mrb[161].mxu1  ;;  %v3304_v44 = vmul.f32 0.3, %v2515_v18 }
 0x727   : > { %v11286_v4 = vpop.f32.mrb[162].mxu1 }
 0x728   : > { %v3205_v46 = vpack.c.bf16 %v11286_v4, %v11285_v8  ;;  %11256 = vmatpush3.bf16.msra.mxu0 %v3017_v13  ;;  %v3172_v41 = vpop.f32.mrb[163].mxu1 }
 0x729   : > { %v3204_v9 = vpack.c.bf16 %v3172_v41, %v3169_v21  ;;  %11257 = vmatprep.subr.bf16.mxu0 %v3018_v49 }
 0x72c   : > { %11258 = vmatpush3.bf16.msra.mxu0 %v3018_v49 }
 0x72d   : > { %11259 = vmatprep.subr.bf16.mxu0 %v3019_v25  ;;  %v11289_v31 = vpop.f32.mrb[164].mxu1 }
 0x72e   : > { %v3185_v53 = vpop.f32.mrb[165].mxu1 }
 0x72f   : > { %v11290_v1 = vpop.f32.mrb[166].mxu1 }
 0x730   : > { %v3207_v28 = vpack.c.bf16 %v11290_v1, %v11289_v31  ;;  %11260 = vmatpush3.bf16.msra.mxu0 %v3019_v25  ;;  %v3188_v3 = vpop.f32.mrb[167].mxu1  ;;  %v2519_v25 = vadd.f32 %v13968_v2, %v9626_v38  ;;  %v9697_v2 = vld [vmem:[%s14927_s2 + $0x9] ss:$0 sm:$0xff] }
 0x731   : > { %v3206_v14 = vpack.c.bf16 %v3188_v3, %v3185_v53  ;;  %11261 = vmatprep.subr.bf16.mxu0 %v3020_v50 }
 0x732   : > { %v3308_v11 = vmul.f32 0.3, %v2519_v25 }
 0x734   : > { %11262 = vmatpush3.bf16.msra.mxu0 %v3020_v50  ;;  %v3303_v50 = vmul.f32 0.3, %v2514_v43 }
 0x735   : > { %11263 = vmatprep.subr.bf16.mxu0 %v3021_v19 }
 0x738   : > { %11264 = vmatpush3.bf16.msra.mxu0 %v3021_v19 }
 0x739   : > { %11291 = vmatprep.subr.bf16.mxu0 %v3200_v22 }
 0x73b   : > { %11266 = vmatmul.mubr.msk.bf16.vlgmr.msra.gmra.mrb[176].mxu0 %vm15107_vm10, %v15037_v27  ;;  %vm15146_vm10 = vcmp.eq.s32.totalorder %v12891_v55, %v12896_v57 }
 0x73c   : > { %11292 = vmatpush3.bf16.msra.mxu0 %v3200_v22  ;;  %11269 = vmatprep.mubr.msk.bf16.mxu0 %vm15139_vm0, %v15037_v27  ;;  %v3306_v22 = vmul.f32 0.3, %v2517_v42  ;;  %vm15156_vm0 = vcmask 130048  }
 0x73d   : > { %11293 = vmatprep.subr.bf16.mxu0 %v3201_v5 }
 0x740   : > { %11294 = vmatpush3.bf16.msra.mxu0 %v3201_v5  ;;  %v2520_v5 = vadd.f32 %v13972_v35, %v9626_v38 }
 0x741   : > { %11295 = vmatprep.subr.bf16.mxu0 %v3202_v52 }
 0x742   : > { %v3309_v53 = vmul.f32 0.3, %v2520_v5 }
 0x743   : > { %11270 = vmatmul.mubr.msk.bf16.gmra.mrb[180].mxu0 %vm15140_vm5, %v15037_v27  ;;  %vm15157_vm5 = vmmov %vm15156_vm0 }
 0x744   : > { %11296 = vmatpush3.bf16.msra.mxu0 %v3202_v52  ;;  %11307 = vmatprep.mubr.msk.bf16.mxu0 %vm15141_vm2, %v15037_v27  ;;  %vm15158_vm2 = vmmov %vm15156_vm0 }
 0x745   : > { %11297 = vmatprep.subr.bf16.mxu0 %v3203_v16 }
 0x748   : > { %11298 = vmatpush3.bf16.msra.mxu0 %v3203_v16 }
 0x749   : > { %11299 = vmatprep.subr.bf16.mxu0 %v3204_v9 }
 0x74c   : > { %11300 = vmatpush3.bf16.msra.mxu0 %v3204_v9 }
 0x74d   : > { %11301 = vmatprep.subr.bf16.mxu0 %v3205_v46 }
 0x750   : > { %11302 = vmatpush3.bf16.msra.mxu0 %v3205_v46 }
 0x751   : > { %11303 = vmatprep.subr.bf16.mxu0 %v3206_v14 }
 0x754   : > { %11304 = vmatpush3.bf16.msra.mxu0 %v3206_v14  ;;  %v3307_v14 = vmul.f32 0.3, %v2518_v20  ;;  %v12357_v20 = vld [vmem:[#allocation2 + $0x7c] sm:$0xff]  }
 0x755   : > { %11305 = vmatprep.subr.bf16.mxu0 %v3207_v28 }
 0x758   : > { %11306 = vmatpush3.bf16.msra.mxu0 %v3207_v28 }
 0x75b   : > { %11308 = vmatmul.mubr.msk.bf16.vlgmr.msra.gmra.mrb[176].mxu0 %vm15142_vm9, %v15037_v27  ;;  %vm15159_vm9 = vmmov %vm15156_vm0 }
 0x75c   : > { %11311 = vmatprep.mubr.msk.bf16.mxu0 %vm15143_vm12, %v15037_v27  ;;  %vm15160_vm12 = vmmov %vm15156_vm0 }
 0x763   : > { %11312 = vmatmul.mubr.msk.bf16.gmra.mrb[180].mxu0 %vm15144_vm3, %v15037_v27  ;;  %v2516_v27 = vadd.f32 %v13964_v6, %v9626_v38  ;;  %vm15161_vm3 = vmmov %vm15156_vm0 }
 0x765   : > { %v3305_v19 = vmul.f32 0.3, %v2516_v27 }
 0x82e   : > { %v11309_v63 = vpop.f32.mrb[176].mxu0 }
 0x82f   : > { %v3288_v34 = vadd.f32 %v11309_v63, %v9695_v37  ;;  %v3242_v13 = vpop.f32.mrb[177].mxu0 }
 0x830   : > { %v3286_v17 = vadd.f32 %v9695_v37, %v3242_v13  ;;  %v11310_v36 = vpop.f32.mrb[178].mxu0 }
 0x831   : > { %v3296_v39 = vmul.f32 2.0, %v3288_v34  ;;  %v3289_v49 = vadd.f32 %v11310_v36, %v9695_v37  ;;  %v3245_v33 = vpop.f32.mrb[179].mxu0 }
 0x832   : > { %v3294_v6 = vmul.f32 2.0, %v3286_v17  ;;  %v3287_v24 = vadd.f32 %v9695_v37, %v3245_v33 }
 0x833   : > { %v3312_v15 = vadd.f32 %v3304_v44, %v3296_v39  ;;  %v3297_v29 = vmul.f32 2.0, %v3289_v49 }
 0x834   : > { %v3310_v30 = vadd.f32 %v3302_v51, %v3294_v6  ;;  %v3295_v58 = vmul.f32 2.0, %v3287_v24 }
 0x835   : > { %v3325_v7 = vmul.f32 %v9696_v62, %v3312_v15  ;;  %v3313_v0 = vadd.f32 %v3305_v19, %v3297_v29 }
 0x836   : > { %v3323_v54 = vmul.f32 %v9696_v62, %v3310_v30  ;;  %v3311_v45 = vadd.f32 %v3303_v50, %v3295_v58  ;;  %v11313_v16 = vpop.f32.mrb[180].mxu0 }
 0x837   : > { %v3338_v60 = vadd.f32 %v9697_v2, %v3325_v7  ;;  %v3326_v52 = vmul.f32 %v9696_v62, %v3313_v0  ;;  %v14057_v8 = vpack.c.bf16 %v3313_v0, %v3312_v15  ;;  %v3292_v21 = vadd.f32 %v11313_v16, %v9695_v37  ;;  %v3258_v4 = vpop.f32.mrb[181].mxu0  ;;  %v12354_v0 = vld [vmem:[#allocation2 + $0x64] sm:$0xff]  }
 0x838   : > { %v3336_v46 = vadd.f32 %v9697_v2, %v3323_v54  ;;  %v3324_v41 = vmul.f32 %v9696_v62, %v3311_v45  ;;  %v14059_v9 = vpack.c.bf16 %v3311_v45, %v3310_v30  ;;  %v3290_v31 = vadd.f32 %v9695_v37, %v3258_v4  ;;  %v11314_v35 = vpop.f32.mrb[182].mxu0  ;;  %11327 = vmatprep.subr.bf16.mxu1 %v12354_v0  ;;  %v9698_v54 = vld [vmem:[%s14927_s2 + $0xc] ss:$0 sm:$0xff]  ;;  %v9705_v16 = vld [vmem:[%s14927_s2 + $0xa] ss:$0 sm:$0xff] }
 0x839   : > { %v3339_v1 = vadd.f32 %v9697_v2, %v3326_v52  ;;  %v3300_v28 = vmul.f32 2.0, %v3292_v21  ;;  %v3293_v3 = vadd.f32 %v11314_v35, %v9695_v37  ;;  %v3261_v47 = vpop.f32.mrb[183].mxu0  ;;  %v3346_v18 = vmax.f32 %v3338_v60, 0.0  ;;  %v9706_v21 = vld [vmem:[%s14927_s2 + $0xb] ss:$0 sm:$0xff] }
 0x83a   : > { %v3337_v12 = vadd.f32 %v9697_v2, %v3324_v41  ;;  %v3298_v26 = vmul.f32 2.0, %v3290_v31  ;;  %v3291_v38 = vadd.f32 %v9695_v37, %v3261_v47  ;;  %v3344_v34 = vmax.f32 %v3336_v46, 0.0 }
 0x83b   : > { %v3347_v23 = vmax.f32 %v3339_v1, 0.0  ;;  %v3316_v63 = vadd.f32 %v3308_v11, %v3300_v28  ;;  %v3301_v27 = vmul.f32 2.0, %v3293_v3 }
 0x83c   : > { %v3345_v13 = vmax.f32 %v3337_v12, 0.0  ;;  %v3314_v43 = vadd.f32 %v3306_v22, %v3298_v26  ;;  %v3299_v17 = vmul.f32 2.0, %v3291_v38  ;;  %v12356_v22 = vld [vmem:[#allocation2 + $0x6c] sm:$0xff]  }
 0x83d   : > { %v3353_v36 = vpack.c.bf16 %v3347_v23, %v3346_v18  ;;  %v3329_v44 = vmul.f32 %v9696_v62, %v3316_v63  ;;  %v3317_v25 = vadd.f32 %v3309_v53, %v3301_v27 }
 0x83e   : > { %v3327_v39 = vmul.f32 %v9696_v62, %v3314_v43  ;;  %v3315_v49 = vadd.f32 %v3307_v14, %v3299_v17  ;;  %v3352_v33 = vpack.c.bf16 %v3345_v13, %v3344_v34 }
 0x83f   : > { %v3342_v51 = vadd.f32 %v9697_v2, %v3329_v44  ;;  %v3330_v42 = vmul.f32 %v9696_v62, %v3317_v25  ;;  %v14061_v6 = vpack.c.bf16 %v3317_v25, %v3316_v63 }
 0x840   : > { %v3340_v37 = vadd.f32 %v9697_v2, %v3327_v39  ;;  %v3328_v24 = vmul.f32 %v9696_v62, %v3315_v49  ;;  %v14063_v19 = vpack.c.bf16 %v3315_v49, %v3314_v43  ;;  %11319 = vmatprep.mubr.msk.bf16.mxu1 %vm3377_vm13, %v3352_v33  ;;  %v12355_v62 = vld [vmem:[#allocation2 + $0x74] sm:$0xff]  }
 0x841   : > { %v3343_v15 = vadd.f32 %v9697_v2, %v3330_v42  ;;  %11320 = vmatmul.mubr.msk.bf16.vlgmr.msra.gmra.mrb[168].mxu1 %vm3377_vm13, %v3353_v36  ;;  %v3350_v50 = vmax.f32 %v3342_v51, 0.0  ;;  %11339 = vmatprep.subr.bf16.mxu0 %v12355_v62 }
 0x842   : > { %v3341_v29 = vadd.f32 %v9697_v2, %v3328_v24  ;;  %v3348_v58 = vmax.f32 %v3340_v37, 0.0  ;;  %11328 = vmatpush3.bf16.msra.mxu1 %v12354_v0  ;;  %11340 = vmatpush3.bf16.msra.mxu0 %v12355_v62  ;;  %v12358_v2 = vld [vmem:[#allocation2 + $0x94] sm:$0xff]   ;;  %v12359_v24 = vld [vmem:[#allocation2 + $0x9c] sm:$0xff]  }
 0x843   : > { %v3351_v30 = vmax.f32 %v3343_v15, 0.0  ;;  %11329 = vmatprep.subr.bf16.mxu1 %v12356_v22  ;;  %11341 = vmatprep.subr.bf16.mxu0 %v12357_v20 }
 0x844   : > { %v3349_v11 = vmax.f32 %v3341_v29, 0.0 }
 0x845   : > { %v3355_v5 = vpack.c.bf16 %v3351_v30, %v3350_v50 }
 0x846   : > { %v3354_v7 = vpack.c.bf16 %v3349_v11, %v3348_v58  ;;  %11330 = vmatpush3.bf16.msra.mxu1 %v12356_v22  ;;  %11342 = vmatpush3.bf16.msra.mxu0 %v12357_v20  ;;  %v12361_v20 = vld [vmem:[#allocation2 + $0xac] sm:$0xff]  }
 0x847   : > { %11399 = vmatprep.subr.bf16.mxu0 %v12358_v2 }
 0x848   : > { %11323 = vmatprep.mubr.msk.bf16.mxu1 %vm3377_vm13, %v3354_v7 }
 0x849   : > { %11324 = vmatmul.mubr.msk.bf16.gmra.mrb[172].mxu1 %vm3377_vm13, %v3355_v5  ;;  %v12360_v5 = vld [vmem:[#allocation2 + $0xa4] sm:$0xff]  }
 0x914   : > { %v11321_v45 = vpop.f32.mrb[168].mxu1 }
 0x915   : > { %v3433_v60 = vadd.f32 %v11321_v45, %v9698_v54  ;;  %v3424_v52 = vpop.f32.mrb[169].mxu1 }
 0x916   : > { %v3425_v4 = vadd.f32 %v9698_v54, %v3424_v52  ;;  %v11322_v46 = vpop.f32.mrb[170].mxu1 }
 0x917   : > { %v3462_v41 = vmul.f32 %v9705_v16, %v3433_v60  ;;  %v3436_v31 = vadd.f32 %v11322_v46, %v9698_v54  ;;  %v3427_v35 = vpop.f32.mrb[171].mxu1 }
 0x918   : > { %v3460_v53 = vmul.f32 %v9705_v16, %v3425_v4  ;;  %v3428_v1 = vadd.f32 %v9698_v54, %v3427_v35 }
 0x919   : > { %v3475_v28 = vadd.f32 %v9706_v21, %v3462_v41  ;;  %v3463_v3 = vmul.f32 %v9705_v16, %v3436_v31 }
 0x91a   : > { %v3473_v47 = vadd.f32 %v9706_v21, %v3460_v53  ;;  %v3461_v14 = vmul.f32 %v9705_v16, %v3428_v1 }
 0x91b   : > { %v3476_v12 = vadd.f32 %v9706_v21, %v3463_v3  ;;  %v3483_v18 = vmax.f32 %v3475_v28, 0.0 }
 0x91c   : > { %v3474_v26 = vadd.f32 %v9706_v21, %v3461_v14  ;;  %v11325_v38 = vpop.f32.mrb[172].mxu1  ;;  %v3481_v34 = vmax.f32 %v3473_v47, 0.0 }
 0x91d   : > { %v3484_v23 = vmax.f32 %v3476_v12, 0.0  ;;  %v3449_v63 = vadd.f32 %v11325_v38, %v9698_v54  ;;  %v3440_v27 = vpop.f32.mrb[173].mxu1 }
 0x91e   : > { %v3482_v13 = vmax.f32 %v3474_v26, 0.0  ;;  %v3441_v43 = vadd.f32 %v9698_v54, %v3440_v27  ;;  %v11326_v17 = vpop.f32.mrb[174].mxu1 }
 0x91f   : > { %v14078_v36 = vpack.c.bf16 %v3484_v23, %v3483_v18  ;;  %v3466_v44 = vmul.f32 %v9705_v16, %v3449_v63  ;;  %v3452_v25 = vadd.f32 %v11326_v17, %v9698_v54  ;;  %v3443_v39 = vpop.f32.mrb[175].mxu1 }
 0x920   : > { %v14080_v49 = vpack.c.bf16 %v3482_v13, %v3481_v34  ;;  %v3464_v33 = vmul.f32 %v9705_v16, %v3441_v43  ;;  %v3444_v51 = vadd.f32 %v9698_v54, %v3443_v39  ;;  %v794_v54 = vsel %vm15146_vm10, 1.0, %v15094_v10  ;;  %v15147_v43 = vld [vmem:[#allocation19_spill] sm:$0xff] }
 0x921   : > { %v3479_v42 = vadd.f32 %v9706_v21, %v3466_v44  ;;  %v3467_v37 = vmul.f32 %v9705_v16, %v3452_v25  ;;  %vm15148_vm15 = vcmp.eq.s32.totalorder %v12891_v55, %v15147_v43  ;;  %v15149_v44 = vld [vmem:[#allocation20_spill] sm:$0xff]  ;;  %vm6903_vm10 = vcmask 654336  }
 0x922   : > { %v3477_v15 = vadd.f32 %v9706_v21, %v3464_v33  ;;  %v3465_v29 = vmul.f32 %v9705_v16, %v3444_v51  ;;  %11331 = vmatprep.mubr.msk.bf16.mxu1 %vm3377_vm13, %v14080_v49  ;;  %11343 = vmatprep.mubr.msk.bf16.mxu0 %vm3377_vm13, %v14080_v49  ;;  %v14139_v17 = vsel %vm15148_vm15, 1.0, %v15094_v10  ;;  %vm15150_vm4 = vcmp.eq.s32.totalorder %v12891_v55, %v15149_v44  ;;  %v12368_v43 = vld [vmem:[#allocation2 + $0xd4] sm:$0xff]   ;;  %v12369_v44 = vld [vmem:[#allocation2 + $0xdc] sm:$0xff]  }
 0x923   : > { %v3480_v50 = vadd.f32 %v9706_v21, %v3467_v37  ;;  %11332 = vmatmul.mubr.msk.bf16.vlgmr.msra.gmra.mrb[176].mxu1 %vm3377_vm13, %v14078_v36  ;;  %11344 = vmatmul.mubr.msk.bf16.vlgmr.msra.gmra.mrb[184].mxu0 %vm3377_vm13, %v14078_v36  ;;  %v3487_v58 = vmax.f32 %v3479_v42, 0.0  ;;  %v533_v25 = vsel %vm15150_vm4, 1.0, %v15094_v10  ;;  %vm15166_vm4 = vcmask 64512  }
 0x924   : > { %v3478_v30 = vadd.f32 %v9706_v21, %v3465_v29  ;;  %11400 = vmatpush3.bf16.msra.mxu0 %v12358_v2  ;;  %v3485_v7 = vmax.f32 %v3477_v15, 0.0  ;;  %v14122_v2 = vsel %vm15145_vm14, 1.0, %v15094_v10  ;;  %v14148_v37 = vpack.c.bf16 %v533_v25, %v14139_v17  ;;  %v15151_v15 = vld [vmem:[#allocation22_spill] sm:$0xff]  ;;  %vm15163_vm14 = vmmov %vm15156_vm0 }
 0x925   : > { %v3488_v11 = vmax.f32 %v3480_v50, 0.0  ;;  %11401 = vmatprep.subr.bf16.mxu0 %v12359_v24  ;;  %v14129_v45 = vpack.c.bf16 %v794_v54, %v14122_v2 }
 0x926   : > { %v3486_v0 = vmax.f32 %v3478_v30, 0.0 }
 0x927   : > { %v14090_v62 = vpack.c.bf16 %v3488_v11, %v3487_v58 }
 0x928   : > { %v14092_v22 = vpack.c.bf16 %v3486_v0, %v3485_v7  ;;  %11402 = vmatpush3.bf16.msra.mxu0 %v12359_v24  ;;  %v12362_v0 = vld [vmem:[#allocation2 + $0x84] sm:$0xff]  }
 0x929   : > { %11423 = vmatprep.subr.bf16.mxu0 %v12360_v5 }
 0x92a   : > { %11335 = vmatprep.mubr.msk.bf16.mxu1 %vm3377_vm13, %v14092_v22  ;;  %11347 = vmatprep.mubr.msk.bf16.mxu0 %vm3377_vm13, %v14092_v22 }
 0x92b   : > { %11336 = vmatmul.mubr.msk.bf16.gmra.mrb[180].mxu1 %vm3377_vm13, %v14090_v62  ;;  %11348 = vmatmul.mubr.msk.bf16.gmra.mrb[188].mxu0 %vm3377_vm13, %v14090_v62 }
 0x92c   : > { %11403 = vmatprep.mubr.msk.bf16.mxu0 %vm3377_vm13, %v14080_v49  ;;  %11359 = vmatprep.mubr.msk.bf16.mxu1 %vm3675_vm6, %v14129_v45 }
 0x933   : > { %11404 = vmatmul.mubr.msk.bf16.vlgmr.msra.gmra.mrb[192].mxu0 %vm3377_vm13, %v14078_v36 }
 0x934   : > { %11407 = vmatprep.mubr.msk.bf16.mxu0 %vm3377_vm13, %v14092_v22  ;;  %11424 = vmatpush3.bf16.msra.mxu0 %v12360_v5 }
 0x935   : > { %11425 = vmatprep.subr.bf16.mxu0 %v12361_v20 }
 0x938   : > { %11426 = vmatpush3.bf16.msra.mxu0 %v12361_v20 }
 0x93b   : > { %11408 = vmatmul.mubr.msk.bf16.gmra.mrb[196].mxu0 %vm3377_vm13, %v14090_v62 }
 0x93c   : > { %11427 = vmatprep.mubr.msk.bf16.mxu0 %vm3377_vm13, %v14059_v9 }
 0x943   : > { %11428 = vmatmul.mubr.msk.bf16.vlgmr.msra.gmra.mrb[200].mxu0 %vm3377_vm13, %v14057_v8 }
 0x944   : > { %11431 = vmatprep.mubr.msk.bf16.mxu0 %vm3377_vm13, %v14063_v19 }
 0x94b   : > { %11432 = vmatmul.mubr.msk.bf16.gmra.mrb[204].mxu0 %vm3377_vm13, %v14061_v6 }
 0x94c   : > { %11455 = vmatprep.mubr.msk.bf16.mxu0 %vm3675_vm6, %v14129_v45 }
 0x9f6   : > { %v11333_v16 = vpop.f32.mrb[176].mxu1  ;;  %v11345_v60 = vpop.f32.mrb[184].mxu0 }
 0x9f7   : > { %v3555_v52 = vpop.f32.mrb[177].mxu1  ;;  %v3640_v21 = vpop.f32.mrb[185].mxu0 }
 0x9f8   : > { %v11334_v4 = vpop.f32.mrb[178].mxu1  ;;  %v11346_v46 = vpop.f32.mrb[186].mxu0 }
 0x9f9   : > { %v3587_v41 = vpack.c.bf16 %v11334_v4, %v11333_v16  ;;  %v3672_v31 = vpack.c.bf16 %v11346_v46, %v11345_v60  ;;  %v3558_v57 = vpop.f32.mrb[179].mxu1  ;;  %v3643_v35 = vpop.f32.mrb[187].mxu0  ;;  %v15152_v4 = vld [vmem:[#allocation23_spill] sm:$0xff] }
 0x9fa   : > { %v3586_v53 = vpack.c.bf16 %v3558_v57, %v3555_v52  ;;  %v3671_v1 = vpack.c.bf16 %v3643_v35, %v3640_v21  ;;  %v12363_v21 = vld [vmem:[#allocation2 + $0x8c] sm:$0xff]  }
 0x9fc   : > { %11351 = vmatprep.subr.bf16.mxu1 %v3671_v1 }
 0x9fd   : > { %11352 = vmatpush3.bf16.msra.mxu1 %v3671_v1  ;;  %v1265_v1 = vsel %vm15154_vm11, 1.0, %v15094_v10 }
 0x9fe   : > { %v11337_v28 = vpop.f32.mrb[180].mxu1  ;;  %v11349_v3 = vpop.f32.mrb[188].mxu0  ;;  %11353 = vmatprep.subr.bf16.mxu1 %v3672_v31 }
 0x9ff   : > { %v3571_v47 = vpop.f32.mrb[181].mxu1  ;;  %v3656_v14 = vpop.f32.mrb[189].mxu0 }
 0xa00   : > { %v11338_v12 = vpop.f32.mrb[182].mxu1  ;;  %v11350_v26 = vpop.f32.mrb[190].mxu0 }
 0xa01   : > { %v3589_v38 = vpack.c.bf16 %v11338_v12, %v11337_v28  ;;  %v3674_v18 = vpack.c.bf16 %v11350_v26, %v11349_v3  ;;  %v3574_v23 = vpop.f32.mrb[183].mxu1  ;;  %v3659_v63 = vpop.f32.mrb[191].mxu0  ;;  %11354 = vmatpush3.bf16.msra.mxu1 %v3672_v31 }
 0xa02   : > { %v3588_v27 = vpack.c.bf16 %v3574_v23, %v3571_v47  ;;  %v3673_v34 = vpack.c.bf16 %v3659_v63, %v3656_v14  ;;  %v15155_v23 = vld [vmem:[#allocation8_spill] sm:$0xff] }
 0xa03   : > { %v12364_v63 = vld [vmem:[#allocation2 + $0xb4] sm:$0xff]  }
 0xa04   : > { %11355 = vmatprep.subr.bf16.mxu1 %v3673_v34 }
 0xa05   : > { %11356 = vmatpush3.bf16.msra.mxu1 %v3673_v34  ;;  %v12366_v34 = vld [vmem:[#allocation2 + $0xc4] sm:$0xff]  }
 0xa06   : > { %11357 = vmatprep.subr.bf16.mxu1 %v3674_v18  ;;  %v11405_v13 = vpop.f32.mrb[192].mxu0 }
 0xa07   : > { %v3980_v39 = vpop.f32.mrb[193].mxu0 }
 0xa08   : > { %v11406_v33 = vpop.f32.mrb[194].mxu0 }
 0xa09   : > { %v14145_v51 = vpack.c.bf16 %v11406_v33, %v11405_v13  ;;  %11358 = vmatpush3.bf16.msra.mxu1 %v3674_v18  ;;  %v3983_v42 = vpop.f32.mrb[195].mxu0  ;;  %v12367_v13 = vld [vmem:[#allocation2 + $0xcc] sm:$0xff]  }
 0xa0a   : > { %v14150_v24 = vpack.c.bf16 %v3983_v42, %v3980_v39  ;;  %11363 = vmatprep.subr.bf16.mxu1 %v3586_v53 }
 0xa0c   : > { %11360 = vmatmul.mubr.msk.bf16.vlgmr.msra.gmra.mrb[184].mxu1 %vm3675_vm6, %v15151_v15 }
 0xa0d   : > { %11364 = vmatpush3.bf16.msra.mxu1 %v3586_v53  ;;  %11371 = vmatprep.mubr.msk.bf16.mxu1 %vm3675_vm6, %v14148_v37 }
 0xa0e   : > { %11365 = vmatprep.subr.bf16.mxu1 %v3587_v41  ;;  %v11409_v29 = vpop.f32.mrb[196].mxu0 }
 0xa0f   : > { %v3996_v50 = vpop.f32.mrb[197].mxu0 }
 0xa10   : > { %v11410_v30 = vpop.f32.mrb[198].mxu0 }
 0xa11   : > { %v14156_v58 = vpack.c.bf16 %v11410_v30, %v11409_v29  ;;  %11366 = vmatpush3.bf16.msra.mxu1 %v3587_v41  ;;  %v3999_v11 = vpop.f32.mrb[199].mxu0 }
 0xa12   : > { %v4013_v5 = vpack.c.bf16 %v3999_v11, %v3996_v50  ;;  %11367 = vmatprep.subr.bf16.mxu1 %v3588_v27 }
 0xa15   : > { %11368 = vmatpush3.bf16.msra.mxu1 %v3588_v27  ;;  %v12365_v27 = vld [vmem:[#allocation2 + $0xbc] sm:$0xff]  }
 0xa16   : > { %11369 = vmatprep.subr.bf16.mxu1 %v3589_v38  ;;  %v11429_v7 = vpop.f32.mrb[200].mxu0 }
 0xa17   : > { %v4149_v20 = vpop.f32.mrb[201].mxu0 }
 0xa18   : > { %v11430_v54 = vpop.f32.mrb[202].mxu0 }
 0xa19   : > { %v14158_v16 = vpack.c.bf16 %v11430_v54, %v11429_v7  ;;  %11370 = vmatpush3.bf16.msra.mxu1 %v3589_v38  ;;  %v4152_v60 = vpop.f32.mrb[203].mxu0 }
 0xa1a   : > { %v14160_v52 = vpack.c.bf16 %v4152_v60, %v4149_v20  ;;  %11375 = vmatprep.subr.bf16.mxu1 %v12362_v0 }
 0xa1c   : > { %11372 = vmatmul.mubr.msk.bf16.vlgmr.msra.gmra.mrb[184].mxu1 %vm3675_vm6, %v15152_v4 }
 0xa1d   : > { %11376 = vmatpush3.bf16.msra.mxu1 %v12362_v0  ;;  %11379 = vmatprep.mubr.msk.bf16.mxu1 %vm3377_vm13, %v14080_v49  ;;  %v14180_v49 = vsel %vm15153_vm7, 1.0, %v15094_v10  ;;  %vm15167_vm7 = vmmov %vm15166_vm4 }
 0xa1e   : > { %v11433_v46 = vpop.f32.mrb[204].mxu0  ;;  %11377 = vmatprep.subr.bf16.mxu1 %v12363_v21  ;;  %v14187_v28 = vpack.c.bf16 %v1265_v1, %v14180_v49 }
 0xa1f   : > { %v4165_v41 = vpop.f32.mrb[205].mxu0 }
 0xa20   : > { %v11434_v31 = vpop.f32.mrb[206].mxu0 }
 0xa21   : > { %v14166_v57 = vpack.c.bf16 %v11434_v31, %v11433_v46  ;;  %11378 = vmatpush3.bf16.msra.mxu1 %v12363_v21  ;;  %v4168_v35 = vpop.f32.mrb[207].mxu0 }
 0xa22   : > { %v14168_v53 = vpack.c.bf16 %v4168_v35, %v4165_v41 }
 0xa24   : > { %11380 = vmatmul.mubr.msk.bf16.vlgmr.msra.gmra.mrb[188].mxu1 %vm3377_vm13, %v14078_v36 }
 0xa25   : > { %11383 = vmatprep.mubr.msk.bf16.mxu1 %vm3377_vm13, %v14092_v22 }
 0xa2c   : > { %11384 = vmatmul.mubr.msk.bf16.gmra.mrb[192].mxu1 %vm3377_vm13, %v14090_v62 }
 0xa2d   : > { %11395 = vmatprep.mubr.msk.bf16.mxu1 %vm3675_vm6, %v14187_v28 }
 0xaf7   : > { %v11381_v36 = vpop.f32.mrb[188].mxu1 }
 0xaf8   : > { %v3836_v22 = vpop.f32.mrb[189].mxu1 }
 0xaf9   : > { %v11382_v62 = vpop.f32.mrb[190].mxu1 }
 0xafa   : > { %v3868_v3 = vpack.c.bf16 %v11382_v62, %v11381_v36  ;;  %v3839_v47 = vpop.f32.mrb[191].mxu1 }
 0xafb   : > { %v3867_v14 = vpack.c.bf16 %v3839_v47, %v3836_v22 }
 0xafd   : > { %11387 = vmatprep.subr.bf16.mxu1 %v3867_v14 }
 0xafe   : > { %11388 = vmatpush3.bf16.msra.mxu1 %v3867_v14 }
 0xaff   : > { %v11385_v48 = vpop.f32.mrb[192].mxu1  ;;  %11389 = vmatprep.subr.bf16.mxu1 %v3868_v3 }
 0xb00   : > { %v3852_v12 = vpop.f32.mrb[193].mxu1 }
 0xb01   : > { %v11386_v26 = vpop.f32.mrb[194].mxu1 }
 0xb02   : > { %v3870_v61 = vpack.c.bf16 %v11386_v26, %v11385_v48  ;;  %v3855_v38 = vpop.f32.mrb[195].mxu1  ;;  %11390 = vmatpush3.bf16.msra.mxu1 %v3868_v3 }
 0xb03   : > { %v3869_v18 = vpack.c.bf16 %v3855_v38, %v3852_v12  ;;  %v9739_v38 = vld [vmem:[%s14927_s2 + $0xd] ss:$0 sm:$0xff] }
 0xb05   : > { %11391 = vmatprep.subr.bf16.mxu1 %v3869_v18 }
 0xb06   : > { %11392 = vmatpush3.bf16.msra.mxu1 %v3869_v18  ;;  %v9772_v18 = vld [vmem:[%s14927_s2 + $0xe] ss:$0 sm:$0xff] }
 0xb07   : > { %11393 = vmatprep.subr.bf16.mxu1 %v3870_v61 }
 0xb0a   : > { %11394 = vmatpush3.bf16.msra.mxu1 %v3870_v61  ;;  %v12372_v61 = vld [vmem:[#allocation2 + $0xf4] sm:$0xff]  }
 0xb0b   : > { %11411 = vmatprep.subr.bf16.mxu1 %v14150_v24 }
 0xb0d   : > { %11396 = vmatmul.mubr.msk.bf16.vlgmr.msra.gmra.mrb[184].mxu1 %vm3675_vm6, %v15155_v23 }
 0xb0e   : > { %11412 = vmatpush3.bf16.msra.mxu1 %v14150_v24  ;;  %11419 = vmatprep.mubr.msk.bf16.mxu1 %vm3675_vm6, %v13791_v59 }
 0xb0f   : > { %11413 = vmatprep.subr.bf16.mxu1 %v14145_v51 }
 0xb12   : > { %11414 = vmatpush3.bf16.msra.mxu1 %v14145_v51 }
 0xb13   : > { %11415 = vmatprep.subr.bf16.mxu1 %v4013_v5 }
 0xb16   : > { %11416 = vmatpush3.bf16.msra.mxu1 %v4013_v5 }
 0xb17   : > { %11417 = vmatprep.subr.bf16.mxu1 %v14156_v58 }
 0xb1a   : > { %11418 = vmatpush3.bf16.msra.mxu1 %v14156_v58 }
 0xb1b   : > { %11435 = vmatprep.subr.bf16.mxu1 %v12364_v63 }
 0xb1d   : > { %11420 = vmatmul.mubr.msk.bf16.vlgmr.msra.gmra.mrb[184].mxu1 %vm3675_vm6, %v13801_v32 }
 0xb1e   : > { %11436 = vmatpush3.bf16.msra.mxu1 %v12364_v63  ;;  %11439 = vmatprep.mubr.msk.bf16.mxu1 %vm3377_vm13, %v14059_v9 }
 0xb1f   : > { %11437 = vmatprep.subr.bf16.mxu1 %v12365_v27 }
 0xb22   : > { %11438 = vmatpush3.bf16.msra.mxu1 %v12365_v27 }
 0xb23   : > { %11471 = vmatprep.subr.bf16.mxu1 %v12366_v34 }
 0xb25   : > { %11440 = vmatmul.mubr.msk.bf16.vlgmr.msra.gmra.mrb[196].mxu1 %vm3377_vm13, %v14057_v8 }
 0xb26   : > { %11443 = vmatprep.mubr.msk.bf16.mxu1 %vm3377_vm13, %v14063_v19  ;;  %11472 = vmatpush3.bf16.msra.mxu1 %v12366_v34 }
 0xb27   : > { %11473 = vmatprep.subr.bf16.mxu1 %v12367_v13 }
 0xb2a   : > { %11474 = vmatpush3.bf16.msra.mxu1 %v12367_v13 }
 0xb2b   : > { %11495 = vmatprep.subr.bf16.mxu1 %v12368_v43 }
 0xb2d   : > { %11444 = vmatmul.mubr.msk.bf16.gmra.mrb[200].mxu1 %vm3377_vm13, %v14061_v6 }
 0xb2e   : > { %11475 = vmatprep.mubr.msk.bf16.mxu1 %vm3377_vm13, %v14059_v9 }
 0xb35   : > { %11476 = vmatmul.mubr.msk.bf16.vlgmr.msra.gmra.mrb[204].mxu1 %vm3377_vm13, %v14057_v8 }
 0xb36   : > { %11479 = vmatprep.mubr.msk.bf16.mxu1 %vm3377_vm13, %v14063_v19  ;;  %11496 = vmatpush3.bf16.msra.mxu1 %v12368_v43 }
 0xb37   : > { %11497 = vmatprep.subr.bf16.mxu1 %v12369_v44 }
 0xb3a   : > { %11498 = vmatpush3.bf16.msra.mxu1 %v12369_v44 }
 0xb3d   : > { %11480 = vmatmul.mubr.msk.bf16.gmra.mrb[208].mxu1 %vm3377_vm13, %v14061_v6 }
 0xb3e   : > { %11499 = vmatprep.mubr.msk.bf16.mxu1 %vm3377_vm13, %v14059_v9 }
 0xb45   : > { %11500 = vmatmul.mubr.msk.bf16.vlgmr.msra.gmra.mrb[212].mxu1 %vm3377_vm13, %v14057_v8 }
 0xb46   : > { %11503 = vmatprep.mubr.msk.bf16.mxu1 %vm3377_vm13, %v14063_v19 }
 0xb4d   : > { %11504 = vmatmul.mubr.msk.bf16.gmra.mrb[216].mxu1 %vm3377_vm13, %v14061_v6 }
 0xbf0   : > { %v14227_v25 = vpop.f32.mrb[184].mxu1 }
 0xbf1   : > { %v14229_v39 = vpop.f32.mrb[185].mxu1 }
 0xbf2   : > { %v14231_v33 = vpop.f32.mrb[186].mxu1 }
 0xbf3   : > { %v14233_v51 = vpop.f32.mrb[187].mxu1  ;;  %v4082_v27 = vadd.f32 %v14231_v33, %v9739_v38 }
 0xbf4   : > { %v4080_v43 = vadd.f32 %v9739_v38, %v14233_v51  ;;  %v9774_v51 = vld [vmem:[%s14927_s2 + $0x10] ss:$0 sm:$0xff] }
 0xbf8   : > { %v11441_v42 = vpop.f32.mrb[196].mxu1 }
 0xbf9   : > { %v4234_v24 = vpop.f32.mrb[197].mxu1 }
 0xbfa   : > { %v11442_v9 = vpop.f32.mrb[198].mxu1 }
 0xbfb   : > { %v4266_v29 = vpack.c.bf16 %v11442_v9, %v11441_v42  ;;  %v4237_v50 = vpop.f32.mrb[199].mxu1 }
 0xbfc   : > { %v4265_v8 = vpack.c.bf16 %v4237_v50, %v4234_v24 }
 0xbfe   : > { %11447 = vmatprep.subr.bf16.mxu0 %v4265_v8 }
 0xbff   : > { %11448 = vmatpush3.bf16.msra.mxu0 %v4265_v8 }
 0xc00   : > { %v11445_v19 = vpop.f32.mrb[200].mxu1  ;;  %11449 = vmatprep.subr.bf16.mxu0 %v4266_v29 }
 0xc01   : > { %v4250_v30 = vpop.f32.mrb[201].mxu1 }
 0xc02   : > { %v11446_v6 = vpop.f32.mrb[202].mxu1 }
 0xc03   : > { %v4268_v58 = vpack.c.bf16 %v11446_v6, %v11445_v19  ;;  %v4253_v11 = vpop.f32.mrb[203].mxu1  ;;  %11450 = vmatpush3.bf16.msra.mxu0 %v4266_v29 }
 0xc04   : > { %v4267_v5 = vpack.c.bf16 %v4253_v11, %v4250_v30  ;;  %v4659_v30 = vmul.f32 0.3, %v4082_v27 }
 0xc06   : > { %11451 = vmatprep.subr.bf16.mxu0 %v4267_v5 }
 0xc07   : > { %11452 = vmatpush3.bf16.msra.mxu0 %v4267_v5 }
 0xc08   : > { %11453 = vmatprep.subr.bf16.mxu0 %v4268_v58  ;;  %v11477_v7 = vpop.f32.mrb[204].mxu1 }
 0xc09   : > { %v4417_v0 = vpop.f32.mrb[205].mxu1 }
 0xc0a   : > { %v11478_v20 = vpop.f32.mrb[206].mxu1 }
 0xc0b   : > { %v4449_v54 = vpack.c.bf16 %v11478_v20, %v11477_v7  ;;  %11454 = vmatpush3.bf16.msra.mxu0 %v4268_v58  ;;  %v4420_v60 = vpop.f32.mrb[207].mxu1  ;;  %v4657_v58 = vmul.f32 0.3, %v4080_v43 }
 0xc0c   : > { %v4448_v21 = vpack.c.bf16 %v4420_v60, %v4417_v0  ;;  %11459 = vmatprep.subr.bf16.mxu0 %v14160_v52 }
 0xc0e   : > { %11456 = vmatmul.mubr.msk.bf16.vlgmr.msra.gmra.mrb[208].mxu0 %vm3675_vm6, %v15151_v15 }
 0xc0f   : > { %11460 = vmatpush3.bf16.msra.mxu0 %v14160_v52  ;;  %11467 = vmatprep.mubr.msk.bf16.mxu0 %vm3675_vm6, %v14148_v37 }
 0xc10   : > { %11461 = vmatprep.subr.bf16.mxu0 %v14158_v16  ;;  %v11481_v46 = vpop.f32.mrb[208].mxu1 }
 0xc11   : > { %v4433_v41 = vpop.f32.mrb[209].mxu1 }
 0xc12   : > { %v11482_v31 = vpop.f32.mrb[210].mxu1 }
 0xc13   : > { %v4451_v35 = vpack.c.bf16 %v11482_v31, %v11481_v46  ;;  %11462 = vmatpush3.bf16.msra.mxu0 %v14158_v16  ;;  %v4436_v1 = vpop.f32.mrb[211].mxu1 }
 0xc14   : > { %v4450_v36 = vpack.c.bf16 %v4436_v1, %v4433_v41  ;;  %11463 = vmatprep.subr.bf16.mxu0 %v14168_v53 }
 0xc17   : > { %11464 = vmatpush3.bf16.msra.mxu0 %v14168_v53 }
 0xc18   : > { %11465 = vmatprep.subr.bf16.mxu0 %v14166_v57  ;;  %v11501_v15 = vpop.f32.mrb[212].mxu1 }
 0xc19   : > { %v4555_v52 = vpop.f32.mrb[213].mxu1 }
 0xc1a   : > { %v11502_v22 = vpop.f32.mrb[214].mxu1 }
 0xc1b   : > { %v4587_v62 = vpack.c.bf16 %v11502_v22, %v11501_v15  ;;  %11466 = vmatpush3.bf16.msra.mxu0 %v14166_v57  ;;  %v4558_v3 = vpop.f32.mrb[215].mxu1  ;;  %v12371_v57 = vld [vmem:[#allocation2 + $0xec] sm:$0xff]  }
 0xc1c   : > { %v4586_v47 = vpack.c.bf16 %v4558_v3, %v4555_v52  ;;  %11483 = vmatprep.subr.bf16.mxu0 %v4448_v21 }
 0xc1e   : > { %11468 = vmatmul.mubr.msk.bf16.vlgmr.msra.gmra.mrb[208].mxu0 %vm3675_vm6, %v15152_v4  ;;  %v12370_v4 = vld [vmem:[#allocation2 + $0xe4] sm:$0xff]  }
 0xc1f   : > { %11484 = vmatpush3.bf16.msra.mxu0 %v4448_v21  ;;  %11491 = vmatprep.mubr.msk.bf16.mxu0 %vm3675_vm6, %v14187_v28 }
 0xc20   : > { %11485 = vmatprep.subr.bf16.mxu0 %v4449_v54  ;;  %v11505_v16 = vpop.f32.mrb[216].mxu1  ;;  %11519 = vmatprep.subr.bf16.mxu1 %v12370_v4 }
 0xc21   : > { %v4571_v53 = vpop.f32.mrb[217].mxu1  ;;  %11520 = vmatpush3.bf16.msra.mxu1 %v12370_v4  ;;  %v9775_v4 = vld [vmem:[%s14927_s2 + $0x13] ss:$0 sm:$0xff] }
 0xc22   : > { %v11506_v14 = vpop.f32.mrb[218].mxu1  ;;  %11521 = vmatprep.subr.bf16.mxu1 %v12371_v57 }
 0xc23   : > { %v4589_v48 = vpack.c.bf16 %v11506_v14, %v11505_v16  ;;  %11486 = vmatpush3.bf16.msra.mxu0 %v4449_v54  ;;  %v4574_v12 = vpop.f32.mrb[219].mxu1  ;;  %v12373_v16 = vld [vmem:[#allocation2 + $0xfc] sm:$0xff]   ;;  %v12375_v14 = vld [vmem:[#allocation2 + $0x104] sm:$0xff]  }
 0xc24   : > { %v4588_v26 = vpack.c.bf16 %v4574_v12, %v4571_v53  ;;  %11487 = vmatprep.subr.bf16.mxu0 %v4450_v36  ;;  %v12374_v53 = vld [vmem:[#allocation2 + $0x114] sm:$0xff]   ;;  %v12377_v12 = vld [vmem:[#allocation2 + $0x10c] sm:$0xff]  }
 0xc25   : > { %11522 = vmatpush3.bf16.msra.mxu1 %v12371_v57 }
 0xc26   : > { %11523 = vmatprep.subr.bf16.mxu1 %v12372_v61 }
 0xc27   : > { %11488 = vmatpush3.bf16.msra.mxu0 %v4450_v36 }
 0xc28   : > { %11489 = vmatprep.subr.bf16.mxu0 %v4451_v35 }
 0xc29   : > { %11524 = vmatpush3.bf16.msra.mxu1 %v12372_v61  ;;  %v9781_v61 = vld [vmem:[%s14927_s2 + $0x11] ss:$0 sm:$0xff] }
 0xc2a   : > { %11529 = vmatprep.subr.bf16.mxu1 %v12373_v16 }
 0xc2b   : > { %11490 = vmatpush3.bf16.msra.mxu0 %v4451_v35 }
 0xc2c   : > { %11507 = vmatprep.subr.bf16.mxu0 %v4586_v47 }
 0xc2e   : > { %11492 = vmatmul.mubr.msk.bf16.vlgmr.msra.gmra.mrb[208].mxu0 %vm3675_vm6, %v15155_v23  ;;  %v4081_v23 = vadd.f32 %v14227_v25, %v9739_v38  ;;  %v9773_v25 = vld [vmem:[%s14927_s2 + $0xf] ss:$0 sm:$0xff] }
 0xc2f   : > { %11508 = vmatpush3.bf16.msra.mxu0 %v4586_v47  ;;  %11515 = vmatprep.mubr.msk.bf16.mxu0 %vm3675_vm6, %v13791_v59 }
 0xc30   : > { %11509 = vmatprep.subr.bf16.mxu0 %v4587_v62  ;;  %v4658_v24 = vmul.f32 0.3, %v4081_v23  ;;  %v9782_v23 = vld [vmem:[%s14927_s2 + $0x12] ss:$0 sm:$0xff] }
 0xc33   : > { %11510 = vmatpush3.bf16.msra.mxu0 %v4587_v62 }
 0xc34   : > { %11511 = vmatprep.subr.bf16.mxu0 %v4588_v26 }
 0xc37   : > { %11512 = vmatpush3.bf16.msra.mxu0 %v4588_v26  ;;  %v12378_v26 = vld [vmem:[#allocation2 + $0x124] sm:$0xff]  }
 0xc38   : > { %11513 = vmatprep.subr.bf16.mxu0 %v4589_v48 }
 0xc3b   : > { %11514 = vmatpush3.bf16.msra.mxu0 %v4589_v48  ;;  %v12376_v48 = vld [vmem:[#allocation2 + $0x11c] sm:$0xff]  }
 0xc3c   : > { %11539 = vmatprep.subr.bf16.mxu0 %v12374_v53 }
 0xc3e   : > { %11516 = vmatmul.mubr.msk.bf16.vlgmr.msra.gmra.mrb[208].mxu0 %vm3675_vm6, %v13801_v32  ;;  %v4079_v32 = vadd.f32 %v9739_v38, %v14229_v39 }
 0xc3f   : > { %11540 = vmatpush3.bf16.msra.mxu0 %v12374_v53 }
 0xc40   : > { %v4656_v8 = vmul.f32 0.3, %v4079_v32  ;;  %11541 = vmatprep.subr.bf16.mxu0 %v12376_v48 }
 0xc43   : > { %11542 = vmatpush3.bf16.msra.mxu0 %v12376_v48 }
 0xc44   : > { %11543 = vmatprep.subr.bf16.mxu0 %v12378_v26 }
 0xc47   : > { %11544 = vmatpush3.bf16.msra.mxu0 %v12378_v26 }
 0xc48   : > { %11557 = vmatprep.subr.bf16.mxu0 %v15094_v10 }
 0xd11   : > { %v11517_v63 = vpop.f32.mrb[208].mxu0 }
 0xd12   : > { %v4650_v34 = vadd.f32 %v11517_v63, %v9772_v18  ;;  %v4624_v13 = vpop.f32.mrb[209].mxu0 }
 0xd13   : > { %v4648_v44 = vadd.f32 %v9772_v18, %v4624_v13  ;;  %v11518_v42 = vpop.f32.mrb[210].mxu0 }
 0xd14   : > { %v4654_v9 = vmul.f32 2.0, %v4650_v34  ;;  %v4651_v29 = vadd.f32 %v11518_v42, %v9772_v18  ;;  %v4627_v50 = vpop.f32.mrb[211].mxu0 }
 0xd15   : > { %v4652_v19 = vmul.f32 2.0, %v4648_v44  ;;  %v4649_v39 = vadd.f32 %v9772_v18, %v4627_v50 }
 0xd16   : > { %v4662_v6 = vadd.f32 %v4658_v24, %v4654_v9  ;;  %v4655_v33 = vmul.f32 2.0, %v4651_v29 }
 0xd17   : > { %v4660_v11 = vadd.f32 %v4656_v8, %v4652_v19  ;;  %v4653_v5 = vmul.f32 2.0, %v4649_v39 }
 0xd18   : > { %v4671_v7 = vmul.f32 %v9773_v25, %v4662_v6  ;;  %v4663_v0 = vadd.f32 %v4659_v30, %v4655_v33 }
 0xd19   : > { %v4669_v20 = vmul.f32 %v9773_v25, %v4660_v11  ;;  %v4661_v54 = vadd.f32 %v4657_v58, %v4653_v5 }
 0xd1a   : > { %v4680_v60 = vadd.f32 %v9774_v51, %v4671_v7  ;;  %v4672_v21 = vmul.f32 %v9773_v25, %v4663_v0  ;;  %v14273_v46 = vpack.c.bf16 %v4663_v0, %v4662_v6 }
 0xd1b   : > { %v4678_v41 = vadd.f32 %v9774_v51, %v4669_v20  ;;  %v4670_v31 = vmul.f32 %v9773_v25, %v4661_v54  ;;  %v14275_v35 = vpack.c.bf16 %v4661_v54, %v4660_v11 }
 0xd1c   : > { %v4681_v1 = vadd.f32 %v9774_v51, %v4672_v21  ;;  %v4684_v15 = vmax.f32 %v4680_v60, 0.0 }
 0xd1d   : > { %v4679_v36 = vadd.f32 %v9774_v51, %v4670_v31  ;;  %v4682_v22 = vmax.f32 %v4678_v41, 0.0 }
 0xd1e   : > { %v4685_v52 = vmax.f32 %v4681_v1, 0.0  ;;  %v12379_v1 = vld [vmem:[#allocation2 + $0x12c] sm:$0xff]  }
 0xd1f   : > { %v4683_v62 = vmax.f32 %v4679_v36, 0.0  ;;  %v12380_v36 = vld [vmem:[#allocation2 + $0x134] sm:$0xff]  }
 0xd20   : > { %v4687_v3 = vpack.c.bf16 %v4685_v52, %v4684_v15  ;;  %v12381_v15 = vld [vmem:[#allocation2 + $0x13c] sm:$0xff]   ;;  %v12382_v52 = vld [vmem:[#allocation2 + $0x144] sm:$0xff]  }
 0xd21   : > { %v4686_v47 = vpack.c.bf16 %v4683_v62, %v4682_v22  ;;  %v12383_v22 = vld [vmem:[#allocation2 + $0x14c] sm:$0xff]   ;;  %v12384_v62 = vld [vmem:[#allocation2 + $0x154] sm:$0xff]  }
 0xd23   : > { %11525 = vmatprep.mubr.msk.bf16.mxu1 %vm4717_vm8, %v4686_v47  ;;  %v12386_v47 = vld [vmem:[#allocation2 + $0x17c] sm:$0xff]  }
 0xd24   : > { %11526 = vmatmul.mubr.msk.bf16.vlgmr.msra.gmra.mrb[220].mxu1 %vm4717_vm8, %v4687_v3  ;;  %v12385_v3 = vld [vmem:[#allocation2 + $0x174] sm:$0xff]  }
 0xd25   : > { %11530 = vmatpush3.bf16.msra.mxu1 %v12373_v16  ;;  %v12387_v16 = vld [vmem:[#allocation2 + $0x184] sm:$0xff]  }
 0xd26   : > { %11531 = vmatprep.subr.bf16.mxu1 %v12375_v14 }
 0xd29   : > { %11532 = vmatpush3.bf16.msra.mxu1 %v12375_v14 }
 0xd2a   : > { %11533 = vmatprep.subr.bf16.mxu1 %v12377_v12 }
 0xd2d   : > { %11534 = vmatpush3.bf16.msra.mxu1 %v12377_v12 }
 0xd2e   : > { %11549 = vmatprep.subr.bf16.mxu1 %v15094_v10 }
 0xdf7   : > { %v11527_v57 = vpop.f32.mrb[220].mxu1 }
 0xdf8   : > { %v4767_v38 = vadd.f32 %v11527_v57, %v9775_v4  ;;  %v4758_v18 = vpop.f32.mrb[221].mxu1 }
 0xdf9   : > { %v4759_v32 = vadd.f32 %v9775_v4, %v4758_v18  ;;  %v11528_v63 = vpop.f32.mrb[222].mxu1 }
 0xdfa   : > { %v4780_v27 = vmul.f32 %v9781_v61, %v4767_v38  ;;  %v4770_v34 = vadd.f32 %v11528_v63, %v9775_v4  ;;  %v4761_v13 = vpop.f32.mrb[223].mxu1 }
 0xdfb   : > { %v4778_v43 = vmul.f32 %v9781_v61, %v4759_v32  ;;  %v4762_v44 = vadd.f32 %v9775_v4, %v4761_v13 }
 0xdfc   : > { %v4789_v42 = vadd.f32 %v9782_v23, %v4780_v27  ;;  %v4781_v24 = vmul.f32 %v9781_v61, %v4770_v34 }
 0xdfd   : > { %v4787_v9 = vadd.f32 %v9782_v23, %v4778_v43  ;;  %v4779_v29 = vmul.f32 %v9781_v61, %v4762_v44 }
 0xdfe   : > { %v4790_v50 = vadd.f32 %v9782_v23, %v4781_v24  ;;  %v4793_v25 = vmax.f32 %v4789_v42, 0.0 }
 0xdff   : > { %v4788_v8 = vadd.f32 %v9782_v23, %v4779_v29  ;;  %v4791_v39 = vmax.f32 %v4787_v9, 0.0 }
 0xe00   : > { %v4794_v19 = vmax.f32 %v4790_v50, 0.0  ;;  %v12388_v50 = vld [vmem:[#allocation2 + $0x15c] sm:$0xff]  }
 0xe01   : > { %v4792_v30 = vmax.f32 %v4788_v8, 0.0  ;;  %v12389_v8 = vld [vmem:[#allocation2 + $0x164] sm:$0xff]  }
 0xe02   : > { %v4796_v6 = vpack.c.bf16 %v4794_v19, %v4793_v25 }
 0xe03   : > { %v4795_v33 = vpack.c.bf16 %v4792_v30, %v4791_v39 }
 0xe05   : > { %11535 = vmatprep.mubr.msk.bf16.mxu1 %vm4717_vm8, %v4795_v33  ;;  %11545 = vmatprep.mubr.msk.bf16.mxu0 %vm4717_vm8, %v4795_v33 }
 0xe06   : > { %11536 = vmatmul.mubr.msk.bf16.vlgmr.msra.gmra.mrb[224].mxu1 %vm4717_vm8, %v4796_v6  ;;  %11546 = vmatmul.mubr.msk.bf16.vlgmr.msra.gmra.mrb[212].mxu0 %vm4717_vm8, %v4796_v6 }
 0xe07   : > { %11553 = vmatprep.mubr.msk.bf16.mxu1 %vm12644_vm1, %v15094_v10  ;;  %11561 = vmatprep.mubr.msk.bf16.mxu0 %vm12644_vm1, %v15094_v10 }
 0xed9   : > { %v11537_v58 = vpop.f32.mrb[224].mxu1  ;;  %v11547_v51 = vpop.f32.mrb[212].mxu0 }
 0xeda   : > { %v4861_v11 = vpop.f32.mrb[225].mxu1  ;;  %v4936_v5 = vpop.f32.mrb[213].mxu0 }
 0xedb   : > { %v11538_v7 = vpop.f32.mrb[226].mxu1  ;;  %v11548_v0 = vpop.f32.mrb[214].mxu0 }
 0xedc   : > { %v4877_v20 = vpack.c.bf16 %v11538_v7, %v11537_v58  ;;  %v4952_v54 = vpack.c.bf16 %v11548_v0, %v11547_v51  ;;  %v4864_v60 = vpop.f32.mrb[227].mxu1  ;;  %v4939_v21 = vpop.f32.mrb[215].mxu0  ;;  %v12391_v51 = vld [vmem:[#allocation2 + $0x18c] sm:$0xff]  }
 0xedd   : > { %v4876_v41 = vpack.c.bf16 %v4864_v60, %v4861_v11  ;;  %v4951_v31 = vpack.c.bf16 %v4939_v21, %v4936_v5  ;;  %v12392_v11 = vld [vmem:[#allocation2 + $0x194] sm:$0xff]   ;;  %v12393_v5 = vld [vmem:[#allocation2 + $0x19c] sm:$0xff]  }
 0xedf   : > { %11550 = vmatpush3.bf16.msra.mxu1 %v4951_v31  ;;  %11558 = vmatpush3.bf16.msra.mxu0 %v4876_v41 }
 0xee0   : > { %11551 = vmatprep.subr.bf16.mxu1 %v15094_v10  ;;  %11559 = vmatprep.subr.bf16.mxu0 %v15094_v10 }
 0xee3   : > { %11552 = vmatpush3.bf16.msra.mxu1 %v4952_v54  ;;  %11560 = vmatpush3.bf16.msra.mxu0 %v4877_v20 }
 0xee4   : > { %11565 = vmatprep.subr.bf16.mxu1 %v12379_v1  ;;  %11575 = vmatprep.subr.bf16.mxu0 %v15094_v10 }
 0xee6   : > { %11554 = vmatmul.mubr.msk.bf16.vlgmr.msra.gmra.mrb[228].mxu1 %vm3377_vm13, %v14129_v45  ;;  %11562 = vmatmul.mubr.msk.bf16.vlgmr.msra.gmra.mrb[216].mxu0 %vm3377_vm13, %v14148_v37 }
 0xee7   : > { %11566 = vmatpush3.bf16.msra.mxu1 %v12379_v1  ;;  %11571 = vmatprep.mubr.msk.bf16.mxu1 %vm4717_vm8, %v4795_v33 }
 0xee8   : > { %11567 = vmatprep.subr.bf16.mxu1 %v12380_v36  ;;  %11579 = vmatprep.mubr.msk.bf16.mxu0 %vm12644_vm1, %v15094_v10 }
 0xeeb   : > { %11568 = vmatpush3.bf16.msra.mxu1 %v12380_v36 }
 0xeec   : > { %11569 = vmatprep.subr.bf16.mxu1 %v12381_v15 }
 0xeef   : > { %11570 = vmatpush3.bf16.msra.mxu1 %v12381_v15 }
 0xef0   : > { %11583 = vmatprep.subr.bf16.mxu1 %v12382_v52 }
 0xef2   : > { %11572 = vmatmul.mubr.msk.bf16.vlgmr.msra.gmra.mrb[232].mxu1 %vm4717_vm8, %v4796_v6 }
 0xef3   : > { %11584 = vmatpush3.bf16.msra.mxu1 %v12382_v52  ;;  %11589 = vmatprep.mubr.msk.bf16.mxu1 %vm4717_vm8, %v4795_v33  ;;  %v12390_v33 = vld [vmem:[#allocation2 + $0x16c] sm:$0xff]  }
 0xef4   : > { %11585 = vmatprep.subr.bf16.mxu1 %v12383_v22 }
 0xef7   : > { %11586 = vmatpush3.bf16.msra.mxu1 %v12383_v22 }
 0xef8   : > { %11587 = vmatprep.subr.bf16.mxu1 %v12384_v62 }
 0xefb   : > { %11588 = vmatpush3.bf16.msra.mxu1 %v12384_v62 }
 0xefc   : > { %11611 = vmatprep.subr.bf16.mxu1 %v12385_v3 }
 0xefe   : > { %11590 = vmatmul.mubr.msk.bf16.vlgmr.msra.gmra.mrb[236].mxu1 %vm4717_vm8, %v4796_v6 }
 0xeff   : > { %11612 = vmatpush3.bf16.msra.mxu1 %v12385_v3  ;;  %11617 = vmatprep.mubr.msk.bf16.mxu1 %vm4717_vm8, %v14275_v35 }
 0xf00   : > { %11613 = vmatprep.subr.bf16.mxu1 %v12386_v47 }
 0xf03   : > { %11614 = vmatpush3.bf16.msra.mxu1 %v12386_v47 }
 0xf04   : > { %11615 = vmatprep.subr.bf16.mxu1 %v12387_v16 }
 0xf07   : > { %11616 = vmatpush3.bf16.msra.mxu1 %v12387_v16 }
 0xf08   : > { %11629 = vmatprep.subr.bf16.mxu1 %v15094_v10 }
 0xf0a   : > { %11618 = vmatmul.mubr.msk.bf16.vlgmr.msra.gmra.mrb[240].mxu1 %vm4717_vm8, %v14273_v46 }
 0xf0b   : > { %11633 = vmatprep.mubr.msk.bf16.mxu1 %vm12644_vm1, %v15094_v10 }
 0xfb9   : > { %v4989_v53 = vpop.f32.mrb[228].mxu1  ;;  %v5032_v14 = vpop.f32.mrb[216].mxu0 }
 0xfba   : > { %v11555_v48 = vpop.f32.mrb[229].mxu1  ;;  %v14318_v12 = vadd.f32 %v5032_v14, %v4989_v53  ;;  %v11563_v26 = vpop.f32.mrb[217].mxu0 }
 0xfbb   : > { %v4992_v4 = vpop.f32.mrb[230].mxu1  ;;  %v5035_v57 = vpop.f32.mrb[218].mxu0 }
 0xfbc   : > { %v11556_v61 = vpop.f32.mrb[231].mxu1  ;;  %v14320_v38 = vadd.f32 %v5035_v57, %v4992_v4  ;;  %v11564_v18 = vpop.f32.mrb[219].mxu0 }
 0xfc5   : > { %v11573_v23 = vpop.f32.mrb[232].mxu1 }
 0xfc6   : > { %v5097_v32 = vpop.f32.mrb[233].mxu1 }
 0xfc7   : > { %v11574_v63 = vpop.f32.mrb[234].mxu1 }
 0xfc8   : > { %v5113_v27 = vpack.c.bf16 %v11574_v63, %v11573_v23  ;;  %v5100_v34 = vpop.f32.mrb[235].mxu1  ;;  %v12394_v23 = vld [vmem:[#allocation2 + $0x1a4] sm:$0xff]  }
 0xfc9   : > { %v5112_v13 = vpack.c.bf16 %v5100_v34, %v5097_v32  ;;  %v12395_v32 = vld [vmem:[#allocation2 + $0x1ac] sm:$0xff]  }
 0xfcb   : > { %11576 = vmatpush3.bf16.msra.mxu0 %v5112_v13 }
 0xfcc   : > { %11577 = vmatprep.subr.bf16.mxu0 %v15094_v10 }
 0xfcf   : > { %11578 = vmatpush3.bf16.msra.mxu0 %v5113_v27 }
 0xfd0   : > { %11593 = vmatprep.subr.bf16.mxu0 %v15094_v10 }
 0xfd1   : > { %v11591_v43 = vpop.f32.mrb[236].mxu1 }
 0xfd2   : > { %11580 = vmatmul.mubr.msk.bf16.vlgmr.msra.gmra.mrb[220].mxu0 %vm3377_vm13, %v14187_v28  ;;  %v5217_v44 = vpop.f32.mrb[237].mxu1 }
 0xfd3   : > { %v11592_v42 = vpop.f32.mrb[238].mxu1  ;;  %11597 = vmatprep.mubr.msk.bf16.mxu0 %vm12644_vm1, %v15094_v10 }
 0xfd4   : > { %v5233_v24 = vpack.c.bf16 %v11592_v42, %v11591_v43  ;;  %v5220_v9 = vpop.f32.mrb[239].mxu1 }
 0xfd5   : > { %v5232_v29 = vpack.c.bf16 %v5220_v9, %v5217_v44 }
 0xfd7   : > { %11594 = vmatpush3.bf16.msra.mxu0 %v5232_v29 }
 0xfd8   : > { %11595 = vmatprep.subr.bf16.mxu0 %v15094_v10 }
 0xfdb   : > { %11596 = vmatpush3.bf16.msra.mxu0 %v5233_v24 }
 0xfdc   : > { %11601 = vmatprep.subr.bf16.mxu0 %v12388_v50 }
 0xfdd   : > { %v11619_v25 = vpop.f32.mrb[240].mxu1 }
 0xfde   : > { %11598 = vmatmul.mubr.msk.bf16.vlgmr.msra.gmra.mrb[224].mxu0 %vm3377_vm13, %v13791_v59  ;;  %v5427_v19 = vpop.f32.mrb[241].mxu1 }
 0xfdf   : > { %11602 = vmatpush3.bf16.msra.mxu0 %v12388_v50  ;;  %11607 = vmatprep.mubr.msk.bf16.mxu0 %vm4717_vm8, %v14275_v35  ;;  %v11620_v39 = vpop.f32.mrb[242].mxu1 }
 0xfe0   : > { %v5443_v30 = vpack.c.bf16 %v11620_v39, %v11619_v25  ;;  %v5430_v6 = vpop.f32.mrb[243].mxu1  ;;  %11603 = vmatprep.subr.bf16.mxu0 %v12389_v8 }
 0xfe1   : > { %v5442_v58 = vpack.c.bf16 %v5430_v6, %v5427_v19  ;;  %v12398_v6 = vld [vmem:[#allocation2 + $0x1c4] sm:$0xff]  }
 0xfe3   : > { %11604 = vmatpush3.bf16.msra.mxu0 %v12389_v8 }
 0xfe4   : > { %11605 = vmatprep.subr.bf16.mxu0 %v12390_v33 }
 0xfe7   : > { %11606 = vmatpush3.bf16.msra.mxu0 %v12390_v33  ;;  %v12399_v33 = vld [vmem:[#allocation2 + $0x1cc] sm:$0xff]  }
 0xfe8   : > { %11621 = vmatprep.subr.bf16.mxu0 %v15094_v10 }
 0xfea   : > { %11608 = vmatmul.mubr.msk.bf16.vlgmr.msra.gmra.mrb[228].mxu0 %vm4717_vm8, %v14273_v46 }
 0xfeb   : > { %11622 = vmatpush3.bf16.msra.mxu0 %v5442_v58  ;;  %11625 = vmatprep.mubr.msk.bf16.mxu0 %vm12644_vm1, %v15094_v10  ;;  %v12400_v58 = vld [vmem:[#allocation2 + $0x1d4] sm:$0xff]  }
 0xfec   : > { %11623 = vmatprep.subr.bf16.mxu0 %v15094_v10 }
 0xfef   : > { %11624 = vmatpush3.bf16.msra.mxu0 %v5443_v30  ;;  %v12397_v30 = vld [vmem:[#allocation2 + $0x1bc] sm:$0xff]  }
 0xff0   : > { %11637 = vmatprep.subr.bf16.mxu0 %v12391_v51 }
 0xff2   : > { %11626 = vmatmul.mubr.msk.bf16.vlgmr.msra.gmra.mrb[232].mxu0 %vm3377_vm13, %v14129_v45 }
 0xff3   : > { %11638 = vmatpush3.bf16.msra.mxu0 %v12391_v51  ;;  %11643 = vmatprep.mubr.msk.bf16.mxu0 %vm4717_vm8, %v14275_v35  ;;  %v9807_v51 = vld [vmem:[%s14927_s2 + $0x14] ss:$0 sm:$0xff] }
 0xff4   : > { %11639 = vmatprep.subr.bf16.mxu0 %v12392_v11 }
 0xff7   : > { %11640 = vmatpush3.bf16.msra.mxu0 %v12392_v11 }
 0xff8   : > { %11641 = vmatprep.subr.bf16.mxu0 %v12393_v5 }
 0xffb   : > { %11642 = vmatpush3.bf16.msra.mxu0 %v12393_v5  ;;  %v9832_v5 = vld [vmem:[%s14927_s2 + $0x15] ss:$0 sm:$0xff] }
 0xffc   : > { %11665 = vmatprep.subr.bf16.mxu0 %v15094_v10 }
 0xffe   : > { %11644 = vmatmul.mubr.msk.bf16.vlgmr.msra.gmra.mrb[236].mxu0 %vm4717_vm8, %v14273_v46 }
 0xfff   : > { %11669 = vmatprep.mubr.msk.bf16.mxu0 %vm12644_vm1, %v15094_v10 }
0x10a5   : > { %v5150_v7 = vpop.f32.mrb[220].mxu0 }
0x10a6   : > { %v5157_v45 = vadd.f32 %v5150_v7, %v14318_v12  ;;  %v11581_v0 = vpop.f32.mrb[221].mxu0 }
0x10a7   : > { %v5153_v20 = vpop.f32.mrb[222].mxu0 }
0x10a8   : > { %v5158_v54 = vadd.f32 %v5153_v20, %v14320_v38  ;;  %v11582_v60 = vpop.f32.mrb[223].mxu0 }
0x10b1   : > { %v5270_v21 = vpop.f32.mrb[224].mxu0 }
0x10b2   : > { %v14350_v41 = vadd.f32 %v5270_v21, %v5157_v45  ;;  %v11599_v31 = vpop.f32.mrb[225].mxu0 }
0x10b3   : > { %v5273_v1 = vpop.f32.mrb[226].mxu0 }
0x10b4   : > { %v14352_v36 = vadd.f32 %v5273_v1, %v5158_v54  ;;  %v11600_v15 = vpop.f32.mrb[227].mxu0  ;;  %v5284_v7 = vadd.f32 %v9807_v51, %v14350_v41  ;;  %v9834_v41 = vld [vmem:[%s14927_s2 + $0x17] ss:$0 sm:$0xff] }
0x10b6   : > { %v5285_v54 = vadd.f32 %v9807_v51, %v14352_v36  ;;  %v5771_v1 = vmul.f32 0.3, %v5284_v7 }
0x10bd   : > { %v11609_v52 = vpop.f32.mrb[228].mxu0 }
0x10be   : > { %v5352_v22 = vpop.f32.mrb[229].mxu0 }
0x10bf   : > { %v11610_v62 = vpop.f32.mrb[230].mxu0 }
0x10c0   : > { %v5368_v3 = vpack.c.bf16 %v11610_v62, %v11609_v52  ;;  %v5355_v47 = vpop.f32.mrb[231].mxu0  ;;  %v5772_v62 = vmul.f32 0.3, %v5285_v54 }
0x10c1   : > { %v5367_v16 = vpack.c.bf16 %v5355_v47, %v5352_v22  ;;  %v9833_v22 = vld [vmem:[%s14927_s2 + $0x16] ss:$0 sm:$0xff] }
0x10c3   : > { %11630 = vmatpush3.bf16.msra.mxu1 %v5367_v16 }
0x10c4   : > { %11631 = vmatprep.subr.bf16.mxu1 %v15094_v10 }
0x10c5   : > { %v5478_v53 = vpop.f32.mrb[232].mxu0 }
0x10c6   : > { %v11627_v14 = vpop.f32.mrb[233].mxu0 }
0x10c7   : > { %11632 = vmatpush3.bf16.msra.mxu1 %v5368_v3  ;;  %v5481_v48 = vpop.f32.mrb[234].mxu0 }
0x10c8   : > { %v11628_v12 = vpop.f32.mrb[235].mxu0  ;;  %11647 = vmatprep.subr.bf16.mxu1 %v15094_v10 }
0x10ca   : > { %11634 = vmatmul.mubr.msk.bf16.vlgmr.msra.gmra.mrb[244].mxu1 %vm3377_vm13, %v14148_v37  ;;  %v12396_v37 = vld [vmem:[#allocation2 + $0x1b4] sm:$0xff]  }
0x10cb   : > { %11651 = vmatprep.mubr.msk.bf16.mxu1 %vm12644_vm1, %v15094_v10 }
0x10d1   : > { %v11645_v26 = vpop.f32.mrb[236].mxu0 }
0x10d2   : > { %v5584_v4 = vpop.f32.mrb[237].mxu0 }
0x10d3   : > { %v11646_v57 = vpop.f32.mrb[238].mxu0 }
0x10d4   : > { %v5600_v61 = vpack.c.bf16 %v11646_v57, %v11645_v26  ;;  %v5587_v38 = vpop.f32.mrb[239].mxu0  ;;  %v12401_v57 = vld [vmem:[#allocation2 + $0x1fc] sm:$0xff]  }
0x10d5   : > { %v5599_v18 = vpack.c.bf16 %v5587_v38, %v5584_v4  ;;  %v12403_v38 = vld [vmem:[#allocation2 + $0x204] sm:$0xff]  }
0x10d7   : > { %11648 = vmatpush3.bf16.msra.mxu1 %v5599_v18  ;;  %v12404_v18 = vld [vmem:[#allocation2 + $0x1e4] sm:$0xff]  }
0x10d8   : > { %11649 = vmatprep.subr.bf16.mxu1 %v15094_v10 }
0x10db   : > { %11650 = vmatpush3.bf16.msra.mxu1 %v5600_v61 }
0x10dc   : > { %11655 = vmatprep.subr.bf16.mxu1 %v12394_v23 }
0x10de   : > { %11652 = vmatmul.mubr.msk.bf16.vlgmr.msra.gmra.mrb[248].mxu1 %vm3377_vm13, %v14187_v28 }
0x10df   : > { %11656 = vmatpush3.bf16.msra.mxu1 %v12394_v23  ;;  %11661 = vmatprep.mubr.msk.bf16.mxu1 %vm4717_vm8, %v14275_v35  ;;  %v12405_v23 = vld [vmem:[#allocation2 + $0x20c] sm:$0xff]  }
0x10e0   : > { %11657 = vmatprep.subr.bf16.mxu1 %v12395_v32 }
0x10e3   : > { %11658 = vmatpush3.bf16.msra.mxu1 %v12395_v32  ;;  %v12406_v32 = vld [vmem:[#allocation2 + $0x1ec] sm:$0xff]  }
0x10e4   : > { %11659 = vmatprep.subr.bf16.mxu1 %v12396_v37 }
0x10e7   : > { %11660 = vmatpush3.bf16.msra.mxu1 %v12396_v37  ;;  %v12407_v37 = vld [vmem:[#allocation2 + $0x214] sm:$0xff]  }
0x10e8   : > { %11685 = vmatprep.subr.bf16.mxu1 %v15094_v10 }
0x10ea   : > { %11662 = vmatmul.mubr.msk.bf16.vlgmr.msra.gmra.mrb[252].mxu1 %vm4717_vm8, %v14273_v46  ;;  %vm15169_vm8 = vmmov %vm15166_vm4 }
0x10eb   : > { %11693 = vmatprep.mubr.msk.bf16.mxu1 %vm12644_vm1, %v15094_v10 }
0x119d   : > { %v5519_v63 = vpop.f32.mrb[244].mxu1 }
0x119e   : > { %v5520_v27 = vadd.f32 %v5519_v63, %v5478_v53  ;;  %v11635_v28 = vpop.f32.mrb[245].mxu1  ;;  %v12408_v63 = vld [vmem:[#allocation2 + $0x1f4] sm:$0xff]  }
0x119f   : > { %v5522_v34 = vpop.f32.mrb[246].mxu1 }
0x11a0   : > { %v5523_v13 = vadd.f32 %v5522_v34, %v5481_v48  ;;  %v11636_v43 = vpop.f32.mrb[247].mxu1  ;;  %v9841_v34 = vld [vmem:[%s14927_s2 + $0x18] ss:$0 sm:$0xff] }
0x11b1   : > { %v5635_v35 = vpop.f32.mrb[248].mxu1 }
0x11b2   : > { %v5642_v44 = vadd.f32 %v5635_v35, %v5520_v27  ;;  %v11653_v42 = vpop.f32.mrb[249].mxu1  ;;  %v9835_v27 = vld [vmem:[%s14927_s2 + $0x1a] ss:$0 sm:$0xff]  ;;  %v9842_v35 = vld [vmem:[%s14927_s2 + $0x19] ss:$0 sm:$0xff] }
0x11b3   : > { %v5638_v24 = vpop.f32.mrb[250].mxu1 }
0x11b4   : > { %v5643_v9 = vadd.f32 %v5638_v24, %v5523_v13  ;;  %v11654_v29 = vpop.f32.mrb[251].mxu1 }
0x11bd   : > { %v11663_v50 = vpop.f32.mrb[252].mxu1 }
0x11be   : > { %v5702_v8 = vpop.f32.mrb[253].mxu1 }
0x11bf   : > { %v11664_v25 = vpop.f32.mrb[254].mxu1 }
0x11c0   : > { %v5718_v19 = vpack.c.bf16 %v11664_v25, %v11663_v50  ;;  %v5705_v46 = vpop.f32.mrb[255].mxu1 }
0x11c1   : > { %v5717_v39 = vpack.c.bf16 %v5705_v46, %v5702_v8  ;;  %v12409_v46 = vld [vmem:[#allocation2 + $0x21c] sm:$0xff]  }
0x11c3   : > { %11666 = vmatpush3.bf16.msra.mxu0 %v5717_v39 }
0x11c4   : > { %11667 = vmatprep.subr.bf16.mxu0 %v15094_v10 }
0x11c7   : > { %11668 = vmatpush3.bf16.msra.mxu0 %v5718_v19 }
0x11c8   : > { %11673 = vmatprep.subr.bf16.mxu0 %v15094_v10 }
0x11ca   : > { %11670 = vmatmul.mubr.msk.bf16.vlgmr.msra.gmra.mrb[240].mxu0 %vm3377_vm13, %v13791_v59  ;;  %v12402_v59 = vld [vmem:[#allocation2 + $0x1dc] sm:$0xff]   ;;  %vm15162_vm13 = vmmov %vm15156_vm0 }
0x11cb   : > { %11681 = vmatprep.mubr.msk.bf16.mxu0 %vm12644_vm1, %v15094_v10  ;;  %11674 = vmatpush3.bf16.msra.mxu0 %v12397_v30  ;;  %v12410_v30 = vld [vmem:[#allocation2 + $0x224] sm:$0xff]  }
0x11cc   : > { %11675 = vmatprep.subr.bf16.mxu0 %v15094_v10  ;;  %11686 = vmatpush3.bf16.msra.mxu1 %v12402_v59 }
0x11cd   : > { %11687 = vmatprep.subr.bf16.mxu1 %v15094_v10 }
0x11cf   : > { %11676 = vmatpush3.bf16.msra.mxu0 %v12398_v6  ;;  %v12411_v6 = vld [vmem:[#allocation2 + $0x22c] sm:$0xff]  }
0x11d0   : > { %11677 = vmatprep.subr.bf16.mxu0 %v15094_v10  ;;  %11688 = vmatpush3.bf16.msra.mxu1 %v12404_v18 }
0x11d1   : > { %11689 = vmatprep.subr.bf16.mxu1 %v15094_v10 }
0x11d3   : > { %11678 = vmatpush3.bf16.msra.mxu0 %v12399_v33  ;;  %v12412_v33 = vld [vmem:[#allocation2 + $0x234] sm:$0xff]  }
0x11d4   : > { %11679 = vmatprep.subr.bf16.mxu0 %v15094_v10  ;;  %11690 = vmatpush3.bf16.msra.mxu1 %v12406_v32 }
0x11d5   : > { %11691 = vmatprep.subr.bf16.mxu1 %v15094_v10 }
0x11d7   : > { %11680 = vmatpush3.bf16.msra.mxu0 %v12400_v58 }
0x11d8   : > { %11697 = vmatprep.subr.bf16.mxu0 %v15094_v10  ;;  %11692 = vmatpush3.bf16.msra.mxu1 %v12408_v63 }
0x11d9   : > { %11709 = vmatprep.subr.bf16.mxu1 %v15094_v10 }
0x129d   : > { %v5753_v11 = vpop.f32.mrb[240].mxu0 }
0x129e   : > { %v5760_v45 = vadd.f32 %v5753_v11, %v5642_v44  ;;  %v11671_v0 = vpop.f32.mrb[241].mxu0 }
0x129f   : > { %v5756_v20 = vpop.f32.mrb[242].mxu0 }
0x12a0   : > { %v5767_v60 = vadd.f32 %v9832_v5, %v5760_v45  ;;  %v5761_v21 = vadd.f32 %v5756_v20, %v5643_v9  ;;  %v11672_v31 = vpop.f32.mrb[243].mxu0 }
0x12a2   : > { %v5769_v15 = vmul.f32 2.0, %v5767_v60  ;;  %v5768_v52 = vadd.f32 %v9832_v5, %v5761_v21  ;;  %v14431_v60 = vpack.c.bf16 %v14122_v2, %v14122_v2  ;;  %v14441_v21 = vpack.c.bf16 %v14139_v17, %v14139_v17  ;;  %v12414_v17 = vld [vmem:[#allocation2 + $0x244] sm:$0xff]  }
0x12a4   : > { %v5773_v3 = vadd.f32 %v5771_v1, %v5769_v15  ;;  %v5770_v47 = vmul.f32 2.0, %v5768_v52 }
0x12a6   : > { %v5780_v16 = vmul.f32 %v9833_v22, %v5773_v3  ;;  %v5774_v53 = vadd.f32 %v5772_v62, %v5770_v47  ;;  %v12413_v62 = vld [vmem:[#allocation2 + $0x23c] sm:$0xff]  }
0x12a7   : > { %v12417_v47 = vld [vmem:[#allocation2 + $0x27c] sm:$0xff]  }
0x12a8   : > { %v5787_v36 = vadd.f32 %v9834_v41, %v5780_v16  ;;  %v5781_v14 = vmul.f32 %v9833_v22, %v5774_v53  ;;  %v14395_v48 = vpack.c.bf16 %v5774_v53, %v5773_v3  ;;  %v14449_v22 = vpack.c.bf16 %v14180_v49, %v14180_v49  ;;  %v12415_v3 = vld [vmem:[#allocation2 + $0x24c] sm:$0xff]   ;;  %v12416_v49 = vld [vmem:[#allocation2 + $0x254] sm:$0xff]  }
0x12a9   : > { %v12419_v16 = vld [vmem:[#allocation2 + $0x28c] sm:$0xff]   ;;  %v12420_v53 = vld [vmem:[#allocation2 + $0x294] sm:$0xff]  }
0x12aa   : > { %v5788_v12 = vadd.f32 %v9834_v41, %v5781_v14  ;;  %v5789_v26 = vmax.f32 %v5787_v36, 0.0  ;;  %v12418_v41 = vld [vmem:[#allocation2 + $0x284] sm:$0xff]  }
0x12ac   : > { %v5790_v4 = vmax.f32 %v5788_v12, 0.0 }
0x12ae   : > { %v5791_v61 = vpack.c.bf16 %v5790_v4, %v5789_v26 }
0x12b0   : > { %11682 = vmatmul.mubr.msk.bf16.vlgmr.msra.gmra.mrb[244].mxu0 %vm3675_vm6, %v5791_v61 }
0x12b1   : > { %11698 = vmatpush3.bf16.msra.mxu0 %v12401_v57  ;;  %11705 = vmatprep.mubr.msk.bf16.mxu0 %vm12644_vm1, %v15094_v10 }
0x12b2   : > { %11699 = vmatprep.subr.bf16.mxu0 %v15094_v10 }
0x12b5   : > { %11700 = vmatpush3.bf16.msra.mxu0 %v12403_v38 }
0x12b6   : > { %11701 = vmatprep.subr.bf16.mxu0 %v15094_v10 }
0x12b9   : > { %11702 = vmatpush3.bf16.msra.mxu0 %v12405_v23 }
0x12ba   : > { %11703 = vmatprep.subr.bf16.mxu0 %v15094_v10 }
0x12bd   : > { %11704 = vmatpush3.bf16.msra.mxu0 %v12407_v37 }
0x12be   : > { %11721 = vmatprep.subr.bf16.mxu0 %v15094_v10 }
0x1383   : > { %v5866_v28 = vpop.f32.mrb[244].mxu0 }
0x1384   : > { %v5867_v13 = vadd.f32 %v9835_v27, %v5866_v28  ;;  %v11683_v43 = vpop.f32.mrb[245].mxu0 }
0x1385   : > { %v5869_v44 = vpop.f32.mrb[246].mxu0 }
0x1386   : > { %v5878_v42 = vmul.f32 %v9841_v34, %v5867_v13  ;;  %v5870_v24 = vadd.f32 %v9835_v27, %v5869_v44  ;;  %v11684_v9 = vpop.f32.mrb[247].mxu0  ;;  %v14473_v44 = vpack.c.bf16 %v13780_v40, %v13780_v40 }
0x1387   : > { %v12423_v9 = vld [vmem:[#allocation2 + $0x26c] sm:$0xff]  }
0x1388   : > { %v5885_v29 = vadd.f32 %v9842_v35, %v5878_v42  ;;  %v5879_v50 = vmul.f32 %v9841_v34, %v5870_v24  ;;  %v12421_v42 = vld [vmem:[#allocation2 + $0x25c] sm:$0xff]   ;;  %v12422_v24 = vld [vmem:[#allocation2 + $0x264] sm:$0xff]  }
0x138a   : > { %v5886_v8 = vadd.f32 %v9842_v35, %v5879_v50  ;;  %v5887_v25 = vmax.f32 %v5885_v29, 0.0  ;;  %v12424_v50 = vld [vmem:[#allocation2 + $0x274] sm:$0xff]  }
0x138c   : > { %v5888_v19 = vmax.f32 %v5886_v8, 0.0 }
0x138e   : > { %v5889_v39 = vpack.c.bf16 %v5888_v19, %v5887_v25 }
0x1390   : > { %11694 = vmatmul.mubr.msk.bf16.vlgmr.msra.gmra.mrb[0].mxu1 %vm3675_vm6, %v5889_v39  ;;  %11706 = vmatmul.mubr.msk.bf16.vlgmr.msra.gmra.mrb[248].mxu0 %vm3675_vm6, %v5889_v39 }
0x1391   : > { %11722 = vmatpush3.bf16.msra.mxu0 %v12409_v46  ;;  %11729 = vmatprep.mubr.msk.bf16.mxu0 %vm12644_vm1, %v15094_v10  ;;  %v12425_v46 = vld [vmem:[#allocation2 + $0x29c] sm:$0xff]  }
0x1392   : > { %11723 = vmatprep.subr.bf16.mxu0 %v15094_v10  ;;  %11711 = vmatprep.mubr.msk.bf16.mxu1 %vm12644_vm1, %v15094_v10 }
0x1395   : > { %11724 = vmatpush3.bf16.msra.mxu0 %v12410_v30  ;;  %v12427_v30 = vld [vmem:[#allocation2 + $0x2ac] sm:$0xff]  }
0x1396   : > { %11725 = vmatprep.subr.bf16.mxu0 %v15094_v10 }
0x1399   : > { %11726 = vmatpush3.bf16.msra.mxu0 %v12411_v6  ;;  %v12428_v6 = vld [vmem:[#allocation2 + $0x2b4] sm:$0xff]  }
0x139a   : > { %11727 = vmatprep.subr.bf16.mxu0 %v15094_v10 }
0x139d   : > { %11728 = vmatpush3.bf16.msra.mxu0 %v12412_v33 }
0x139e   : > { %11751 = vmatprep.subr.bf16.mxu0 %v15094_v10 }
0x13a0   : > { %11730 = vmatmul.mubr.msk.bf16.vlgmr.msra.gmra.mrb[252].mxu0 %vm3675_vm6, %v5889_v39 }
0x13a1   : > { %11753 = vmatprep.mubr.msk.bf16.mxu0 %vm12644_vm1, %v15094_v10 }
0x1463   : > { %v5959_v58 = vpop.f32.mrb[0].mxu1  ;;  %v6034_v59 = vpop.f32.mrb[248].mxu0 }
0x1464   : > { %v11695_v51 = vpop.f32.mrb[1].mxu1  ;;  %v11707_v11 = vpop.f32.mrb[249].mxu0 }
0x1465   : > { %v5962_v5 = vpop.f32.mrb[2].mxu1  ;;  %v6037_v7 = vpop.f32.mrb[250].mxu0 }
0x1466   : > { %v5967_v45 = vpack.c.bf16 %v5962_v5, %v5959_v58  ;;  %v6042_v0 = vpack.c.bf16 %v6037_v7, %v6034_v59  ;;  %v11696_v20 = vpop.f32.mrb[3].mxu1  ;;  %v11708_v54 = vpop.f32.mrb[251].mxu0 }
0x1468   : > { %11710 = vmatpush3.bf16.msra.mxu1 %v6042_v0 }
0x1469   : > { %11715 = vmatprep.subr.bf16.mxu1 %v15094_v10 }
0x146b   : > { %11712 = vmatmul.mubr.msk.bf16.vlgmr.msra.gmra.mrb[4].mxu1 %vm15156_vm0, %v14431_v60 }
0x146c   : > { %11716 = vmatpush3.bf16.msra.mxu1 %v5967_v45  ;;  %11717 = vmatprep.mubr.msk.bf16.mxu1 %vm12644_vm1, %v15094_v10 }
0x146d   : > { %11733 = vmatprep.subr.bf16.mxu1 %v15094_v10 }
0x1473   : > { %v6195_v31 = vpop.f32.mrb[252].mxu0  ;;  %11718 = vmatmul.mubr.msk.bf16.vlgmr.msra.gmra.mrb[8].mxu1 %vm15157_vm5, %v14441_v21  ;;  %vm15171_vm5 = vmmov %vm15166_vm4 }
0x1474   : > { %v11731_v2 = vpop.f32.mrb[253].mxu0  ;;  %11735 = vmatprep.mubr.msk.bf16.mxu1 %vm12644_vm1, %v15094_v10 }
0x1475   : > { %v6198_v1 = vpop.f32.mrb[254].mxu0 }
0x1476   : > { %v6203_v15 = vpack.c.bf16 %v6198_v1, %v6195_v31  ;;  %v11732_v52 = vpop.f32.mrb[255].mxu0 }
0x1478   : > { %11734 = vmatpush3.bf16.msra.mxu1 %v6203_v15 }
0x1479   : > { %11739 = vmatprep.subr.bf16.mxu1 %v15094_v10 }
0x147b   : > { %11736 = vmatmul.mubr.msk.bf16.vlgmr.msra.gmra.mrb[12].mxu1 %vm15158_vm2, %v14449_v22 }
0x147c   : > { %11740 = vmatpush3.bf16.msra.mxu1 %v12413_v62  ;;  %11747 = vmatprep.mubr.msk.bf16.mxu1 %vm12644_vm1, %v15094_v10 }
0x147d   : > { %11741 = vmatprep.subr.bf16.mxu1 %v15094_v10 }
0x1480   : > { %11742 = vmatpush3.bf16.msra.mxu1 %v12414_v17 }
0x1481   : > { %11743 = vmatprep.subr.bf16.mxu1 %v15094_v10 }
0x1484   : > { %11744 = vmatpush3.bf16.msra.mxu1 %v12415_v3 }
0x1485   : > { %11745 = vmatprep.subr.bf16.mxu1 %v15094_v10 }
0x1488   : > { %11746 = vmatpush3.bf16.msra.mxu1 %v12416_v49  ;;  %v12429_v49 = vld [vmem:[#allocation2 + $0x2bc] sm:$0xff]  }
0x1489   : > { %11769 = vmatprep.subr.bf16.mxu1 %v15094_v10 }
0x148b   : > { %11748 = vmatmul.mubr.msk.bf16.vlgmr.msra.gmra.mrb[16].mxu1 %vm3675_vm6, %v5889_v39  ;;  %v12426_v39 = vld [vmem:[#allocation2 + $0x2a4] sm:$0xff]  }
0x148c   : > { %11770 = vmatpush3.bf16.msra.mxu1 %v12417_v47  ;;  %11777 = vmatprep.mubr.msk.bf16.mxu1 %vm12644_vm1, %v15094_v10  ;;  %v12430_v47 = vld [vmem:[#allocation2 + $0x2c4] sm:$0xff]  }
0x148d   : > { %11771 = vmatprep.subr.bf16.mxu1 %v15094_v10 }
0x1490   : > { %11772 = vmatpush3.bf16.msra.mxu1 %v12418_v41  ;;  %v12431_v41 = vld [vmem:[#allocation2 + $0x2cc] sm:$0xff]  }
0x1491   : > { %11773 = vmatprep.subr.bf16.mxu1 %v15094_v10 }
0x1494   : > { %11774 = vmatpush3.bf16.msra.mxu1 %v12419_v16  ;;  %v12432_v16 = vld [vmem:[#allocation2 + $0x2d4] sm:$0xff]  }
0x1495   : > { %11775 = vmatprep.subr.bf16.mxu1 %v15094_v10 }
0x1498   : > { %11776 = vmatpush3.bf16.msra.mxu1 %v12420_v53 }
0x1499   : > { %11787 = vmatprep.subr.bf16.mxu1 %v15094_v10 }
0x149b   : > { %11778 = vmatmul.mubr.msk.bf16.vlgmr.msra.gmra.mrb[20].mxu1 %vm3675_vm6, %v14395_v48 }
0x149c   : > { %11789 = vmatprep.mubr.msk.bf16.mxu1 %vm12644_vm1, %v15094_v10 }
0x153e   : > { %v6080_v36 = vpop.f32.mrb[4].mxu1 }
0x153f   : > { %v11713_v14 = vpop.f32.mrb[5].mxu1 }
0x1540   : > { %v6083_v12 = vpop.f32.mrb[6].mxu1 }
0x1541   : > { %v11714_v26 = vpop.f32.mrb[7].mxu1 }
0x1546   : > { %v6123_v4 = vpop.f32.mrb[8].mxu1 }
0x1547   : > { %v6124_v57 = vadd.f32 %v6123_v4, %v6080_v36  ;;  %v11719_v61 = vpop.f32.mrb[9].mxu1 }
0x1548   : > { %v6126_v38 = vpop.f32.mrb[10].mxu1 }
0x1549   : > { %v11720_v18 = vpop.f32.mrb[11].mxu1 }
0x154e   : > { %v6241_v23 = vpop.f32.mrb[12].mxu1 }
0x154f   : > { %v6247_v32 = vadd.f32 %v6241_v23, %v6124_v57  ;;  %v11737_v37 = vpop.f32.mrb[13].mxu1 }
0x1550   : > { %v6244_v63 = vpop.f32.mrb[14].mxu1 }
0x1551   : > { %v11738_v27 = vpop.f32.mrb[15].mxu1 }
0x155e   : > { %v6314_v28 = vpop.f32.mrb[16].mxu1 }
0x155f   : > { %v11749_v34 = vpop.f32.mrb[17].mxu1 }
0x1560   : > { %v6317_v13 = vpop.f32.mrb[18].mxu1  ;;  %v12435_v34 = vld [vmem:[#allocation2 + $0x2ec] sm:$0xff]  }
0x1561   : > { %v6322_v43 = vpack.c.bf16 %v6317_v13, %v6314_v28  ;;  %v11750_v35 = vpop.f32.mrb[19].mxu1  ;;  %v12434_v28 = vld [vmem:[#allocation2 + $0x2e4] sm:$0xff]   ;;  %v12436_v13 = vld [vmem:[#allocation2 + $0x2f4] sm:$0xff]  }
0x1562   : > { %v12438_v35 = vld [vmem:[#allocation2 + $0x304] sm:$0xff]  }
0x1563   : > { %11752 = vmatpush3.bf16.msra.mxu0 %v6322_v43  ;;  %v12437_v43 = vld [vmem:[#allocation2 + $0x2fc] sm:$0xff]  }
0x1564   : > { %11757 = vmatprep.subr.bf16.mxu0 %v15094_v10 }
0x1566   : > { %11754 = vmatmul.mubr.msk.bf16.vlgmr.msra.gmra.mrb[0].mxu0 %vm15159_vm9, %v14473_v44  ;;  %vm15173_vm9 = vmmov %vm15166_vm4 }
0x1567   : > { %11758 = vmatpush3.bf16.msra.mxu0 %v12421_v42  ;;  %11765 = vmatprep.mubr.msk.bf16.mxu0 %vm12644_vm1, %v15094_v10  ;;  %v12440_v42 = vld [vmem:[#allocation2 + $0x30c] sm:$0xff]  }
0x1568   : > { %11759 = vmatprep.subr.bf16.mxu0 %v15094_v10 }
0x156b   : > { %11760 = vmatpush3.bf16.msra.mxu0 %v12422_v24  ;;  %v9867_v24 = vld [vmem:[%s14927_s2 + $0x1b] ss:$0 sm:$0xff] }
0x156c   : > { %11761 = vmatprep.subr.bf16.mxu0 %v15094_v10 }
0x156e   : > { %v6517_v40 = vpop.f32.mrb[20].mxu1 }
0x156f   : > { %11762 = vmatpush3.bf16.msra.mxu0 %v12423_v9  ;;  %v11779_v29 = vpop.f32.mrb[21].mxu1 }
0x1570   : > { %v6520_v8 = vpop.f32.mrb[22].mxu1  ;;  %11763 = vmatprep.subr.bf16.mxu0 %v15094_v10 }
0x1571   : > { %v6524_v25 = vpack.c.bf16 %v6520_v8, %v6517_v40  ;;  %v11780_v19 = vpop.f32.mrb[23].mxu1  ;;  %v9892_v40 = vld [vmem:[%s14927_s2 + $0x1c] ss:$0 sm:$0xff] }
0x1573   : > { %11764 = vmatpush3.bf16.msra.mxu0 %v12424_v50 }
0x1574   : > { %11781 = vmatprep.subr.bf16.mxu0 %v15094_v10 }
0x1576   : > { %11766 = vmatmul.mubr.msk.bf16.vlgmr.msra.gmra.mrb[4].mxu0 %vm3675_vm6, %v14395_v48 }
0x1577   : > { %11782 = vmatpush3.bf16.msra.mxu0 %v6524_v25  ;;  %11783 = vmatprep.mubr.msk.bf16.mxu0 %vm12644_vm1, %v15094_v10 }
0x1578   : > { %11793 = vmatprep.subr.bf16.mxu0 %v15094_v10 }
0x157e   : > { %11784 = vmatmul.mubr.msk.bf16.vlgmr.msra.gmra.mrb[8].mxu0 %vm15160_vm12, %v14431_v60 }
0x157f   : > { %11794 = vmatpush3.bf16.msra.mxu0 %v12425_v46  ;;  %11801 = vmatprep.mubr.msk.bf16.mxu0 %vm12644_vm1, %v15094_v10 }
0x1580   : > { %11795 = vmatprep.subr.bf16.mxu0 %v15094_v10 }
0x1583   : > { %11796 = vmatpush3.bf16.msra.mxu0 %v12426_v39 }
0x1584   : > { %11797 = vmatprep.subr.bf16.mxu0 %v15094_v10 }
0x1587   : > { %11798 = vmatpush3.bf16.msra.mxu0 %v12427_v30 }
0x1588   : > { %11799 = vmatprep.subr.bf16.mxu0 %v15094_v10 }
0x158b   : > { %11800 = vmatpush3.bf16.msra.mxu0 %v12428_v6  ;;  %v9893_v6 = vld [vmem:[%s14927_s2 + $0x1d] ss:$0 sm:$0xff] }
0x158c   : > { %11823 = vmatprep.subr.bf16.mxu0 %v15094_v10 }
0x158e   : > { %11802 = vmatmul.mubr.msk.bf16.vlgmr.msra.gmra.mrb[12].mxu0 %vm3675_vm6, %v14395_v48 }
0x158f   : > { %11825 = vmatprep.mubr.msk.bf16.mxu0 %vm12644_vm1, %v15094_v10 }
0x1639   : > { %v6360_v33 = vpop.f32.mrb[0].mxu0 }
0x163a   : > { %v14501_v58 = vadd.f32 %v6360_v33, %v6247_v32  ;;  %v11755_v59 = vpop.f32.mrb[1].mxu0 }
0x163b   : > { %v6363_v51 = vpop.f32.mrb[2].mxu0  ;;  %v9894_v59 = vld [vmem:[%s14927_s2 + $0x1e] ss:$0 sm:$0xff] }
0x163c   : > { %v11756_v11 = vpop.f32.mrb[3].mxu0  ;;  %v6372_v29 = vadd.f32 %v9867_v24, %v14501_v58 }
0x163e   : > { %v6842_v39 = vmul.f32 0.3, %v6372_v29 }
0x1649   : > { %v6443_v5 = vpop.f32.mrb[4].mxu0 }
0x164a   : > { %v11767_v7 = vpop.f32.mrb[5].mxu0 }
0x164b   : > { %v6446_v45 = vpop.f32.mrb[6].mxu0 }
0x164c   : > { %v6450_v0 = vpack.c.bf16 %v6446_v45, %v6443_v5  ;;  %v11768_v20 = vpop.f32.mrb[7].mxu0  ;;  %v12439_v5 = vld [vmem:[#allocation2 + $0x32c] sm:$0xff]   ;;  %v12441_v45 = vld [vmem:[#allocation2 + $0x334] sm:$0xff]  }
0x164d   : > { %v12443_v20 = vld [vmem:[#allocation2 + $0x33c] sm:$0xff]  }
0x164e   : > { %11788 = vmatpush3.bf16.msra.mxu1 %v6450_v0  ;;  %v12442_v0 = vld [vmem:[#allocation2 + $0x314] sm:$0xff]  }
0x164f   : > { %11805 = vmatprep.subr.bf16.mxu1 %v15094_v10 }
0x1651   : > { %11790 = vmatmul.mubr.msk.bf16.vlgmr.msra.gmra.mrb[24].mxu1 %vm15161_vm3, %v14441_v21  ;;  %v6559_v54 = vpop.f32.mrb[8].mxu0  ;;  %vm15175_vm3 = vmmov %vm15166_vm4 }
0x1652   : > { %v11785_v31 = vpop.f32.mrb[9].mxu0  ;;  %11807 = vmatprep.mubr.msk.bf16.mxu1 %vm12644_vm1, %v15094_v10 }
0x1653   : > { %v6562_v2 = vpop.f32.mrb[10].mxu0  ;;  %v12445_v31 = vld [vmem:[#allocation2 + $0x344] sm:$0xff]  }
0x1654   : > { %v11786_v1 = vpop.f32.mrb[11].mxu0  ;;  %v12446_v2 = vld [vmem:[#allocation2 + $0x324] sm:$0xff]  }
0x1655   : > { %v12447_v1 = vld [vmem:[#allocation2 + $0x34c] sm:$0xff]  }
0x1661   : > { %v6671_v15 = vpop.f32.mrb[12].mxu0 }
0x1662   : > { %v11803_v52 = vpop.f32.mrb[13].mxu0 }
0x1663   : > { %v6674_v62 = vpop.f32.mrb[14].mxu0 }
0x1664   : > { %v6678_v17 = vpack.c.bf16 %v6674_v62, %v6671_v15  ;;  %v11804_v3 = vpop.f32.mrb[15].mxu0  ;;  %v9895_v15 = vld [vmem:[%s14927_s2 + $0x21] ss:$0 sm:$0xff]  ;;  %v9902_v62 = vld [vmem:[%s14927_s2 + $0x1f] ss:$0 sm:$0xff] }
0x1666   : > { %11806 = vmatpush3.bf16.msra.mxu1 %v6678_v17 }
0x1667   : > { %11811 = vmatprep.subr.bf16.mxu1 %v15094_v10 }
0x1669   : > { %11808 = vmatmul.mubr.msk.bf16.vlgmr.msra.gmra.mrb[28].mxu1 %vm15162_vm13, %v14449_v22 }
0x166a   : > { %11812 = vmatpush3.bf16.msra.mxu1 %v12429_v49  ;;  %11819 = vmatprep.mubr.msk.bf16.mxu1 %vm12644_vm1, %v15094_v10  ;;  %v9903_v49 = vld [vmem:[%s14927_s2 + $0x20] ss:$0 sm:$0xff] }
0x166b   : > { %11813 = vmatprep.subr.bf16.mxu1 %v15094_v10 }
0x166e   : > { %11814 = vmatpush3.bf16.msra.mxu1 %v12430_v47 }
0x166f   : > { %11815 = vmatprep.subr.bf16.mxu1 %v15094_v10 }
0x1672   : > { %11816 = vmatpush3.bf16.msra.mxu1 %v12431_v41 }
0x1673   : > { %11817 = vmatprep.subr.bf16.mxu1 %v15094_v10 }
0x1676   : > { %11818 = vmatpush3.bf16.msra.mxu1 %v12432_v16 }
0x1677   : > { %11843 = vmatprep.subr.bf16.mxu1 %v15094_v10 }
0x1679   : > { %11820 = vmatmul.mubr.msk.bf16.vlgmr.msra.gmra.mrb[32].mxu1 %vm3675_vm6, %v14395_v48  ;;  %v12433_v48 = vld [vmem:[#allocation2 + $0x2dc] sm:$0xff]   ;;  %vm15164_vm6 = vcmask 1043456  }
0x167a   : > { %11853 = vmatprep.mubr.msk.bf16.mxu1 %vm12644_vm1, %v15094_v10  ;;  %11844 = vmatpush3.bf16.msra.mxu1 %v12438_v35  ;;  %vm15165_vm15 = vmmov %vm15164_vm6 }
0x167b   : > { %11845 = vmatprep.subr.bf16.mxu1 %v15094_v10  ;;  %vm15168_vm11 = vmmov %vm15164_vm6 }
0x167c   : > { %vm15170_vm0 = vmmov %vm15164_vm6 }
0x167d   : > { %vm15172_vm2 = vmmov %vm15170_vm0 }
0x167e   : > { %11846 = vmatpush3.bf16.msra.mxu1 %v12440_v42  ;;  %vm15174_vm12 = vmmov %vm15170_vm0 }
0x167f   : > { %11847 = vmatprep.subr.bf16.mxu1 %v15094_v10  ;;  %vm15176_vm13 = vmmov %vm15170_vm0 }
0x1682   : > { %11848 = vmatpush3.bf16.msra.mxu1 %v12442_v0  ;;  %v12459_v0 = vld [vmem:[#allocation2 + $0x3d4] sm:$0xff]  }
0x1683   : > { %11849 = vmatprep.subr.bf16.mxu1 %v15094_v10 }
0x1724   : > { %v6599_v53 = vpop.f32.mrb[24].mxu1 }
0x1725   : > { %v6600_v36 = vadd.f32 %v6599_v53, %v6559_v54  ;;  %v11791_v14 = vpop.f32.mrb[25].mxu1  ;;  %v12444_v54 = vld [vmem:[#allocation2 + $0x31c] sm:$0xff]  }
0x1726   : > { %v6602_v12 = vpop.f32.mrb[26].mxu1  ;;  %11850 = vmatpush3.bf16.msra.mxu1 %v12444_v54  ;;  %v12461_v54 = vld [vmem:[#allocation2 + $0x3e4] sm:$0xff]  }
0x1727   : > { %v11792_v26 = vpop.f32.mrb[27].mxu1  ;;  %11851 = vmatprep.subr.bf16.mxu1 %v15094_v10 }
0x172a   : > { %11852 = vmatpush3.bf16.msra.mxu1 %v12446_v2 }
0x172b   : > { %11871 = vmatprep.subr.bf16.mxu1 %v15094_v10 }
0x173c   : > { %v6713_v4 = vpop.f32.mrb[28].mxu1 }
0x173d   : > { %v6719_v57 = vadd.f32 %v6713_v4, %v6600_v36  ;;  %v11809_v61 = vpop.f32.mrb[29].mxu1 }
0x173e   : > { %v6716_v38 = vpop.f32.mrb[30].mxu1 }
0x173f   : > { %v11810_v18 = vpop.f32.mrb[31].mxu1 }
0x174c   : > { %v6786_v23 = vpop.f32.mrb[32].mxu1 }
0x174d   : > { %v11821_v32 = vpop.f32.mrb[33].mxu1 }
0x174e   : > { %v6789_v37 = vpop.f32.mrb[34].mxu1 }
0x174f   : > { %v6793_v63 = vpack.c.bf16 %v6789_v37, %v6786_v23  ;;  %v11822_v27 = vpop.f32.mrb[35].mxu1 }
0x1751   : > { %11824 = vmatpush3.bf16.msra.mxu0 %v6793_v63 }
0x1752   : > { %11829 = vmatprep.subr.bf16.mxu0 %v15094_v10 }
0x1754   : > { %11826 = vmatmul.mubr.msk.bf16.vlgmr.msra.gmra.mrb[16].mxu0 %vm15163_vm14, %v14473_v44  ;;  %vm15177_vm14 = vmmov %vm15175_vm3 }
0x1755   : > { %11830 = vmatpush3.bf16.msra.mxu0 %v12433_v48  ;;  %11839 = vmatprep.mubr.msk.bf16.mxu0 %vm12644_vm1, %v15094_v10  ;;  %v12448_v48 = vld [vmem:[#allocation2 + $0x354] sm:$0xff]  }
0x1756   : > { %11831 = vmatprep.subr.bf16.mxu0 %v15094_v10 }
0x1759   : > { %11832 = vmatpush3.bf16.msra.mxu0 %v12434_v28  ;;  %v12449_v28 = vld [vmem:[#allocation2 + $0x35c] sm:$0xff]  }
0x175a   : > { %11833 = vmatprep.subr.bf16.mxu0 %v15094_v10 }
0x175d   : > { %11834 = vmatpush3.bf16.msra.mxu0 %v12435_v34  ;;  %v12450_v34 = vld [vmem:[#allocation2 + $0x364] sm:$0xff]  }
0x175e   : > { %11835 = vmatprep.subr.bf16.mxu0 %v15094_v10 }
0x1761   : > { %11836 = vmatpush3.bf16.msra.mxu0 %v12436_v13  ;;  %v12451_v13 = vld [vmem:[#allocation2 + $0x36c] sm:$0xff]  }
0x1762   : > { %11837 = vmatprep.subr.bf16.mxu0 %v15094_v10 }
0x1765   : > { %11838 = vmatpush3.bf16.msra.mxu0 %v12437_v43  ;;  %v12452_v43 = vld [vmem:[#allocation2 + $0x374] sm:$0xff]  }
0x1766   : > { %11857 = vmatprep.subr.bf16.mxu0 %v15094_v10 }
0x1827   : > { %v6828_v9 = vpop.f32.mrb[16].mxu0 }
0x1828   : > { %v6834_v50 = vadd.f32 %v6828_v9, %v6719_v57  ;;  %v11827_v8 = vpop.f32.mrb[17].mxu0 }
0x1829   : > { %v6831_v25 = vpop.f32.mrb[18].mxu0 }
0x182a   : > { %v6840_v19 = vadd.f32 %v9892_v40, %v6834_v50  ;;  %v11828_v46 = vpop.f32.mrb[19].mxu0 }
0x182c   : > { %v6841_v30 = vmul.f32 2.0, %v6840_v19 }
0x182e   : > { %v14543_v33 = vadd.f32 %v6842_v39, %v6841_v30 }
0x1830   : > { %v6849_v51 = vmul.f32 %v9893_v6, %v14543_v33  ;;  %v14621_v2 = vpack.c.bf16 %v14543_v33, %v14543_v33 }
0x1832   : > { %v6855_v58 = vadd.f32 %v9894_v59, %v6849_v51  ;;  %v12453_v51 = vld [vmem:[#allocation2 + $0x37c] sm:$0xff]  }
0x1834   : > { %v6856_v11 = vmax.f32 %v6855_v58, 0.0  ;;  %v12454_v58 = vld [vmem:[#allocation2 + $0x384] sm:$0xff]  }
0x1836   : > { %v6857_v7 = vpack.c.bf16 %v6856_v11, %v6856_v11  ;;  %v12455_v11 = vld [vmem:[#allocation2 + $0x38c] sm:$0xff]  }
0x1838   : > { %11840 = vmatmul.mubr.msk.bf16.vlgmr.msra.gmra.mrb[20].mxu0 %vm6903_vm10, %v6857_v7  ;;  %v12457_v7 = vld [vmem:[#allocation2 + $0x39c] sm:$0xff]  }
0x1839   : > { %11858 = vmatpush3.bf16.msra.mxu0 %v12439_v5  ;;  %11867 = vmatprep.mubr.msk.bf16.mxu0 %vm12644_vm1, %v15094_v10  ;;  %v12456_v5 = vld [vmem:[#allocation2 + $0x394] sm:$0xff]  }
0x183a   : > { %11859 = vmatprep.subr.bf16.mxu0 %v15094_v10 }
0x183d   : > { %11860 = vmatpush3.bf16.msra.mxu0 %v12441_v45  ;;  %v12458_v45 = vld [vmem:[#allocation2 + $0x3cc] sm:$0xff]  }
0x183e   : > { %11861 = vmatprep.subr.bf16.mxu0 %v15094_v10 }
0x1841   : > { %11862 = vmatpush3.bf16.msra.mxu0 %v12443_v20  ;;  %v12460_v20 = vld [vmem:[#allocation2 + $0x3dc] sm:$0xff]  }
0x1842   : > { %11863 = vmatprep.subr.bf16.mxu0 %v15094_v10 }
0x1845   : > { %11864 = vmatpush3.bf16.msra.mxu0 %v12445_v31  ;;  %v12462_v31 = vld [vmem:[#allocation2 + $0x3ec] sm:$0xff]  }
0x1846   : > { %11865 = vmatprep.subr.bf16.mxu0 %v15094_v10 }
0x1849   : > { %11866 = vmatpush3.bf16.msra.mxu0 %v12447_v1 }
0x184a   : > { %11897 = vmatprep.subr.bf16.mxu0 %v15094_v10 }
0x190b   : > { %v6941_v52 = vpop.f32.mrb[20].mxu0 }
0x190c   : > { %v6942_v17 = vadd.f32 %v9895_v15, %v6941_v52  ;;  %v11841_v3 = vpop.f32.mrb[21].mxu0 }
0x190d   : > { %v6944_v47 = vpop.f32.mrb[22].mxu0 }
0x190e   : > { %v6952_v41 = vmul.f32 %v9902_v62, %v6942_v17  ;;  %v11842_v16 = vpop.f32.mrb[23].mxu0 }
0x1910   : > { %v6958_v53 = vadd.f32 %v9903_v49, %v6952_v41 }
0x1912   : > { %v6959_v36 = vmax.f32 %v6958_v53, 0.0  ;;  %v12463_v53 = vld [vmem:[#allocation2 + $0x3a4] sm:$0xff]  }
0x1914   : > { %v14569_v14 = vpack.c.bf16 %v6959_v36, %v6959_v36  ;;  %v12464_v36 = vld [vmem:[#allocation2 + $0x3ac] sm:$0xff]  }
0x1916   : > { %11854 = vmatmul.mubr.msk.bf16.vlgmr.msra.gmra.mrb[36].mxu1 %vm6903_vm10, %v14569_v14  ;;  %11868 = vmatmul.mubr.msk.bf16.vlgmr.msra.gmra.mrb[24].mxu0 %vm6903_vm10, %v14569_v14 }
0x1917   : > { %11873 = vmatprep.mubr.msk.bf16.mxu1 %vm12644_vm1, %v15094_v10  ;;  %11899 = vmatprep.mubr.msk.bf16.mxu0 %vm12644_vm1, %v15094_v10 }
0x19e9   : > { %v7038_v12 = vpop.f32.mrb[36].mxu1  ;;  %v7119_v26 = vpop.f32.mrb[24].mxu0 }
0x19ea   : > { %v7125_v4 = vpack.c.bf16 %v7119_v26, %v7119_v26  ;;  %v11855_v57 = vpop.f32.mrb[37].mxu1  ;;  %v11869_v61 = vpop.f32.mrb[25].mxu0  ;;  %v7044_v23 = vpack.c.bf16 %v7038_v12, %v7038_v12  ;;  %v12466_v12 = vld [vmem:[#allocation2 + $0x3bc] sm:$0xff]  }
0x19eb   : > { %v7041_v38 = vpop.f32.mrb[38].mxu1  ;;  %v7122_v18 = vpop.f32.mrb[26].mxu0 }
0x19ec   : > { %v7129_v32 = vsel %vm15164_vm6, %v7125_v4, 0  ;;  %v11856_v37 = vpop.f32.mrb[39].mxu1  ;;  %v11870_v63 = vpop.f32.mrb[27].mxu0  ;;  %v7174_v27 = vsel %vm15165_vm15, %v7044_v23, 0  ;;  %v12467_v4 = vld [vmem:[#allocation2 + $0x3c4] sm:$0xff]   ;;  %vm15178_vm6 = vmmov %vm15170_vm0  ;;  %vm8054_vm15 = vcmask 785408  }
0x19ed   : > { %11872 = vmatpush3.bf16.msra.mxu1 %v7129_v32  ;;  %v12468_v32 = vld [vmem:[#allocation2 + $0x3f4] sm:$0xff]   ;;  %v12469_v37 = vld [vmem:[#allocation2 + $0x3fc] sm:$0xff]   ;;  %v12470_v63 = vld [vmem:[#allocation2 + $0x404] sm:$0xff]  }
0x19ee   : > { %11877 = vmatprep.subr.bf16.mxu1 %v15094_v10 }
0x19f0   : > { %11874 = vmatmul.mubr.msk.bf16.vlgmr.msra.gmra.mrb[40].mxu1 %vm15166_vm4, %v14431_v60  ;;  %vm8296_vm4 = vcmask 1041408  }
0x19f1   : > { %11878 = vmatpush3.bf16.msra.mxu1 %v7174_v27  ;;  %11879 = vmatprep.mubr.msk.bf16.mxu1 %vm12644_vm1, %v15094_v10  ;;  %v12471_v27 = vld [vmem:[#allocation2 + $0x40c] sm:$0xff]  }
0x19f2   : > { %11883 = vmatprep.subr.bf16.mxu1 %v15094_v10 }
0x19f8   : > { %11880 = vmatmul.mubr.msk.bf16.vlgmr.msra.gmra.mrb[44].mxu1 %vm15167_vm7, %v14441_v21  ;;  %vm8293_vm7 = vcmask 31744  }
0x19f9   : > { %11884 = vmatpush3.bf16.msra.mxu1 %v12448_v48  ;;  %11893 = vmatprep.mubr.msk.bf16.mxu1 %vm12644_vm1, %v15094_v10  ;;  %v12472_v48 = vld [vmem:[#allocation2 + $0x414] sm:$0xff]  }
0x19fa   : > { %11885 = vmatprep.subr.bf16.mxu1 %v15094_v10 }
0x19fd   : > { %11886 = vmatpush3.bf16.msra.mxu1 %v12449_v28 }
0x19fe   : > { %11887 = vmatprep.subr.bf16.mxu1 %v15094_v10 }
0x1a01   : > { %11888 = vmatpush3.bf16.msra.mxu1 %v12450_v34 }
0x1a02   : > { %11889 = vmatprep.subr.bf16.mxu1 %v15094_v10 }
0x1a05   : > { %11890 = vmatpush3.bf16.msra.mxu1 %v12451_v13 }
0x1a06   : > { %11891 = vmatprep.subr.bf16.mxu1 %v15094_v10 }
0x1a09   : > { %11892 = vmatpush3.bf16.msra.mxu1 %v12452_v43 }
0x1a0a   : > { %11917 = vmatprep.subr.bf16.mxu1 %v15094_v10 }
0x1a0c   : > { %11894 = vmatmul.mubr.msk.bf16.vlgmr.msra.gmra.mrb[48].mxu1 %vm6903_vm10, %v14569_v14 }
0x1a0d   : > { %11919 = vmatprep.mubr.msk.bf16.mxu1 %vm12644_vm1, %v15094_v10 }
0x1ac3   : > { %v7165_v35 = vpop.f32.mrb[40].mxu1 }
0x1ac4   : > { %v11875_v42 = vpop.f32.mrb[41].mxu1 }
0x1ac5   : > { %v7168_v24 = vpop.f32.mrb[42].mxu1 }
0x1ac6   : > { %v11876_v9 = vpop.f32.mrb[43].mxu1 }
0x1acb   : > { %v7210_v40 = vpop.f32.mrb[44].mxu1 }
0x1acc   : > { %v7211_v29 = vadd.f32 %v7210_v40, %v7165_v35  ;;  %v11881_v50 = vpop.f32.mrb[45].mxu1 }
0x1acd   : > { %v7213_v8 = vpop.f32.mrb[46].mxu1 }
0x1ace   : > { %v11882_v25 = vpop.f32.mrb[47].mxu1 }
0x1adf   : > { %v7290_v19 = vpop.f32.mrb[48].mxu1 }
0x1ae0   : > { %v7296_v46 = vpack.c.bf16 %v7290_v19, %v7290_v19  ;;  %v11895_v39 = vpop.f32.mrb[49].mxu1 }
0x1ae1   : > { %v7293_v30 = vpop.f32.mrb[50].mxu1 }
0x1ae2   : > { %v7300_v6 = vsel %vm15168_vm11, %v7296_v46, 0  ;;  %v11896_v59 = vpop.f32.mrb[51].mxu1 }
0x1ae3   : > { %11898 = vmatpush3.bf16.msra.mxu0 %v7300_v6 }
0x1ae4   : > { %11903 = vmatprep.subr.bf16.mxu0 %v15094_v10 }
0x1ae6   : > { %11900 = vmatmul.mubr.msk.bf16.vlgmr.msra.gmra.mrb[28].mxu0 %vm15169_vm8, %v14449_v22  ;;  %vm9309_vm8 = vcmask 319488  }
0x1ae7   : > { %11904 = vmatpush3.bf16.msra.mxu0 %v12453_v51  ;;  %11913 = vmatprep.mubr.msk.bf16.mxu0 %vm12644_vm1, %v15094_v10 }
0x1ae8   : > { %11905 = vmatprep.subr.bf16.mxu0 %v15094_v10 }
0x1aeb   : > { %11906 = vmatpush3.bf16.msra.mxu0 %v12454_v58 }
0x1aec   : > { %11907 = vmatprep.subr.bf16.mxu0 %v15094_v10 }
0x1aef   : > { %11908 = vmatpush3.bf16.msra.mxu0 %v12455_v11  ;;  %v12473_v11 = vld [vmem:[#allocation2 + $0x41c] sm:$0xff]  }
0x1af0   : > { %11909 = vmatprep.subr.bf16.mxu0 %v15094_v10 }
0x1af3   : > { %11910 = vmatpush3.bf16.msra.mxu0 %v12456_v5  ;;  %v12475_v5 = vld [vmem:[#allocation2 + $0x42c] sm:$0xff]  }
0x1af4   : > { %11911 = vmatprep.subr.bf16.mxu0 %v15094_v10 }
0x1af7   : > { %11912 = vmatpush3.bf16.msra.mxu0 %v12457_v7  ;;  %v12476_v7 = vld [vmem:[#allocation2 + $0x434] sm:$0xff]  }
0x1af8   : > { %11937 = vmatprep.subr.bf16.mxu0 %v15094_v10 }
0x1afa   : > { %11914 = vmatmul.mubr.msk.bf16.vlgmr.msra.gmra.mrb[32].mxu0 %vm6903_vm10, %v14569_v14  ;;  %v12465_v14 = vld [vmem:[#allocation2 + $0x3b4] sm:$0xff]  }
0x1afb   : > { %11938 = vmatpush3.bf16.msra.mxu0 %v12458_v45  ;;  %11947 = vmatprep.mubr.msk.bf16.mxu0 %vm12644_vm1, %v15094_v10  ;;  %v12477_v45 = vld [vmem:[#allocation2 + $0x43c] sm:$0xff]  }
0x1afc   : > { %11939 = vmatprep.subr.bf16.mxu0 %v15094_v10 }
0x1aff   : > { %11940 = vmatpush3.bf16.msra.mxu0 %v12459_v0 }
0x1b00   : > { %11941 = vmatprep.subr.bf16.mxu0 %v15094_v10 }
0x1b03   : > { %11942 = vmatpush3.bf16.msra.mxu0 %v12460_v20 }
0x1b04   : > { %11943 = vmatprep.subr.bf16.mxu0 %v15094_v10 }
0x1b07   : > { %11944 = vmatpush3.bf16.msra.mxu0 %v12461_v54 }
0x1b08   : > { %11945 = vmatprep.subr.bf16.mxu0 %v15094_v10 }
0x1b0b   : > { %11946 = vmatpush3.bf16.msra.mxu0 %v12462_v31 }
0x1b0c   : > { %11957 = vmatprep.subr.bf16.mxu0 %v15094_v10 }
0x1b0e   : > { %11948 = vmatmul.mubr.msk.bf16.vlgmr.msra.gmra.mrb[36].mxu0 %vm6903_vm10, %v14621_v2 }
0x1b0f   : > { %11959 = vmatprep.mubr.msk.bf16.mxu0 %vm12644_vm1, %v15094_v10 }
0x1bb9   : > { %v7336_v1 = vpop.f32.mrb[28].mxu0 }
0x1bba   : > { %v7342_v15 = vadd.f32 %v7336_v1, %v7211_v29  ;;  %v11901_v52 = vpop.f32.mrb[29].mxu0 }
0x1bbb   : > { %v7339_v62 = vpop.f32.mrb[30].mxu0 }
0x1bbc   : > { %v11902_v17 = vpop.f32.mrb[31].mxu0 }
0x1bcd   : > { %v7417_v3 = vpop.f32.mrb[32].mxu0 }
0x1bce   : > { %v7423_v49 = vpack.c.bf16 %v7417_v3, %v7417_v3  ;;  %v11915_v47 = vpop.f32.mrb[33].mxu0 }
0x1bcf   : > { %v7420_v41 = vpop.f32.mrb[34].mxu0 }
0x1bd0   : > { %v7427_v33 = vsel %vm15170_vm0, %v7423_v49, 0  ;;  %v11916_v16 = vpop.f32.mrb[35].mxu0 }
0x1bd1   : > { %11918 = vmatpush3.bf16.msra.mxu1 %v7427_v33 }
0x1bd2   : > { %11923 = vmatprep.subr.bf16.mxu1 %v15094_v10 }
0x1bd4   : > { %11920 = vmatmul.mubr.msk.bf16.vlgmr.msra.gmra.mrb[52].mxu1 %vm15171_vm5, %v14473_v44 }
0x1bd5   : > { %11924 = vmatpush3.bf16.msra.mxu1 %v12463_v53  ;;  %11933 = vmatprep.mubr.msk.bf16.mxu1 %vm12644_vm1, %v15094_v10  ;;  %v12478_v53 = vld [vmem:[#allocation2 + $0x444] sm:$0xff]  }
0x1bd6   : > { %11925 = vmatprep.subr.bf16.mxu1 %v15094_v10 }
0x1bd9   : > { %11926 = vmatpush3.bf16.msra.mxu1 %v12464_v36  ;;  %v12479_v36 = vld [vmem:[#allocation2 + $0x44c] sm:$0xff]  }
0x1bda   : > { %11927 = vmatprep.subr.bf16.mxu1 %v15094_v10 }
0x1bdd   : > { %11928 = vmatpush3.bf16.msra.mxu1 %v12465_v14  ;;  %v12480_v14 = vld [vmem:[#allocation2 + $0x454] sm:$0xff]  }
0x1bde   : > { %11929 = vmatprep.subr.bf16.mxu1 %v15094_v10 }
0x1be1   : > { %11930 = vmatpush3.bf16.msra.mxu1 %v12466_v12  ;;  %v7635_v26 = vpop.f32.mrb[36].mxu0  ;;  %v12481_v12 = vld [vmem:[#allocation2 + $0x45c] sm:$0xff]  }
0x1be2   : > { %v11949_v57 = vpop.f32.mrb[37].mxu0  ;;  %11931 = vmatprep.subr.bf16.mxu1 %v15094_v10  ;;  %v7641_v38 = vpack.c.bf16 %v7635_v26, %v7635_v26  ;;  %v12482_v26 = vld [vmem:[#allocation2 + $0x464] sm:$0xff]  }
0x1be3   : > { %v7638_v61 = vpop.f32.mrb[38].mxu0  ;;  %v12484_v57 = vld [vmem:[#allocation2 + $0x474] sm:$0xff]  }
0x1be4   : > { %v11950_v18 = vpop.f32.mrb[39].mxu0  ;;  %v7643_v23 = vsel %vm15172_vm2, %v7641_v38, 0  ;;  %v12486_v61 = vld [vmem:[#allocation2 + $0x47c] sm:$0xff]   ;;  %v12488_v38 = vld [vmem:[#allocation2 + $0x484] sm:$0xff]  }
0x1be5   : > { %11932 = vmatpush3.bf16.msra.mxu1 %v12467_v4  ;;  %v12483_v4 = vld [vmem:[#allocation2 + $0x46c] sm:$0xff]   ;;  %v9932_v18 = vld [vmem:[%s14927_s2 + $0x22] ss:$0 sm:$0xff] }
0x1be6   : > { %11951 = vmatprep.subr.bf16.mxu1 %v15094_v10 }
0x1be8   : > { %11934 = vmatmul.mubr.msk.bf16.vlgmr.msra.gmra.mrb[56].mxu1 %vm6903_vm10, %v14621_v2 }
0x1be9   : > { %11952 = vmatpush3.bf16.msra.mxu1 %v7643_v23  ;;  %11953 = vmatprep.mubr.msk.bf16.mxu1 %vm12644_vm1, %v15094_v10 }
0x1bea   : > { %11963 = vmatprep.subr.bf16.mxu1 %v15094_v10 }
0x1bf0   : > { %11954 = vmatmul.mubr.msk.bf16.vlgmr.msra.gmra.mrb[60].mxu1 %vm15173_vm9, %v14431_v60 }
0x1bf1   : > { %11964 = vmatpush3.bf16.msra.mxu1 %v12468_v32  ;;  %11973 = vmatprep.mubr.msk.bf16.mxu1 %vm12644_vm1, %v15094_v10  ;;  %v9961_v32 = vld [vmem:[%s14927_s2 + $0x23] ss:$0 sm:$0xff] }
0x1bf2   : > { %11965 = vmatprep.subr.bf16.mxu1 %v15094_v10 }
0x1bf5   : > { %11966 = vmatpush3.bf16.msra.mxu1 %v12469_v37 }
0x1bf6   : > { %11967 = vmatprep.subr.bf16.mxu1 %v15094_v10 }
0x1bf9   : > { %11968 = vmatpush3.bf16.msra.mxu1 %v12470_v63 }
0x1bfa   : > { %11969 = vmatprep.subr.bf16.mxu1 %v15094_v10 }
0x1bfd   : > { %11970 = vmatpush3.bf16.msra.mxu1 %v12471_v27 }
0x1bfe   : > { %11971 = vmatprep.subr.bf16.mxu1 %v15094_v10 }
0x1c01   : > { %11972 = vmatpush3.bf16.msra.mxu1 %v12472_v48 }
0x1c02   : > { %11997 = vmatprep.subr.bf16.mxu1 %v15094_v10 }
0x1c04   : > { %11974 = vmatmul.mubr.msk.bf16.vlgmr.msra.gmra.mrb[64].mxu1 %vm6903_vm10, %v14621_v2 }
0x1c05   : > { %11999 = vmatprep.mubr.msk.bf16.mxu1 %vm12644_vm1, %v15094_v10 }
0x1ca7   : > { %v7463_v28 = vpop.f32.mrb[52].mxu1 }
0x1ca8   : > { %v14658_v34 = vadd.f32 %v7463_v28, %v7342_v15  ;;  %v11921_v13 = vpop.f32.mrb[53].mxu1 }
0x1ca9   : > { %v7466_v43 = vpop.f32.mrb[54].mxu1 }
0x1caa   : > { %v11922_v35 = vpop.f32.mrb[55].mxu1  ;;  %v7475_v37 = vadd.f32 %v9932_v18, %v14658_v34 }
0x1cac   : > { %v7985_v43 = vmul.f32 0.3, %v7475_v37 }
0x1cbb   : > { %v7554_v42 = vpop.f32.mrb[56].mxu1 }
0x1cbc   : > { %v7560_v24 = vpack.c.bf16 %v7554_v42, %v7554_v42  ;;  %v11935_v9 = vpop.f32.mrb[57].mxu1  ;;  %v9962_v42 = vld [vmem:[%s14927_s2 + $0x24] ss:$0 sm:$0xff] }
0x1cbd   : > { %v7557_v40 = vpop.f32.mrb[58].mxu1  ;;  %v9963_v9 = vld [vmem:[%s14927_s2 + $0x25] ss:$0 sm:$0xff] }
0x1cbe   : > { %v7686_v29 = vsel %vm15174_vm12, %v7560_v24, 0  ;;  %v11936_v50 = vpop.f32.mrb[59].mxu1 }
0x1cbf   : > { %11958 = vmatpush3.bf16.msra.mxu0 %v7686_v29  ;;  %v12485_v50 = vld [vmem:[#allocation2 + $0x4a4] sm:$0xff]  }
0x1cc0   : > { %11977 = vmatprep.subr.bf16.mxu0 %v15094_v10 }
0x1cc2   : > { %11960 = vmatmul.mubr.msk.bf16.vlgmr.msra.gmra.mrb[40].mxu0 %vm15175_vm3, %v14441_v21  ;;  %v12474_v21 = vld [vmem:[#allocation2 + $0x424] sm:$0xff]  }
0x1cc3   : > { %v7679_v8 = vpop.f32.mrb[60].mxu1  ;;  %11979 = vmatprep.mubr.msk.bf16.mxu0 %vm12644_vm1, %v15094_v10 }
0x1cc4   : > { %v11955_v25 = vpop.f32.mrb[61].mxu1 }
0x1cc5   : > { %v7682_v19 = vpop.f32.mrb[62].mxu1  ;;  %v12487_v25 = vld [vmem:[#allocation2 + $0x4ac] sm:$0xff]  }
0x1cc6   : > { %v11956_v46 = vpop.f32.mrb[63].mxu1  ;;  %v12489_v19 = vld [vmem:[#allocation2 + $0x4b4] sm:$0xff]  }
0x1cc7   : > { %v12490_v46 = vld [vmem:[#allocation2 + $0x48c] sm:$0xff]  }
0x1cd7   : > { %v7802_v39 = vpop.f32.mrb[64].mxu1 }
0x1cd8   : > { %v7808_v30 = vpack.c.bf16 %v7802_v39, %v7802_v39  ;;  %v11975_v6 = vpop.f32.mrb[65].mxu1  ;;  %v12491_v39 = vld [vmem:[#allocation2 + $0x4bc] sm:$0xff]  }
0x1cd9   : > { %v7805_v59 = vpop.f32.mrb[66].mxu1  ;;  %v12493_v6 = vld [vmem:[#allocation2 + $0x4c4] sm:$0xff]  }
0x1cda   : > { %v7810_v51 = vsel %vm15176_vm13, %v7808_v30, 0  ;;  %v11976_v58 = vpop.f32.mrb[67].mxu1  ;;  %v12492_v30 = vld [vmem:[#allocation2 + $0x494] sm:$0xff]   ;;  %v12494_v59 = vld [vmem:[#allocation2 + $0x49c] sm:$0xff]  }
0x1cdb   : > { %11978 = vmatpush3.bf16.msra.mxu0 %v7810_v51  ;;  %v12495_v51 = vld [vmem:[#allocation2 + $0x4cc] sm:$0xff]   ;;  %v9964_v58 = vld [vmem:[%s14927_s2 + $0x28] ss:$0 sm:$0xff] }
0x1cdc   : > { %11983 = vmatprep.subr.bf16.mxu0 %v15094_v10 }
0x1cde   : > { %11980 = vmatmul.mubr.msk.bf16.vlgmr.msra.gmra.mrb[44].mxu0 %vm15177_vm14, %v14449_v22 }
0x1cdf   : > { %11984 = vmatpush3.bf16.msra.mxu0 %v12473_v11  ;;  %11993 = vmatprep.mubr.msk.bf16.mxu0 %vm12644_vm1, %v15094_v10 }
0x1ce0   : > { %11985 = vmatprep.subr.bf16.mxu0 %v15094_v10 }
0x1ce3   : > { %11986 = vmatpush3.bf16.msra.mxu0 %v12474_v21  ;;  %v9972_v21 = vld [vmem:[%s14927_s2 + $0x26] ss:$0 sm:$0xff] }
0x1ce4   : > { %11987 = vmatprep.subr.bf16.mxu0 %v15094_v10 }
0x1ce7   : > { %11988 = vmatpush3.bf16.msra.mxu0 %v12475_v5 }
0x1ce8   : > { %11989 = vmatprep.subr.bf16.mxu0 %v15094_v10 }
0x1ceb   : > { %11990 = vmatpush3.bf16.msra.mxu0 %v12476_v7 }
0x1cec   : > { %11991 = vmatprep.subr.bf16.mxu0 %v15094_v10 }
0x1cef   : > { %11992 = vmatpush3.bf16.msra.mxu0 %v12477_v45  ;;  %v9973_v45 = vld [vmem:[%s14927_s2 + $0x27] ss:$0 sm:$0xff] }
0x1cf0   : > { %12019 = vmatprep.subr.bf16.mxu0 %v15094_v10 }
0x1cf2   : > { %11994 = vmatmul.mubr.msk.bf16.vlgmr.msra.gmra.mrb[48].mxu0 %vm6903_vm10, %v14621_v2  ;;  %vm15179_vm10 = vmmov %vm15175_vm3 }
0x1cf3   : > { %12031 = vmatprep.mubr.msk.bf16.mxu0 %vm12644_vm1, %v15094_v10  ;;  %12020 = vmatpush3.bf16.msra.mxu0 %v12484_v57  ;;  %v12500_v57 = vld [vmem:[#allocation2 + $0x4f4] sm:$0xff]  }
0x1cf4   : > { %12021 = vmatprep.subr.bf16.mxu0 %v15094_v10 }
0x1cf7   : > { %12022 = vmatpush3.bf16.msra.mxu0 %v12486_v61  ;;  %v12501_v61 = vld [vmem:[#allocation2 + $0x4fc] sm:$0xff]  }
0x1cf8   : > { %12023 = vmatprep.subr.bf16.mxu0 %v15094_v10 }
0x1cfb   : > { %12024 = vmatpush3.bf16.msra.mxu0 %v12488_v38 }
0x1cfc   : > { %12025 = vmatprep.subr.bf16.mxu0 %v15094_v10 }
0x1cff   : > { %12026 = vmatpush3.bf16.msra.mxu0 %v12490_v46  ;;  %v12508_v46 = vld [vmem:[#allocation2 + $0x564] sm:$0xff]  }
0x1d00   : > { %12027 = vmatprep.subr.bf16.mxu0 %v15094_v10 }
0x1d03   : > { %12028 = vmatpush3.bf16.msra.mxu0 %v12492_v30  ;;  %v12510_v30 = vld [vmem:[#allocation2 + $0x574] sm:$0xff]  }
0x1d04   : > { %12029 = vmatprep.subr.bf16.mxu0 %v15094_v10 }
0x1d07   : > { %12030 = vmatpush3.bf16.msra.mxu0 %v12494_v59  ;;  %v12512_v59 = vld [vmem:[#allocation2 + $0x584] sm:$0xff]  }
0x1d08   : > { %12051 = vmatprep.subr.bf16.mxu0 %v15094_v10 }
0x1d95   : > { %v7722_v0 = vpop.f32.mrb[40].mxu0 }
0x1d96   : > { %v7723_v20 = vadd.f32 %v7722_v0, %v7679_v8  ;;  %v11961_v54 = vpop.f32.mrb[41].mxu0 }
0x1d97   : > { %v7725_v31 = vpop.f32.mrb[42].mxu0 }
0x1d98   : > { %v11962_v1 = vpop.f32.mrb[43].mxu0 }
0x1db1   : > { %v7846_v15 = vpop.f32.mrb[44].mxu0 }
0x1db2   : > { %v7852_v52 = vadd.f32 %v7846_v15, %v7723_v20  ;;  %v11981_v62 = vpop.f32.mrb[45].mxu0 }
0x1db3   : > { %v7849_v17 = vpop.f32.mrb[46].mxu0 }
0x1db4   : > { %v11982_v3 = vpop.f32.mrb[47].mxu0 }
0x1dc5   : > { %v7927_v49 = vpop.f32.mrb[48].mxu0 }
0x1dc6   : > { %v7933_v47 = vpack.c.bf16 %v7927_v49, %v7927_v49  ;;  %v11995_v41 = vpop.f32.mrb[49].mxu0 }
0x1dc7   : > { %v7930_v33 = vpop.f32.mrb[50].mxu0 }
0x1dc8   : > { %v7935_v16 = vsel %vm15178_vm6, %v7933_v47, 0  ;;  %v11996_v2 = vpop.f32.mrb[51].mxu0 }
0x1dc9   : > { %11998 = vmatpush3.bf16.msra.mxu1 %v7935_v16 }
0x1dca   : > { %12003 = vmatprep.subr.bf16.mxu1 %v15094_v10 }
0x1dcc   : > { %12000 = vmatmul.mubr.msk.bf16.vlgmr.msra.gmra.mrb[68].mxu1 %vm15179_vm10, %v14473_v44 }
0x1dcd   : > { %12004 = vmatpush3.bf16.msra.mxu1 %v12478_v53  ;;  %12015 = vmatprep.mubr.msk.bf16.mxu1 %vm12644_vm1, %v15094_v10 }
0x1dce   : > { %12005 = vmatprep.subr.bf16.mxu1 %v15094_v10 }
0x1dd1   : > { %12006 = vmatpush3.bf16.msra.mxu1 %v12479_v36 }
0x1dd2   : > { %12007 = vmatprep.subr.bf16.mxu1 %v15094_v10 }
0x1dd5   : > { %12008 = vmatpush3.bf16.msra.mxu1 %v12480_v14  ;;  %v12496_v14 = vld [vmem:[#allocation2 + $0x4d4] sm:$0xff]  }
0x1dd6   : > { %12009 = vmatprep.subr.bf16.mxu1 %v15094_v10 }
0x1dd9   : > { %12010 = vmatpush3.bf16.msra.mxu1 %v12481_v12  ;;  %v12497_v12 = vld [vmem:[#allocation2 + $0x4dc] sm:$0xff]  }
0x1dda   : > { %12011 = vmatprep.subr.bf16.mxu1 %v15094_v10 }
0x1ddd   : > { %12012 = vmatpush3.bf16.msra.mxu1 %v12482_v26  ;;  %v12498_v26 = vld [vmem:[#allocation2 + $0x4e4] sm:$0xff]  }
0x1dde   : > { %12013 = vmatprep.subr.bf16.mxu1 %v15094_v10 }
0x1de1   : > { %12014 = vmatpush3.bf16.msra.mxu1 %v12483_v4  ;;  %v12499_v4 = vld [vmem:[#allocation2 + $0x4ec] sm:$0xff]  }
0x1de2   : > { %12035 = vmatprep.subr.bf16.mxu1 %v15094_v10 }
0x1e9f   : > { %v7971_v23 = vpop.f32.mrb[68].mxu1 }
0x1ea0   : > { %v7977_v63 = vadd.f32 %v7971_v23, %v7852_v52  ;;  %v12001_v27 = vpop.f32.mrb[69].mxu1 }
0x1ea1   : > { %v7974_v48 = vpop.f32.mrb[70].mxu1 }
0x1ea2   : > { %v7983_v28 = vadd.f32 %v9961_v32, %v7977_v63  ;;  %v12002_v13 = vpop.f32.mrb[71].mxu1 }
0x1ea4   : > { %v7984_v35 = vmul.f32 2.0, %v7983_v28 }
0x1ea6   : > { %v14706_v24 = vadd.f32 %v7985_v43, %v7984_v35 }
0x1ea8   : > { %v7992_v40 = vmul.f32 %v9962_v42, %v14706_v24 }
0x1eaa   : > { %v7998_v34 = vadd.f32 %v9963_v9, %v7992_v40 }
0x1eac   : > { %v7999_v29 = vmax.f32 %v7998_v34, 0.0  ;;  %v12502_v34 = vld [vmem:[#allocation2 + $0x504] sm:$0xff]  }
0x1eae   : > { %v8000_v8 = vpack.c.bf16 %v7999_v29, %v7999_v29  ;;  %v12503_v29 = vld [vmem:[#allocation2 + $0x50c] sm:$0xff]  }
0x1eb0   : > { %12016 = vmatmul.mubr.msk.bf16.vlgmr.msra.gmra.mrb[72].mxu1 %vm8054_vm15, %v8000_v8  ;;  %v12505_v8 = vld [vmem:[#allocation2 + $0x51c] sm:$0xff]  }
0x1eb1   : > { %12036 = vmatpush3.bf16.msra.mxu1 %v12485_v50  ;;  %12047 = vmatprep.mubr.msk.bf16.mxu1 %vm12644_vm1, %v15094_v10  ;;  %v12504_v50 = vld [vmem:[#allocation2 + $0x514] sm:$0xff]  }
0x1eb2   : > { %12037 = vmatprep.subr.bf16.mxu1 %v15094_v10 }
0x1eb5   : > { %12038 = vmatpush3.bf16.msra.mxu1 %v12487_v25  ;;  %v12506_v25 = vld [vmem:[#allocation2 + $0x524] sm:$0xff]  }
0x1eb6   : > { %12039 = vmatprep.subr.bf16.mxu1 %v15094_v10 }
0x1eb9   : > { %12040 = vmatpush3.bf16.msra.mxu1 %v12489_v19  ;;  %v12507_v19 = vld [vmem:[#allocation2 + $0x52c] sm:$0xff]  }
0x1eba   : > { %12041 = vmatprep.subr.bf16.mxu1 %v15094_v10 }
0x1ebd   : > { %12042 = vmatpush3.bf16.msra.mxu1 %v12491_v39  ;;  %v12509_v39 = vld [vmem:[#allocation2 + $0x56c] sm:$0xff]  }
0x1ebe   : > { %12043 = vmatprep.subr.bf16.mxu1 %v15094_v10 }
0x1ec1   : > { %12044 = vmatpush3.bf16.msra.mxu1 %v12493_v6  ;;  %v12511_v6 = vld [vmem:[#allocation2 + $0x57c] sm:$0xff]  }
0x1ec2   : > { %12045 = vmatprep.subr.bf16.mxu1 %v15094_v10 }
0x1ec5   : > { %12046 = vmatpush3.bf16.msra.mxu1 %v12495_v51  ;;  %v12513_v51 = vld [vmem:[#allocation2 + $0x58c] sm:$0xff]  }
0x1ec6   : > { %12079 = vmatprep.subr.bf16.mxu1 %v15094_v10 }
0x1f83   : > { %v8092_v11 = vpop.f32.mrb[72].mxu1 }
0x1f84   : > { %v8093_v5 = vadd.f32 %v9964_v58, %v8092_v11  ;;  %v12017_v7 = vpop.f32.mrb[73].mxu1  ;;  %v14788_v58 = vpack.c.bf16 %v14706_v24, %v14706_v24 }
0x1f85   : > { %v8095_v0 = vpop.f32.mrb[74].mxu1 }
0x1f86   : > { %v8103_v20 = vmul.f32 %v9972_v21, %v8093_v5  ;;  %v12018_v54 = vpop.f32.mrb[75].mxu1  ;;  %v8608_v0 = vadd.s32 3, %v12894_v56  ;;  %v12516_v56 = vld [vmem:[#allocation2 + $0x544] sm:$0xff]  }
0x1f88   : > { %v8109_v31 = vadd.f32 %v9973_v45, %v8103_v20  ;;  %vm8609_vm11 = vcmp.eq.s32.totalorder %v12891_v55, %v8608_v0  ;;  %v12515_v55 = vld [vmem:[#allocation2 + $0x53c] sm:$0xff]  }
0x1f89   : > { %v8610_v20 = vsel %vm8609_vm11, 1.0, %v15094_v10 }
0x1f8a   : > { %v8110_v1 = vmax.f32 %v8109_v31, 0.0 }
0x1f8c   : > { %v14733_v15 = vpack.c.bf16 %v8110_v1, %v8110_v1 }
0x1f8e   : > { %12032 = vmatmul.mubr.msk.bf16.vlgmr.msra.gmra.mrb[52].mxu0 %vm8054_vm15, %v14733_v15  ;;  %12048 = vmatmul.mubr.msk.bf16.vlgmr.msra.gmra.mrb[76].mxu1 %vm8054_vm15, %v14733_v15 }
0x1f8f   : > { %12053 = vmatprep.mubr.msk.bf16.mxu0 %vm12644_vm1, %v15094_v10  ;;  %12081 = vmatprep.mubr.msk.bf16.mxu1 %vm12644_vm1, %v15094_v10 }
0x2061   : > { %v8197_v52 = vpop.f32.mrb[52].mxu0  ;;  %v8286_v62 = vpop.f32.mrb[76].mxu1 }
0x2062   : > { %v8292_v17 = vpack.c.bf16 %v8286_v62, %v8286_v62  ;;  %v12033_v3 = vpop.f32.mrb[53].mxu0  ;;  %v12049_v49 = vpop.f32.mrb[77].mxu1  ;;  %v8203_v33 = vpack.c.bf16 %v8197_v52, %v8197_v52  ;;  %v14801_v62 = vpack.c.bf16 %v8610_v20, %v8610_v20 }
0x2063   : > { %v8200_v47 = vpop.f32.mrb[54].mxu0  ;;  %v8289_v41 = vpop.f32.mrb[78].mxu1  ;;  %v12517_v3 = vld [vmem:[#allocation2 + $0x54c] sm:$0xff]   ;;  %v12518_v49 = vld [vmem:[#allocation2 + $0x554] sm:$0xff]  }
0x2064   : > { %v8298_v16 = vsel %vm8296_vm4, %v8292_v17, 0  ;;  %v12034_v2 = vpop.f32.mrb[55].mxu0  ;;  %v12050_v53 = vpop.f32.mrb[79].mxu1  ;;  %v8343_v36 = vsel %vm8296_vm4, %v8203_v33, 0  ;;  %v12514_v17 = vld [vmem:[#allocation2 + $0x534] sm:$0xff]   ;;  %v12519_v41 = vld [vmem:[#allocation2 + $0x55c] sm:$0xff]  }
0x2065   : > { %12052 = vmatpush3.bf16.msra.mxu0 %v8298_v16 }
0x2066   : > { %12057 = vmatprep.subr.bf16.mxu0 %v15094_v10 }
0x2068   : > { %12054 = vmatmul.mubr.msk.bf16.vlgmr.msra.gmra.mrb[56].mxu0 %vm8293_vm7, %v14449_v22 }
0x2069   : > { %12058 = vmatpush3.bf16.msra.mxu0 %v8343_v36  ;;  %12059 = vmatprep.mubr.msk.bf16.mxu0 %vm12644_vm1, %v15094_v10 }
0x206a   : > { %12063 = vmatprep.subr.bf16.mxu0 %v15094_v10 }
0x2070   : > { %12060 = vmatmul.mubr.msk.bf16.vlgmr.msra.gmra.mrb[60].mxu0 %vm8293_vm7, %v14431_v60 }
0x2071   : > { %12064 = vmatpush3.bf16.msra.mxu0 %v12496_v14  ;;  %12075 = vmatprep.mubr.msk.bf16.mxu0 %vm12644_vm1, %v15094_v10  ;;  %v12520_v14 = vld [vmem:[#allocation2 + $0x594] sm:$0xff]  }
0x2072   : > { %12065 = vmatprep.subr.bf16.mxu0 %v15094_v10 }
0x2075   : > { %12066 = vmatpush3.bf16.msra.mxu0 %v12497_v12  ;;  %v12521_v12 = vld [vmem:[#allocation2 + $0x59c] sm:$0xff]  }
0x2076   : > { %12067 = vmatprep.subr.bf16.mxu0 %v15094_v10 }
0x2079   : > { %12068 = vmatpush3.bf16.msra.mxu0 %v12498_v26  ;;  %v12522_v26 = vld [vmem:[#allocation2 + $0x5a4] sm:$0xff]  }
0x207a   : > { %12069 = vmatprep.subr.bf16.mxu0 %v15094_v10 }
0x207d   : > { %12070 = vmatpush3.bf16.msra.mxu0 %v12499_v4  ;;  %v12523_v4 = vld [vmem:[#allocation2 + $0x5ac] sm:$0xff]  }
0x207e   : > { %12071 = vmatprep.subr.bf16.mxu0 %v15094_v10 }
0x2081   : > { %12072 = vmatpush3.bf16.msra.mxu0 %v12500_v57  ;;  %v12524_v57 = vld [vmem:[#allocation2 + $0x5b4] sm:$0xff]  }
0x2082   : > { %12073 = vmatprep.subr.bf16.mxu0 %v15094_v10 }
0x2085   : > { %12074 = vmatpush3.bf16.msra.mxu0 %v12501_v61 }
0x2086   : > { %12101 = vmatprep.subr.bf16.mxu0 %v15094_v10 }
0x2088   : > { %12076 = vmatmul.mubr.msk.bf16.vlgmr.msra.gmra.mrb[64].mxu0 %vm8054_vm15, %v14733_v15 }
0x2089   : > { %12103 = vmatprep.mubr.msk.bf16.mxu0 %vm12644_vm1, %v15094_v10 }
0x213b   : > { %v8334_v38 = vpop.f32.mrb[56].mxu0 }
0x213c   : > { %v12055_v18 = vpop.f32.mrb[57].mxu0 }
0x213d   : > { %v8337_v23 = vpop.f32.mrb[58].mxu0 }
0x213e   : > { %v12056_v32 = vpop.f32.mrb[59].mxu0 }
0x2143   : > { %v8379_v37 = vpop.f32.mrb[60].mxu0 }
0x2144   : > { %v8380_v63 = vadd.f32 %v8379_v37, %v8334_v38  ;;  %v12061_v27 = vpop.f32.mrb[61].mxu0 }
0x2145   : > { %v8382_v48 = vpop.f32.mrb[62].mxu0 }
0x2146   : > { %v12062_v28 = vpop.f32.mrb[63].mxu0 }
0x215b   : > { %v8467_v13 = vpop.f32.mrb[64].mxu0 }
0x215c   : > { %v8473_v43 = vpack.c.bf16 %v8467_v13, %v8467_v13  ;;  %v12077_v35 = vpop.f32.mrb[65].mxu0 }
0x215d   : > { %v8470_v42 = vpop.f32.mrb[66].mxu0 }
0x215e   : > { %v8477_v9 = vsel %vm8296_vm4, %v8473_v43, 0  ;;  %v12078_v40 = vpop.f32.mrb[67].mxu0 }
0x215f   : > { %12080 = vmatpush3.bf16.msra.mxu1 %v8477_v9 }
0x2160   : > { %12085 = vmatprep.subr.bf16.mxu1 %v15094_v10 }
0x2162   : > { %12082 = vmatmul.mubr.msk.bf16.vlgmr.msra.gmra.mrb[80].mxu1 %vm8293_vm7, %v14473_v44 }
0x2163   : > { %12086 = vmatpush3.bf16.msra.mxu1 %v12502_v34  ;;  %12097 = vmatprep.mubr.msk.bf16.mxu1 %vm12644_vm1, %v15094_v10 }
0x2164   : > { %12087 = vmatprep.subr.bf16.mxu1 %v15094_v10 }
0x2167   : > { %12088 = vmatpush3.bf16.msra.mxu1 %v12503_v29 }
0x2168   : > { %12089 = vmatprep.subr.bf16.mxu1 %v15094_v10 }
0x216b   : > { %12090 = vmatpush3.bf16.msra.mxu1 %v12504_v50 }
0x216c   : > { %12091 = vmatprep.subr.bf16.mxu1 %v15094_v10 }
0x216f   : > { %12092 = vmatpush3.bf16.msra.mxu1 %v12505_v8 }
0x2170   : > { %12093 = vmatprep.subr.bf16.mxu1 %v15094_v10 }
0x2173   : > { %12094 = vmatpush3.bf16.msra.mxu1 %v12506_v25 }
0x2174   : > { %12095 = vmatprep.subr.bf16.mxu1 %v15094_v10 }
0x2177   : > { %12096 = vmatpush3.bf16.msra.mxu1 %v12507_v19  ;;  %v12526_v19 = vld [vmem:[#allocation2 + $0x5c4] sm:$0xff]  }
0x2178   : > { %12123 = vmatprep.subr.bf16.mxu1 %v15094_v10 }
0x217a   : > { %12098 = vmatmul.mubr.msk.bf16.vlgmr.msra.gmra.mrb[84].mxu1 %vm8054_vm15, %v14733_v15 }
0x217b   : > { %12124 = vmatpush3.bf16.msra.mxu1 %v12508_v46  ;;  %12135 = vmatprep.mubr.msk.bf16.mxu1 %vm12644_vm1, %v15094_v10  ;;  %v12528_v46 = vld [vmem:[#allocation2 + $0x5d4] sm:$0xff]  }
0x217c   : > { %12125 = vmatprep.subr.bf16.mxu1 %v15094_v10 }
0x217f   : > { %12126 = vmatpush3.bf16.msra.mxu1 %v12509_v39  ;;  %v12529_v39 = vld [vmem:[#allocation2 + $0x5dc] sm:$0xff]  }
0x2180   : > { %12127 = vmatprep.subr.bf16.mxu1 %v15094_v10 }
0x2183   : > { %12128 = vmatpush3.bf16.msra.mxu1 %v12510_v30  ;;  %v12530_v30 = vld [vmem:[#allocation2 + $0x5e4] sm:$0xff]  }
0x2184   : > { %12129 = vmatprep.subr.bf16.mxu1 %v15094_v10 }
0x2187   : > { %12130 = vmatpush3.bf16.msra.mxu1 %v12511_v6 }
0x2188   : > { %12131 = vmatprep.subr.bf16.mxu1 %v15094_v10 }
0x218b   : > { %12132 = vmatpush3.bf16.msra.mxu1 %v12512_v59 }
0x218c   : > { %12133 = vmatprep.subr.bf16.mxu1 %v15094_v10 }
0x218f   : > { %12134 = vmatpush3.bf16.msra.mxu1 %v12513_v51 }
0x2190   : > { %12145 = vmatprep.subr.bf16.mxu1 %v15094_v10 }
0x2192   : > { %12136 = vmatmul.mubr.msk.bf16.vlgmr.msra.gmra.mrb[88].mxu1 %vm8054_vm15, %v14788_v58 }
0x2193   : > { %12147 = vmatprep.mubr.msk.bf16.mxu1 %vm12644_vm1, %v15094_v10 }
0x2235   : > { %v8513_v11 = vpop.f32.mrb[80].mxu1 }
0x2236   : > { %v14795_v21 = vadd.f32 %v8513_v11, %v8380_v63  ;;  %v12083_v5 = vpop.f32.mrb[81].mxu1 }
0x2237   : > { %v8516_v7 = vpop.f32.mrb[82].mxu1 }
0x2238   : > { %v12084_v45 = vpop.f32.mrb[83].mxu1 }
0x224d   : > { %v8602_v24 = vpop.f32.mrb[84].mxu1 }
0x224e   : > { %v8612_v54 = vpack.c.bf16 %v8602_v24, %v8602_v24  ;;  %v12099_v31 = vpop.f32.mrb[85].mxu1 }
0x224f   : > { %v8605_v1 = vpop.f32.mrb[86].mxu1 }
0x2250   : > { %v8617_v15 = vsel %vm8296_vm4, %v8612_v54, 0  ;;  %v12100_v52 = vpop.f32.mrb[87].mxu1 }
0x2251   : > { %12102 = vmatpush3.bf16.msra.mxu0 %v8617_v15 }
0x2252   : > { %12107 = vmatprep.subr.bf16.mxu0 %v15094_v10 }
0x2254   : > { %12104 = vmatmul.mubr.msk.bf16.vlgmr.msra.gmra.mrb[68].mxu0 %vm8293_vm7, %v14801_v62 }
0x2255   : > { %12108 = vmatpush3.bf16.msra.mxu0 %v12514_v17  ;;  %12119 = vmatprep.mubr.msk.bf16.mxu0 %vm12644_vm1, %v15094_v10  ;;  %v12532_v17 = vld [vmem:[#allocation2 + $0x5f4] sm:$0xff]  }
0x2256   : > { %12109 = vmatprep.subr.bf16.mxu0 %v15094_v10 }
0x2259   : > { %12110 = vmatpush3.bf16.msra.mxu0 %v12515_v55  ;;  %v12534_v55 = vld [vmem:[#allocation2 + $0x604] sm:$0xff]  }
0x225a   : > { %12111 = vmatprep.subr.bf16.mxu0 %v15094_v10 }
0x225d   : > { %12112 = vmatpush3.bf16.msra.mxu0 %v12516_v56  ;;  %v12535_v56 = vld [vmem:[#allocation2 + $0x60c] sm:$0xff]  }
0x225e   : > { %12113 = vmatprep.subr.bf16.mxu0 %v15094_v10 }
0x2261   : > { %12114 = vmatpush3.bf16.msra.mxu0 %v12517_v3  ;;  %v12536_v3 = vld [vmem:[#allocation2 + $0x614] sm:$0xff]  }
0x2262   : > { %12115 = vmatprep.subr.bf16.mxu0 %v15094_v10 }
0x2265   : > { %12116 = vmatpush3.bf16.msra.mxu0 %v12518_v49  ;;  %v8837_v47 = vpop.f32.mrb[88].mxu1  ;;  %v12538_v49 = vld [vmem:[#allocation2 + $0x624] sm:$0xff]  }
0x2266   : > { %v12137_v33 = vpop.f32.mrb[89].mxu1  ;;  %12117 = vmatprep.subr.bf16.mxu0 %v15094_v10  ;;  %v8843_v2 = vpack.c.bf16 %v8837_v47, %v8837_v47  ;;  %v8660_v47 = vld [vmem:[%s14927_s2 + $0x29] sm:$0x1] }
0x2267   : > { %v8840_v16 = vpop.f32.mrb[90].mxu1  ;;  %v9196_v33 = vld [vmem:[%s14927_s2 + $0x2a] sm:$0x1] }
0x2268   : > { %v12138_v53 = vpop.f32.mrb[91].mxu1  ;;  %v8845_v36 = vsel %vm8296_vm4, %v8843_v2, 0 }
0x2269   : > { %12118 = vmatpush3.bf16.msra.mxu0 %v12519_v41 }
0x226a   : > { %12139 = vmatprep.subr.bf16.mxu0 %v15094_v10 }
0x226c   : > { %12120 = vmatmul.mubr.msk.bf16.vlgmr.msra.gmra.mrb[72].mxu0 %vm8054_vm15, %v14788_v58 }
0x226d   : > { %12140 = vmatpush3.bf16.msra.mxu0 %v8845_v36  ;;  %12141 = vmatprep.mubr.msk.bf16.mxu0 %vm12644_vm1, %v15094_v10 }
0x226e   : > { %12151 = vmatprep.subr.bf16.mxu0 %v15094_v10 }
0x2274   : > { %12142 = vmatmul.mubr.msk.bf16.vlgmr.msra.gmra.mrb[76].mxu0 %vm8293_vm7, %v14449_v22  ;;  %v12525_v22 = vld [vmem:[#allocation2 + $0x5bc] sm:$0xff]  }
0x2275   : > { %12152 = vmatpush3.bf16.msra.mxu0 %v12520_v14  ;;  %12163 = vmatprep.mubr.msk.bf16.mxu0 %vm12644_vm1, %v15094_v10 }
0x2276   : > { %12153 = vmatprep.subr.bf16.mxu0 %v15094_v10 }
0x2279   : > { %12154 = vmatpush3.bf16.msra.mxu0 %v12521_v12 }
0x227a   : > { %12155 = vmatprep.subr.bf16.mxu0 %v15094_v10 }
0x227d   : > { %12156 = vmatpush3.bf16.msra.mxu0 %v12522_v26 }
0x227e   : > { %12157 = vmatprep.subr.bf16.mxu0 %v15094_v10 }
0x2281   : > { %12158 = vmatpush3.bf16.msra.mxu0 %v12523_v4 }
0x2282   : > { %12159 = vmatprep.subr.bf16.mxu0 %v15094_v10 }
0x2285   : > { %12160 = vmatpush3.bf16.msra.mxu0 %v12524_v57 }
0x2286   : > { %12161 = vmatprep.subr.bf16.mxu0 %v15094_v10 }
0x2289   : > { %12162 = vmatpush3.bf16.msra.mxu0 %v12525_v22  ;;  %v9216_v22 = vld [vmem:[%s14927_s2 + $0x2b] sm:$0x1] }
0x228a   : > { %12189 = vmatprep.subr.bf16.mxu0 %v15094_v10 }
0x228c   : > { %12164 = vmatmul.mubr.msk.bf16.vlgmr.msra.gmra.mrb[80].mxu0 %vm8054_vm15, %v14788_v58 }
0x228d   : > { %12191 = vmatprep.mubr.msk.bf16.mxu0 %vm12644_vm1, %v15094_v10 }
0x2327   : > { %v8653_v61 = vpop.f32.mrb[68].mxu0 }
0x2328   : > { %v14835_v38 = vadd.f32 %v8653_v61, %v14795_v21  ;;  %v12105_v18 = vpop.f32.mrb[69].mxu0 }
0x2329   : > { %v8656_v23 = vpop.f32.mrb[70].mxu0 }
0x232a   : > { %v12106_v32 = vpop.f32.mrb[71].mxu0  ;;  %v8661_v16 = vadd.f32 %v8660_v47, %v14835_v38 }
0x232c   : > { %v9199_v26 = vmul.f32 0.3, %v8661_v16 }
0x233f   : > { %v8748_v37 = vpop.f32.mrb[72].mxu0 }
0x2340   : > { %v8754_v63 = vpack.c.bf16 %v8748_v37, %v8748_v37  ;;  %v12121_v27 = vpop.f32.mrb[73].mxu0 }
0x2341   : > { %v8751_v48 = vpop.f32.mrb[74].mxu0 }
0x2342   : > { %v8888_v28 = vsel %vm8296_vm4, %v8754_v63, 0  ;;  %v12122_v13 = vpop.f32.mrb[75].mxu0 }
0x2343   : > { %12146 = vmatpush3.bf16.msra.mxu1 %v8888_v28 }
0x2344   : > { %12167 = vmatprep.subr.bf16.mxu1 %v15094_v10 }
0x2346   : > { %12148 = vmatmul.mubr.msk.bf16.vlgmr.msra.gmra.mrb[92].mxu1 %vm8293_vm7, %v14431_v60  ;;  %v12527_v60 = vld [vmem:[#allocation2 + $0x5cc] sm:$0xff]  }
0x2347   : > { %v8881_v43 = vpop.f32.mrb[76].mxu0  ;;  %12169 = vmatprep.mubr.msk.bf16.mxu1 %vm12644_vm1, %v15094_v10 }
0x2348   : > { %v12143_v35 = vpop.f32.mrb[77].mxu0 }
0x2349   : > { %v8884_v42 = vpop.f32.mrb[78].mxu0 }
0x234a   : > { %v12144_v9 = vpop.f32.mrb[79].mxu0 }
0x235f   : > { %v9012_v40 = vpop.f32.mrb[80].mxu0 }
0x2360   : > { %v9018_v34 = vpack.c.bf16 %v9012_v40, %v9012_v40  ;;  %v12165_v29 = vpop.f32.mrb[81].mxu0 }
0x2361   : > { %v9015_v50 = vpop.f32.mrb[82].mxu0 }
0x2362   : > { %v9020_v8 = vsel %vm8296_vm4, %v9018_v34, 0  ;;  %v12166_v25 = vpop.f32.mrb[83].mxu0 }
0x2363   : > { %12168 = vmatpush3.bf16.msra.mxu1 %v9020_v8 }
0x2364   : > { %12173 = vmatprep.subr.bf16.mxu1 %v15094_v10 }
0x2366   : > { %12170 = vmatmul.mubr.msk.bf16.vlgmr.msra.gmra.mrb[96].mxu1 %vm8293_vm7, %v14473_v44  ;;  %v12531_v44 = vld [vmem:[#allocation2 + $0x5ec] sm:$0xff]  }
0x2367   : > { %12174 = vmatpush3.bf16.msra.mxu1 %v12526_v19  ;;  %12185 = vmatprep.mubr.msk.bf16.mxu1 %vm12644_vm1, %v15094_v10 }
0x2368   : > { %12175 = vmatprep.subr.bf16.mxu1 %v15094_v10 }
0x236b   : > { %12176 = vmatpush3.bf16.msra.mxu1 %v12527_v60 }
0x236c   : > { %12177 = vmatprep.subr.bf16.mxu1 %v15094_v10 }
0x236f   : > { %12178 = vmatpush3.bf16.msra.mxu1 %v12528_v46 }
0x2370   : > { %12179 = vmatprep.subr.bf16.mxu1 %v15094_v10 }
0x2373   : > { %12180 = vmatpush3.bf16.msra.mxu1 %v12529_v39 }
0x2374   : > { %12181 = vmatprep.subr.bf16.mxu1 %v15094_v10 }
0x2377   : > { %12182 = vmatpush3.bf16.msra.mxu1 %v12530_v30 }
0x2378   : > { %12183 = vmatprep.subr.bf16.mxu1 %v15094_v10 }
0x237b   : > { %12184 = vmatpush3.bf16.msra.mxu1 %v12531_v44 }
0x237e   : > { %12186 = vmatmul.mubr.msk.bf16.vlgmr.msra.gmra.mrb[100].mxu1 %vm8054_vm15, %v14788_v58  ;;  %v12533_v58 = vld [vmem:[#allocation2 + $0x5fc] sm:$0xff]  }
0x2419   : > { %v8924_v6 = vpop.f32.mrb[92].mxu1 }
0x241a   : > { %v8925_v59 = vadd.f32 %v8924_v6, %v8881_v43  ;;  %v12149_v51 = vpop.f32.mrb[93].mxu1 }
0x241b   : > { %v8927_v11 = vpop.f32.mrb[94].mxu1 }
0x241c   : > { %v12150_v21 = vpop.f32.mrb[95].mxu1 }
0x2439   : > { %v9056_v5 = vpop.f32.mrb[96].mxu1 }
0x243a   : > { %v9062_v7 = vadd.f32 %v9056_v5, %v8925_v59  ;;  %v12171_v45 = vpop.f32.mrb[97].mxu1 }
0x243b   : > { %v9059_v0 = vpop.f32.mrb[98].mxu1 }
0x243c   : > { %v12172_v24 = vpop.f32.mrb[99].mxu1 }
0x2451   : > { %v9145_v20 = vpop.f32.mrb[100].mxu1 }
0x2452   : > { %v9151_v54 = vpack.c.bf16 %v9145_v20, %v9145_v20  ;;  %v12187_v31 = vpop.f32.mrb[101].mxu1 }
0x2453   : > { %v9148_v1 = vpop.f32.mrb[102].mxu1 }
0x2454   : > { %v9153_v15 = vsel %vm8296_vm4, %v9151_v54, 0  ;;  %v12188_v52 = vpop.f32.mrb[103].mxu1 }
0x2455   : > { %12190 = vmatpush3.bf16.msra.mxu0 %v9153_v15 }
0x2456   : > { %12195 = vmatprep.subr.bf16.mxu0 %v15094_v10 }
0x2458   : > { %12192 = vmatmul.mubr.msk.bf16.vlgmr.msra.gmra.mrb[84].mxu0 %vm8293_vm7, %v14801_v62  ;;  %v12537_v62 = vld [vmem:[#allocation2 + $0x61c] sm:$0xff]  }
0x2459   : > { %12196 = vmatpush3.bf16.msra.mxu0 %v12532_v17  ;;  %12209 = vmatprep.mubr.msk.bf16.mxu0 %vm12644_vm1, %v15094_v10  ;;  %vm9259_vm1 = vcmask 916480  }
0x245a   : > { %12197 = vmatprep.subr.bf16.mxu0 %v15094_v10 }
0x245d   : > { %12198 = vmatpush3.bf16.msra.mxu0 %v12533_v58 }
0x245e   : > { %12199 = vmatprep.subr.bf16.mxu0 %v15094_v10 }
0x2461   : > { %12200 = vmatpush3.bf16.msra.mxu0 %v12534_v55 }
0x2462   : > { %12201 = vmatprep.subr.bf16.mxu0 %v15094_v10 }
0x2465   : > { %12202 = vmatpush3.bf16.msra.mxu0 %v12535_v56 }
0x2466   : > { %12203 = vmatprep.subr.bf16.mxu0 %v15094_v10 }
0x2469   : > { %12204 = vmatpush3.bf16.msra.mxu0 %v12536_v3 }
0x246a   : > { %12205 = vmatprep.subr.bf16.mxu0 %v15094_v10 }
0x246d   : > { %12206 = vmatpush3.bf16.msra.mxu0 %v12537_v62 }
0x246e   : > { %12207 = vmatprep.subr.bf16.mxu0 %v15094_v10 }
0x2471   : > { %12208 = vmatpush3.bf16.msra.mxu0 %v12538_v49 }
0x252b   : > { %v9189_v41 = vpop.f32.mrb[84].mxu0 }
0x252c   : > { %v9195_v2 = vadd.f32 %v9189_v41, %v9062_v7  ;;  %v12193_v53 = vpop.f32.mrb[85].mxu0 }
0x252d   : > { %v9192_v36 = vpop.f32.mrb[86].mxu0 }
0x252e   : > { %v9197_v14 = vadd.f32 %v9196_v33, %v9195_v2  ;;  %v12194_v12 = vpop.f32.mrb[87].mxu0 }
0x2530   : > { %v9198_v10 = vmul.f32 2.0, %v9197_v14 }
0x2532   : > { %v9200_v4 = vadd.f32 %v9199_v26, %v9198_v10 }
0x2534   : > { %v9201_v57 = vpack.c.bf16 %v9200_v4, %v9200_v4 }
0x2536   : > { %12210 = vmatmul.mubr.msk.bf16.vlgmr.msra.gmra.mrb[88].mxu0 %vm9259_vm1, %v9201_v57 }
0x2609   : > { %v9297_v61 = vpop.f32.mrb[88].mxu0 }
0x260a   : > { %v9298_v18 = vadd.f32 %v9297_v61, %v9216_v22  ;;  %v12211_v38 = vpop.f32.mrb[89].mxu0 }
0x260b   : > { %v9300_v23 = vpop.f32.mrb[90].mxu0 }
0x260c   : > { %v9303_v32 = vsub.f32 0.0, %v9298_v18  ;;  %v12212_v37 = vpop.f32.mrb[91].mxu0 }
0x260e   : > { %v9304_v63 = vmul.f32 1.442695, %v9303_v32 }
0x2610   : > { %12539 = vpow2.f32 %v9304_v63 }
0x261a   : > { %v12540_v27 = vpop.eup %12539 }
0x261b   : > { %v9306_v48 = vadd.f32 1.0, %v12540_v27 }
0x261d   : > { %12541 = vrcp.f32 %v9306_v48 }
0x2627   : > { %v12542_v28 = vpop.eup %12541 }
0x2628   : > { %9310 = vst.msk [vmem:[%s177_s24] sm:$0x1] %vm9309_vm8, %v12542_v28 }
0x2629   : > { %12584 = shalt.err (!%p12581_p7)
}
0x262a   : > { %s12585_s9 = scalar_lea.hbm %s14883_s4, 16  ;;  %s12589_s17 = scalar_lea.hbm %s14928_s3, 32 }
0x262b   : > { %p12586_p8 = scmp.ne.s32.totalorder %s14883_s4, %s12585_s9  ;;  %p12590_p1 = scmp.lt.u32.totalorder %s14883_s4, %s14928_s3 }
0x262c   : > { %p12591_p0 = scmp.lt.u32.totalorder %s12589_s17, %s12585_s9  ;;  %p12593_p6 = scmp.lt.u32.totalorder %s12585_s9, %s14883_s4 }
0x262d   : > { %p12587_p11 = pnand %p12586_p8, %p15180_p9 }
0x262e   : > { %p12592_p5 = por %p12591_p0, %p12590_p1 }
0x262f   : > { %p12588_p13 = pneg %p12587_p11 }
0x2630   : > { %p12594_p10 = por %p12593_p6, %p12592_p5 }
0x2632   : > { %p12595_p12 = pnand %p12594_p10, %p12588_p13 }
0x2634   : > { %12598 = shalt.err (!%p12595_p12)
}
0x2635   : > { %12292 = dma.vmem_to_hbm [thread:$0]  (%p15180_p9), %s14885_s26, 16, %s14883_s4, %s9312_s5  }
0x2636 PF: > { %p12304_p2 = scmp.ge.s32.totalorder %s12637_s15, 2  ;;  %s9336_s25 = sand.u32 1, %s12625_s12  }
0x2637   : > { %p15181_p3 = scmp.ne.s32.totalorder %s14998_s23, 0  ;;  %s9337_s27 = scalar_lea.sflag [#allocation4], %s9336_s25 }
0x2639   : > { %p12299_p4 = pnand %p12304_p2, %p15181_p3 }
0x263b   : > { %12620 = dma.done.wait (!%p12299_p4), %s9337_s27, 16  }
0x263c   : > { %12622 = vsyncadd (!%p12299_p4), %s9337_s27, 4294967280  ;;  %p14_p7 = scmp.ge.s32.totalorder %s12691_s18, 4   ;;  %s15182_s12 = smov %s12629_s13 }
0x263d   : > { %s15183_s13 = smov %s12633_s14  ;;  %s15184_s14 = smov %s12702_s21 }
0x263e   : > { %s15185_s15 = smov %s12691_s18  ;;  %16 = sbr.rel (!%p14_p7) target bundleno = 4 (0x4), region = 72 }
0x2645   :  { %9341 = vsyncpa [#allocation3], 1 }
0x2646   :  { %9343 = vsyncpa [#allocation3 + $0x1], 1 }
0x2647   :  { %9344 = vsyncpa [#allocation4], 1 }
0x2648   :  { %9346 = vsyncpa [#allocation4 + $0x1], 1 }

</bundles_post_ra>
